<compile_context>
chip_gen: v7x
topology: tpu7x:2x2x1
jax: 0.10.0
libtpu: 0.0.40
codegen_flags: <defaults>
</compile_context>

<pallas_src>
import functools
import math

import jax
import jax.numpy as jnp
from jax.experimental import pallas as pl
from jax.experimental.pallas import tpu as pltpu

# ----------------------------- configuration --------------------------------
HIDDEN = 32          # "tiny" transformer hidden dim
NUM_HEADS = 4
HEAD_DIM = HIDDEN // NUM_HEADS
FFN_DIM = 64
NUM_ENC_LAYERS = 2
NUM_DEC_LAYERS = 2
NUM_QUERY = 8
NUM_CLASS = 5        # -> numClass + 1 = 6 logits
BACKBONE_CH = 64     # backbone.backbone.outChannels
PATCH = 8            # backbone downsampling factor (patchify conv stride)
_ATTN_SCALE = 1.0 / math.sqrt(HEAD_DIM)


# ----------------------- in-kernel value-level helpers ------------------------
def _ln(x, g, b):
    """Layernorm over the last axis (values, not refs)."""
    mu = jnp.mean(x, axis=-1, keepdims=True)
    xc = x - mu
    var = jnp.mean(xc * xc, axis=-1, keepdims=True)
    return xc * jax.lax.rsqrt(var + 1e-5) * g + b


def _sdpa_heads(q, k, v, n_batch, lq, lk):
    """Scaled-dot-product attention over all heads, entirely in VMEM.

    q: [n_batch*lq, C], k/v: [n_batch*lk, C] with heads packed on the lane axis.
    Heads are a short unrolled loop; batch is handled by a batched einsum.
    """
    heads = []
    for h in range(NUM_HEADS):
        c0, c1 = h * HEAD_DIM, (h + 1) * HEAD_DIM
        qh = q[:, c0:c1].reshape(n_batch, lq, HEAD_DIM)
        kh = k[:, c0:c1].reshape(n_batch, lk, HEAD_DIM)
        vh = v[:, c0:c1].reshape(n_batch, lk, HEAD_DIM)
        s = jnp.einsum("bqd,bkd->bqk", qh, kh,
                       preferred_element_type=jnp.float32) * _ATTN_SCALE
        m = jnp.max(s, axis=-1, keepdims=True)
        p = jnp.exp(s - m)
        denom = jnp.sum(p, axis=-1, keepdims=True)
        o = jnp.einsum("bqk,bkd->bqd", p, vh, preferred_element_type=jnp.float32)
        o = o * pl.reciprocal(denom, approx=True)     # EUP instead of VALU divide
        heads.append(o.reshape(n_batch * lq, HEAD_DIM))
    return jnp.concatenate(heads, axis=-1)


def _self_attn(x, pos, wqk, bqk, wv, bv, wo, bo, n_batch, lq):
    """DETR self-attention: q = k = x + pos, v = x.  Q/K projection merged."""
    xp = x + pos
    qk = jnp.dot(xp, wqk, preferred_element_type=jnp.float32) + bqk   # [N, 2C]
    v = jnp.dot(x, wv, preferred_element_type=jnp.float32) + bv       # [N, C]
    o = _sdpa_heads(qk[:, :HIDDEN], qk[:, HIDDEN:], v, n_batch, lq, lq)
    return jnp.dot(o, wo, preferred_element_type=jnp.float32) + bo


def _cross_attn(q_in, k_in, v_in, wq, bq, wk, bk, wv, bv, wo, bo,
                n_batch, lq, lk):
    q = jnp.dot(q_in, wq, preferred_element_type=jnp.float32) + bq
    k = jnp.dot(k_in, wk, preferred_element_type=jnp.float32) + bk
    v = jnp.dot(v_in, wv, preferred_element_type=jnp.float32) + bv
    o = _sdpa_heads(q, k, v, n_batch, lq, lk)
    return jnp.dot(o, wo, preferred_element_type=jnp.float32) + bo


# -------------------------- the single fused kernel ---------------------------
def _detr_kernel(
    # activations / embeddings
    patches_ref, pos_ref, qpos_ref,
    # backbone (patchify conv + 1x1 reshape conv)
    bw_ref, bb_ref, rw_ref, rb_ref,
    # encoder layers (stacked on leading layer axis)
    e_wqk_ref, e_bqk_ref, e_wv_ref, e_bv_ref, e_wo_ref, e_bo_ref,
    e_ln1g_ref, e_ln1b_ref,
    e_fw1_ref, e_fb1_ref, e_fw2_ref, e_fb2_ref,
    e_ln2g_ref, e_ln2b_ref,
    # decoder layers (stacked on leading layer axis)
    d_swqk_ref, d_sbqk_ref, d_swv_ref, d_sbv_ref, d_swo_ref, d_sbo_ref,
    d_ln1g_ref, d_ln1b_ref,
    d_cwq_ref, d_cbq_ref, d_cwk_ref, d_cbk_ref, d_cwv_ref, d_cbv_ref,
    d_cwo_ref, d_cbo_ref,
    d_ln2g_ref, d_ln2b_ref,
    d_fw1_ref, d_fb1_ref, d_fw2_ref, d_fb2_ref,
    d_ln3g_ref, d_ln3b_ref,
    # decoder output norm (applied to every intermediate)
    dng_ref, dnb_ref,
    # packed prediction heads (class MLP + bbox MLP, block-diagonal)
    h_w1_ref, h_b1_ref, h_w2_ref, h_b2_ref, h_w3_ref, h_b3_ref,
    # outputs
    cls_ref, box_ref,
    *, n_batch, seq, n_query, n_cls):
    # ---- backbone: patchify conv (as matmul) + ReLU + 1x1 reshape conv ----
    f = jnp.dot(patches_ref[...], bw_ref[...],
                preferred_element_type=jnp.float32) + bb_ref[...]
    f = jnp.maximum(f, 0.0)
    src = jnp.dot(f, rw_ref[...], preferred_element_type=jnp.float32) + rb_ref[...]

    pos = pos_ref[...]
    qpos = qpos_ref[...]

    # ---- encoder (statically unrolled layers) ----
    mem = src
    for i in range(NUM_ENC_LAYERS):
        attn = _self_attn(mem, pos,
                          e_wqk_ref[i], e_bqk_ref[i], e_wv_ref[i], e_bv_ref[i],
                          e_wo_ref[i], e_bo_ref[i], n_batch, seq)
        x = _ln(mem + attn, e_ln1g_ref[i], e_ln1b_ref[i])
        h = jnp.maximum(
            jnp.dot(x, e_fw1_ref[i], preferred_element_type=jnp.float32)
            + e_fb1_ref[i], 0.0)
        y = jnp.dot(h, e_fw2_ref[i], preferred_element_type=jnp.float32) + e_fb2_ref[i]
        mem = _ln(x + y, e_ln2g_ref[i], e_ln2b_ref[i])

    # ---- decoder (statically unrolled layers) ----
    tgt = jnp.zeros((n_batch * n_query, HIDDEN), jnp.float32)
    inters = []
    for i in range(NUM_DEC_LAYERS):
        # self-attention (q = k = tgt + query_pos, v = tgt)
        sa = _self_attn(tgt, qpos,
                        d_swqk_ref[i], d_sbqk_ref[i], d_swv_ref[i], d_sbv_ref[i],
                        d_swo_ref[i], d_sbo_ref[i], n_batch, n_query)
        x = _ln(tgt + sa, d_ln1g_ref[i], d_ln1b_ref[i])
        # cross-attention (q = x + query_pos, k = memory + pos, v = memory)
        ca = _cross_attn(x + qpos, mem + pos, mem,
                         d_cwq_ref[i], d_cbq_ref[i], d_cwk_ref[i], d_cbk_ref[i],
                         d_cwv_ref[i], d_cbv_ref[i], d_cwo_ref[i], d_cbo_ref[i],
                         n_batch, n_query, seq)
        x = _ln(x + ca, d_ln2g_ref[i], d_ln2b_ref[i])
        # FFN
        h = jnp.maximum(
            jnp.dot(x, d_fw1_ref[i], preferred_element_type=jnp.float32)
            + d_fb1_ref[i], 0.0)
        y = jnp.dot(h, d_fw2_ref[i], preferred_element_type=jnp.float32) + d_fb2_ref[i]
        x = _ln(x + y, d_ln3g_ref[i], d_ln3b_ref[i])
        tgt = x
        inters.append(_ln(x, dng_ref[...], dnb_ref[...]))   # decoder output norm

    hs = jnp.concatenate(inters, axis=0)       # [nDec * B * Q, C]

    # ---- prediction heads: class MLP + bbox MLP as one block-diag chain ----
    h = jnp.maximum(
        jnp.dot(hs, h_w1_ref[...], preferred_element_type=jnp.float32)
        + h_b1_ref[...], 0.0)
    h = jnp.maximum(
        jnp.dot(h, h_w2_ref[...], preferred_element_type=jnp.float32)
        + h_b2_ref[...], 0.0)
    y = jnp.dot(h, h_w3_ref[...], preferred_element_type=jnp.float32) + h_b3_ref[...]
    cls_ref[...] = y[:, :n_cls]
    box_ref[...] = jax.nn.sigmoid(y[:, n_cls:])


# ----------------------------- positional embedding --------------------------
def sine_pos_embed(Hs, Ws, hidden):
    """DETR sine positional embedding with an all-False mask -> [Hs*Ws, hidden]."""
    num_pos_feats = hidden // 2
    temperature = 10000.0
    scale = 2 * math.pi
    eps = 1e-6
    y_embed = jnp.broadcast_to(
        jnp.arange(1, Hs + 1, dtype=jnp.float32)[:, None], (Hs, Ws))
    x_embed = jnp.broadcast_to(
        jnp.arange(1, Ws + 1, dtype=jnp.float32)[None, :], (Hs, Ws))
    y_embed = y_embed / (Hs + eps) * scale
    x_embed = x_embed / (Ws + eps) * scale
    dim_t = jnp.arange(num_pos_feats, dtype=jnp.float32)
    dim_t = temperature ** (2.0 * jnp.floor(dim_t / 2.0) / num_pos_feats)
    pos_x = x_embed[..., None] / dim_t
    pos_y = y_embed[..., None] / dim_t
    pos_x = jnp.stack(
        [jnp.sin(pos_x[..., 0::2]), jnp.cos(pos_x[..., 1::2])], axis=-1
    ).reshape(Hs, Ws, -1)
    pos_y = jnp.stack(
        [jnp.sin(pos_y[..., 0::2]), jnp.cos(pos_y[..., 1::2])], axis=-1
    ).reshape(Hs, Ws, -1)
    return jnp.concatenate([pos_y, pos_x], axis=-1).reshape(Hs * Ws, hidden)


# ----------------------------- parameters ------------------------------------
def init_params(key):
    keys = iter(jax.random.split(key, 256))

    def wmat(fi, fo):
        return jax.random.normal(next(keys), (fi, fo), jnp.float32) / math.sqrt(fi)

    def bias(fo):
        return jnp.zeros((1, fo), jnp.float32)

    def ones(fo):
        return jnp.ones((1, fo), jnp.float32)

    def enc_layer():
        return {
            "wqk": jnp.concatenate([wmat(HIDDEN, HIDDEN), wmat(HIDDEN, HIDDEN)], axis=1),
            "bqk": bias(2 * HIDDEN),
            "wv": wmat(HIDDEN, HIDDEN), "bv": bias(HIDDEN),
            "wo": wmat(HIDDEN, HIDDEN), "bo": bias(HIDDEN),
            "ln1_g": ones(HIDDEN), "ln1_b": bias(HIDDEN),
            "fw1": wmat(HIDDEN, FFN_DIM), "fb1": bias(FFN_DIM),
            "fw2": wmat(FFN_DIM, HIDDEN), "fb2": bias(HIDDEN),
            "ln2_g": ones(HIDDEN), "ln2_b": bias(HIDDEN),
        }

    def dec_layer():
        return {
            "s_wqk": jnp.concatenate([wmat(HIDDEN, HIDDEN), wmat(HIDDEN, HIDDEN)], axis=1),
            "s_bqk": bias(2 * HIDDEN),
            "s_wv": wmat(HIDDEN, HIDDEN), "s_bv": bias(HIDDEN),
            "s_wo": wmat(HIDDEN, HIDDEN), "s_bo": bias(HIDDEN),
            "ln1_g": ones(HIDDEN), "ln1_b": bias(HIDDEN),
            "c_wq": wmat(HIDDEN, HIDDEN), "c_bq": bias(HIDDEN),
            "c_wk": wmat(HIDDEN, HIDDEN), "c_bk": bias(HIDDEN),
            "c_wv": wmat(HIDDEN, HIDDEN), "c_bv": bias(HIDDEN),
            "c_wo": wmat(HIDDEN, HIDDEN), "c_bo": bias(HIDDEN),
            "ln2_g": ones(HIDDEN), "ln2_b": bias(HIDDEN),
            "fw1": wmat(HIDDEN, FFN_DIM), "fb1": bias(FFN_DIM),
            "fw2": wmat(FFN_DIM, HIDDEN), "fb2": bias(HIDDEN),
            "ln3_g": ones(HIDDEN), "ln3_b": bias(HIDDEN),
        }

    def stack_layers(layers):
        return {k: jnp.stack([l[k] for l in layers], axis=0) for k in layers[0]}

    def blockdiag(a, b):
        z01 = jnp.zeros((a.shape[0], b.shape[1]), jnp.float32)
        z10 = jnp.zeros((b.shape[0], a.shape[1]), jnp.float32)
        return jnp.concatenate([jnp.concatenate([a, z01], axis=1),
                                jnp.concatenate([z10, b], axis=1)], axis=0)

    # class MLP(hidden, hidden, numClass+1, 3) and bbox MLP(hidden, hidden, 4, 3),
    # packed so both heads run as one fused matmul chain.
    cw1, cw2, cw3 = (wmat(HIDDEN, HIDDEN), wmat(HIDDEN, HIDDEN),
                     wmat(HIDDEN, NUM_CLASS + 1))
    bw1, bw2, bw3 = wmat(HIDDEN, HIDDEN), wmat(HIDDEN, HIDDEN), wmat(HIDDEN, 4)
    heads = {
        "w1": jnp.concatenate([cw1, bw1], axis=1), "b1": bias(2 * HIDDEN),
        "w2": blockdiag(cw2, bw2),                 "b2": bias(2 * HIDDEN),
        "w3": blockdiag(cw3, bw3),                 "b3": bias(NUM_CLASS + 1 + 4),
    }

    return {
        "backbone": {"w": wmat(3 * PATCH * PATCH, BACKBONE_CH), "b": bias(BACKBONE_CH)},
        "reshape": {"w": wmat(BACKBONE_CH, HIDDEN), "b": bias(HIDDEN)},
        "query_embed": jax.random.normal(next(keys), (NUM_QUERY, HIDDEN), jnp.float32),
        "enc": stack_layers([enc_layer() for _ in range(NUM_ENC_LAYERS)]),
        "dec": stack_layers([dec_layer() for _ in range(NUM_DEC_LAYERS)]),
        "heads": heads,
        "dec_norm": {"g": ones(HIDDEN), "b": bias(HIDDEN)},
    }


# ----------------------------- forward ----------------------------------------
def detr_forward(params, x, pos):
    """x: [B, 3, H, W] NCHW.  pos: [H//PATCH * W//PATCH, HIDDEN] (precomputed)."""
    B, Cin, H, W = x.shape
    Hs, Ws = H // PATCH, W // PATCH
    L = Hs * Ws
    n_cls = NUM_CLASS + 1
    n_hs = NUM_DEC_LAYERS * B * NUM_QUERY

    # Patchify layout for the fused backbone matmul (kept outside the kernel:
    # a single tiny 6-D transpose handled by XLA).
    patches = x.reshape(B, Cin, Hs, PATCH, Ws, PATCH)
    patches = patches.transpose(0, 2, 4, 1, 3, 5).reshape(B * L, Cin * PATCH * PATCH)

    pos_bl = jnp.tile(pos, (B, 1))                          # [B*L, C]
    qpos = jnp.tile(params["query_embed"], (B, 1))          # [B*Q, C]

    enc = params["enc"]
    dec = params["dec"]
    hd = params["heads"]

    # mask is all-False (same-shape training) -> no attention masking needed.
    cls, box = pl.pallas_call(
        functools.partial(_detr_kernel, n_batch=B, seq=L,
                          n_query=NUM_QUERY, n_cls=n_cls),
        out_shape=(jax.ShapeDtypeStruct((n_hs, n_cls), jnp.float32),
                   jax.ShapeDtypeStruct((n_hs, 4), jnp.float32)),
        compiler_params=pltpu.CompilerParams(vmem_limit_bytes=32 * 1024 * 1024),
    )(patches, pos_bl, qpos,
      params["backbone"]["w"], params["backbone"]["b"],
      params["reshape"]["w"], params["reshape"]["b"],
      enc["wqk"], enc["bqk"], enc["wv"], enc["bv"], enc["wo"], enc["bo"],
      enc["ln1_g"], enc["ln1_b"],
      enc["fw1"], enc["fb1"], enc["fw2"], enc["fb2"],
      enc["ln2_g"], enc["ln2_b"],
      dec["s_wqk"], dec["s_bqk"], dec["s_wv"], dec["s_bv"], dec["s_wo"], dec["s_bo"],
      dec["ln1_g"], dec["ln1_b"],
      dec["c_wq"], dec["c_bq"], dec["c_wk"], dec["c_bk"],
      dec["c_wv"], dec["c_bv"], dec["c_wo"], dec["c_bo"],
      dec["ln2_g"], dec["ln2_b"],
      dec["fw1"], dec["fb1"], dec["fw2"], dec["fb2"],
      dec["ln3_g"], dec["ln3_b"],
      params["dec_norm"]["g"], params["dec_norm"]["b"],
      hd["w1"], hd["b1"], hd["w2"], hd["b2"], hd["w3"], hd["b3"])

    cls = cls.reshape(NUM_DEC_LAYERS, B, NUM_QUERY, n_cls)
    box = box.reshape(NUM_DEC_LAYERS, B, NUM_QUERY, 4)
    return {
        "class": cls[-1],                                   # [B, numQuery, numClass+1]
        "bbox": box[-1],                                     # [B, numQuery, 4]
        "aux": [{"class": c, "bbox": bb}
                for c, bb in zip(cls[:-1], box[:-1])],
    }


# ----------------------------- main -------------------------------------------
if __name__ == "__main__":
    key = jax.random.PRNGKey(0)
    pkey, xkey = jax.random.split(key)
    params = init_params(pkey)
    x = jax.random.normal(xkey, (2, 3, 32, 32), jnp.float32)   # NCHW, like PyTorch

    # Precompute the sine positional embedding once (constant for fixed H, W).
    pos = sine_pos_embed(32 // PATCH, 32 // PATCH, HIDDEN)

    fwd = jax.jit(detr_forward)
    out = fwd(params, x, pos)
    jax.block_until_ready(out)

    assert out["class"].shape == (2, NUM_QUERY, NUM_CLASS + 1)
    assert out["bbox"].shape == (2, NUM_QUERY, 4)
    assert len(out["aux"]) == NUM_DEC_LAYERS - 1
    assert bool(jnp.all(jnp.isfinite(out["class"])))
    assert bool(jnp.all((out["bbox"] >= 0.0) & (out["bbox"] <= 1.0)))
    print("KERNEL_OK")
</pallas_src>

<mosaic_0001>
module attributes {stable_mosaic.version = 11 : i64} {
  func.func @_detr_kernel(%arg0: memref<32x192xf32, #tpu.memory_space<vmem>>, %arg1: memref<32x32xf32, #tpu.memory_space<vmem>>, %arg2: memref<16x32xf32, #tpu.memory_space<vmem>>, %arg3: memref<192x64xf32, #tpu.memory_space<vmem>>, %arg4: memref<1x64xf32, #tpu.memory_space<vmem>>, %arg5: memref<64x32xf32, #tpu.memory_space<vmem>>, %arg6: memref<1x32xf32, #tpu.memory_space<vmem>>, %arg7: memref<2x32x64xf32, #tpu.memory_space<vmem>>, %arg8: memref<2x1x64xf32, #tpu.memory_space<vmem>>, %arg9: memref<2x32x32xf32, #tpu.memory_space<vmem>>, %arg10: memref<2x1x32xf32, #tpu.memory_space<vmem>>, %arg11: memref<2x32x32xf32, #tpu.memory_space<vmem>>, %arg12: memref<2x1x32xf32, #tpu.memory_space<vmem>>, %arg13: memref<2x1x32xf32, #tpu.memory_space<vmem>>, %arg14: memref<2x1x32xf32, #tpu.memory_space<vmem>>, %arg15: memref<2x32x64xf32, #tpu.memory_space<vmem>>, %arg16: memref<2x1x64xf32, #tpu.memory_space<vmem>>, %arg17: memref<2x64x32xf32, #tpu.memory_space<vmem>>, %arg18: memref<2x1x32xf32, #tpu.memory_space<vmem>>, %arg19: memref<2x1x32xf32, #tpu.memory_space<vmem>>, %arg20: memref<2x1x32xf32, #tpu.memory_space<vmem>>, %arg21: memref<2x32x64xf32, #tpu.memory_space<vmem>>, %arg22: memref<2x1x64xf32, #tpu.memory_space<vmem>>, %arg23: memref<2x32x32xf32, #tpu.memory_space<vmem>>, %arg24: memref<2x1x32xf32, #tpu.memory_space<vmem>>, %arg25: memref<2x32x32xf32, #tpu.memory_space<vmem>>, %arg26: memref<2x1x32xf32, #tpu.memory_space<vmem>>, %arg27: memref<2x1x32xf32, #tpu.memory_space<vmem>>, %arg28: memref<2x1x32xf32, #tpu.memory_space<vmem>>, %arg29: memref<2x32x32xf32, #tpu.memory_space<vmem>>, %arg30: memref<2x1x32xf32, #tpu.memory_space<vmem>>, %arg31: memref<2x32x32xf32, #tpu.memory_space<vmem>>, %arg32: memref<2x1x32xf32, #tpu.memory_space<vmem>>, %arg33: memref<2x32x32xf32, #tpu.memory_space<vmem>>, %arg34: memref<2x1x32xf32, #tpu.memory_space<vmem>>, %arg35: memref<2x32x32xf32, #tpu.memory_space<vmem>>, %arg36: memref<2x1x32xf32, #tpu.memory_space<vmem>>, %arg37: memref<2x1x32xf32, #tpu.memory_space<vmem>>, %arg38: memref<2x1x32xf32, #tpu.memory_space<vmem>>, %arg39: memref<2x32x64xf32, #tpu.memory_space<vmem>>, %arg40: memref<2x1x64xf32, #tpu.memory_space<vmem>>, %arg41: memref<2x64x32xf32, #tpu.memory_space<vmem>>, %arg42: memref<2x1x32xf32, #tpu.memory_space<vmem>>, %arg43: memref<2x1x32xf32, #tpu.memory_space<vmem>>, %arg44: memref<2x1x32xf32, #tpu.memory_space<vmem>>, %arg45: memref<1x32xf32, #tpu.memory_space<vmem>>, %arg46: memref<1x32xf32, #tpu.memory_space<vmem>>, %arg47: memref<32x64xf32, #tpu.memory_space<vmem>>, %arg48: memref<1x64xf32, #tpu.memory_space<vmem>>, %arg49: memref<64x64xf32, #tpu.memory_space<vmem>>, %arg50: memref<1x64xf32, #tpu.memory_space<vmem>>, %arg51: memref<64x10xf32, #tpu.memory_space<vmem>>, %arg52: memref<1x10xf32, #tpu.memory_space<vmem>>, %arg53: memref<32x6xf32, #tpu.memory_space<vmem>>, %arg54: memref<32x4xf32, #tpu.memory_space<vmem>>) attributes {dimension_semantics = [], scalar_prefetch = 0 : i64, scratch_operands = 0 : i64, tpu.core_type = #tpu.core_type<tc>} {
    %c0 = arith.constant 0 : index
    %c0_0 = arith.constant 0 : index
    %0 = vector.load %arg0[%c0, %c0_0] : memref<32x192xf32, #tpu.memory_space<vmem>>, vector<32x192xf32>
    %c0_1 = arith.constant 0 : index
    %c0_2 = arith.constant 0 : index
    %1 = vector.load %arg3[%c0_1, %c0_2] : memref<192x64xf32, #tpu.memory_space<vmem>>, vector<192x64xf32>
    %cst = arith.constant dense<0.000000e+00> : vector<32x64xf32>
    %2 = tpu.matmul %0, %1, %cst {dimension_numbers = #tpu.dot_dimension_numbers<[1], [0], [0], [1], [0, 0, 1, 1], [], []>} : vector<32x192xf32>, vector<192x64xf32>, vector<32x64xf32> -> vector<32x64xf32>
    %c0_3 = arith.constant 0 : index
    %c0_4 = arith.constant 0 : index
    %3 = vector.load %arg4[%c0_3, %c0_4] : memref<1x64xf32, #tpu.memory_space<vmem>>, vector<1x64xf32>
    %4 = vector.broadcast %3 : vector<1x64xf32> to vector<32x64xf32>
    %5 = arith.addf %2, %4 : vector<32x64xf32>
    %cst_5 = arith.constant 0.000000e+00 : f32
    %6 = vector.broadcast %cst_5 : f32 to vector<32x64xf32>
    %7 = arith.maximumf %5, %6 : vector<32x64xf32>
    %c0_6 = arith.constant 0 : index
    %c0_7 = arith.constant 0 : index
    %8 = vector.load %arg5[%c0_6, %c0_7] : memref<64x32xf32, #tpu.memory_space<vmem>>, vector<64x32xf32>
    %cst_8 = arith.constant dense<0.000000e+00> : vector<32x32xf32>
    %9 = tpu.matmul %7, %8, %cst_8 {dimension_numbers = #tpu.dot_dimension_numbers<[1], [0], [0], [1], [0, 0, 1, 1], [], []>} : vector<32x64xf32>, vector<64x32xf32>, vector<32x32xf32> -> vector<32x32xf32>
    %c0_9 = arith.constant 0 : index
    %c0_10 = arith.constant 0 : index
    %10 = vector.load %arg6[%c0_9, %c0_10] : memref<1x32xf32, #tpu.memory_space<vmem>>, vector<1x32xf32>
    %11 = vector.broadcast %10 : vector<1x32xf32> to vector<32x32xf32>
    %12 = arith.addf %9, %11 : vector<32x32xf32>
    %c0_11 = arith.constant 0 : index
    %c0_12 = arith.constant 0 : index
    %13 = vector.load %arg1[%c0_11, %c0_12] : memref<32x32xf32, #tpu.memory_space<vmem>>, vector<32x32xf32>
    %c0_13 = arith.constant 0 : index
    %c0_14 = arith.constant 0 : index
    %14 = vector.load %arg2[%c0_13, %c0_14] : memref<16x32xf32, #tpu.memory_space<vmem>>, vector<16x32xf32>
    %c0_15 = arith.constant 0 : index
    %c0_16 = arith.constant 0 : index
    %c0_17 = arith.constant 0 : index
    %15 = vector.load %arg7[%c0_15, %c0_16, %c0_17] : memref<2x32x64xf32, #tpu.memory_space<vmem>>, vector<1x32x64xf32>
    %16 = vector.shape_cast %15 : vector<1x32x64xf32> to vector<32x64xf32>
    %c0_18 = arith.constant 0 : index
    %c0_19 = arith.constant 0 : index
    %c0_20 = arith.constant 0 : index
    %17 = vector.load %arg8[%c0_18, %c0_19, %c0_20] : memref<2x1x64xf32, #tpu.memory_space<vmem>>, vector<1x1x64xf32>
    %18 = vector.shape_cast %17 : vector<1x1x64xf32> to vector<1x64xf32>
    %c0_21 = arith.constant 0 : index
    %c0_22 = arith.constant 0 : index
    %c0_23 = arith.constant 0 : index
    %19 = vector.load %arg9[%c0_21, %c0_22, %c0_23] : memref<2x32x32xf32, #tpu.memory_space<vmem>>, vector<1x32x32xf32>
    %20 = vector.shape_cast %19 : vector<1x32x32xf32> to vector<32x32xf32>
    %c0_24 = arith.constant 0 : index
    %c0_25 = arith.constant 0 : index
    %c0_26 = arith.constant 0 : index
    %21 = vector.load %arg10[%c0_24, %c0_25, %c0_26] : memref<2x1x32xf32, #tpu.memory_space<vmem>>, vector<1x1x32xf32>
    %22 = vector.shape_cast %21 : vector<1x1x32xf32> to vector<1x32xf32>
    %c0_27 = arith.constant 0 : index
    %c0_28 = arith.constant 0 : index
    %c0_29 = arith.constant 0 : index
    %23 = vector.load %arg11[%c0_27, %c0_28, %c0_29] : memref<2x32x32xf32, #tpu.memory_space<vmem>>, vector<1x32x32xf32>
    %24 = vector.shape_cast %23 : vector<1x32x32xf32> to vector<32x32xf32>
    %c0_30 = arith.constant 0 : index
    %c0_31 = arith.constant 0 : index
    %c0_32 = arith.constant 0 : index
    %25 = vector.load %arg12[%c0_30, %c0_31, %c0_32] : memref<2x1x32xf32, #tpu.memory_space<vmem>>, vector<1x1x32xf32>
    %26 = vector.shape_cast %25 : vector<1x1x32xf32> to vector<1x32xf32>
    %27 = arith.addf %12, %13 : vector<32x32xf32>
    %cst_33 = arith.constant dense<0.000000e+00> : vector<32x64xf32>
    %28 = tpu.matmul %27, %16, %cst_33 {dimension_numbers = #tpu.dot_dimension_numbers<[1], [0], [0], [1], [0, 0, 1, 1], [], []>} : vector<32x32xf32>, vector<32x64xf32>, vector<32x64xf32> -> vector<32x64xf32>
    %29 = vector.broadcast %18 : vector<1x64xf32> to vector<32x64xf32>
    %30 = arith.addf %28, %29 : vector<32x64xf32>
    %cst_34 = arith.constant dense<0.000000e+00> : vector<32x32xf32>
    %31 = tpu.matmul %12, %20, %cst_34 {dimension_numbers = #tpu.dot_dimension_numbers<[1], [0], [0], [1], [0, 0, 1, 1], [], []>} : vector<32x32xf32>, vector<32x32xf32>, vector<32x32xf32> -> vector<32x32xf32>
    %32 = vector.broadcast %22 : vector<1x32xf32> to vector<32x32xf32>
    %33 = arith.addf %31, %32 : vector<32x32xf32>
    %34 = vector.extract_strided_slice %30 {offsets = [0, 0], sizes = [32, 32], strides = [1, 1]} : vector<32x64xf32> to vector<32x32xf32>
    %35 = vector.extract_strided_slice %30 {offsets = [0, 32], sizes = [32, 32], strides = [1, 1]} : vector<32x64xf32> to vector<32x32xf32>
    %36 = vector.extract_strided_slice %34 {offsets = [0, 0], sizes = [32, 8], strides = [1, 1]} : vector<32x32xf32> to vector<32x8xf32>
    %37 = vector.shape_cast %36 : vector<32x8xf32> to vector<2x16x8xf32>
    %38 = vector.extract_strided_slice %35 {offsets = [0, 0], sizes = [32, 8], strides = [1, 1]} : vector<32x32xf32> to vector<32x8xf32>
    %39 = vector.shape_cast %38 : vector<32x8xf32> to vector<2x16x8xf32>
    %40 = vector.extract_strided_slice %33 {offsets = [0, 0], sizes = [32, 8], strides = [1, 1]} : vector<32x32xf32> to vector<32x8xf32>
    %41 = vector.shape_cast %40 : vector<32x8xf32> to vector<2x16x8xf32>
    "tpu.trace_start"() <{level = 10 : i32, message = "bqd,bkd->bqk"}> : () -> ()
    %cst_35 = arith.constant dense<0.000000e+00> : vector<2x16x16xf32>
    %42 = tpu.matmul %37, %39, %cst_35 {dimension_numbers = #tpu.dot_dimension_numbers<[2], [2], [1], [1], [0, 0, 0, 1, 1, 1], [0], [0]>} : vector<2x16x8xf32>, vector<2x16x8xf32>, vector<2x16x16xf32> -> vector<2x16x16xf32>
    "tpu.trace_stop"() : () -> ()
    %cst_36 = arith.constant 0.353553385 : f32
    %43 = vector.broadcast %cst_36 : f32 to vector<2x16x16xf32>
    %44 = arith.mulf %42, %43 : vector<2x16x16xf32>
    %cst_37 = arith.constant dense<0xFF800000> : vector<2x16xf32>
    %45 = vector.multi_reduction <maximumf>, %44, %cst_37 [2] : vector<2x16x16xf32> to vector<2x16xf32>
    %46 = vector.shape_cast %45 : vector<2x16xf32> to vector<2x16x1xf32>
    %47 = vector.broadcast %46 : vector<2x16x1xf32> to vector<2x16x16xf32>
    %48 = arith.subf %44, %47 : vector<2x16x16xf32>
    %49 = math.exp %48 : vector<2x16x16xf32>
    %cst_38 = arith.constant dense<0.000000e+00> : vector<2x16xf32>
    %50 = vector.multi_reduction <add>, %49, %cst_38 [2] : vector<2x16x16xf32> to vector<2x16xf32>
    %51 = vector.shape_cast %50 : vector<2x16xf32> to vector<2x16x1xf32>
    "tpu.trace_start"() <{level = 10 : i32, message = "bqk,bkd->bqd"}> : () -> ()
    %cst_39 = arith.constant dense<0.000000e+00> : vector<2x16x8xf32>
    %52 = tpu.matmul %49, %41, %cst_39 {dimension_numbers = #tpu.dot_dimension_numbers<[2], [1], [1], [2], [0, 0, 0, 1, 1, 2], [0], [0]>} : vector<2x16x16xf32>, vector<2x16x8xf32>, vector<2x16x8xf32> -> vector<2x16x8xf32>
    "tpu.trace_stop"() : () -> ()
    %53 = tpu.reciprocal %51 {approx = true} : vector<2x16x1xf32> -> vector<2x16x1xf32>
    %54 = vector.broadcast %53 : vector<2x16x1xf32> to vector<2x16x8xf32>
    %55 = arith.mulf %52, %54 : vector<2x16x8xf32>
    %56 = vector.shape_cast %55 : vector<2x16x8xf32> to vector<32x8xf32>
    %57 = vector.extract_strided_slice %34 {offsets = [0, 8], sizes = [32, 8], strides = [1, 1]} : vector<32x32xf32> to vector<32x8xf32>
    %58 = vector.shape_cast %57 : vector<32x8xf32> to vector<2x16x8xf32>
    %59 = vector.extract_strided_slice %35 {offsets = [0, 8], sizes = [32, 8], strides = [1, 1]} : vector<32x32xf32> to vector<32x8xf32>
    %60 = vector.shape_cast %59 : vector<32x8xf32> to vector<2x16x8xf32>
    %61 = vector.extract_strided_slice %33 {offsets = [0, 8], sizes = [32, 8], strides = [1, 1]} : vector<32x32xf32> to vector<32x8xf32>
    %62 = vector.shape_cast %61 : vector<32x8xf32> to vector<2x16x8xf32>
    "tpu.trace_start"() <{level = 10 : i32, message = "bqd,bkd->bqk"}> : () -> ()
    %cst_40 = arith.constant dense<0.000000e+00> : vector<2x16x16xf32>
    %63 = tpu.matmul %58, %60, %cst_40 {dimension_numbers = #tpu.dot_dimension_numbers<[2], [2], [1], [1], [0, 0, 0, 1, 1, 1], [0], [0]>} : vector<2x16x8xf32>, vector<2x16x8xf32>, vector<2x16x16xf32> -> vector<2x16x16xf32>
    "tpu.trace_stop"() : () -> ()
    %cst_41 = arith.constant 0.353553385 : f32
    %64 = vector.broadcast %cst_41 : f32 to vector<2x16x16xf32>
    %65 = arith.mulf %63, %64 : vector<2x16x16xf32>
    %cst_42 = arith.constant dense<0xFF800000> : vector<2x16xf32>
    %66 = vector.multi_reduction <maximumf>, %65, %cst_42 [2] : vector<2x16x16xf32> to vector<2x16xf32>
    %67 = vector.shape_cast %66 : vector<2x16xf32> to vector<2x16x1xf32>
    %68 = vector.broadcast %67 : vector<2x16x1xf32> to vector<2x16x16xf32>
    %69 = arith.subf %65, %68 : vector<2x16x16xf32>
    %70 = math.exp %69 : vector<2x16x16xf32>
    %cst_43 = arith.constant dense<0.000000e+00> : vector<2x16xf32>
    %71 = vector.multi_reduction <add>, %70, %cst_43 [2] : vector<2x16x16xf32> to vector<2x16xf32>
    %72 = vector.shape_cast %71 : vector<2x16xf32> to vector<2x16x1xf32>
    "tpu.trace_start"() <{level = 10 : i32, message = "bqk,bkd->bqd"}> : () -> ()
    %cst_44 = arith.constant dense<0.000000e+00> : vector<2x16x8xf32>
    %73 = tpu.matmul %70, %62, %cst_44 {dimension_numbers = #tpu.dot_dimension_numbers<[2], [1], [1], [2], [0, 0, 0, 1, 1, 2], [0], [0]>} : vector<2x16x16xf32>, vector<2x16x8xf32>, vector<2x16x8xf32> -> vector<2x16x8xf32>
    "tpu.trace_stop"() : () -> ()
    %74 = tpu.reciprocal %72 {approx = true} : vector<2x16x1xf32> -> vector<2x16x1xf32>
    %75 = vector.broadcast %74 : vector<2x16x1xf32> to vector<2x16x8xf32>
    %76 = arith.mulf %73, %75 : vector<2x16x8xf32>
    %77 = vector.shape_cast %76 : vector<2x16x8xf32> to vector<32x8xf32>
    %78 = vector.extract_strided_slice %34 {offsets = [0, 16], sizes = [32, 8], strides = [1, 1]} : vector<32x32xf32> to vector<32x8xf32>
    %79 = vector.shape_cast %78 : vector<32x8xf32> to vector<2x16x8xf32>
    %80 = vector.extract_strided_slice %35 {offsets = [0, 16], sizes = [32, 8], strides = [1, 1]} : vector<32x32xf32> to vector<32x8xf32>
    %81 = vector.shape_cast %80 : vector<32x8xf32> to vector<2x16x8xf32>
    %82 = vector.extract_strided_slice %33 {offsets = [0, 16], sizes = [32, 8], strides = [1, 1]} : vector<32x32xf32> to vector<32x8xf32>
    %83 = vector.shape_cast %82 : vector<32x8xf32> to vector<2x16x8xf32>
    "tpu.trace_start"() <{level = 10 : i32, message = "bqd,bkd->bqk"}> : () -> ()
    %cst_45 = arith.constant dense<0.000000e+00> : vector<2x16x16xf32>
    %84 = tpu.matmul %79, %81, %cst_45 {dimension_numbers = #tpu.dot_dimension_numbers<[2], [2], [1], [1], [0, 0, 0, 1, 1, 1], [0], [0]>} : vector<2x16x8xf32>, vector<2x16x8xf32>, vector<2x16x16xf32> -> vector<2x16x16xf32>
    "tpu.trace_stop"() : () -> ()
    %cst_46 = arith.constant 0.353553385 : f32
    %85 = vector.broadcast %cst_46 : f32 to vector<2x16x16xf32>
    %86 = arith.mulf %84, %85 : vector<2x16x16xf32>
    %cst_47 = arith.constant dense<0xFF800000> : vector<2x16xf32>
    %87 = vector.multi_reduction <maximumf>, %86, %cst_47 [2] : vector<2x16x16xf32> to vector<2x16xf32>
    %88 = vector.shape_cast %87 : vector<2x16xf32> to vector<2x16x1xf32>
    %89 = vector.broadcast %88 : vector<2x16x1xf32> to vector<2x16x16xf32>
    %90 = arith.subf %86, %89 : vector<2x16x16xf32>
    %91 = math.exp %90 : vector<2x16x16xf32>
    %cst_48 = arith.constant dense<0.000000e+00> : vector<2x16xf32>
    %92 = vector.multi_reduction <add>, %91, %cst_48 [2] : vector<2x16x16xf32> to vector<2x16xf32>
    %93 = vector.shape_cast %92 : vector<2x16xf32> to vector<2x16x1xf32>
    "tpu.trace_start"() <{level = 10 : i32, message = "bqk,bkd->bqd"}> : () -> ()
    %cst_49 = arith.constant dense<0.000000e+00> : vector<2x16x8xf32>
    %94 = tpu.matmul %91, %83, %cst_49 {dimension_numbers = #tpu.dot_dimension_numbers<[2], [1], [1], [2], [0, 0, 0, 1, 1, 2], [0], [0]>} : vector<2x16x16xf32>, vector<2x16x8xf32>, vector<2x16x8xf32> -> vector<2x16x8xf32>
    "tpu.trace_stop"() : () -> ()
    %95 = tpu.reciprocal %93 {approx = true} : vector<2x16x1xf32> -> vector<2x16x1xf32>
    %96 = vector.broadcast %95 : vector<2x16x1xf32> to vector<2x16x8xf32>
    %97 = arith.mulf %94, %96 : vector<2x16x8xf32>
    %98 = vector.shape_cast %97 : vector<2x16x8xf32> to vector<32x8xf32>
    %99 = vector.extract_strided_slice %34 {offsets = [0, 24], sizes = [32, 8], strides = [1, 1]} : vector<32x32xf32> to vector<32x8xf32>
    %100 = vector.shape_cast %99 : vector<32x8xf32> to vector<2x16x8xf32>
    %101 = vector.extract_strided_slice %35 {offsets = [0, 24], sizes = [32, 8], strides = [1, 1]} : vector<32x32xf32> to vector<32x8xf32>
    %102 = vector.shape_cast %101 : vector<32x8xf32> to vector<2x16x8xf32>
    %103 = vector.extract_strided_slice %33 {offsets = [0, 24], sizes = [32, 8], strides = [1, 1]} : vector<32x32xf32> to vector<32x8xf32>
    %104 = vector.shape_cast %103 : vector<32x8xf32> to vector<2x16x8xf32>
    "tpu.trace_start"() <{level = 10 : i32, message = "bqd,bkd->bqk"}> : () -> ()
    %cst_50 = arith.constant dense<0.000000e+00> : vector<2x16x16xf32>
    %105 = tpu.matmul %100, %102, %cst_50 {dimension_numbers = #tpu.dot_dimension_numbers<[2], [2], [1], [1], [0, 0, 0, 1, 1, 1], [0], [0]>} : vector<2x16x8xf32>, vector<2x16x8xf32>, vector<2x16x16xf32> -> vector<2x16x16xf32>
    "tpu.trace_stop"() : () -> ()
    %cst_51 = arith.constant 0.353553385 : f32
    %106 = vector.broadcast %cst_51 : f32 to vector<2x16x16xf32>
    %107 = arith.mulf %105, %106 : vector<2x16x16xf32>
    %cst_52 = arith.constant dense<0xFF800000> : vector<2x16xf32>
    %108 = vector.multi_reduction <maximumf>, %107, %cst_52 [2] : vector<2x16x16xf32> to vector<2x16xf32>
    %109 = vector.shape_cast %108 : vector<2x16xf32> to vector<2x16x1xf32>
    %110 = vector.broadcast %109 : vector<2x16x1xf32> to vector<2x16x16xf32>
    %111 = arith.subf %107, %110 : vector<2x16x16xf32>
    %112 = math.exp %111 : vector<2x16x16xf32>
    %cst_53 = arith.constant dense<0.000000e+00> : vector<2x16xf32>
    %113 = vector.multi_reduction <add>, %112, %cst_53 [2] : vector<2x16x16xf32> to vector<2x16xf32>
    %114 = vector.shape_cast %113 : vector<2x16xf32> to vector<2x16x1xf32>
    "tpu.trace_start"() <{level = 10 : i32, message = "bqk,bkd->bqd"}> : () -> ()
    %cst_54 = arith.constant dense<0.000000e+00> : vector<2x16x8xf32>
    %115 = tpu.matmul %112, %104, %cst_54 {dimension_numbers = #tpu.dot_dimension_numbers<[2], [1], [1], [2], [0, 0, 0, 1, 1, 2], [0], [0]>} : vector<2x16x16xf32>, vector<2x16x8xf32>, vector<2x16x8xf32> -> vector<2x16x8xf32>
    "tpu.trace_stop"() : () -> ()
    %116 = tpu.reciprocal %114 {approx = true} : vector<2x16x1xf32> -> vector<2x16x1xf32>
    %117 = vector.broadcast %116 : vector<2x16x1xf32> to vector<2x16x8xf32>
    %118 = arith.mulf %115, %117 : vector<2x16x8xf32>
    %119 = vector.shape_cast %118 : vector<2x16x8xf32> to vector<32x8xf32>
    %120 = tpu.concatenate %56, %77, %98, %119 in 1 : vector<32x8xf32>, vector<32x8xf32>, vector<32x8xf32>, vector<32x8xf32> -> vector<32x32xf32>
    %cst_55 = arith.constant dense<0.000000e+00> : vector<32x32xf32>
    %121 = tpu.matmul %120, %24, %cst_55 {dimension_numbers = #tpu.dot_dimension_numbers<[1], [0], [0], [1], [0, 0, 1, 1], [], []>} : vector<32x32xf32>, vector<32x32xf32>, vector<32x32xf32> -> vector<32x32xf32>
    %122 = vector.broadcast %26 : vector<1x32xf32> to vector<32x32xf32>
    %123 = arith.addf %121, %122 : vector<32x32xf32>
    %124 = arith.addf %12, %123 : vector<32x32xf32>
    %c0_56 = arith.constant 0 : index
    %c0_57 = arith.constant 0 : index
    %c0_58 = arith.constant 0 : index
    %125 = vector.load %arg13[%c0_56, %c0_57, %c0_58] : memref<2x1x32xf32, #tpu.memory_space<vmem>>, vector<1x1x32xf32>
    %126 = vector.shape_cast %125 : vector<1x1x32xf32> to vector<1x32xf32>
    %c0_59 = arith.constant 0 : index
    %c0_60 = arith.constant 0 : index
    %c0_61 = arith.constant 0 : index
    %127 = vector.load %arg14[%c0_59, %c0_60, %c0_61] : memref<2x1x32xf32, #tpu.memory_space<vmem>>, vector<1x1x32xf32>
    %128 = vector.shape_cast %127 : vector<1x1x32xf32> to vector<1x32xf32>
    %cst_62 = arith.constant dense<0.000000e+00> : vector<32xf32>
    %129 = vector.multi_reduction <add>, %124, %cst_62 [1] : vector<32x32xf32> to vector<32xf32>
    %130 = vector.shape_cast %129 : vector<32xf32> to vector<32x1xf32>
    %cst_63 = arith.constant 3.200000e+01 : f32
    %131 = vector.broadcast %cst_63 : f32 to vector<32x1xf32>
    %132 = arith.divf %130, %131 : vector<32x1xf32>
    %133 = vector.broadcast %132 : vector<32x1xf32> to vector<32x32xf32>
    %134 = arith.subf %124, %133 : vector<32x32xf32>
    %135 = arith.mulf %134, %134 : vector<32x32xf32>
    %cst_64 = arith.constant dense<0.000000e+00> : vector<32xf32>
    %136 = vector.multi_reduction <add>, %135, %cst_64 [1] : vector<32x32xf32> to vector<32xf32>
    %137 = vector.shape_cast %136 : vector<32xf32> to vector<32x1xf32>
    %cst_65 = arith.constant 3.200000e+01 : f32
    %138 = vector.broadcast %cst_65 : f32 to vector<32x1xf32>
    %139 = arith.divf %137, %138 : vector<32x1xf32>
    %cst_66 = arith.constant 9.99999974E-6 : f32
    %140 = vector.broadcast %cst_66 : f32 to vector<32x1xf32>
    %141 = arith.addf %139, %140 : vector<32x1xf32>
    %142 = math.rsqrt %141 : vector<32x1xf32>
    %143 = vector.broadcast %142 : vector<32x1xf32> to vector<32x32xf32>
    %144 = arith.mulf %134, %143 : vector<32x32xf32>
    %145 = vector.broadcast %126 : vector<1x32xf32> to vector<32x32xf32>
    %146 = arith.mulf %144, %145 : vector<32x32xf32>
    %147 = vector.broadcast %128 : vector<1x32xf32> to vector<32x32xf32>
    %148 = arith.addf %146, %147 : vector<32x32xf32>
    %c0_67 = arith.constant 0 : index
    %c0_68 = arith.constant 0 : index
    %c0_69 = arith.constant 0 : index
    %149 = vector.load %arg15[%c0_67, %c0_68, %c0_69] : memref<2x32x64xf32, #tpu.memory_space<vmem>>, vector<1x32x64xf32>
    %150 = vector.shape_cast %149 : vector<1x32x64xf32> to vector<32x64xf32>
    %cst_70 = arith.constant dense<0.000000e+00> : vector<32x64xf32>
    %151 = tpu.matmul %148, %150, %cst_70 {dimension_numbers = #tpu.dot_dimension_numbers<[1], [0], [0], [1], [0, 0, 1, 1], [], []>} : vector<32x32xf32>, vector<32x64xf32>, vector<32x64xf32> -> vector<32x64xf32>
    %c0_71 = arith.constant 0 : index
    %c0_72 = arith.constant 0 : index
    %c0_73 = arith.constant 0 : index
    %152 = vector.load %arg16[%c0_71, %c0_72, %c0_73] : memref<2x1x64xf32, #tpu.memory_space<vmem>>, vector<1x1x64xf32>
    %153 = vector.shape_cast %152 : vector<1x1x64xf32> to vector<1x64xf32>
    %154 = vector.broadcast %153 : vector<1x64xf32> to vector<32x64xf32>
    %155 = arith.addf %151, %154 : vector<32x64xf32>
    %cst_74 = arith.constant 0.000000e+00 : f32
    %156 = vector.broadcast %cst_74 : f32 to vector<32x64xf32>
    %157 = arith.maximumf %155, %156 : vector<32x64xf32>
    %c0_75 = arith.constant 0 : index
    %c0_76 = arith.constant 0 : index
    %c0_77 = arith.constant 0 : index
    %158 = vector.load %arg17[%c0_75, %c0_76, %c0_77] : memref<2x64x32xf32, #tpu.memory_space<vmem>>, vector<1x64x32xf32>
    %159 = vector.shape_cast %158 : vector<1x64x32xf32> to vector<64x32xf32>
    %cst_78 = arith.constant dense<0.000000e+00> : vector<32x32xf32>
    %160 = tpu.matmul %157, %159, %cst_78 {dimension_numbers = #tpu.dot_dimension_numbers<[1], [0], [0], [1], [0, 0, 1, 1], [], []>} : vector<32x64xf32>, vector<64x32xf32>, vector<32x32xf32> -> vector<32x32xf32>
    %c0_79 = arith.constant 0 : index
    %c0_80 = arith.constant 0 : index
    %c0_81 = arith.constant 0 : index
    %161 = vector.load %arg18[%c0_79, %c0_80, %c0_81] : memref<2x1x32xf32, #tpu.memory_space<vmem>>, vector<1x1x32xf32>
    %162 = vector.shape_cast %161 : vector<1x1x32xf32> to vector<1x32xf32>
    %163 = vector.broadcast %162 : vector<1x32xf32> to vector<32x32xf32>
    %164 = arith.addf %160, %163 : vector<32x32xf32>
    %165 = arith.addf %148, %164 : vector<32x32xf32>
    %c0_82 = arith.constant 0 : index
    %c0_83 = arith.constant 0 : index
    %c0_84 = arith.constant 0 : index
    %166 = vector.load %arg19[%c0_82, %c0_83, %c0_84] : memref<2x1x32xf32, #tpu.memory_space<vmem>>, vector<1x1x32xf32>
    %167 = vector.shape_cast %166 : vector<1x1x32xf32> to vector<1x32xf32>
    %c0_85 = arith.constant 0 : index
    %c0_86 = arith.constant 0 : index
    %c0_87 = arith.constant 0 : index
    %168 = vector.load %arg20[%c0_85, %c0_86, %c0_87] : memref<2x1x32xf32, #tpu.memory_space<vmem>>, vector<1x1x32xf32>
    %169 = vector.shape_cast %168 : vector<1x1x32xf32> to vector<1x32xf32>
    %cst_88 = arith.constant dense<0.000000e+00> : vector<32xf32>
    %170 = vector.multi_reduction <add>, %165, %cst_88 [1] : vector<32x32xf32> to vector<32xf32>
    %171 = vector.shape_cast %170 : vector<32xf32> to vector<32x1xf32>
    %cst_89 = arith.constant 3.200000e+01 : f32
    %172 = vector.broadcast %cst_89 : f32 to vector<32x1xf32>
    %173 = arith.divf %171, %172 : vector<32x1xf32>
    %174 = vector.broadcast %173 : vector<32x1xf32> to vector<32x32xf32>
    %175 = arith.subf %165, %174 : vector<32x32xf32>
    %176 = arith.mulf %175, %175 : vector<32x32xf32>
    %cst_90 = arith.constant dense<0.000000e+00> : vector<32xf32>
    %177 = vector.multi_reduction <add>, %176, %cst_90 [1] : vector<32x32xf32> to vector<32xf32>
    %178 = vector.shape_cast %177 : vector<32xf32> to vector<32x1xf32>
    %cst_91 = arith.constant 3.200000e+01 : f32
    %179 = vector.broadcast %cst_91 : f32 to vector<32x1xf32>
    %180 = arith.divf %178, %179 : vector<32x1xf32>
    %cst_92 = arith.constant 9.99999974E-6 : f32
    %181 = vector.broadcast %cst_92 : f32 to vector<32x1xf32>
    %182 = arith.addf %180, %181 : vector<32x1xf32>
    %183 = math.rsqrt %182 : vector<32x1xf32>
    %184 = vector.broadcast %183 : vector<32x1xf32> to vector<32x32xf32>
    %185 = arith.mulf %175, %184 : vector<32x32xf32>
    %186 = vector.broadcast %167 : vector<1x32xf32> to vector<32x32xf32>
    %187 = arith.mulf %185, %186 : vector<32x32xf32>
    %188 = vector.broadcast %169 : vector<1x32xf32> to vector<32x32xf32>
    %189 = arith.addf %187, %188 : vector<32x32xf32>
    %c1 = arith.constant 1 : index
    %c0_93 = arith.constant 0 : index
    %c0_94 = arith.constant 0 : index
    %190 = vector.load %arg7[%c1, %c0_93, %c0_94] : memref<2x32x64xf32, #tpu.memory_space<vmem>>, vector<1x32x64xf32>
    %191 = vector.shape_cast %190 : vector<1x32x64xf32> to vector<32x64xf32>
    %c1_95 = arith.constant 1 : index
    %c0_96 = arith.constant 0 : index
    %c0_97 = arith.constant 0 : index
    %192 = vector.load %arg8[%c1_95, %c0_96, %c0_97] : memref<2x1x64xf32, #tpu.memory_space<vmem>>, vector<1x1x64xf32>
    %193 = vector.shape_cast %192 : vector<1x1x64xf32> to vector<1x64xf32>
    %c1_98 = arith.constant 1 : index
    %c0_99 = arith.constant 0 : index
    %c0_100 = arith.constant 0 : index
    %194 = vector.load %arg9[%c1_98, %c0_99, %c0_100] : memref<2x32x32xf32, #tpu.memory_space<vmem>>, vector<1x32x32xf32>
    %195 = vector.shape_cast %194 : vector<1x32x32xf32> to vector<32x32xf32>
    %c1_101 = arith.constant 1 : index
    %c0_102 = arith.constant 0 : index
    %c0_103 = arith.constant 0 : index
    %196 = vector.load %arg10[%c1_101, %c0_102, %c0_103] : memref<2x1x32xf32, #tpu.memory_space<vmem>>, vector<1x1x32xf32>
    %197 = vector.shape_cast %196 : vector<1x1x32xf32> to vector<1x32xf32>
    %c1_104 = arith.constant 1 : index
    %c0_105 = arith.constant 0 : index
    %c0_106 = arith.constant 0 : index
    %198 = vector.load %arg11[%c1_104, %c0_105, %c0_106] : memref<2x32x32xf32, #tpu.memory_space<vmem>>, vector<1x32x32xf32>
    %199 = vector.shape_cast %198 : vector<1x32x32xf32> to vector<32x32xf32>
    %c1_107 = arith.constant 1 : index
    %c0_108 = arith.constant 0 : index
    %c0_109 = arith.constant 0 : index
    %200 = vector.load %arg12[%c1_107, %c0_108, %c0_109] : memref<2x1x32xf32, #tpu.memory_space<vmem>>, vector<1x1x32xf32>
    %201 = vector.shape_cast %200 : vector<1x1x32xf32> to vector<1x32xf32>
    %202 = arith.addf %189, %13 : vector<32x32xf32>
    %cst_110 = arith.constant dense<0.000000e+00> : vector<32x64xf32>
    %203 = tpu.matmul %202, %191, %cst_110 {dimension_numbers = #tpu.dot_dimension_numbers<[1], [0], [0], [1], [0, 0, 1, 1], [], []>} : vector<32x32xf32>, vector<32x64xf32>, vector<32x64xf32> -> vector<32x64xf32>
    %204 = vector.broadcast %193 : vector<1x64xf32> to vector<32x64xf32>
    %205 = arith.addf %203, %204 : vector<32x64xf32>
    %cst_111 = arith.constant dense<0.000000e+00> : vector<32x32xf32>
    %206 = tpu.matmul %189, %195, %cst_111 {dimension_numbers = #tpu.dot_dimension_numbers<[1], [0], [0], [1], [0, 0, 1, 1], [], []>} : vector<32x32xf32>, vector<32x32xf32>, vector<32x32xf32> -> vector<32x32xf32>
    %207 = vector.broadcast %197 : vector<1x32xf32> to vector<32x32xf32>
    %208 = arith.addf %206, %207 : vector<32x32xf32>
    %209 = vector.extract_strided_slice %205 {offsets = [0, 0], sizes = [32, 32], strides = [1, 1]} : vector<32x64xf32> to vector<32x32xf32>
    %210 = vector.extract_strided_slice %205 {offsets = [0, 32], sizes = [32, 32], strides = [1, 1]} : vector<32x64xf32> to vector<32x32xf32>
    %211 = vector.extract_strided_slice %209 {offsets = [0, 0], sizes = [32, 8], strides = [1, 1]} : vector<32x32xf32> to vector<32x8xf32>
    %212 = vector.shape_cast %211 : vector<32x8xf32> to vector<2x16x8xf32>
    %213 = vector.extract_strided_slice %210 {offsets = [0, 0], sizes = [32, 8], strides = [1, 1]} : vector<32x32xf32> to vector<32x8xf32>
    %214 = vector.shape_cast %213 : vector<32x8xf32> to vector<2x16x8xf32>
    %215 = vector.extract_strided_slice %208 {offsets = [0, 0], sizes = [32, 8], strides = [1, 1]} : vector<32x32xf32> to vector<32x8xf32>
    %216 = vector.shape_cast %215 : vector<32x8xf32> to vector<2x16x8xf32>
    "tpu.trace_start"() <{level = 10 : i32, message = "bqd,bkd->bqk"}> : () -> ()
    %cst_112 = arith.constant dense<0.000000e+00> : vector<2x16x16xf32>
    %217 = tpu.matmul %212, %214, %cst_112 {dimension_numbers = #tpu.dot_dimension_numbers<[2], [2], [1], [1], [0, 0, 0, 1, 1, 1], [0], [0]>} : vector<2x16x8xf32>, vector<2x16x8xf32>, vector<2x16x16xf32> -> vector<2x16x16xf32>
    "tpu.trace_stop"() : () -> ()
    %cst_113 = arith.constant 0.353553385 : f32
    %218 = vector.broadcast %cst_113 : f32 to vector<2x16x16xf32>
    %219 = arith.mulf %217, %218 : vector<2x16x16xf32>
    %cst_114 = arith.constant dense<0xFF800000> : vector<2x16xf32>
    %220 = vector.multi_reduction <maximumf>, %219, %cst_114 [2] : vector<2x16x16xf32> to vector<2x16xf32>
    %221 = vector.shape_cast %220 : vector<2x16xf32> to vector<2x16x1xf32>
    %222 = vector.broadcast %221 : vector<2x16x1xf32> to vector<2x16x16xf32>
    %223 = arith.subf %219, %222 : vector<2x16x16xf32>
    %224 = math.exp %223 : vector<2x16x16xf32>
    %cst_115 = arith.constant dense<0.000000e+00> : vector<2x16xf32>
    %225 = vector.multi_reduction <add>, %224, %cst_115 [2] : vector<2x16x16xf32> to vector<2x16xf32>
    %226 = vector.shape_cast %225 : vector<2x16xf32> to vector<2x16x1xf32>
    "tpu.trace_start"() <{level = 10 : i32, message = "bqk,bkd->bqd"}> : () -> ()
    %cst_116 = arith.constant dense<0.000000e+00> : vector<2x16x8xf32>
    %227 = tpu.matmul %224, %216, %cst_116 {dimension_numbers = #tpu.dot_dimension_numbers<[2], [1], [1], [2], [0, 0, 0, 1, 1, 2], [0], [0]>} : vector<2x16x16xf32>, vector<2x16x8xf32>, vector<2x16x8xf32> -> vector<2x16x8xf32>
    "tpu.trace_stop"() : () -> ()
    %228 = tpu.reciprocal %226 {approx = true} : vector<2x16x1xf32> -> vector<2x16x1xf32>
    %229 = vector.broadcast %228 : vector<2x16x1xf32> to vector<2x16x8xf32>
    %230 = arith.mulf %227, %229 : vector<2x16x8xf32>
    %231 = vector.shape_cast %230 : vector<2x16x8xf32> to vector<32x8xf32>
    %232 = vector.extract_strided_slice %209 {offsets = [0, 8], sizes = [32, 8], strides = [1, 1]} : vector<32x32xf32> to vector<32x8xf32>
    %233 = vector.shape_cast %232 : vector<32x8xf32> to vector<2x16x8xf32>
    %234 = vector.extract_strided_slice %210 {offsets = [0, 8], sizes = [32, 8], strides = [1, 1]} : vector<32x32xf32> to vector<32x8xf32>
    %235 = vector.shape_cast %234 : vector<32x8xf32> to vector<2x16x8xf32>
    %236 = vector.extract_strided_slice %208 {offsets = [0, 8], sizes = [32, 8], strides = [1, 1]} : vector<32x32xf32> to vector<32x8xf32>
    %237 = vector.shape_cast %236 : vector<32x8xf32> to vector<2x16x8xf32>
    "tpu.trace_start"() <{level = 10 : i32, message = "bqd,bkd->bqk"}> : () -> ()
    %cst_117 = arith.constant dense<0.000000e+00> : vector<2x16x16xf32>
    %238 = tpu.matmul %233, %235, %cst_117 {dimension_numbers = #tpu.dot_dimension_numbers<[2], [2], [1], [1], [0, 0, 0, 1, 1, 1], [0], [0]>} : vector<2x16x8xf32>, vector<2x16x8xf32>, vector<2x16x16xf32> -> vector<2x16x16xf32>
    "tpu.trace_stop"() : () -> ()
    %cst_118 = arith.constant 0.353553385 : f32
    %239 = vector.broadcast %cst_118 : f32 to vector<2x16x16xf32>
    %240 = arith.mulf %238, %239 : vector<2x16x16xf32>
    %cst_119 = arith.constant dense<0xFF800000> : vector<2x16xf32>
    %241 = vector.multi_reduction <maximumf>, %240, %cst_119 [2] : vector<2x16x16xf32> to vector<2x16xf32>
    %242 = vector.shape_cast %241 : vector<2x16xf32> to vector<2x16x1xf32>
    %243 = vector.broadcast %242 : vector<2x16x1xf32> to vector<2x16x16xf32>
    %244 = arith.subf %240, %243 : vector<2x16x16xf32>
    %245 = math.exp %244 : vector<2x16x16xf32>
    %cst_120 = arith.constant dense<0.000000e+00> : vector<2x16xf32>
    %246 = vector.multi_reduction <add>, %245, %cst_120 [2] : vector<2x16x16xf32> to vector<2x16xf32>
    %247 = vector.shape_cast %246 : vector<2x16xf32> to vector<2x16x1xf32>
    "tpu.trace_start"() <{level = 10 : i32, message = "bqk,bkd->bqd"}> : () -> ()
    %cst_121 = arith.constant dense<0.000000e+00> : vector<2x16x8xf32>
    %248 = tpu.matmul %245, %237, %cst_121 {dimension_numbers = #tpu.dot_dimension_numbers<[2], [1], [1], [2], [0, 0, 0, 1, 1, 2], [0], [0]>} : vector<2x16x16xf32>, vector<2x16x8xf32>, vector<2x16x8xf32> -> vector<2x16x8xf32>
    "tpu.trace_stop"() : () -> ()
    %249 = tpu.reciprocal %247 {approx = true} : vector<2x16x1xf32> -> vector<2x16x1xf32>
    %250 = vector.broadcast %249 : vector<2x16x1xf32> to vector<2x16x8xf32>
    %251 = arith.mulf %248, %250 : vector<2x16x8xf32>
    %252 = vector.shape_cast %251 : vector<2x16x8xf32> to vector<32x8xf32>
    %253 = vector.extract_strided_slice %209 {offsets = [0, 16], sizes = [32, 8], strides = [1, 1]} : vector<32x32xf32> to vector<32x8xf32>
    %254 = vector.shape_cast %253 : vector<32x8xf32> to vector<2x16x8xf32>
    %255 = vector.extract_strided_slice %210 {offsets = [0, 16], sizes = [32, 8], strides = [1, 1]} : vector<32x32xf32> to vector<32x8xf32>
    %256 = vector.shape_cast %255 : vector<32x8xf32> to vector<2x16x8xf32>
    %257 = vector.extract_strided_slice %208 {offsets = [0, 16], sizes = [32, 8], strides = [1, 1]} : vector<32x32xf32> to vector<32x8xf32>
    %258 = vector.shape_cast %257 : vector<32x8xf32> to vector<2x16x8xf32>
    "tpu.trace_start"() <{level = 10 : i32, message = "bqd,bkd->bqk"}> : () -> ()
    %cst_122 = arith.constant dense<0.000000e+00> : vector<2x16x16xf32>
    %259 = tpu.matmul %254, %256, %cst_122 {dimension_numbers = #tpu.dot_dimension_numbers<[2], [2], [1], [1], [0, 0, 0, 1, 1, 1], [0], [0]>} : vector<2x16x8xf32>, vector<2x16x8xf32>, vector<2x16x16xf32> -> vector<2x16x16xf32>
    "tpu.trace_stop"() : () -> ()
    %cst_123 = arith.constant 0.353553385 : f32
    %260 = vector.broadcast %cst_123 : f32 to vector<2x16x16xf32>
    %261 = arith.mulf %259, %260 : vector<2x16x16xf32>
    %cst_124 = arith.constant dense<0xFF800000> : vector<2x16xf32>
    %262 = vector.multi_reduction <maximumf>, %261, %cst_124 [2] : vector<2x16x16xf32> to vector<2x16xf32>
    %263 = vector.shape_cast %262 : vector<2x16xf32> to vector<2x16x1xf32>
    %264 = vector.broadcast %263 : vector<2x16x1xf32> to vector<2x16x16xf32>
    %265 = arith.subf %261, %264 : vector<2x16x16xf32>
    %266 = math.exp %265 : vector<2x16x16xf32>
    %cst_125 = arith.constant dense<0.000000e+00> : vector<2x16xf32>
    %267 = vector.multi_reduction <add>, %266, %cst_125 [2] : vector<2x16x16xf32> to vector<2x16xf32>
    %268 = vector.shape_cast %267 : vector<2x16xf32> to vector<2x16x1xf32>
    "tpu.trace_start"() <{level = 10 : i32, message = "bqk,bkd->bqd"}> : () -> ()
    %cst_126 = arith.constant dense<0.000000e+00> : vector<2x16x8xf32>
    %269 = tpu.matmul %266, %258, %cst_126 {dimension_numbers = #tpu.dot_dimension_numbers<[2], [1], [1], [2], [0, 0, 0, 1, 1, 2], [0], [0]>} : vector<2x16x16xf32>, vector<2x16x8xf32>, vector<2x16x8xf32> -> vector<2x16x8xf32>
    "tpu.trace_stop"() : () -> ()
    %270 = tpu.reciprocal %268 {approx = true} : vector<2x16x1xf32> -> vector<2x16x1xf32>
    %271 = vector.broadcast %270 : vector<2x16x1xf32> to vector<2x16x8xf32>
    %272 = arith.mulf %269, %271 : vector<2x16x8xf32>
    %273 = vector.shape_cast %272 : vector<2x16x8xf32> to vector<32x8xf32>
    %274 = vector.extract_strided_slice %209 {offsets = [0, 24], sizes = [32, 8], strides = [1, 1]} : vector<32x32xf32> to vector<32x8xf32>
    %275 = vector.shape_cast %274 : vector<32x8xf32> to vector<2x16x8xf32>
    %276 = vector.extract_strided_slice %210 {offsets = [0, 24], sizes = [32, 8], strides = [1, 1]} : vector<32x32xf32> to vector<32x8xf32>
    %277 = vector.shape_cast %276 : vector<32x8xf32> to vector<2x16x8xf32>
    %278 = vector.extract_strided_slice %208 {offsets = [0, 24], sizes = [32, 8], strides = [1, 1]} : vector<32x32xf32> to vector<32x8xf32>
    %279 = vector.shape_cast %278 : vector<32x8xf32> to vector<2x16x8xf32>
    "tpu.trace_start"() <{level = 10 : i32, message = "bqd,bkd->bqk"}> : () -> ()
    %cst_127 = arith.constant dense<0.000000e+00> : vector<2x16x16xf32>
    %280 = tpu.matmul %275, %277, %cst_127 {dimension_numbers = #tpu.dot_dimension_numbers<[2], [2], [1], [1], [0, 0, 0, 1, 1, 1], [0], [0]>} : vector<2x16x8xf32>, vector<2x16x8xf32>, vector<2x16x16xf32> -> vector<2x16x16xf32>
    "tpu.trace_stop"() : () -> ()
    %cst_128 = arith.constant 0.353553385 : f32
    %281 = vector.broadcast %cst_128 : f32 to vector<2x16x16xf32>
    %282 = arith.mulf %280, %281 : vector<2x16x16xf32>
    %cst_129 = arith.constant dense<0xFF800000> : vector<2x16xf32>
    %283 = vector.multi_reduction <maximumf>, %282, %cst_129 [2] : vector<2x16x16xf32> to vector<2x16xf32>
    %284 = vector.shape_cast %283 : vector<2x16xf32> to vector<2x16x1xf32>
    %285 = vector.broadcast %284 : vector<2x16x1xf32> to vector<2x16x16xf32>
    %286 = arith.subf %282, %285 : vector<2x16x16xf32>
    %287 = math.exp %286 : vector<2x16x16xf32>
    %cst_130 = arith.constant dense<0.000000e+00> : vector<2x16xf32>
    %288 = vector.multi_reduction <add>, %287, %cst_130 [2] : vector<2x16x16xf32> to vector<2x16xf32>
    %289 = vector.shape_cast %288 : vector<2x16xf32> to vector<2x16x1xf32>
    "tpu.trace_start"() <{level = 10 : i32, message = "bqk,bkd->bqd"}> : () -> ()
    %cst_131 = arith.constant dense<0.000000e+00> : vector<2x16x8xf32>
    %290 = tpu.matmul %287, %279, %cst_131 {dimension_numbers = #tpu.dot_dimension_numbers<[2], [1], [1], [2], [0, 0, 0, 1, 1, 2], [0], [0]>} : vector<2x16x16xf32>, vector<2x16x8xf32>, vector<2x16x8xf32> -> vector<2x16x8xf32>
    "tpu.trace_stop"() : () -> ()
    %291 = tpu.reciprocal %289 {approx = true} : vector<2x16x1xf32> -> vector<2x16x1xf32>
    %292 = vector.broadcast %291 : vector<2x16x1xf32> to vector<2x16x8xf32>
    %293 = arith.mulf %290, %292 : vector<2x16x8xf32>
    %294 = vector.shape_cast %293 : vector<2x16x8xf32> to vector<32x8xf32>
    %295 = tpu.concatenate %231, %252, %273, %294 in 1 : vector<32x8xf32>, vector<32x8xf32>, vector<32x8xf32>, vector<32x8xf32> -> vector<32x32xf32>
    %cst_132 = arith.constant dense<0.000000e+00> : vector<32x32xf32>
    %296 = tpu.matmul %295, %199, %cst_132 {dimension_numbers = #tpu.dot_dimension_numbers<[1], [0], [0], [1], [0, 0, 1, 1], [], []>} : vector<32x32xf32>, vector<32x32xf32>, vector<32x32xf32> -> vector<32x32xf32>
    %297 = vector.broadcast %201 : vector<1x32xf32> to vector<32x32xf32>
    %298 = arith.addf %296, %297 : vector<32x32xf32>
    %299 = arith.addf %189, %298 : vector<32x32xf32>
    %c1_133 = arith.constant 1 : index
    %c0_134 = arith.constant 0 : index
    %c0_135 = arith.constant 0 : index
    %300 = vector.load %arg13[%c1_133, %c0_134, %c0_135] : memref<2x1x32xf32, #tpu.memory_space<vmem>>, vector<1x1x32xf32>
    %301 = vector.shape_cast %300 : vector<1x1x32xf32> to vector<1x32xf32>
    %c1_136 = arith.constant 1 : index
    %c0_137 = arith.constant 0 : index
    %c0_138 = arith.constant 0 : index
    %302 = vector.load %arg14[%c1_136, %c0_137, %c0_138] : memref<2x1x32xf32, #tpu.memory_space<vmem>>, vector<1x1x32xf32>
    %303 = vector.shape_cast %302 : vector<1x1x32xf32> to vector<1x32xf32>
    %cst_139 = arith.constant dense<0.000000e+00> : vector<32xf32>
    %304 = vector.multi_reduction <add>, %299, %cst_139 [1] : vector<32x32xf32> to vector<32xf32>
    %305 = vector.shape_cast %304 : vector<32xf32> to vector<32x1xf32>
    %cst_140 = arith.constant 3.200000e+01 : f32
    %306 = vector.broadcast %cst_140 : f32 to vector<32x1xf32>
    %307 = arith.divf %305, %306 : vector<32x1xf32>
    %308 = vector.broadcast %307 : vector<32x1xf32> to vector<32x32xf32>
    %309 = arith.subf %299, %308 : vector<32x32xf32>
    %310 = arith.mulf %309, %309 : vector<32x32xf32>
    %cst_141 = arith.constant dense<0.000000e+00> : vector<32xf32>
    %311 = vector.multi_reduction <add>, %310, %cst_141 [1] : vector<32x32xf32> to vector<32xf32>
    %312 = vector.shape_cast %311 : vector<32xf32> to vector<32x1xf32>
    %cst_142 = arith.constant 3.200000e+01 : f32
    %313 = vector.broadcast %cst_142 : f32 to vector<32x1xf32>
    %314 = arith.divf %312, %313 : vector<32x1xf32>
    %cst_143 = arith.constant 9.99999974E-6 : f32
    %315 = vector.broadcast %cst_143 : f32 to vector<32x1xf32>
    %316 = arith.addf %314, %315 : vector<32x1xf32>
    %317 = math.rsqrt %316 : vector<32x1xf32>
    %318 = vector.broadcast %317 : vector<32x1xf32> to vector<32x32xf32>
    %319 = arith.mulf %309, %318 : vector<32x32xf32>
    %320 = vector.broadcast %301 : vector<1x32xf32> to vector<32x32xf32>
    %321 = arith.mulf %319, %320 : vector<32x32xf32>
    %322 = vector.broadcast %303 : vector<1x32xf32> to vector<32x32xf32>
    %323 = arith.addf %321, %322 : vector<32x32xf32>
    %c1_144 = arith.constant 1 : index
    %c0_145 = arith.constant 0 : index
    %c0_146 = arith.constant 0 : index
    %324 = vector.load %arg15[%c1_144, %c0_145, %c0_146] : memref<2x32x64xf32, #tpu.memory_space<vmem>>, vector<1x32x64xf32>
    %325 = vector.shape_cast %324 : vector<1x32x64xf32> to vector<32x64xf32>
    %cst_147 = arith.constant dense<0.000000e+00> : vector<32x64xf32>
    %326 = tpu.matmul %323, %325, %cst_147 {dimension_numbers = #tpu.dot_dimension_numbers<[1], [0], [0], [1], [0, 0, 1, 1], [], []>} : vector<32x32xf32>, vector<32x64xf32>, vector<32x64xf32> -> vector<32x64xf32>
    %c1_148 = arith.constant 1 : index
    %c0_149 = arith.constant 0 : index
    %c0_150 = arith.constant 0 : index
    %327 = vector.load %arg16[%c1_148, %c0_149, %c0_150] : memref<2x1x64xf32, #tpu.memory_space<vmem>>, vector<1x1x64xf32>
    %328 = vector.shape_cast %327 : vector<1x1x64xf32> to vector<1x64xf32>
    %329 = vector.broadcast %328 : vector<1x64xf32> to vector<32x64xf32>
    %330 = arith.addf %326, %329 : vector<32x64xf32>
    %cst_151 = arith.constant 0.000000e+00 : f32
    %331 = vector.broadcast %cst_151 : f32 to vector<32x64xf32>
    %332 = arith.maximumf %330, %331 : vector<32x64xf32>
    %c1_152 = arith.constant 1 : index
    %c0_153 = arith.constant 0 : index
    %c0_154 = arith.constant 0 : index
    %333 = vector.load %arg17[%c1_152, %c0_153, %c0_154] : memref<2x64x32xf32, #tpu.memory_space<vmem>>, vector<1x64x32xf32>
    %334 = vector.shape_cast %333 : vector<1x64x32xf32> to vector<64x32xf32>
    %cst_155 = arith.constant dense<0.000000e+00> : vector<32x32xf32>
    %335 = tpu.matmul %332, %334, %cst_155 {dimension_numbers = #tpu.dot_dimension_numbers<[1], [0], [0], [1], [0, 0, 1, 1], [], []>} : vector<32x64xf32>, vector<64x32xf32>, vector<32x32xf32> -> vector<32x32xf32>
    %c1_156 = arith.constant 1 : index
    %c0_157 = arith.constant 0 : index
    %c0_158 = arith.constant 0 : index
    %336 = vector.load %arg18[%c1_156, %c0_157, %c0_158] : memref<2x1x32xf32, #tpu.memory_space<vmem>>, vector<1x1x32xf32>
    %337 = vector.shape_cast %336 : vector<1x1x32xf32> to vector<1x32xf32>
    %338 = vector.broadcast %337 : vector<1x32xf32> to vector<32x32xf32>
    %339 = arith.addf %335, %338 : vector<32x32xf32>
    %340 = arith.addf %323, %339 : vector<32x32xf32>
    %c1_159 = arith.constant 1 : index
    %c0_160 = arith.constant 0 : index
    %c0_161 = arith.constant 0 : index
    %341 = vector.load %arg19[%c1_159, %c0_160, %c0_161] : memref<2x1x32xf32, #tpu.memory_space<vmem>>, vector<1x1x32xf32>
    %342 = vector.shape_cast %341 : vector<1x1x32xf32> to vector<1x32xf32>
    %c1_162 = arith.constant 1 : index
    %c0_163 = arith.constant 0 : index
    %c0_164 = arith.constant 0 : index
    %343 = vector.load %arg20[%c1_162, %c0_163, %c0_164] : memref<2x1x32xf32, #tpu.memory_space<vmem>>, vector<1x1x32xf32>
    %344 = vector.shape_cast %343 : vector<1x1x32xf32> to vector<1x32xf32>
    %cst_165 = arith.constant dense<0.000000e+00> : vector<32xf32>
    %345 = vector.multi_reduction <add>, %340, %cst_165 [1] : vector<32x32xf32> to vector<32xf32>
    %346 = vector.shape_cast %345 : vector<32xf32> to vector<32x1xf32>
    %cst_166 = arith.constant 3.200000e+01 : f32
    %347 = vector.broadcast %cst_166 : f32 to vector<32x1xf32>
    %348 = arith.divf %346, %347 : vector<32x1xf32>
    %349 = vector.broadcast %348 : vector<32x1xf32> to vector<32x32xf32>
    %350 = arith.subf %340, %349 : vector<32x32xf32>
    %351 = arith.mulf %350, %350 : vector<32x32xf32>
    %cst_167 = arith.constant dense<0.000000e+00> : vector<32xf32>
    %352 = vector.multi_reduction <add>, %351, %cst_167 [1] : vector<32x32xf32> to vector<32xf32>
    %353 = vector.shape_cast %352 : vector<32xf32> to vector<32x1xf32>
    %cst_168 = arith.constant 3.200000e+01 : f32
    %354 = vector.broadcast %cst_168 : f32 to vector<32x1xf32>
    %355 = arith.divf %353, %354 : vector<32x1xf32>
    %cst_169 = arith.constant 9.99999974E-6 : f32
    %356 = vector.broadcast %cst_169 : f32 to vector<32x1xf32>
    %357 = arith.addf %355, %356 : vector<32x1xf32>
    %358 = math.rsqrt %357 : vector<32x1xf32>
    %359 = vector.broadcast %358 : vector<32x1xf32> to vector<32x32xf32>
    %360 = arith.mulf %350, %359 : vector<32x32xf32>
    %361 = vector.broadcast %342 : vector<1x32xf32> to vector<32x32xf32>
    %362 = arith.mulf %360, %361 : vector<32x32xf32>
    %363 = vector.broadcast %344 : vector<1x32xf32> to vector<32x32xf32>
    %364 = arith.addf %362, %363 : vector<32x32xf32>
    %cst_170 = arith.constant 0.000000e+00 : f32
    %365 = vector.broadcast %cst_170 : f32 to vector<16x32xf32>
    %c0_171 = arith.constant 0 : index
    %c0_172 = arith.constant 0 : index
    %c0_173 = arith.constant 0 : index
    %366 = vector.load %arg21[%c0_171, %c0_172, %c0_173] : memref<2x32x64xf32, #tpu.memory_space<vmem>>, vector<1x32x64xf32>
    %367 = vector.shape_cast %366 : vector<1x32x64xf32> to vector<32x64xf32>
    %c0_174 = arith.constant 0 : index
    %c0_175 = arith.constant 0 : index
    %c0_176 = arith.constant 0 : index
    %368 = vector.load %arg22[%c0_174, %c0_175, %c0_176] : memref<2x1x64xf32, #tpu.memory_space<vmem>>, vector<1x1x64xf32>
    %369 = vector.shape_cast %368 : vector<1x1x64xf32> to vector<1x64xf32>
    %c0_177 = arith.constant 0 : index
    %c0_178 = arith.constant 0 : index
    %c0_179 = arith.constant 0 : index
    %370 = vector.load %arg23[%c0_177, %c0_178, %c0_179] : memref<2x32x32xf32, #tpu.memory_space<vmem>>, vector<1x32x32xf32>
    %371 = vector.shape_cast %370 : vector<1x32x32xf32> to vector<32x32xf32>
    %c0_180 = arith.constant 0 : index
    %c0_181 = arith.constant 0 : index
    %c0_182 = arith.constant 0 : index
    %372 = vector.load %arg24[%c0_180, %c0_181, %c0_182] : memref<2x1x32xf32, #tpu.memory_space<vmem>>, vector<1x1x32xf32>
    %373 = vector.shape_cast %372 : vector<1x1x32xf32> to vector<1x32xf32>
    %c0_183 = arith.constant 0 : index
    %c0_184 = arith.constant 0 : index
    %c0_185 = arith.constant 0 : index
    %374 = vector.load %arg25[%c0_183, %c0_184, %c0_185] : memref<2x32x32xf32, #tpu.memory_space<vmem>>, vector<1x32x32xf32>
    %375 = vector.shape_cast %374 : vector<1x32x32xf32> to vector<32x32xf32>
    %c0_186 = arith.constant 0 : index
    %c0_187 = arith.constant 0 : index
    %c0_188 = arith.constant 0 : index
    %376 = vector.load %arg26[%c0_186, %c0_187, %c0_188] : memref<2x1x32xf32, #tpu.memory_space<vmem>>, vector<1x1x32xf32>
    %377 = vector.shape_cast %376 : vector<1x1x32xf32> to vector<1x32xf32>
    %378 = arith.addf %365, %14 : vector<16x32xf32>
    %cst_189 = arith.constant dense<0.000000e+00> : vector<16x64xf32>
    %379 = tpu.matmul %378, %367, %cst_189 {dimension_numbers = #tpu.dot_dimension_numbers<[1], [0], [0], [1], [0, 0, 1, 1], [], []>} : vector<16x32xf32>, vector<32x64xf32>, vector<16x64xf32> -> vector<16x64xf32>
    %380 = vector.broadcast %369 : vector<1x64xf32> to vector<16x64xf32>
    %381 = arith.addf %379, %380 : vector<16x64xf32>
    %cst_190 = arith.constant dense<0.000000e+00> : vector<16x32xf32>
    %382 = tpu.matmul %365, %371, %cst_190 {dimension_numbers = #tpu.dot_dimension_numbers<[1], [0], [0], [1], [0, 0, 1, 1], [], []>} : vector<16x32xf32>, vector<32x32xf32>, vector<16x32xf32> -> vector<16x32xf32>
    %383 = vector.broadcast %373 : vector<1x32xf32> to vector<16x32xf32>
    %384 = arith.addf %382, %383 : vector<16x32xf32>
    %385 = vector.extract_strided_slice %381 {offsets = [0, 0], sizes = [16, 32], strides = [1, 1]} : vector<16x64xf32> to vector<16x32xf32>
    %386 = vector.extract_strided_slice %381 {offsets = [0, 32], sizes = [16, 32], strides = [1, 1]} : vector<16x64xf32> to vector<16x32xf32>
    %387 = vector.extract_strided_slice %385 {offsets = [0, 0], sizes = [16, 8], strides = [1, 1]} : vector<16x32xf32> to vector<16x8xf32>
    %388 = vector.shape_cast %387 : vector<16x8xf32> to vector<2x8x8xf32>
    %389 = vector.extract_strided_slice %386 {offsets = [0, 0], sizes = [16, 8], strides = [1, 1]} : vector<16x32xf32> to vector<16x8xf32>
    %390 = vector.shape_cast %389 : vector<16x8xf32> to vector<2x8x8xf32>
    %391 = vector.extract_strided_slice %384 {offsets = [0, 0], sizes = [16, 8], strides = [1, 1]} : vector<16x32xf32> to vector<16x8xf32>
    %392 = vector.shape_cast %391 : vector<16x8xf32> to vector<2x8x8xf32>
    "tpu.trace_start"() <{level = 10 : i32, message = "bqd,bkd->bqk"}> : () -> ()
    %cst_191 = arith.constant dense<0.000000e+00> : vector<2x8x8xf32>
    %393 = tpu.matmul %388, %390, %cst_191 {dimension_numbers = #tpu.dot_dimension_numbers<[2], [2], [1], [1], [0, 0, 0, 1, 1, 1], [0], [0]>} : vector<2x8x8xf32>, vector<2x8x8xf32>, vector<2x8x8xf32> -> vector<2x8x8xf32>
    "tpu.trace_stop"() : () -> ()
    %cst_192 = arith.constant 0.353553385 : f32
    %394 = vector.broadcast %cst_192 : f32 to vector<2x8x8xf32>
    %395 = arith.mulf %393, %394 : vector<2x8x8xf32>
    %cst_193 = arith.constant dense<0xFF800000> : vector<2x8xf32>
    %396 = vector.multi_reduction <maximumf>, %395, %cst_193 [2] : vector<2x8x8xf32> to vector<2x8xf32>
    %397 = vector.shape_cast %396 : vector<2x8xf32> to vector<2x8x1xf32>
    %398 = vector.broadcast %397 : vector<2x8x1xf32> to vector<2x8x8xf32>
    %399 = arith.subf %395, %398 : vector<2x8x8xf32>
    %400 = math.exp %399 : vector<2x8x8xf32>
    %cst_194 = arith.constant dense<0.000000e+00> : vector<2x8xf32>
    %401 = vector.multi_reduction <add>, %400, %cst_194 [2] : vector<2x8x8xf32> to vector<2x8xf32>
    %402 = vector.shape_cast %401 : vector<2x8xf32> to vector<2x8x1xf32>
    "tpu.trace_start"() <{level = 10 : i32, message = "bqk,bkd->bqd"}> : () -> ()
    %cst_195 = arith.constant dense<0.000000e+00> : vector<2x8x8xf32>
    %403 = tpu.matmul %400, %392, %cst_195 {dimension_numbers = #tpu.dot_dimension_numbers<[2], [1], [1], [2], [0, 0, 0, 1, 1, 2], [0], [0]>} : vector<2x8x8xf32>, vector<2x8x8xf32>, vector<2x8x8xf32> -> vector<2x8x8xf32>
    "tpu.trace_stop"() : () -> ()
    %404 = tpu.reciprocal %402 {approx = true} : vector<2x8x1xf32> -> vector<2x8x1xf32>
    %405 = vector.broadcast %404 : vector<2x8x1xf32> to vector<2x8x8xf32>
    %406 = arith.mulf %403, %405 : vector<2x8x8xf32>
    %407 = vector.shape_cast %406 : vector<2x8x8xf32> to vector<16x8xf32>
    %408 = vector.extract_strided_slice %385 {offsets = [0, 8], sizes = [16, 8], strides = [1, 1]} : vector<16x32xf32> to vector<16x8xf32>
    %409 = vector.shape_cast %408 : vector<16x8xf32> to vector<2x8x8xf32>
    %410 = vector.extract_strided_slice %386 {offsets = [0, 8], sizes = [16, 8], strides = [1, 1]} : vector<16x32xf32> to vector<16x8xf32>
    %411 = vector.shape_cast %410 : vector<16x8xf32> to vector<2x8x8xf32>
    %412 = vector.extract_strided_slice %384 {offsets = [0, 8], sizes = [16, 8], strides = [1, 1]} : vector<16x32xf32> to vector<16x8xf32>
    %413 = vector.shape_cast %412 : vector<16x8xf32> to vector<2x8x8xf32>
    "tpu.trace_start"() <{level = 10 : i32, message = "bqd,bkd->bqk"}> : () -> ()
    %cst_196 = arith.constant dense<0.000000e+00> : vector<2x8x8xf32>
    %414 = tpu.matmul %409, %411, %cst_196 {dimension_numbers = #tpu.dot_dimension_numbers<[2], [2], [1], [1], [0, 0, 0, 1, 1, 1], [0], [0]>} : vector<2x8x8xf32>, vector<2x8x8xf32>, vector<2x8x8xf32> -> vector<2x8x8xf32>
    "tpu.trace_stop"() : () -> ()
    %cst_197 = arith.constant 0.353553385 : f32
    %415 = vector.broadcast %cst_197 : f32 to vector<2x8x8xf32>
    %416 = arith.mulf %414, %415 : vector<2x8x8xf32>
    %cst_198 = arith.constant dense<0xFF800000> : vector<2x8xf32>
    %417 = vector.multi_reduction <maximumf>, %416, %cst_198 [2] : vector<2x8x8xf32> to vector<2x8xf32>
    %418 = vector.shape_cast %417 : vector<2x8xf32> to vector<2x8x1xf32>
    %419 = vector.broadcast %418 : vector<2x8x1xf32> to vector<2x8x8xf32>
    %420 = arith.subf %416, %419 : vector<2x8x8xf32>
    %421 = math.exp %420 : vector<2x8x8xf32>
    %cst_199 = arith.constant dense<0.000000e+00> : vector<2x8xf32>
    %422 = vector.multi_reduction <add>, %421, %cst_199 [2] : vector<2x8x8xf32> to vector<2x8xf32>
    %423 = vector.shape_cast %422 : vector<2x8xf32> to vector<2x8x1xf32>
    "tpu.trace_start"() <{level = 10 : i32, message = "bqk,bkd->bqd"}> : () -> ()
    %cst_200 = arith.constant dense<0.000000e+00> : vector<2x8x8xf32>
    %424 = tpu.matmul %421, %413, %cst_200 {dimension_numbers = #tpu.dot_dimension_numbers<[2], [1], [1], [2], [0, 0, 0, 1, 1, 2], [0], [0]>} : vector<2x8x8xf32>, vector<2x8x8xf32>, vector<2x8x8xf32> -> vector<2x8x8xf32>
    "tpu.trace_stop"() : () -> ()
    %425 = tpu.reciprocal %423 {approx = true} : vector<2x8x1xf32> -> vector<2x8x1xf32>
    %426 = vector.broadcast %425 : vector<2x8x1xf32> to vector<2x8x8xf32>
    %427 = arith.mulf %424, %426 : vector<2x8x8xf32>
    %428 = vector.shape_cast %427 : vector<2x8x8xf32> to vector<16x8xf32>
    %429 = vector.extract_strided_slice %385 {offsets = [0, 16], sizes = [16, 8], strides = [1, 1]} : vector<16x32xf32> to vector<16x8xf32>
    %430 = vector.shape_cast %429 : vector<16x8xf32> to vector<2x8x8xf32>
    %431 = vector.extract_strided_slice %386 {offsets = [0, 16], sizes = [16, 8], strides = [1, 1]} : vector<16x32xf32> to vector<16x8xf32>
    %432 = vector.shape_cast %431 : vector<16x8xf32> to vector<2x8x8xf32>
    %433 = vector.extract_strided_slice %384 {offsets = [0, 16], sizes = [16, 8], strides = [1, 1]} : vector<16x32xf32> to vector<16x8xf32>
    %434 = vector.shape_cast %433 : vector<16x8xf32> to vector<2x8x8xf32>
    "tpu.trace_start"() <{level = 10 : i32, message = "bqd,bkd->bqk"}> : () -> ()
    %cst_201 = arith.constant dense<0.000000e+00> : vector<2x8x8xf32>
    %435 = tpu.matmul %430, %432, %cst_201 {dimension_numbers = #tpu.dot_dimension_numbers<[2], [2], [1], [1], [0, 0, 0, 1, 1, 1], [0], [0]>} : vector<2x8x8xf32>, vector<2x8x8xf32>, vector<2x8x8xf32> -> vector<2x8x8xf32>
    "tpu.trace_stop"() : () -> ()
    %cst_202 = arith.constant 0.353553385 : f32
    %436 = vector.broadcast %cst_202 : f32 to vector<2x8x8xf32>
    %437 = arith.mulf %435, %436 : vector<2x8x8xf32>
    %cst_203 = arith.constant dense<0xFF800000> : vector<2x8xf32>
    %438 = vector.multi_reduction <maximumf>, %437, %cst_203 [2] : vector<2x8x8xf32> to vector<2x8xf32>
    %439 = vector.shape_cast %438 : vector<2x8xf32> to vector<2x8x1xf32>
    %440 = vector.broadcast %439 : vector<2x8x1xf32> to vector<2x8x8xf32>
    %441 = arith.subf %437, %440 : vector<2x8x8xf32>
    %442 = math.exp %441 : vector<2x8x8xf32>
    %cst_204 = arith.constant dense<0.000000e+00> : vector<2x8xf32>
    %443 = vector.multi_reduction <add>, %442, %cst_204 [2] : vector<2x8x8xf32> to vector<2x8xf32>
    %444 = vector.shape_cast %443 : vector<2x8xf32> to vector<2x8x1xf32>
    "tpu.trace_start"() <{level = 10 : i32, message = "bqk,bkd->bqd"}> : () -> ()
    %cst_205 = arith.constant dense<0.000000e+00> : vector<2x8x8xf32>
    %445 = tpu.matmul %442, %434, %cst_205 {dimension_numbers = #tpu.dot_dimension_numbers<[2], [1], [1], [2], [0, 0, 0, 1, 1, 2], [0], [0]>} : vector<2x8x8xf32>, vector<2x8x8xf32>, vector<2x8x8xf32> -> vector<2x8x8xf32>
    "tpu.trace_stop"() : () -> ()
    %446 = tpu.reciprocal %444 {approx = true} : vector<2x8x1xf32> -> vector<2x8x1xf32>
    %447 = vector.broadcast %446 : vector<2x8x1xf32> to vector<2x8x8xf32>
    %448 = arith.mulf %445, %447 : vector<2x8x8xf32>
    %449 = vector.shape_cast %448 : vector<2x8x8xf32> to vector<16x8xf32>
    %450 = vector.extract_strided_slice %385 {offsets = [0, 24], sizes = [16, 8], strides = [1, 1]} : vector<16x32xf32> to vector<16x8xf32>
    %451 = vector.shape_cast %450 : vector<16x8xf32> to vector<2x8x8xf32>
    %452 = vector.extract_strided_slice %386 {offsets = [0, 24], sizes = [16, 8], strides = [1, 1]} : vector<16x32xf32> to vector<16x8xf32>
    %453 = vector.shape_cast %452 : vector<16x8xf32> to vector<2x8x8xf32>
    %454 = vector.extract_strided_slice %384 {offsets = [0, 24], sizes = [16, 8], strides = [1, 1]} : vector<16x32xf32> to vector<16x8xf32>
    %455 = vector.shape_cast %454 : vector<16x8xf32> to vector<2x8x8xf32>
    "tpu.trace_start"() <{level = 10 : i32, message = "bqd,bkd->bqk"}> : () -> ()
    %cst_206 = arith.constant dense<0.000000e+00> : vector<2x8x8xf32>
    %456 = tpu.matmul %451, %453, %cst_206 {dimension_numbers = #tpu.dot_dimension_numbers<[2], [2], [1], [1], [0, 0, 0, 1, 1, 1], [0], [0]>} : vector<2x8x8xf32>, vector<2x8x8xf32>, vector<2x8x8xf32> -> vector<2x8x8xf32>
    "tpu.trace_stop"() : () -> ()
    %cst_207 = arith.constant 0.353553385 : f32
    %457 = vector.broadcast %cst_207 : f32 to vector<2x8x8xf32>
    %458 = arith.mulf %456, %457 : vector<2x8x8xf32>
    %cst_208 = arith.constant dense<0xFF800000> : vector<2x8xf32>
    %459 = vector.multi_reduction <maximumf>, %458, %cst_208 [2] : vector<2x8x8xf32> to vector<2x8xf32>
    %460 = vector.shape_cast %459 : vector<2x8xf32> to vector<2x8x1xf32>
    %461 = vector.broadcast %460 : vector<2x8x1xf32> to vector<2x8x8xf32>
    %462 = arith.subf %458, %461 : vector<2x8x8xf32>
    %463 = math.exp %462 : vector<2x8x8xf32>
    %cst_209 = arith.constant dense<0.000000e+00> : vector<2x8xf32>
    %464 = vector.multi_reduction <add>, %463, %cst_209 [2] : vector<2x8x8xf32> to vector<2x8xf32>
    %465 = vector.shape_cast %464 : vector<2x8xf32> to vector<2x8x1xf32>
    "tpu.trace_start"() <{level = 10 : i32, message = "bqk,bkd->bqd"}> : () -> ()
    %cst_210 = arith.constant dense<0.000000e+00> : vector<2x8x8xf32>
    %466 = tpu.matmul %463, %455, %cst_210 {dimension_numbers = #tpu.dot_dimension_numbers<[2], [1], [1], [2], [0, 0, 0, 1, 1, 2], [0], [0]>} : vector<2x8x8xf32>, vector<2x8x8xf32>, vector<2x8x8xf32> -> vector<2x8x8xf32>
    "tpu.trace_stop"() : () -> ()
    %467 = tpu.reciprocal %465 {approx = true} : vector<2x8x1xf32> -> vector<2x8x1xf32>
    %468 = vector.broadcast %467 : vector<2x8x1xf32> to vector<2x8x8xf32>
    %469 = arith.mulf %466, %468 : vector<2x8x8xf32>
    %470 = vector.shape_cast %469 : vector<2x8x8xf32> to vector<16x8xf32>
    %471 = tpu.concatenate %407, %428, %449, %470 in 1 : vector<16x8xf32>, vector<16x8xf32>, vector<16x8xf32>, vector<16x8xf32> -> vector<16x32xf32>
    %cst_211 = arith.constant dense<0.000000e+00> : vector<16x32xf32>
    %472 = tpu.matmul %471, %375, %cst_211 {dimension_numbers = #tpu.dot_dimension_numbers<[1], [0], [0], [1], [0, 0, 1, 1], [], []>} : vector<16x32xf32>, vector<32x32xf32>, vector<16x32xf32> -> vector<16x32xf32>
    %473 = vector.broadcast %377 : vector<1x32xf32> to vector<16x32xf32>
    %474 = arith.addf %472, %473 : vector<16x32xf32>
    %475 = arith.addf %365, %474 : vector<16x32xf32>
    %c0_212 = arith.constant 0 : index
    %c0_213 = arith.constant 0 : index
    %c0_214 = arith.constant 0 : index
    %476 = vector.load %arg27[%c0_212, %c0_213, %c0_214] : memref<2x1x32xf32, #tpu.memory_space<vmem>>, vector<1x1x32xf32>
    %477 = vector.shape_cast %476 : vector<1x1x32xf32> to vector<1x32xf32>
    %c0_215 = arith.constant 0 : index
    %c0_216 = arith.constant 0 : index
    %c0_217 = arith.constant 0 : index
    %478 = vector.load %arg28[%c0_215, %c0_216, %c0_217] : memref<2x1x32xf32, #tpu.memory_space<vmem>>, vector<1x1x32xf32>
    %479 = vector.shape_cast %478 : vector<1x1x32xf32> to vector<1x32xf32>
    %cst_218 = arith.constant dense<0.000000e+00> : vector<16xf32>
    %480 = vector.multi_reduction <add>, %475, %cst_218 [1] : vector<16x32xf32> to vector<16xf32>
    %481 = vector.shape_cast %480 : vector<16xf32> to vector<16x1xf32>
    %cst_219 = arith.constant 3.200000e+01 : f32
    %482 = vector.broadcast %cst_219 : f32 to vector<16x1xf32>
    %483 = arith.divf %481, %482 : vector<16x1xf32>
    %484 = vector.broadcast %483 : vector<16x1xf32> to vector<16x32xf32>
    %485 = arith.subf %475, %484 : vector<16x32xf32>
    %486 = arith.mulf %485, %485 : vector<16x32xf32>
    %cst_220 = arith.constant dense<0.000000e+00> : vector<16xf32>
    %487 = vector.multi_reduction <add>, %486, %cst_220 [1] : vector<16x32xf32> to vector<16xf32>
    %488 = vector.shape_cast %487 : vector<16xf32> to vector<16x1xf32>
    %cst_221 = arith.constant 3.200000e+01 : f32
    %489 = vector.broadcast %cst_221 : f32 to vector<16x1xf32>
    %490 = arith.divf %488, %489 : vector<16x1xf32>
    %cst_222 = arith.constant 9.99999974E-6 : f32
    %491 = vector.broadcast %cst_222 : f32 to vector<16x1xf32>
    %492 = arith.addf %490, %491 : vector<16x1xf32>
    %493 = math.rsqrt %492 : vector<16x1xf32>
    %494 = vector.broadcast %493 : vector<16x1xf32> to vector<16x32xf32>
    %495 = arith.mulf %485, %494 : vector<16x32xf32>
    %496 = vector.broadcast %477 : vector<1x32xf32> to vector<16x32xf32>
    %497 = arith.mulf %495, %496 : vector<16x32xf32>
    %498 = vector.broadcast %479 : vector<1x32xf32> to vector<16x32xf32>
    %499 = arith.addf %497, %498 : vector<16x32xf32>
    %500 = arith.addf %499, %14 : vector<16x32xf32>
    %501 = arith.addf %364, %13 : vector<32x32xf32>
    %c0_223 = arith.constant 0 : index
    %c0_224 = arith.constant 0 : index
    %c0_225 = arith.constant 0 : index
    %502 = vector.load %arg29[%c0_223, %c0_224, %c0_225] : memref<2x32x32xf32, #tpu.memory_space<vmem>>, vector<1x32x32xf32>
    %503 = vector.shape_cast %502 : vector<1x32x32xf32> to vector<32x32xf32>
    %c0_226 = arith.constant 0 : index
    %c0_227 = arith.constant 0 : index
    %c0_228 = arith.constant 0 : index
    %504 = vector.load %arg30[%c0_226, %c0_227, %c0_228] : memref<2x1x32xf32, #tpu.memory_space<vmem>>, vector<1x1x32xf32>
    %505 = vector.shape_cast %504 : vector<1x1x32xf32> to vector<1x32xf32>
    %c0_229 = arith.constant 0 : index
    %c0_230 = arith.constant 0 : index
    %c0_231 = arith.constant 0 : index
    %506 = vector.load %arg31[%c0_229, %c0_230, %c0_231] : memref<2x32x32xf32, #tpu.memory_space<vmem>>, vector<1x32x32xf32>
    %507 = vector.shape_cast %506 : vector<1x32x32xf32> to vector<32x32xf32>
    %c0_232 = arith.constant 0 : index
    %c0_233 = arith.constant 0 : index
    %c0_234 = arith.constant 0 : index
    %508 = vector.load %arg32[%c0_232, %c0_233, %c0_234] : memref<2x1x32xf32, #tpu.memory_space<vmem>>, vector<1x1x32xf32>
    %509 = vector.shape_cast %508 : vector<1x1x32xf32> to vector<1x32xf32>
    %c0_235 = arith.constant 0 : index
    %c0_236 = arith.constant 0 : index
    %c0_237 = arith.constant 0 : index
    %510 = vector.load %arg33[%c0_235, %c0_236, %c0_237] : memref<2x32x32xf32, #tpu.memory_space<vmem>>, vector<1x32x32xf32>
    %511 = vector.shape_cast %510 : vector<1x32x32xf32> to vector<32x32xf32>
    %c0_238 = arith.constant 0 : index
    %c0_239 = arith.constant 0 : index
    %c0_240 = arith.constant 0 : index
    %512 = vector.load %arg34[%c0_238, %c0_239, %c0_240] : memref<2x1x32xf32, #tpu.memory_space<vmem>>, vector<1x1x32xf32>
    %513 = vector.shape_cast %512 : vector<1x1x32xf32> to vector<1x32xf32>
    %c0_241 = arith.constant 0 : index
    %c0_242 = arith.constant 0 : index
    %c0_243 = arith.constant 0 : index
    %514 = vector.load %arg35[%c0_241, %c0_242, %c0_243] : memref<2x32x32xf32, #tpu.memory_space<vmem>>, vector<1x32x32xf32>
    %515 = vector.shape_cast %514 : vector<1x32x32xf32> to vector<32x32xf32>
    %c0_244 = arith.constant 0 : index
    %c0_245 = arith.constant 0 : index
    %c0_246 = arith.constant 0 : index
    %516 = vector.load %arg36[%c0_244, %c0_245, %c0_246] : memref<2x1x32xf32, #tpu.memory_space<vmem>>, vector<1x1x32xf32>
    %517 = vector.shape_cast %516 : vector<1x1x32xf32> to vector<1x32xf32>
    %cst_247 = arith.constant dense<0.000000e+00> : vector<16x32xf32>
    %518 = tpu.matmul %500, %503, %cst_247 {dimension_numbers = #tpu.dot_dimension_numbers<[1], [0], [0], [1], [0, 0, 1, 1], [], []>} : vector<16x32xf32>, vector<32x32xf32>, vector<16x32xf32> -> vector<16x32xf32>
    %519 = vector.broadcast %505 : vector<1x32xf32> to vector<16x32xf32>
    %520 = arith.addf %518, %519 : vector<16x32xf32>
    %cst_248 = arith.constant dense<0.000000e+00> : vector<32x32xf32>
    %521 = tpu.matmul %501, %507, %cst_248 {dimension_numbers = #tpu.dot_dimension_numbers<[1], [0], [0], [1], [0, 0, 1, 1], [], []>} : vector<32x32xf32>, vector<32x32xf32>, vector<32x32xf32> -> vector<32x32xf32>
    %522 = vector.broadcast %509 : vector<1x32xf32> to vector<32x32xf32>
    %523 = arith.addf %521, %522 : vector<32x32xf32>
    %cst_249 = arith.constant dense<0.000000e+00> : vector<32x32xf32>
    %524 = tpu.matmul %364, %511, %cst_249 {dimension_numbers = #tpu.dot_dimension_numbers<[1], [0], [0], [1], [0, 0, 1, 1], [], []>} : vector<32x32xf32>, vector<32x32xf32>, vector<32x32xf32> -> vector<32x32xf32>
    %525 = vector.broadcast %513 : vector<1x32xf32> to vector<32x32xf32>
    %526 = arith.addf %524, %525 : vector<32x32xf32>
    %527 = vector.extract_strided_slice %520 {offsets = [0, 0], sizes = [16, 8], strides = [1, 1]} : vector<16x32xf32> to vector<16x8xf32>
    %528 = vector.shape_cast %527 : vector<16x8xf32> to vector<2x8x8xf32>
    %529 = vector.extract_strided_slice %523 {offsets = [0, 0], sizes = [32, 8], strides = [1, 1]} : vector<32x32xf32> to vector<32x8xf32>
    %530 = vector.shape_cast %529 : vector<32x8xf32> to vector<2x16x8xf32>
    %531 = vector.extract_strided_slice %526 {offsets = [0, 0], sizes = [32, 8], strides = [1, 1]} : vector<32x32xf32> to vector<32x8xf32>
    %532 = vector.shape_cast %531 : vector<32x8xf32> to vector<2x16x8xf32>
    "tpu.trace_start"() <{level = 10 : i32, message = "bqd,bkd->bqk"}> : () -> ()
    %cst_250 = arith.constant dense<0.000000e+00> : vector<2x8x16xf32>
    %533 = tpu.matmul %528, %530, %cst_250 {dimension_numbers = #tpu.dot_dimension_numbers<[2], [2], [1], [1], [0, 0, 0, 1, 1, 1], [0], [0]>} : vector<2x8x8xf32>, vector<2x16x8xf32>, vector<2x8x16xf32> -> vector<2x8x16xf32>
    "tpu.trace_stop"() : () -> ()
    %cst_251 = arith.constant 0.353553385 : f32
    %534 = vector.broadcast %cst_251 : f32 to vector<2x8x16xf32>
    %535 = arith.mulf %533, %534 : vector<2x8x16xf32>
    %cst_252 = arith.constant dense<0xFF800000> : vector<2x8xf32>
    %536 = vector.multi_reduction <maximumf>, %535, %cst_252 [2] : vector<2x8x16xf32> to vector<2x8xf32>
    %537 = vector.shape_cast %536 : vector<2x8xf32> to vector<2x8x1xf32>
    %538 = vector.broadcast %537 : vector<2x8x1xf32> to vector<2x8x16xf32>
    %539 = arith.subf %535, %538 : vector<2x8x16xf32>
    %540 = math.exp %539 : vector<2x8x16xf32>
    %cst_253 = arith.constant dense<0.000000e+00> : vector<2x8xf32>
    %541 = vector.multi_reduction <add>, %540, %cst_253 [2] : vector<2x8x16xf32> to vector<2x8xf32>
    %542 = vector.shape_cast %541 : vector<2x8xf32> to vector<2x8x1xf32>
    "tpu.trace_start"() <{level = 10 : i32, message = "bqk,bkd->bqd"}> : () -> ()
    %cst_254 = arith.constant dense<0.000000e+00> : vector<2x8x8xf32>
    %543 = tpu.matmul %540, %532, %cst_254 {dimension_numbers = #tpu.dot_dimension_numbers<[2], [1], [1], [2], [0, 0, 0, 1, 1, 2], [0], [0]>} : vector<2x8x16xf32>, vector<2x16x8xf32>, vector<2x8x8xf32> -> vector<2x8x8xf32>
    "tpu.trace_stop"() : () -> ()
    %544 = tpu.reciprocal %542 {approx = true} : vector<2x8x1xf32> -> vector<2x8x1xf32>
    %545 = vector.broadcast %544 : vector<2x8x1xf32> to vector<2x8x8xf32>
    %546 = arith.mulf %543, %545 : vector<2x8x8xf32>
    %547 = vector.shape_cast %546 : vector<2x8x8xf32> to vector<16x8xf32>
    %548 = vector.extract_strided_slice %520 {offsets = [0, 8], sizes = [16, 8], strides = [1, 1]} : vector<16x32xf32> to vector<16x8xf32>
    %549 = vector.shape_cast %548 : vector<16x8xf32> to vector<2x8x8xf32>
    %550 = vector.extract_strided_slice %523 {offsets = [0, 8], sizes = [32, 8], strides = [1, 1]} : vector<32x32xf32> to vector<32x8xf32>
    %551 = vector.shape_cast %550 : vector<32x8xf32> to vector<2x16x8xf32>
    %552 = vector.extract_strided_slice %526 {offsets = [0, 8], sizes = [32, 8], strides = [1, 1]} : vector<32x32xf32> to vector<32x8xf32>
    %553 = vector.shape_cast %552 : vector<32x8xf32> to vector<2x16x8xf32>
    "tpu.trace_start"() <{level = 10 : i32, message = "bqd,bkd->bqk"}> : () -> ()
    %cst_255 = arith.constant dense<0.000000e+00> : vector<2x8x16xf32>
    %554 = tpu.matmul %549, %551, %cst_255 {dimension_numbers = #tpu.dot_dimension_numbers<[2], [2], [1], [1], [0, 0, 0, 1, 1, 1], [0], [0]>} : vector<2x8x8xf32>, vector<2x16x8xf32>, vector<2x8x16xf32> -> vector<2x8x16xf32>
    "tpu.trace_stop"() : () -> ()
    %cst_256 = arith.constant 0.353553385 : f32
    %555 = vector.broadcast %cst_256 : f32 to vector<2x8x16xf32>
    %556 = arith.mulf %554, %555 : vector<2x8x16xf32>
    %cst_257 = arith.constant dense<0xFF800000> : vector<2x8xf32>
    %557 = vector.multi_reduction <maximumf>, %556, %cst_257 [2] : vector<2x8x16xf32> to vector<2x8xf32>
    %558 = vector.shape_cast %557 : vector<2x8xf32> to vector<2x8x1xf32>
    %559 = vector.broadcast %558 : vector<2x8x1xf32> to vector<2x8x16xf32>
    %560 = arith.subf %556, %559 : vector<2x8x16xf32>
    %561 = math.exp %560 : vector<2x8x16xf32>
    %cst_258 = arith.constant dense<0.000000e+00> : vector<2x8xf32>
    %562 = vector.multi_reduction <add>, %561, %cst_258 [2] : vector<2x8x16xf32> to vector<2x8xf32>
    %563 = vector.shape_cast %562 : vector<2x8xf32> to vector<2x8x1xf32>
    "tpu.trace_start"() <{level = 10 : i32, message = "bqk,bkd->bqd"}> : () -> ()
    %cst_259 = arith.constant dense<0.000000e+00> : vector<2x8x8xf32>
    %564 = tpu.matmul %561, %553, %cst_259 {dimension_numbers = #tpu.dot_dimension_numbers<[2], [1], [1], [2], [0, 0, 0, 1, 1, 2], [0], [0]>} : vector<2x8x16xf32>, vector<2x16x8xf32>, vector<2x8x8xf32> -> vector<2x8x8xf32>
    "tpu.trace_stop"() : () -> ()
    %565 = tpu.reciprocal %563 {approx = true} : vector<2x8x1xf32> -> vector<2x8x1xf32>
    %566 = vector.broadcast %565 : vector<2x8x1xf32> to vector<2x8x8xf32>
    %567 = arith.mulf %564, %566 : vector<2x8x8xf32>
    %568 = vector.shape_cast %567 : vector<2x8x8xf32> to vector<16x8xf32>
    %569 = vector.extract_strided_slice %520 {offsets = [0, 16], sizes = [16, 8], strides = [1, 1]} : vector<16x32xf32> to vector<16x8xf32>
    %570 = vector.shape_cast %569 : vector<16x8xf32> to vector<2x8x8xf32>
    %571 = vector.extract_strided_slice %523 {offsets = [0, 16], sizes = [32, 8], strides = [1, 1]} : vector<32x32xf32> to vector<32x8xf32>
    %572 = vector.shape_cast %571 : vector<32x8xf32> to vector<2x16x8xf32>
    %573 = vector.extract_strided_slice %526 {offsets = [0, 16], sizes = [32, 8], strides = [1, 1]} : vector<32x32xf32> to vector<32x8xf32>
    %574 = vector.shape_cast %573 : vector<32x8xf32> to vector<2x16x8xf32>
    "tpu.trace_start"() <{level = 10 : i32, message = "bqd,bkd->bqk"}> : () -> ()
    %cst_260 = arith.constant dense<0.000000e+00> : vector<2x8x16xf32>
    %575 = tpu.matmul %570, %572, %cst_260 {dimension_numbers = #tpu.dot_dimension_numbers<[2], [2], [1], [1], [0, 0, 0, 1, 1, 1], [0], [0]>} : vector<2x8x8xf32>, vector<2x16x8xf32>, vector<2x8x16xf32> -> vector<2x8x16xf32>
    "tpu.trace_stop"() : () -> ()
    %cst_261 = arith.constant 0.353553385 : f32
    %576 = vector.broadcast %cst_261 : f32 to vector<2x8x16xf32>
    %577 = arith.mulf %575, %576 : vector<2x8x16xf32>
    %cst_262 = arith.constant dense<0xFF800000> : vector<2x8xf32>
    %578 = vector.multi_reduction <maximumf>, %577, %cst_262 [2] : vector<2x8x16xf32> to vector<2x8xf32>
    %579 = vector.shape_cast %578 : vector<2x8xf32> to vector<2x8x1xf32>
    %580 = vector.broadcast %579 : vector<2x8x1xf32> to vector<2x8x16xf32>
    %581 = arith.subf %577, %580 : vector<2x8x16xf32>
    %582 = math.exp %581 : vector<2x8x16xf32>
    %cst_263 = arith.constant dense<0.000000e+00> : vector<2x8xf32>
    %583 = vector.multi_reduction <add>, %582, %cst_263 [2] : vector<2x8x16xf32> to vector<2x8xf32>
    %584 = vector.shape_cast %583 : vector<2x8xf32> to vector<2x8x1xf32>
    "tpu.trace_start"() <{level = 10 : i32, message = "bqk,bkd->bqd"}> : () -> ()
    %cst_264 = arith.constant dense<0.000000e+00> : vector<2x8x8xf32>
    %585 = tpu.matmul %582, %574, %cst_264 {dimension_numbers = #tpu.dot_dimension_numbers<[2], [1], [1], [2], [0, 0, 0, 1, 1, 2], [0], [0]>} : vector<2x8x16xf32>, vector<2x16x8xf32>, vector<2x8x8xf32> -> vector<2x8x8xf32>
    "tpu.trace_stop"() : () -> ()
    %586 = tpu.reciprocal %584 {approx = true} : vector<2x8x1xf32> -> vector<2x8x1xf32>
    %587 = vector.broadcast %586 : vector<2x8x1xf32> to vector<2x8x8xf32>
    %588 = arith.mulf %585, %587 : vector<2x8x8xf32>
    %589 = vector.shape_cast %588 : vector<2x8x8xf32> to vector<16x8xf32>
    %590 = vector.extract_strided_slice %520 {offsets = [0, 24], sizes = [16, 8], strides = [1, 1]} : vector<16x32xf32> to vector<16x8xf32>
    %591 = vector.shape_cast %590 : vector<16x8xf32> to vector<2x8x8xf32>
    %592 = vector.extract_strided_slice %523 {offsets = [0, 24], sizes = [32, 8], strides = [1, 1]} : vector<32x32xf32> to vector<32x8xf32>
    %593 = vector.shape_cast %592 : vector<32x8xf32> to vector<2x16x8xf32>
    %594 = vector.extract_strided_slice %526 {offsets = [0, 24], sizes = [32, 8], strides = [1, 1]} : vector<32x32xf32> to vector<32x8xf32>
    %595 = vector.shape_cast %594 : vector<32x8xf32> to vector<2x16x8xf32>
    "tpu.trace_start"() <{level = 10 : i32, message = "bqd,bkd->bqk"}> : () -> ()
    %cst_265 = arith.constant dense<0.000000e+00> : vector<2x8x16xf32>
    %596 = tpu.matmul %591, %593, %cst_265 {dimension_numbers = #tpu.dot_dimension_numbers<[2], [2], [1], [1], [0, 0, 0, 1, 1, 1], [0], [0]>} : vector<2x8x8xf32>, vector<2x16x8xf32>, vector<2x8x16xf32> -> vector<2x8x16xf32>
    "tpu.trace_stop"() : () -> ()
    %cst_266 = arith.constant 0.353553385 : f32
    %597 = vector.broadcast %cst_266 : f32 to vector<2x8x16xf32>
    %598 = arith.mulf %596, %597 : vector<2x8x16xf32>
    %cst_267 = arith.constant dense<0xFF800000> : vector<2x8xf32>
    %599 = vector.multi_reduction <maximumf>, %598, %cst_267 [2] : vector<2x8x16xf32> to vector<2x8xf32>
    %600 = vector.shape_cast %599 : vector<2x8xf32> to vector<2x8x1xf32>
    %601 = vector.broadcast %600 : vector<2x8x1xf32> to vector<2x8x16xf32>
    %602 = arith.subf %598, %601 : vector<2x8x16xf32>
    %603 = math.exp %602 : vector<2x8x16xf32>
    %cst_268 = arith.constant dense<0.000000e+00> : vector<2x8xf32>
    %604 = vector.multi_reduction <add>, %603, %cst_268 [2] : vector<2x8x16xf32> to vector<2x8xf32>
    %605 = vector.shape_cast %604 : vector<2x8xf32> to vector<2x8x1xf32>
    "tpu.trace_start"() <{level = 10 : i32, message = "bqk,bkd->bqd"}> : () -> ()
    %cst_269 = arith.constant dense<0.000000e+00> : vector<2x8x8xf32>
    %606 = tpu.matmul %603, %595, %cst_269 {dimension_numbers = #tpu.dot_dimension_numbers<[2], [1], [1], [2], [0, 0, 0, 1, 1, 2], [0], [0]>} : vector<2x8x16xf32>, vector<2x16x8xf32>, vector<2x8x8xf32> -> vector<2x8x8xf32>
    "tpu.trace_stop"() : () -> ()
    %607 = tpu.reciprocal %605 {approx = true} : vector<2x8x1xf32> -> vector<2x8x1xf32>
    %608 = vector.broadcast %607 : vector<2x8x1xf32> to vector<2x8x8xf32>
    %609 = arith.mulf %606, %608 : vector<2x8x8xf32>
    %610 = vector.shape_cast %609 : vector<2x8x8xf32> to vector<16x8xf32>
    %611 = tpu.concatenate %547, %568, %589, %610 in 1 : vector<16x8xf32>, vector<16x8xf32>, vector<16x8xf32>, vector<16x8xf32> -> vector<16x32xf32>
    %cst_270 = arith.constant dense<0.000000e+00> : vector<16x32xf32>
    %612 = tpu.matmul %611, %515, %cst_270 {dimension_numbers = #tpu.dot_dimension_numbers<[1], [0], [0], [1], [0, 0, 1, 1], [], []>} : vector<16x32xf32>, vector<32x32xf32>, vector<16x32xf32> -> vector<16x32xf32>
    %613 = vector.broadcast %517 : vector<1x32xf32> to vector<16x32xf32>
    %614 = arith.addf %612, %613 : vector<16x32xf32>
    %615 = arith.addf %499, %614 : vector<16x32xf32>
    %c0_271 = arith.constant 0 : index
    %c0_272 = arith.constant 0 : index
    %c0_273 = arith.constant 0 : index
    %616 = vector.load %arg37[%c0_271, %c0_272, %c0_273] : memref<2x1x32xf32, #tpu.memory_space<vmem>>, vector<1x1x32xf32>
    %617 = vector.shape_cast %616 : vector<1x1x32xf32> to vector<1x32xf32>
    %c0_274 = arith.constant 0 : index
    %c0_275 = arith.constant 0 : index
    %c0_276 = arith.constant 0 : index
    %618 = vector.load %arg38[%c0_274, %c0_275, %c0_276] : memref<2x1x32xf32, #tpu.memory_space<vmem>>, vector<1x1x32xf32>
    %619 = vector.shape_cast %618 : vector<1x1x32xf32> to vector<1x32xf32>
    %cst_277 = arith.constant dense<0.000000e+00> : vector<16xf32>
    %620 = vector.multi_reduction <add>, %615, %cst_277 [1] : vector<16x32xf32> to vector<16xf32>
    %621 = vector.shape_cast %620 : vector<16xf32> to vector<16x1xf32>
    %cst_278 = arith.constant 3.200000e+01 : f32
    %622 = vector.broadcast %cst_278 : f32 to vector<16x1xf32>
    %623 = arith.divf %621, %622 : vector<16x1xf32>
    %624 = vector.broadcast %623 : vector<16x1xf32> to vector<16x32xf32>
    %625 = arith.subf %615, %624 : vector<16x32xf32>
    %626 = arith.mulf %625, %625 : vector<16x32xf32>
    %cst_279 = arith.constant dense<0.000000e+00> : vector<16xf32>
    %627 = vector.multi_reduction <add>, %626, %cst_279 [1] : vector<16x32xf32> to vector<16xf32>
    %628 = vector.shape_cast %627 : vector<16xf32> to vector<16x1xf32>
    %cst_280 = arith.constant 3.200000e+01 : f32
    %629 = vector.broadcast %cst_280 : f32 to vector<16x1xf32>
    %630 = arith.divf %628, %629 : vector<16x1xf32>
    %cst_281 = arith.constant 9.99999974E-6 : f32
    %631 = vector.broadcast %cst_281 : f32 to vector<16x1xf32>
    %632 = arith.addf %630, %631 : vector<16x1xf32>
    %633 = math.rsqrt %632 : vector<16x1xf32>
    %634 = vector.broadcast %633 : vector<16x1xf32> to vector<16x32xf32>
    %635 = arith.mulf %625, %634 : vector<16x32xf32>
    %636 = vector.broadcast %617 : vector<1x32xf32> to vector<16x32xf32>
    %637 = arith.mulf %635, %636 : vector<16x32xf32>
    %638 = vector.broadcast %619 : vector<1x32xf32> to vector<16x32xf32>
    %639 = arith.addf %637, %638 : vector<16x32xf32>
    %c0_282 = arith.constant 0 : index
    %c0_283 = arith.constant 0 : index
    %c0_284 = arith.constant 0 : index
    %640 = vector.load %arg39[%c0_282, %c0_283, %c0_284] : memref<2x32x64xf32, #tpu.memory_space<vmem>>, vector<1x32x64xf32>
    %641 = vector.shape_cast %640 : vector<1x32x64xf32> to vector<32x64xf32>
    %cst_285 = arith.constant dense<0.000000e+00> : vector<16x64xf32>
    %642 = tpu.matmul %639, %641, %cst_285 {dimension_numbers = #tpu.dot_dimension_numbers<[1], [0], [0], [1], [0, 0, 1, 1], [], []>} : vector<16x32xf32>, vector<32x64xf32>, vector<16x64xf32> -> vector<16x64xf32>
    %c0_286 = arith.constant 0 : index
    %c0_287 = arith.constant 0 : index
    %c0_288 = arith.constant 0 : index
    %643 = vector.load %arg40[%c0_286, %c0_287, %c0_288] : memref<2x1x64xf32, #tpu.memory_space<vmem>>, vector<1x1x64xf32>
    %644 = vector.shape_cast %643 : vector<1x1x64xf32> to vector<1x64xf32>
    %645 = vector.broadcast %644 : vector<1x64xf32> to vector<16x64xf32>
    %646 = arith.addf %642, %645 : vector<16x64xf32>
    %cst_289 = arith.constant 0.000000e+00 : f32
    %647 = vector.broadcast %cst_289 : f32 to vector<16x64xf32>
    %648 = arith.maximumf %646, %647 : vector<16x64xf32>
    %c0_290 = arith.constant 0 : index
    %c0_291 = arith.constant 0 : index
    %c0_292 = arith.constant 0 : index
    %649 = vector.load %arg41[%c0_290, %c0_291, %c0_292] : memref<2x64x32xf32, #tpu.memory_space<vmem>>, vector<1x64x32xf32>
    %650 = vector.shape_cast %649 : vector<1x64x32xf32> to vector<64x32xf32>
    %cst_293 = arith.constant dense<0.000000e+00> : vector<16x32xf32>
    %651 = tpu.matmul %648, %650, %cst_293 {dimension_numbers = #tpu.dot_dimension_numbers<[1], [0], [0], [1], [0, 0, 1, 1], [], []>} : vector<16x64xf32>, vector<64x32xf32>, vector<16x32xf32> -> vector<16x32xf32>
    %c0_294 = arith.constant 0 : index
    %c0_295 = arith.constant 0 : index
    %c0_296 = arith.constant 0 : index
    %652 = vector.load %arg42[%c0_294, %c0_295, %c0_296] : memref<2x1x32xf32, #tpu.memory_space<vmem>>, vector<1x1x32xf32>
    %653 = vector.shape_cast %652 : vector<1x1x32xf32> to vector<1x32xf32>
    %654 = vector.broadcast %653 : vector<1x32xf32> to vector<16x32xf32>
    %655 = arith.addf %651, %654 : vector<16x32xf32>
    %656 = arith.addf %639, %655 : vector<16x32xf32>
    %c0_297 = arith.constant 0 : index
    %c0_298 = arith.constant 0 : index
    %c0_299 = arith.constant 0 : index
    %657 = vector.load %arg43[%c0_297, %c0_298, %c0_299] : memref<2x1x32xf32, #tpu.memory_space<vmem>>, vector<1x1x32xf32>
    %658 = vector.shape_cast %657 : vector<1x1x32xf32> to vector<1x32xf32>
    %c0_300 = arith.constant 0 : index
    %c0_301 = arith.constant 0 : index
    %c0_302 = arith.constant 0 : index
    %659 = vector.load %arg44[%c0_300, %c0_301, %c0_302] : memref<2x1x32xf32, #tpu.memory_space<vmem>>, vector<1x1x32xf32>
    %660 = vector.shape_cast %659 : vector<1x1x32xf32> to vector<1x32xf32>
    %cst_303 = arith.constant dense<0.000000e+00> : vector<16xf32>
    %661 = vector.multi_reduction <add>, %656, %cst_303 [1] : vector<16x32xf32> to vector<16xf32>
    %662 = vector.shape_cast %661 : vector<16xf32> to vector<16x1xf32>
    %cst_304 = arith.constant 3.200000e+01 : f32
    %663 = vector.broadcast %cst_304 : f32 to vector<16x1xf32>
    %664 = arith.divf %662, %663 : vector<16x1xf32>
    %665 = vector.broadcast %664 : vector<16x1xf32> to vector<16x32xf32>
    %666 = arith.subf %656, %665 : vector<16x32xf32>
    %667 = arith.mulf %666, %666 : vector<16x32xf32>
    %cst_305 = arith.constant dense<0.000000e+00> : vector<16xf32>
    %668 = vector.multi_reduction <add>, %667, %cst_305 [1] : vector<16x32xf32> to vector<16xf32>
    %669 = vector.shape_cast %668 : vector<16xf32> to vector<16x1xf32>
    %cst_306 = arith.constant 3.200000e+01 : f32
    %670 = vector.broadcast %cst_306 : f32 to vector<16x1xf32>
    %671 = arith.divf %669, %670 : vector<16x1xf32>
    %cst_307 = arith.constant 9.99999974E-6 : f32
    %672 = vector.broadcast %cst_307 : f32 to vector<16x1xf32>
    %673 = arith.addf %671, %672 : vector<16x1xf32>
    %674 = math.rsqrt %673 : vector<16x1xf32>
    %675 = vector.broadcast %674 : vector<16x1xf32> to vector<16x32xf32>
    %676 = arith.mulf %666, %675 : vector<16x32xf32>
    %677 = vector.broadcast %658 : vector<1x32xf32> to vector<16x32xf32>
    %678 = arith.mulf %676, %677 : vector<16x32xf32>
    %679 = vector.broadcast %660 : vector<1x32xf32> to vector<16x32xf32>
    %680 = arith.addf %678, %679 : vector<16x32xf32>
    %c0_308 = arith.constant 0 : index
    %c0_309 = arith.constant 0 : index
    %681 = vector.load %arg45[%c0_308, %c0_309] : memref<1x32xf32, #tpu.memory_space<vmem>>, vector<1x32xf32>
    %c0_310 = arith.constant 0 : index
    %c0_311 = arith.constant 0 : index
    %682 = vector.load %arg46[%c0_310, %c0_311] : memref<1x32xf32, #tpu.memory_space<vmem>>, vector<1x32xf32>
    %cst_312 = arith.constant dense<0.000000e+00> : vector<16xf32>
    %683 = vector.multi_reduction <add>, %680, %cst_312 [1] : vector<16x32xf32> to vector<16xf32>
    %684 = vector.shape_cast %683 : vector<16xf32> to vector<16x1xf32>
    %cst_313 = arith.constant 3.200000e+01 : f32
    %685 = vector.broadcast %cst_313 : f32 to vector<16x1xf32>
    %686 = arith.divf %684, %685 : vector<16x1xf32>
    %687 = vector.broadcast %686 : vector<16x1xf32> to vector<16x32xf32>
    %688 = arith.subf %680, %687 : vector<16x32xf32>
    %689 = arith.mulf %688, %688 : vector<16x32xf32>
    %cst_314 = arith.constant dense<0.000000e+00> : vector<16xf32>
    %690 = vector.multi_reduction <add>, %689, %cst_314 [1] : vector<16x32xf32> to vector<16xf32>
    %691 = vector.shape_cast %690 : vector<16xf32> to vector<16x1xf32>
    %cst_315 = arith.constant 3.200000e+01 : f32
    %692 = vector.broadcast %cst_315 : f32 to vector<16x1xf32>
    %693 = arith.divf %691, %692 : vector<16x1xf32>
    %cst_316 = arith.constant 9.99999974E-6 : f32
    %694 = vector.broadcast %cst_316 : f32 to vector<16x1xf32>
    %695 = arith.addf %693, %694 : vector<16x1xf32>
    %696 = math.rsqrt %695 : vector<16x1xf32>
    %697 = vector.broadcast %696 : vector<16x1xf32> to vector<16x32xf32>
    %698 = arith.mulf %688, %697 : vector<16x32xf32>
    %699 = vector.broadcast %681 : vector<1x32xf32> to vector<16x32xf32>
    %700 = arith.mulf %698, %699 : vector<16x32xf32>
    %701 = vector.broadcast %682 : vector<1x32xf32> to vector<16x32xf32>
    %702 = arith.addf %700, %701 : vector<16x32xf32>
    %c1_317 = arith.constant 1 : index
    %c0_318 = arith.constant 0 : index
    %c0_319 = arith.constant 0 : index
    %703 = vector.load %arg21[%c1_317, %c0_318, %c0_319] : memref<2x32x64xf32, #tpu.memory_space<vmem>>, vector<1x32x64xf32>
    %704 = vector.shape_cast %703 : vector<1x32x64xf32> to vector<32x64xf32>
    %c1_320 = arith.constant 1 : index
    %c0_321 = arith.constant 0 : index
    %c0_322 = arith.constant 0 : index
    %705 = vector.load %arg22[%c1_320, %c0_321, %c0_322] : memref<2x1x64xf32, #tpu.memory_space<vmem>>, vector<1x1x64xf32>
    %706 = vector.shape_cast %705 : vector<1x1x64xf32> to vector<1x64xf32>
    %c1_323 = arith.constant 1 : index
    %c0_324 = arith.constant 0 : index
    %c0_325 = arith.constant 0 : index
    %707 = vector.load %arg23[%c1_323, %c0_324, %c0_325] : memref<2x32x32xf32, #tpu.memory_space<vmem>>, vector<1x32x32xf32>
    %708 = vector.shape_cast %707 : vector<1x32x32xf32> to vector<32x32xf32>
    %c1_326 = arith.constant 1 : index
    %c0_327 = arith.constant 0 : index
    %c0_328 = arith.constant 0 : index
    %709 = vector.load %arg24[%c1_326, %c0_327, %c0_328] : memref<2x1x32xf32, #tpu.memory_space<vmem>>, vector<1x1x32xf32>
    %710 = vector.shape_cast %709 : vector<1x1x32xf32> to vector<1x32xf32>
    %c1_329 = arith.constant 1 : index
    %c0_330 = arith.constant 0 : index
    %c0_331 = arith.constant 0 : index
    %711 = vector.load %arg25[%c1_329, %c0_330, %c0_331] : memref<2x32x32xf32, #tpu.memory_space<vmem>>, vector<1x32x32xf32>
    %712 = vector.shape_cast %711 : vector<1x32x32xf32> to vector<32x32xf32>
    %c1_332 = arith.constant 1 : index
    %c0_333 = arith.constant 0 : index
    %c0_334 = arith.constant 0 : index
    %713 = vector.load %arg26[%c1_332, %c0_333, %c0_334] : memref<2x1x32xf32, #tpu.memory_space<vmem>>, vector<1x1x32xf32>
    %714 = vector.shape_cast %713 : vector<1x1x32xf32> to vector<1x32xf32>
    %715 = arith.addf %680, %14 : vector<16x32xf32>
    %cst_335 = arith.constant dense<0.000000e+00> : vector<16x64xf32>
    %716 = tpu.matmul %715, %704, %cst_335 {dimension_numbers = #tpu.dot_dimension_numbers<[1], [0], [0], [1], [0, 0, 1, 1], [], []>} : vector<16x32xf32>, vector<32x64xf32>, vector<16x64xf32> -> vector<16x64xf32>
    %717 = vector.broadcast %706 : vector<1x64xf32> to vector<16x64xf32>
    %718 = arith.addf %716, %717 : vector<16x64xf32>
    %cst_336 = arith.constant dense<0.000000e+00> : vector<16x32xf32>
    %719 = tpu.matmul %680, %708, %cst_336 {dimension_numbers = #tpu.dot_dimension_numbers<[1], [0], [0], [1], [0, 0, 1, 1], [], []>} : vector<16x32xf32>, vector<32x32xf32>, vector<16x32xf32> -> vector<16x32xf32>
    %720 = vector.broadcast %710 : vector<1x32xf32> to vector<16x32xf32>
    %721 = arith.addf %719, %720 : vector<16x32xf32>
    %722 = vector.extract_strided_slice %718 {offsets = [0, 0], sizes = [16, 32], strides = [1, 1]} : vector<16x64xf32> to vector<16x32xf32>
    %723 = vector.extract_strided_slice %718 {offsets = [0, 32], sizes = [16, 32], strides = [1, 1]} : vector<16x64xf32> to vector<16x32xf32>
    %724 = vector.extract_strided_slice %722 {offsets = [0, 0], sizes = [16, 8], strides = [1, 1]} : vector<16x32xf32> to vector<16x8xf32>
    %725 = vector.shape_cast %724 : vector<16x8xf32> to vector<2x8x8xf32>
    %726 = vector.extract_strided_slice %723 {offsets = [0, 0], sizes = [16, 8], strides = [1, 1]} : vector<16x32xf32> to vector<16x8xf32>
    %727 = vector.shape_cast %726 : vector<16x8xf32> to vector<2x8x8xf32>
    %728 = vector.extract_strided_slice %721 {offsets = [0, 0], sizes = [16, 8], strides = [1, 1]} : vector<16x32xf32> to vector<16x8xf32>
    %729 = vector.shape_cast %728 : vector<16x8xf32> to vector<2x8x8xf32>
    "tpu.trace_start"() <{level = 10 : i32, message = "bqd,bkd->bqk"}> : () -> ()
    %cst_337 = arith.constant dense<0.000000e+00> : vector<2x8x8xf32>
    %730 = tpu.matmul %725, %727, %cst_337 {dimension_numbers = #tpu.dot_dimension_numbers<[2], [2], [1], [1], [0, 0, 0, 1, 1, 1], [0], [0]>} : vector<2x8x8xf32>, vector<2x8x8xf32>, vector<2x8x8xf32> -> vector<2x8x8xf32>
    "tpu.trace_stop"() : () -> ()
    %cst_338 = arith.constant 0.353553385 : f32
    %731 = vector.broadcast %cst_338 : f32 to vector<2x8x8xf32>
    %732 = arith.mulf %730, %731 : vector<2x8x8xf32>
    %cst_339 = arith.constant dense<0xFF800000> : vector<2x8xf32>
    %733 = vector.multi_reduction <maximumf>, %732, %cst_339 [2] : vector<2x8x8xf32> to vector<2x8xf32>
    %734 = vector.shape_cast %733 : vector<2x8xf32> to vector<2x8x1xf32>
    %735 = vector.broadcast %734 : vector<2x8x1xf32> to vector<2x8x8xf32>
    %736 = arith.subf %732, %735 : vector<2x8x8xf32>
    %737 = math.exp %736 : vector<2x8x8xf32>
    %cst_340 = arith.constant dense<0.000000e+00> : vector<2x8xf32>
    %738 = vector.multi_reduction <add>, %737, %cst_340 [2] : vector<2x8x8xf32> to vector<2x8xf32>
    %739 = vector.shape_cast %738 : vector<2x8xf32> to vector<2x8x1xf32>
    "tpu.trace_start"() <{level = 10 : i32, message = "bqk,bkd->bqd"}> : () -> ()
    %cst_341 = arith.constant dense<0.000000e+00> : vector<2x8x8xf32>
    %740 = tpu.matmul %737, %729, %cst_341 {dimension_numbers = #tpu.dot_dimension_numbers<[2], [1], [1], [2], [0, 0, 0, 1, 1, 2], [0], [0]>} : vector<2x8x8xf32>, vector<2x8x8xf32>, vector<2x8x8xf32> -> vector<2x8x8xf32>
    "tpu.trace_stop"() : () -> ()
    %741 = tpu.reciprocal %739 {approx = true} : vector<2x8x1xf32> -> vector<2x8x1xf32>
    %742 = vector.broadcast %741 : vector<2x8x1xf32> to vector<2x8x8xf32>
    %743 = arith.mulf %740, %742 : vector<2x8x8xf32>
    %744 = vector.shape_cast %743 : vector<2x8x8xf32> to vector<16x8xf32>
    %745 = vector.extract_strided_slice %722 {offsets = [0, 8], sizes = [16, 8], strides = [1, 1]} : vector<16x32xf32> to vector<16x8xf32>
    %746 = vector.shape_cast %745 : vector<16x8xf32> to vector<2x8x8xf32>
    %747 = vector.extract_strided_slice %723 {offsets = [0, 8], sizes = [16, 8], strides = [1, 1]} : vector<16x32xf32> to vector<16x8xf32>
    %748 = vector.shape_cast %747 : vector<16x8xf32> to vector<2x8x8xf32>
    %749 = vector.extract_strided_slice %721 {offsets = [0, 8], sizes = [16, 8], strides = [1, 1]} : vector<16x32xf32> to vector<16x8xf32>
    %750 = vector.shape_cast %749 : vector<16x8xf32> to vector<2x8x8xf32>
    "tpu.trace_start"() <{level = 10 : i32, message = "bqd,bkd->bqk"}> : () -> ()
    %cst_342 = arith.constant dense<0.000000e+00> : vector<2x8x8xf32>
    %751 = tpu.matmul %746, %748, %cst_342 {dimension_numbers = #tpu.dot_dimension_numbers<[2], [2], [1], [1], [0, 0, 0, 1, 1, 1], [0], [0]>} : vector<2x8x8xf32>, vector<2x8x8xf32>, vector<2x8x8xf32> -> vector<2x8x8xf32>
    "tpu.trace_stop"() : () -> ()
    %cst_343 = arith.constant 0.353553385 : f32
    %752 = vector.broadcast %cst_343 : f32 to vector<2x8x8xf32>
    %753 = arith.mulf %751, %752 : vector<2x8x8xf32>
    %cst_344 = arith.constant dense<0xFF800000> : vector<2x8xf32>
    %754 = vector.multi_reduction <maximumf>, %753, %cst_344 [2] : vector<2x8x8xf32> to vector<2x8xf32>
    %755 = vector.shape_cast %754 : vector<2x8xf32> to vector<2x8x1xf32>
    %756 = vector.broadcast %755 : vector<2x8x1xf32> to vector<2x8x8xf32>
    %757 = arith.subf %753, %756 : vector<2x8x8xf32>
    %758 = math.exp %757 : vector<2x8x8xf32>
    %cst_345 = arith.constant dense<0.000000e+00> : vector<2x8xf32>
    %759 = vector.multi_reduction <add>, %758, %cst_345 [2] : vector<2x8x8xf32> to vector<2x8xf32>
    %760 = vector.shape_cast %759 : vector<2x8xf32> to vector<2x8x1xf32>
    "tpu.trace_start"() <{level = 10 : i32, message = "bqk,bkd->bqd"}> : () -> ()
    %cst_346 = arith.constant dense<0.000000e+00> : vector<2x8x8xf32>
    %761 = tpu.matmul %758, %750, %cst_346 {dimension_numbers = #tpu.dot_dimension_numbers<[2], [1], [1], [2], [0, 0, 0, 1, 1, 2], [0], [0]>} : vector<2x8x8xf32>, vector<2x8x8xf32>, vector<2x8x8xf32> -> vector<2x8x8xf32>
    "tpu.trace_stop"() : () -> ()
    %762 = tpu.reciprocal %760 {approx = true} : vector<2x8x1xf32> -> vector<2x8x1xf32>
    %763 = vector.broadcast %762 : vector<2x8x1xf32> to vector<2x8x8xf32>
    %764 = arith.mulf %761, %763 : vector<2x8x8xf32>
    %765 = vector.shape_cast %764 : vector<2x8x8xf32> to vector<16x8xf32>
    %766 = vector.extract_strided_slice %722 {offsets = [0, 16], sizes = [16, 8], strides = [1, 1]} : vector<16x32xf32> to vector<16x8xf32>
    %767 = vector.shape_cast %766 : vector<16x8xf32> to vector<2x8x8xf32>
    %768 = vector.extract_strided_slice %723 {offsets = [0, 16], sizes = [16, 8], strides = [1, 1]} : vector<16x32xf32> to vector<16x8xf32>
    %769 = vector.shape_cast %768 : vector<16x8xf32> to vector<2x8x8xf32>
    %770 = vector.extract_strided_slice %721 {offsets = [0, 16], sizes = [16, 8], strides = [1, 1]} : vector<16x32xf32> to vector<16x8xf32>
    %771 = vector.shape_cast %770 : vector<16x8xf32> to vector<2x8x8xf32>
    "tpu.trace_start"() <{level = 10 : i32, message = "bqd,bkd->bqk"}> : () -> ()
    %cst_347 = arith.constant dense<0.000000e+00> : vector<2x8x8xf32>
    %772 = tpu.matmul %767, %769, %cst_347 {dimension_numbers = #tpu.dot_dimension_numbers<[2], [2], [1], [1], [0, 0, 0, 1, 1, 1], [0], [0]>} : vector<2x8x8xf32>, vector<2x8x8xf32>, vector<2x8x8xf32> -> vector<2x8x8xf32>
    "tpu.trace_stop"() : () -> ()
    %cst_348 = arith.constant 0.353553385 : f32
    %773 = vector.broadcast %cst_348 : f32 to vector<2x8x8xf32>
    %774 = arith.mulf %772, %773 : vector<2x8x8xf32>
    %cst_349 = arith.constant dense<0xFF800000> : vector<2x8xf32>
    %775 = vector.multi_reduction <maximumf>, %774, %cst_349 [2] : vector<2x8x8xf32> to vector<2x8xf32>
    %776 = vector.shape_cast %775 : vector<2x8xf32> to vector<2x8x1xf32>
    %777 = vector.broadcast %776 : vector<2x8x1xf32> to vector<2x8x8xf32>
    %778 = arith.subf %774, %777 : vector<2x8x8xf32>
    %779 = math.exp %778 : vector<2x8x8xf32>
    %cst_350 = arith.constant dense<0.000000e+00> : vector<2x8xf32>
    %780 = vector.multi_reduction <add>, %779, %cst_350 [2] : vector<2x8x8xf32> to vector<2x8xf32>
    %781 = vector.shape_cast %780 : vector<2x8xf32> to vector<2x8x1xf32>
    "tpu.trace_start"() <{level = 10 : i32, message = "bqk,bkd->bqd"}> : () -> ()
    %cst_351 = arith.constant dense<0.000000e+00> : vector<2x8x8xf32>
    %782 = tpu.matmul %779, %771, %cst_351 {dimension_numbers = #tpu.dot_dimension_numbers<[2], [1], [1], [2], [0, 0, 0, 1, 1, 2], [0], [0]>} : vector<2x8x8xf32>, vector<2x8x8xf32>, vector<2x8x8xf32> -> vector<2x8x8xf32>
    "tpu.trace_stop"() : () -> ()
    %783 = tpu.reciprocal %781 {approx = true} : vector<2x8x1xf32> -> vector<2x8x1xf32>
    %784 = vector.broadcast %783 : vector<2x8x1xf32> to vector<2x8x8xf32>
    %785 = arith.mulf %782, %784 : vector<2x8x8xf32>
    %786 = vector.shape_cast %785 : vector<2x8x8xf32> to vector<16x8xf32>
    %787 = vector.extract_strided_slice %722 {offsets = [0, 24], sizes = [16, 8], strides = [1, 1]} : vector<16x32xf32> to vector<16x8xf32>
    %788 = vector.shape_cast %787 : vector<16x8xf32> to vector<2x8x8xf32>
    %789 = vector.extract_strided_slice %723 {offsets = [0, 24], sizes = [16, 8], strides = [1, 1]} : vector<16x32xf32> to vector<16x8xf32>
    %790 = vector.shape_cast %789 : vector<16x8xf32> to vector<2x8x8xf32>
    %791 = vector.extract_strided_slice %721 {offsets = [0, 24], sizes = [16, 8], strides = [1, 1]} : vector<16x32xf32> to vector<16x8xf32>
    %792 = vector.shape_cast %791 : vector<16x8xf32> to vector<2x8x8xf32>
    "tpu.trace_start"() <{level = 10 : i32, message = "bqd,bkd->bqk"}> : () -> ()
    %cst_352 = arith.constant dense<0.000000e+00> : vector<2x8x8xf32>
    %793 = tpu.matmul %788, %790, %cst_352 {dimension_numbers = #tpu.dot_dimension_numbers<[2], [2], [1], [1], [0, 0, 0, 1, 1, 1], [0], [0]>} : vector<2x8x8xf32>, vector<2x8x8xf32>, vector<2x8x8xf32> -> vector<2x8x8xf32>
    "tpu.trace_stop"() : () -> ()
    %cst_353 = arith.constant 0.353553385 : f32
    %794 = vector.broadcast %cst_353 : f32 to vector<2x8x8xf32>
    %795 = arith.mulf %793, %794 : vector<2x8x8xf32>
    %cst_354 = arith.constant dense<0xFF800000> : vector<2x8xf32>
    %796 = vector.multi_reduction <maximumf>, %795, %cst_354 [2] : vector<2x8x8xf32> to vector<2x8xf32>
    %797 = vector.shape_cast %796 : vector<2x8xf32> to vector<2x8x1xf32>
    %798 = vector.broadcast %797 : vector<2x8x1xf32> to vector<2x8x8xf32>
    %799 = arith.subf %795, %798 : vector<2x8x8xf32>
    %800 = math.exp %799 : vector<2x8x8xf32>
    %cst_355 = arith.constant dense<0.000000e+00> : vector<2x8xf32>
    %801 = vector.multi_reduction <add>, %800, %cst_355 [2] : vector<2x8x8xf32> to vector<2x8xf32>
    %802 = vector.shape_cast %801 : vector<2x8xf32> to vector<2x8x1xf32>
    "tpu.trace_start"() <{level = 10 : i32, message = "bqk,bkd->bqd"}> : () -> ()
    %cst_356 = arith.constant dense<0.000000e+00> : vector<2x8x8xf32>
    %803 = tpu.matmul %800, %792, %cst_356 {dimension_numbers = #tpu.dot_dimension_numbers<[2], [1], [1], [2], [0, 0, 0, 1, 1, 2], [0], [0]>} : vector<2x8x8xf32>, vector<2x8x8xf32>, vector<2x8x8xf32> -> vector<2x8x8xf32>
    "tpu.trace_stop"() : () -> ()
    %804 = tpu.reciprocal %802 {approx = true} : vector<2x8x1xf32> -> vector<2x8x1xf32>
    %805 = vector.broadcast %804 : vector<2x8x1xf32> to vector<2x8x8xf32>
    %806 = arith.mulf %803, %805 : vector<2x8x8xf32>
    %807 = vector.shape_cast %806 : vector<2x8x8xf32> to vector<16x8xf32>
    %808 = tpu.concatenate %744, %765, %786, %807 in 1 : vector<16x8xf32>, vector<16x8xf32>, vector<16x8xf32>, vector<16x8xf32> -> vector<16x32xf32>
    %cst_357 = arith.constant dense<0.000000e+00> : vector<16x32xf32>
    %809 = tpu.matmul %808, %712, %cst_357 {dimension_numbers = #tpu.dot_dimension_numbers<[1], [0], [0], [1], [0, 0, 1, 1], [], []>} : vector<16x32xf32>, vector<32x32xf32>, vector<16x32xf32> -> vector<16x32xf32>
    %810 = vector.broadcast %714 : vector<1x32xf32> to vector<16x32xf32>
    %811 = arith.addf %809, %810 : vector<16x32xf32>
    %812 = arith.addf %680, %811 : vector<16x32xf32>
    %c1_358 = arith.constant 1 : index
    %c0_359 = arith.constant 0 : index
    %c0_360 = arith.constant 0 : index
    %813 = vector.load %arg27[%c1_358, %c0_359, %c0_360] : memref<2x1x32xf32, #tpu.memory_space<vmem>>, vector<1x1x32xf32>
    %814 = vector.shape_cast %813 : vector<1x1x32xf32> to vector<1x32xf32>
    %c1_361 = arith.constant 1 : index
    %c0_362 = arith.constant 0 : index
    %c0_363 = arith.constant 0 : index
    %815 = vector.load %arg28[%c1_361, %c0_362, %c0_363] : memref<2x1x32xf32, #tpu.memory_space<vmem>>, vector<1x1x32xf32>
    %816 = vector.shape_cast %815 : vector<1x1x32xf32> to vector<1x32xf32>
    %cst_364 = arith.constant dense<0.000000e+00> : vector<16xf32>
    %817 = vector.multi_reduction <add>, %812, %cst_364 [1] : vector<16x32xf32> to vector<16xf32>
    %818 = vector.shape_cast %817 : vector<16xf32> to vector<16x1xf32>
    %cst_365 = arith.constant 3.200000e+01 : f32
    %819 = vector.broadcast %cst_365 : f32 to vector<16x1xf32>
    %820 = arith.divf %818, %819 : vector<16x1xf32>
    %821 = vector.broadcast %820 : vector<16x1xf32> to vector<16x32xf32>
    %822 = arith.subf %812, %821 : vector<16x32xf32>
    %823 = arith.mulf %822, %822 : vector<16x32xf32>
    %cst_366 = arith.constant dense<0.000000e+00> : vector<16xf32>
    %824 = vector.multi_reduction <add>, %823, %cst_366 [1] : vector<16x32xf32> to vector<16xf32>
    %825 = vector.shape_cast %824 : vector<16xf32> to vector<16x1xf32>
    %cst_367 = arith.constant 3.200000e+01 : f32
    %826 = vector.broadcast %cst_367 : f32 to vector<16x1xf32>
    %827 = arith.divf %825, %826 : vector<16x1xf32>
    %cst_368 = arith.constant 9.99999974E-6 : f32
    %828 = vector.broadcast %cst_368 : f32 to vector<16x1xf32>
    %829 = arith.addf %827, %828 : vector<16x1xf32>
    %830 = math.rsqrt %829 : vector<16x1xf32>
    %831 = vector.broadcast %830 : vector<16x1xf32> to vector<16x32xf32>
    %832 = arith.mulf %822, %831 : vector<16x32xf32>
    %833 = vector.broadcast %814 : vector<1x32xf32> to vector<16x32xf32>
    %834 = arith.mulf %832, %833 : vector<16x32xf32>
    %835 = vector.broadcast %816 : vector<1x32xf32> to vector<16x32xf32>
    %836 = arith.addf %834, %835 : vector<16x32xf32>
    %837 = arith.addf %836, %14 : vector<16x32xf32>
    %838 = arith.addf %364, %13 : vector<32x32xf32>
    %c1_369 = arith.constant 1 : index
    %c0_370 = arith.constant 0 : index
    %c0_371 = arith.constant 0 : index
    %839 = vector.load %arg29[%c1_369, %c0_370, %c0_371] : memref<2x32x32xf32, #tpu.memory_space<vmem>>, vector<1x32x32xf32>
    %840 = vector.shape_cast %839 : vector<1x32x32xf32> to vector<32x32xf32>
    %c1_372 = arith.constant 1 : index
    %c0_373 = arith.constant 0 : index
    %c0_374 = arith.constant 0 : index
    %841 = vector.load %arg30[%c1_372, %c0_373, %c0_374] : memref<2x1x32xf32, #tpu.memory_space<vmem>>, vector<1x1x32xf32>
    %842 = vector.shape_cast %841 : vector<1x1x32xf32> to vector<1x32xf32>
    %c1_375 = arith.constant 1 : index
    %c0_376 = arith.constant 0 : index
    %c0_377 = arith.constant 0 : index
    %843 = vector.load %arg31[%c1_375, %c0_376, %c0_377] : memref<2x32x32xf32, #tpu.memory_space<vmem>>, vector<1x32x32xf32>
    %844 = vector.shape_cast %843 : vector<1x32x32xf32> to vector<32x32xf32>
    %c1_378 = arith.constant 1 : index
    %c0_379 = arith.constant 0 : index
    %c0_380 = arith.constant 0 : index
    %845 = vector.load %arg32[%c1_378, %c0_379, %c0_380] : memref<2x1x32xf32, #tpu.memory_space<vmem>>, vector<1x1x32xf32>
    %846 = vector.shape_cast %845 : vector<1x1x32xf32> to vector<1x32xf32>
    %c1_381 = arith.constant 1 : index
    %c0_382 = arith.constant 0 : index
    %c0_383 = arith.constant 0 : index
    %847 = vector.load %arg33[%c1_381, %c0_382, %c0_383] : memref<2x32x32xf32, #tpu.memory_space<vmem>>, vector<1x32x32xf32>
    %848 = vector.shape_cast %847 : vector<1x32x32xf32> to vector<32x32xf32>
    %c1_384 = arith.constant 1 : index
    %c0_385 = arith.constant 0 : index
    %c0_386 = arith.constant 0 : index
    %849 = vector.load %arg34[%c1_384, %c0_385, %c0_386] : memref<2x1x32xf32, #tpu.memory_space<vmem>>, vector<1x1x32xf32>
    %850 = vector.shape_cast %849 : vector<1x1x32xf32> to vector<1x32xf32>
    %c1_387 = arith.constant 1 : index
    %c0_388 = arith.constant 0 : index
    %c0_389 = arith.constant 0 : index
    %851 = vector.load %arg35[%c1_387, %c0_388, %c0_389] : memref<2x32x32xf32, #tpu.memory_space<vmem>>, vector<1x32x32xf32>
    %852 = vector.shape_cast %851 : vector<1x32x32xf32> to vector<32x32xf32>
    %c1_390 = arith.constant 1 : index
    %c0_391 = arith.constant 0 : index
    %c0_392 = arith.constant 0 : index
    %853 = vector.load %arg36[%c1_390, %c0_391, %c0_392] : memref<2x1x32xf32, #tpu.memory_space<vmem>>, vector<1x1x32xf32>
    %854 = vector.shape_cast %853 : vector<1x1x32xf32> to vector<1x32xf32>
    %cst_393 = arith.constant dense<0.000000e+00> : vector<16x32xf32>
    %855 = tpu.matmul %837, %840, %cst_393 {dimension_numbers = #tpu.dot_dimension_numbers<[1], [0], [0], [1], [0, 0, 1, 1], [], []>} : vector<16x32xf32>, vector<32x32xf32>, vector<16x32xf32> -> vector<16x32xf32>
    %856 = vector.broadcast %842 : vector<1x32xf32> to vector<16x32xf32>
    %857 = arith.addf %855, %856 : vector<16x32xf32>
    %cst_394 = arith.constant dense<0.000000e+00> : vector<32x32xf32>
    %858 = tpu.matmul %838, %844, %cst_394 {dimension_numbers = #tpu.dot_dimension_numbers<[1], [0], [0], [1], [0, 0, 1, 1], [], []>} : vector<32x32xf32>, vector<32x32xf32>, vector<32x32xf32> -> vector<32x32xf32>
    %859 = vector.broadcast %846 : vector<1x32xf32> to vector<32x32xf32>
    %860 = arith.addf %858, %859 : vector<32x32xf32>
    %cst_395 = arith.constant dense<0.000000e+00> : vector<32x32xf32>
    %861 = tpu.matmul %364, %848, %cst_395 {dimension_numbers = #tpu.dot_dimension_numbers<[1], [0], [0], [1], [0, 0, 1, 1], [], []>} : vector<32x32xf32>, vector<32x32xf32>, vector<32x32xf32> -> vector<32x32xf32>
    %862 = vector.broadcast %850 : vector<1x32xf32> to vector<32x32xf32>
    %863 = arith.addf %861, %862 : vector<32x32xf32>
    %864 = vector.extract_strided_slice %857 {offsets = [0, 0], sizes = [16, 8], strides = [1, 1]} : vector<16x32xf32> to vector<16x8xf32>
    %865 = vector.shape_cast %864 : vector<16x8xf32> to vector<2x8x8xf32>
    %866 = vector.extract_strided_slice %860 {offsets = [0, 0], sizes = [32, 8], strides = [1, 1]} : vector<32x32xf32> to vector<32x8xf32>
    %867 = vector.shape_cast %866 : vector<32x8xf32> to vector<2x16x8xf32>
    %868 = vector.extract_strided_slice %863 {offsets = [0, 0], sizes = [32, 8], strides = [1, 1]} : vector<32x32xf32> to vector<32x8xf32>
    %869 = vector.shape_cast %868 : vector<32x8xf32> to vector<2x16x8xf32>
    "tpu.trace_start"() <{level = 10 : i32, message = "bqd,bkd->bqk"}> : () -> ()
    %cst_396 = arith.constant dense<0.000000e+00> : vector<2x8x16xf32>
    %870 = tpu.matmul %865, %867, %cst_396 {dimension_numbers = #tpu.dot_dimension_numbers<[2], [2], [1], [1], [0, 0, 0, 1, 1, 1], [0], [0]>} : vector<2x8x8xf32>, vector<2x16x8xf32>, vector<2x8x16xf32> -> vector<2x8x16xf32>
    "tpu.trace_stop"() : () -> ()
    %cst_397 = arith.constant 0.353553385 : f32
    %871 = vector.broadcast %cst_397 : f32 to vector<2x8x16xf32>
    %872 = arith.mulf %870, %871 : vector<2x8x16xf32>
    %cst_398 = arith.constant dense<0xFF800000> : vector<2x8xf32>
    %873 = vector.multi_reduction <maximumf>, %872, %cst_398 [2] : vector<2x8x16xf32> to vector<2x8xf32>
    %874 = vector.shape_cast %873 : vector<2x8xf32> to vector<2x8x1xf32>
    %875 = vector.broadcast %874 : vector<2x8x1xf32> to vector<2x8x16xf32>
    %876 = arith.subf %872, %875 : vector<2x8x16xf32>
    %877 = math.exp %876 : vector<2x8x16xf32>
    %cst_399 = arith.constant dense<0.000000e+00> : vector<2x8xf32>
    %878 = vector.multi_reduction <add>, %877, %cst_399 [2] : vector<2x8x16xf32> to vector<2x8xf32>
    %879 = vector.shape_cast %878 : vector<2x8xf32> to vector<2x8x1xf32>
    "tpu.trace_start"() <{level = 10 : i32, message = "bqk,bkd->bqd"}> : () -> ()
    %cst_400 = arith.constant dense<0.000000e+00> : vector<2x8x8xf32>
    %880 = tpu.matmul %877, %869, %cst_400 {dimension_numbers = #tpu.dot_dimension_numbers<[2], [1], [1], [2], [0, 0, 0, 1, 1, 2], [0], [0]>} : vector<2x8x16xf32>, vector<2x16x8xf32>, vector<2x8x8xf32> -> vector<2x8x8xf32>
    "tpu.trace_stop"() : () -> ()
    %881 = tpu.reciprocal %879 {approx = true} : vector<2x8x1xf32> -> vector<2x8x1xf32>
    %882 = vector.broadcast %881 : vector<2x8x1xf32> to vector<2x8x8xf32>
    %883 = arith.mulf %880, %882 : vector<2x8x8xf32>
    %884 = vector.shape_cast %883 : vector<2x8x8xf32> to vector<16x8xf32>
    %885 = vector.extract_strided_slice %857 {offsets = [0, 8], sizes = [16, 8], strides = [1, 1]} : vector<16x32xf32> to vector<16x8xf32>
    %886 = vector.shape_cast %885 : vector<16x8xf32> to vector<2x8x8xf32>
    %887 = vector.extract_strided_slice %860 {offsets = [0, 8], sizes = [32, 8], strides = [1, 1]} : vector<32x32xf32> to vector<32x8xf32>
    %888 = vector.shape_cast %887 : vector<32x8xf32> to vector<2x16x8xf32>
    %889 = vector.extract_strided_slice %863 {offsets = [0, 8], sizes = [32, 8], strides = [1, 1]} : vector<32x32xf32> to vector<32x8xf32>
    %890 = vector.shape_cast %889 : vector<32x8xf32> to vector<2x16x8xf32>
    "tpu.trace_start"() <{level = 10 : i32, message = "bqd,bkd->bqk"}> : () -> ()
    %cst_401 = arith.constant dense<0.000000e+00> : vector<2x8x16xf32>
    %891 = tpu.matmul %886, %888, %cst_401 {dimension_numbers = #tpu.dot_dimension_numbers<[2], [2], [1], [1], [0, 0, 0, 1, 1, 1], [0], [0]>} : vector<2x8x8xf32>, vector<2x16x8xf32>, vector<2x8x16xf32> -> vector<2x8x16xf32>
    "tpu.trace_stop"() : () -> ()
    %cst_402 = arith.constant 0.353553385 : f32
    %892 = vector.broadcast %cst_402 : f32 to vector<2x8x16xf32>
    %893 = arith.mulf %891, %892 : vector<2x8x16xf32>
    %cst_403 = arith.constant dense<0xFF800000> : vector<2x8xf32>
    %894 = vector.multi_reduction <maximumf>, %893, %cst_403 [2] : vector<2x8x16xf32> to vector<2x8xf32>
    %895 = vector.shape_cast %894 : vector<2x8xf32> to vector<2x8x1xf32>
    %896 = vector.broadcast %895 : vector<2x8x1xf32> to vector<2x8x16xf32>
    %897 = arith.subf %893, %896 : vector<2x8x16xf32>
    %898 = math.exp %897 : vector<2x8x16xf32>
    %cst_404 = arith.constant dense<0.000000e+00> : vector<2x8xf32>
    %899 = vector.multi_reduction <add>, %898, %cst_404 [2] : vector<2x8x16xf32> to vector<2x8xf32>
    %900 = vector.shape_cast %899 : vector<2x8xf32> to vector<2x8x1xf32>
    "tpu.trace_start"() <{level = 10 : i32, message = "bqk,bkd->bqd"}> : () -> ()
    %cst_405 = arith.constant dense<0.000000e+00> : vector<2x8x8xf32>
    %901 = tpu.matmul %898, %890, %cst_405 {dimension_numbers = #tpu.dot_dimension_numbers<[2], [1], [1], [2], [0, 0, 0, 1, 1, 2], [0], [0]>} : vector<2x8x16xf32>, vector<2x16x8xf32>, vector<2x8x8xf32> -> vector<2x8x8xf32>
    "tpu.trace_stop"() : () -> ()
    %902 = tpu.reciprocal %900 {approx = true} : vector<2x8x1xf32> -> vector<2x8x1xf32>
    %903 = vector.broadcast %902 : vector<2x8x1xf32> to vector<2x8x8xf32>
    %904 = arith.mulf %901, %903 : vector<2x8x8xf32>
    %905 = vector.shape_cast %904 : vector<2x8x8xf32> to vector<16x8xf32>
    %906 = vector.extract_strided_slice %857 {offsets = [0, 16], sizes = [16, 8], strides = [1, 1]} : vector<16x32xf32> to vector<16x8xf32>
    %907 = vector.shape_cast %906 : vector<16x8xf32> to vector<2x8x8xf32>
    %908 = vector.extract_strided_slice %860 {offsets = [0, 16], sizes = [32, 8], strides = [1, 1]} : vector<32x32xf32> to vector<32x8xf32>
    %909 = vector.shape_cast %908 : vector<32x8xf32> to vector<2x16x8xf32>
    %910 = vector.extract_strided_slice %863 {offsets = [0, 16], sizes = [32, 8], strides = [1, 1]} : vector<32x32xf32> to vector<32x8xf32>
    %911 = vector.shape_cast %910 : vector<32x8xf32> to vector<2x16x8xf32>
    "tpu.trace_start"() <{level = 10 : i32, message = "bqd,bkd->bqk"}> : () -> ()
    %cst_406 = arith.constant dense<0.000000e+00> : vector<2x8x16xf32>
    %912 = tpu.matmul %907, %909, %cst_406 {dimension_numbers = #tpu.dot_dimension_numbers<[2], [2], [1], [1], [0, 0, 0, 1, 1, 1], [0], [0]>} : vector<2x8x8xf32>, vector<2x16x8xf32>, vector<2x8x16xf32> -> vector<2x8x16xf32>
    "tpu.trace_stop"() : () -> ()
    %cst_407 = arith.constant 0.353553385 : f32
    %913 = vector.broadcast %cst_407 : f32 to vector<2x8x16xf32>
    %914 = arith.mulf %912, %913 : vector<2x8x16xf32>
    %cst_408 = arith.constant dense<0xFF800000> : vector<2x8xf32>
    %915 = vector.multi_reduction <maximumf>, %914, %cst_408 [2] : vector<2x8x16xf32> to vector<2x8xf32>
    %916 = vector.shape_cast %915 : vector<2x8xf32> to vector<2x8x1xf32>
    %917 = vector.broadcast %916 : vector<2x8x1xf32> to vector<2x8x16xf32>
    %918 = arith.subf %914, %917 : vector<2x8x16xf32>
    %919 = math.exp %918 : vector<2x8x16xf32>
    %cst_409 = arith.constant dense<0.000000e+00> : vector<2x8xf32>
    %920 = vector.multi_reduction <add>, %919, %cst_409 [2] : vector<2x8x16xf32> to vector<2x8xf32>
    %921 = vector.shape_cast %920 : vector<2x8xf32> to vector<2x8x1xf32>
    "tpu.trace_start"() <{level = 10 : i32, message = "bqk,bkd->bqd"}> : () -> ()
    %cst_410 = arith.constant dense<0.000000e+00> : vector<2x8x8xf32>
    %922 = tpu.matmul %919, %911, %cst_410 {dimension_numbers = #tpu.dot_dimension_numbers<[2], [1], [1], [2], [0, 0, 0, 1, 1, 2], [0], [0]>} : vector<2x8x16xf32>, vector<2x16x8xf32>, vector<2x8x8xf32> -> vector<2x8x8xf32>
    "tpu.trace_stop"() : () -> ()
    %923 = tpu.reciprocal %921 {approx = true} : vector<2x8x1xf32> -> vector<2x8x1xf32>
    %924 = vector.broadcast %923 : vector<2x8x1xf32> to vector<2x8x8xf32>
    %925 = arith.mulf %922, %924 : vector<2x8x8xf32>
    %926 = vector.shape_cast %925 : vector<2x8x8xf32> to vector<16x8xf32>
    %927 = vector.extract_strided_slice %857 {offsets = [0, 24], sizes = [16, 8], strides = [1, 1]} : vector<16x32xf32> to vector<16x8xf32>
    %928 = vector.shape_cast %927 : vector<16x8xf32> to vector<2x8x8xf32>
    %929 = vector.extract_strided_slice %860 {offsets = [0, 24], sizes = [32, 8], strides = [1, 1]} : vector<32x32xf32> to vector<32x8xf32>
    %930 = vector.shape_cast %929 : vector<32x8xf32> to vector<2x16x8xf32>
    %931 = vector.extract_strided_slice %863 {offsets = [0, 24], sizes = [32, 8], strides = [1, 1]} : vector<32x32xf32> to vector<32x8xf32>
    %932 = vector.shape_cast %931 : vector<32x8xf32> to vector<2x16x8xf32>
    "tpu.trace_start"() <{level = 10 : i32, message = "bqd,bkd->bqk"}> : () -> ()
    %cst_411 = arith.constant dense<0.000000e+00> : vector<2x8x16xf32>
    %933 = tpu.matmul %928, %930, %cst_411 {dimension_numbers = #tpu.dot_dimension_numbers<[2], [2], [1], [1], [0, 0, 0, 1, 1, 1], [0], [0]>} : vector<2x8x8xf32>, vector<2x16x8xf32>, vector<2x8x16xf32> -> vector<2x8x16xf32>
    "tpu.trace_stop"() : () -> ()
    %cst_412 = arith.constant 0.353553385 : f32
    %934 = vector.broadcast %cst_412 : f32 to vector<2x8x16xf32>
    %935 = arith.mulf %933, %934 : vector<2x8x16xf32>
    %cst_413 = arith.constant dense<0xFF800000> : vector<2x8xf32>
    %936 = vector.multi_reduction <maximumf>, %935, %cst_413 [2] : vector<2x8x16xf32> to vector<2x8xf32>
    %937 = vector.shape_cast %936 : vector<2x8xf32> to vector<2x8x1xf32>
    %938 = vector.broadcast %937 : vector<2x8x1xf32> to vector<2x8x16xf32>
    %939 = arith.subf %935, %938 : vector<2x8x16xf32>
    %940 = math.exp %939 : vector<2x8x16xf32>
    %cst_414 = arith.constant dense<0.000000e+00> : vector<2x8xf32>
    %941 = vector.multi_reduction <add>, %940, %cst_414 [2] : vector<2x8x16xf32> to vector<2x8xf32>
    %942 = vector.shape_cast %941 : vector<2x8xf32> to vector<2x8x1xf32>
    "tpu.trace_start"() <{level = 10 : i32, message = "bqk,bkd->bqd"}> : () -> ()
    %cst_415 = arith.constant dense<0.000000e+00> : vector<2x8x8xf32>
    %943 = tpu.matmul %940, %932, %cst_415 {dimension_numbers = #tpu.dot_dimension_numbers<[2], [1], [1], [2], [0, 0, 0, 1, 1, 2], [0], [0]>} : vector<2x8x16xf32>, vector<2x16x8xf32>, vector<2x8x8xf32> -> vector<2x8x8xf32>
    "tpu.trace_stop"() : () -> ()
    %944 = tpu.reciprocal %942 {approx = true} : vector<2x8x1xf32> -> vector<2x8x1xf32>
    %945 = vector.broadcast %944 : vector<2x8x1xf32> to vector<2x8x8xf32>
    %946 = arith.mulf %943, %945 : vector<2x8x8xf32>
    %947 = vector.shape_cast %946 : vector<2x8x8xf32> to vector<16x8xf32>
    %948 = tpu.concatenate %884, %905, %926, %947 in 1 : vector<16x8xf32>, vector<16x8xf32>, vector<16x8xf32>, vector<16x8xf32> -> vector<16x32xf32>
    %cst_416 = arith.constant dense<0.000000e+00> : vector<16x32xf32>
    %949 = tpu.matmul %948, %852, %cst_416 {dimension_numbers = #tpu.dot_dimension_numbers<[1], [0], [0], [1], [0, 0, 1, 1], [], []>} : vector<16x32xf32>, vector<32x32xf32>, vector<16x32xf32> -> vector<16x32xf32>
    %950 = vector.broadcast %854 : vector<1x32xf32> to vector<16x32xf32>
    %951 = arith.addf %949, %950 : vector<16x32xf32>
    %952 = arith.addf %836, %951 : vector<16x32xf32>
    %c1_417 = arith.constant 1 : index
    %c0_418 = arith.constant 0 : index
    %c0_419 = arith.constant 0 : index
    %953 = vector.load %arg37[%c1_417, %c0_418, %c0_419] : memref<2x1x32xf32, #tpu.memory_space<vmem>>, vector<1x1x32xf32>
    %954 = vector.shape_cast %953 : vector<1x1x32xf32> to vector<1x32xf32>
    %c1_420 = arith.constant 1 : index
    %c0_421 = arith.constant 0 : index
    %c0_422 = arith.constant 0 : index
    %955 = vector.load %arg38[%c1_420, %c0_421, %c0_422] : memref<2x1x32xf32, #tpu.memory_space<vmem>>, vector<1x1x32xf32>
    %956 = vector.shape_cast %955 : vector<1x1x32xf32> to vector<1x32xf32>
    %cst_423 = arith.constant dense<0.000000e+00> : vector<16xf32>
    %957 = vector.multi_reduction <add>, %952, %cst_423 [1] : vector<16x32xf32> to vector<16xf32>
    %958 = vector.shape_cast %957 : vector<16xf32> to vector<16x1xf32>
    %cst_424 = arith.constant 3.200000e+01 : f32
    %959 = vector.broadcast %cst_424 : f32 to vector<16x1xf32>
    %960 = arith.divf %958, %959 : vector<16x1xf32>
    %961 = vector.broadcast %960 : vector<16x1xf32> to vector<16x32xf32>
    %962 = arith.subf %952, %961 : vector<16x32xf32>
    %963 = arith.mulf %962, %962 : vector<16x32xf32>
    %cst_425 = arith.constant dense<0.000000e+00> : vector<16xf32>
    %964 = vector.multi_reduction <add>, %963, %cst_425 [1] : vector<16x32xf32> to vector<16xf32>
    %965 = vector.shape_cast %964 : vector<16xf32> to vector<16x1xf32>
    %cst_426 = arith.constant 3.200000e+01 : f32
    %966 = vector.broadcast %cst_426 : f32 to vector<16x1xf32>
    %967 = arith.divf %965, %966 : vector<16x1xf32>
    %cst_427 = arith.constant 9.99999974E-6 : f32
    %968 = vector.broadcast %cst_427 : f32 to vector<16x1xf32>
    %969 = arith.addf %967, %968 : vector<16x1xf32>
    %970 = math.rsqrt %969 : vector<16x1xf32>
    %971 = vector.broadcast %970 : vector<16x1xf32> to vector<16x32xf32>
    %972 = arith.mulf %962, %971 : vector<16x32xf32>
    %973 = vector.broadcast %954 : vector<1x32xf32> to vector<16x32xf32>
    %974 = arith.mulf %972, %973 : vector<16x32xf32>
    %975 = vector.broadcast %956 : vector<1x32xf32> to vector<16x32xf32>
    %976 = arith.addf %974, %975 : vector<16x32xf32>
    %c1_428 = arith.constant 1 : index
    %c0_429 = arith.constant 0 : index
    %c0_430 = arith.constant 0 : index
    %977 = vector.load %arg39[%c1_428, %c0_429, %c0_430] : memref<2x32x64xf32, #tpu.memory_space<vmem>>, vector<1x32x64xf32>
    %978 = vector.shape_cast %977 : vector<1x32x64xf32> to vector<32x64xf32>
    %cst_431 = arith.constant dense<0.000000e+00> : vector<16x64xf32>
    %979 = tpu.matmul %976, %978, %cst_431 {dimension_numbers = #tpu.dot_dimension_numbers<[1], [0], [0], [1], [0, 0, 1, 1], [], []>} : vector<16x32xf32>, vector<32x64xf32>, vector<16x64xf32> -> vector<16x64xf32>
    %c1_432 = arith.constant 1 : index
    %c0_433 = arith.constant 0 : index
    %c0_434 = arith.constant 0 : index
    %980 = vector.load %arg40[%c1_432, %c0_433, %c0_434] : memref<2x1x64xf32, #tpu.memory_space<vmem>>, vector<1x1x64xf32>
    %981 = vector.shape_cast %980 : vector<1x1x64xf32> to vector<1x64xf32>
    %982 = vector.broadcast %981 : vector<1x64xf32> to vector<16x64xf32>
    %983 = arith.addf %979, %982 : vector<16x64xf32>
    %cst_435 = arith.constant 0.000000e+00 : f32
    %984 = vector.broadcast %cst_435 : f32 to vector<16x64xf32>
    %985 = arith.maximumf %983, %984 : vector<16x64xf32>
    %c1_436 = arith.constant 1 : index
    %c0_437 = arith.constant 0 : index
    %c0_438 = arith.constant 0 : index
    %986 = vector.load %arg41[%c1_436, %c0_437, %c0_438] : memref<2x64x32xf32, #tpu.memory_space<vmem>>, vector<1x64x32xf32>
    %987 = vector.shape_cast %986 : vector<1x64x32xf32> to vector<64x32xf32>
    %cst_439 = arith.constant dense<0.000000e+00> : vector<16x32xf32>
    %988 = tpu.matmul %985, %987, %cst_439 {dimension_numbers = #tpu.dot_dimension_numbers<[1], [0], [0], [1], [0, 0, 1, 1], [], []>} : vector<16x64xf32>, vector<64x32xf32>, vector<16x32xf32> -> vector<16x32xf32>
    %c1_440 = arith.constant 1 : index
    %c0_441 = arith.constant 0 : index
    %c0_442 = arith.constant 0 : index
    %989 = vector.load %arg42[%c1_440, %c0_441, %c0_442] : memref<2x1x32xf32, #tpu.memory_space<vmem>>, vector<1x1x32xf32>
    %990 = vector.shape_cast %989 : vector<1x1x32xf32> to vector<1x32xf32>
    %991 = vector.broadcast %990 : vector<1x32xf32> to vector<16x32xf32>
    %992 = arith.addf %988, %991 : vector<16x32xf32>
    %993 = arith.addf %976, %992 : vector<16x32xf32>
    %c1_443 = arith.constant 1 : index
    %c0_444 = arith.constant 0 : index
    %c0_445 = arith.constant 0 : index
    %994 = vector.load %arg43[%c1_443, %c0_444, %c0_445] : memref<2x1x32xf32, #tpu.memory_space<vmem>>, vector<1x1x32xf32>
    %995 = vector.shape_cast %994 : vector<1x1x32xf32> to vector<1x32xf32>
    %c1_446 = arith.constant 1 : index
    %c0_447 = arith.constant 0 : index
    %c0_448 = arith.constant 0 : index
    %996 = vector.load %arg44[%c1_446, %c0_447, %c0_448] : memref<2x1x32xf32, #tpu.memory_space<vmem>>, vector<1x1x32xf32>
    %997 = vector.shape_cast %996 : vector<1x1x32xf32> to vector<1x32xf32>
    %cst_449 = arith.constant dense<0.000000e+00> : vector<16xf32>
    %998 = vector.multi_reduction <add>, %993, %cst_449 [1] : vector<16x32xf32> to vector<16xf32>
    %999 = vector.shape_cast %998 : vector<16xf32> to vector<16x1xf32>
    %cst_450 = arith.constant 3.200000e+01 : f32
    %1000 = vector.broadcast %cst_450 : f32 to vector<16x1xf32>
    %1001 = arith.divf %999, %1000 : vector<16x1xf32>
    %1002 = vector.broadcast %1001 : vector<16x1xf32> to vector<16x32xf32>
    %1003 = arith.subf %993, %1002 : vector<16x32xf32>
    %1004 = arith.mulf %1003, %1003 : vector<16x32xf32>
    %cst_451 = arith.constant dense<0.000000e+00> : vector<16xf32>
    %1005 = vector.multi_reduction <add>, %1004, %cst_451 [1] : vector<16x32xf32> to vector<16xf32>
    %1006 = vector.shape_cast %1005 : vector<16xf32> to vector<16x1xf32>
    %cst_452 = arith.constant 3.200000e+01 : f32
    %1007 = vector.broadcast %cst_452 : f32 to vector<16x1xf32>
    %1008 = arith.divf %1006, %1007 : vector<16x1xf32>
    %cst_453 = arith.constant 9.99999974E-6 : f32
    %1009 = vector.broadcast %cst_453 : f32 to vector<16x1xf32>
    %1010 = arith.addf %1008, %1009 : vector<16x1xf32>
    %1011 = math.rsqrt %1010 : vector<16x1xf32>
    %1012 = vector.broadcast %1011 : vector<16x1xf32> to vector<16x32xf32>
    %1013 = arith.mulf %1003, %1012 : vector<16x32xf32>
    %1014 = vector.broadcast %995 : vector<1x32xf32> to vector<16x32xf32>
    %1015 = arith.mulf %1013, %1014 : vector<16x32xf32>
    %1016 = vector.broadcast %997 : vector<1x32xf32> to vector<16x32xf32>
    %1017 = arith.addf %1015, %1016 : vector<16x32xf32>
    %c0_454 = arith.constant 0 : index
    %c0_455 = arith.constant 0 : index
    %1018 = vector.load %arg45[%c0_454, %c0_455] : memref<1x32xf32, #tpu.memory_space<vmem>>, vector<1x32xf32>
    %c0_456 = arith.constant 0 : index
    %c0_457 = arith.constant 0 : index
    %1019 = vector.load %arg46[%c0_456, %c0_457] : memref<1x32xf32, #tpu.memory_space<vmem>>, vector<1x32xf32>
    %cst_458 = arith.constant dense<0.000000e+00> : vector<16xf32>
    %1020 = vector.multi_reduction <add>, %1017, %cst_458 [1] : vector<16x32xf32> to vector<16xf32>
    %1021 = vector.shape_cast %1020 : vector<16xf32> to vector<16x1xf32>
    %cst_459 = arith.constant 3.200000e+01 : f32
    %1022 = vector.broadcast %cst_459 : f32 to vector<16x1xf32>
    %1023 = arith.divf %1021, %1022 : vector<16x1xf32>
    %1024 = vector.broadcast %1023 : vector<16x1xf32> to vector<16x32xf32>
    %1025 = arith.subf %1017, %1024 : vector<16x32xf32>
    %1026 = arith.mulf %1025, %1025 : vector<16x32xf32>
    %cst_460 = arith.constant dense<0.000000e+00> : vector<16xf32>
    %1027 = vector.multi_reduction <add>, %1026, %cst_460 [1] : vector<16x32xf32> to vector<16xf32>
    %1028 = vector.shape_cast %1027 : vector<16xf32> to vector<16x1xf32>
    %cst_461 = arith.constant 3.200000e+01 : f32
    %1029 = vector.broadcast %cst_461 : f32 to vector<16x1xf32>
    %1030 = arith.divf %1028, %1029 : vector<16x1xf32>
    %cst_462 = arith.constant 9.99999974E-6 : f32
    %1031 = vector.broadcast %cst_462 : f32 to vector<16x1xf32>
    %1032 = arith.addf %1030, %1031 : vector<16x1xf32>
    %1033 = math.rsqrt %1032 : vector<16x1xf32>
    %1034 = vector.broadcast %1033 : vector<16x1xf32> to vector<16x32xf32>
    %1035 = arith.mulf %1025, %1034 : vector<16x32xf32>
    %1036 = vector.broadcast %1018 : vector<1x32xf32> to vector<16x32xf32>
    %1037 = arith.mulf %1035, %1036 : vector<16x32xf32>
    %1038 = vector.broadcast %1019 : vector<1x32xf32> to vector<16x32xf32>
    %1039 = arith.addf %1037, %1038 : vector<16x32xf32>
    %1040 = tpu.concatenate %702, %1039 in 0 : vector<16x32xf32>, vector<16x32xf32> -> vector<32x32xf32>
    %c0_463 = arith.constant 0 : index
    %c0_464 = arith.constant 0 : index
    %1041 = vector.load %arg47[%c0_463, %c0_464] : memref<32x64xf32, #tpu.memory_space<vmem>>, vector<32x64xf32>
    %cst_465 = arith.constant dense<0.000000e+00> : vector<32x64xf32>
    %1042 = tpu.matmul %1040, %1041, %cst_465 {dimension_numbers = #tpu.dot_dimension_numbers<[1], [0], [0], [1], [0, 0, 1, 1], [], []>} : vector<32x32xf32>, vector<32x64xf32>, vector<32x64xf32> -> vector<32x64xf32>
    %c0_466 = arith.constant 0 : index
    %c0_467 = arith.constant 0 : index
    %1043 = vector.load %arg48[%c0_466, %c0_467] : memref<1x64xf32, #tpu.memory_space<vmem>>, vector<1x64xf32>
    %1044 = vector.broadcast %1043 : vector<1x64xf32> to vector<32x64xf32>
    %1045 = arith.addf %1042, %1044 : vector<32x64xf32>
    %cst_468 = arith.constant 0.000000e+00 : f32
    %1046 = vector.broadcast %cst_468 : f32 to vector<32x64xf32>
    %1047 = arith.maximumf %1045, %1046 : vector<32x64xf32>
    %c0_469 = arith.constant 0 : index
    %c0_470 = arith.constant 0 : index
    %1048 = vector.load %arg49[%c0_469, %c0_470] : memref<64x64xf32, #tpu.memory_space<vmem>>, vector<64x64xf32>
    %cst_471 = arith.constant dense<0.000000e+00> : vector<32x64xf32>
    %1049 = tpu.matmul %1047, %1048, %cst_471 {dimension_numbers = #tpu.dot_dimension_numbers<[1], [0], [0], [1], [0, 0, 1, 1], [], []>} : vector<32x64xf32>, vector<64x64xf32>, vector<32x64xf32> -> vector<32x64xf32>
    %c0_472 = arith.constant 0 : index
    %c0_473 = arith.constant 0 : index
    %1050 = vector.load %arg50[%c0_472, %c0_473] : memref<1x64xf32, #tpu.memory_space<vmem>>, vector<1x64xf32>
    %1051 = vector.broadcast %1050 : vector<1x64xf32> to vector<32x64xf32>
    %1052 = arith.addf %1049, %1051 : vector<32x64xf32>
    %cst_474 = arith.constant 0.000000e+00 : f32
    %1053 = vector.broadcast %cst_474 : f32 to vector<32x64xf32>
    %1054 = arith.maximumf %1052, %1053 : vector<32x64xf32>
    %c0_475 = arith.constant 0 : index
    %c0_476 = arith.constant 0 : index
    %1055 = vector.load %arg51[%c0_475, %c0_476] : memref<64x10xf32, #tpu.memory_space<vmem>>, vector<64x10xf32>
    %cst_477 = arith.constant dense<0.000000e+00> : vector<32x10xf32>
    %1056 = tpu.matmul %1054, %1055, %cst_477 {dimension_numbers = #tpu.dot_dimension_numbers<[1], [0], [0], [1], [0, 0, 1, 1], [], []>} : vector<32x64xf32>, vector<64x10xf32>, vector<32x10xf32> -> vector<32x10xf32>
    %c0_478 = arith.constant 0 : index
    %c0_479 = arith.constant 0 : index
    %1057 = vector.load %arg52[%c0_478, %c0_479] : memref<1x10xf32, #tpu.memory_space<vmem>>, vector<1x10xf32>
    %1058 = vector.broadcast %1057 : vector<1x10xf32> to vector<32x10xf32>
    %1059 = arith.addf %1056, %1058 : vector<32x10xf32>
    %1060 = vector.extract_strided_slice %1059 {offsets = [0, 0], sizes = [32, 6], strides = [1, 1]} : vector<32x10xf32> to vector<32x6xf32>
    %c0_480 = arith.constant 0 : index
    %c0_481 = arith.constant 0 : index
    %1061 = vector.load %arg53[%c0_480, %c0_481] : memref<32x6xf32, #tpu.memory_space<vmem>>, vector<32x6xf32>
    tpu.vector_store %arg53[%c0_480, %c0_481], %1060 {strides = array<i32>} : memref<32x6xf32, #tpu.memory_space<vmem>>, vector<32x6xf32>,
    %1062 = vector.extract_strided_slice %1059 {offsets = [0, 6], sizes = [32, 4], strides = [1, 1]} : vector<32x10xf32> to vector<32x4xf32>
    %1063 = arith.negf %1062 : vector<32x4xf32>
    %1064 = math.exp %1063 : vector<32x4xf32>
    %cst_482 = arith.constant 1.000000e+00 : f32
    %1065 = vector.broadcast %cst_482 : f32 to vector<32x4xf32>
    %1066 = arith.addf %1065, %1064 : vector<32x4xf32>
    %1067 = arith.divf %1065, %1066 : vector<32x4xf32>
    %c0_483 = arith.constant 0 : index
    %c0_484 = arith.constant 0 : index
    %1068 = vector.load %arg54[%c0_483, %c0_484] : memref<32x4xf32, #tpu.memory_space<vmem>>, vector<32x4xf32>
    tpu.vector_store %arg54[%c0_483, %c0_484], %1067 {strides = array<i32>} : memref<32x4xf32, #tpu.memory_space<vmem>>, vector<32x4xf32>,
    return
  }
}

</mosaic_0001>

<bundles_post_ra>
// kernel: detr_forward.1
= control target key start
LH: loop header
LB: loop body
LE: loop exit
PB: predicated region body
PF: predicated region fallthrough
CT: control target
= control target key end

     0   :  { %s17075_s6 = smov 1   ;;  %s17076_s10 = smov 2   ;;  %s19456_s0 = inlined_call_operand.smem [shape: u32[55], index: -1, kind: input, shape index: {}] }
   0x1   :  { %s17163_s5 = sld [smem:[%s19456_s0]]   ;;  %s17077_s14 = smov 3  }
   0x2   :  { %s17168_s9 = sld [smem:[%s19456_s0 + %s17075_s6]]   ;;  %s17078_s18 = smov 4  }
   0x3   :  { %s17173_s13 = sld [smem:[%s19456_s0 + %s17076_s10]]   ;;  %s17079_s22 = smov 5  }
   0x4   :  { %s17178_s17 = sld [smem:[%s19456_s0 + %s17077_s14]]   ;;  %s17080_s26 = smov 6  }
   0x5   :  { %s17183_s21 = sld [smem:[%s19456_s0 + %s17078_s18]]   ;;  %s17081_s30 = smov 7  }
   0x6   :  { %s17188_s25 = sld [smem:[%s19456_s0 + %s17079_s22]]   ;;  %s17082_s4 = smov 8  }
   0x7   :  { %s17193_s29 = sld [smem:[%s19456_s0 + %s17080_s26]]   ;;  %s17083_s10 = smov 9  }
   0x8   :  { %19497 = sst [smem:[#allocation25_spill]] %s17168_s9  ;;  %s17084_s15 = smov 10  }
   0x9   :  { %19498 = sst [smem:[#allocation26_spill]] %s17173_s13  ;;  %s17085_s20 = smov 11  }
   0xa   :  { %s17198_s3 = sld [smem:[%s19456_s0 + %s17081_s30]]   ;;  %s17086_s26 = smov 12  }
   0xb   :  { %19499 = sst [smem:[#allocation27_spill]] %s17183_s21  ;;  %s17087_s1 = smov 13  }
   0xc   :  { %s17203_s8 = sld [smem:[%s19456_s0 + %s17082_s4]]   ;;  %s17088_s7 = smov 14  }
   0xd   :  { %s17208_s14 = sld [smem:[%s19456_s0 + %s17083_s10]]   ;;  %s17090_s22 = smov 16  }
   0xe   :  { %s17213_s19 = sld [smem:[%s19456_s0 + %s17084_s15]]   ;;  %s17089_s15 = smov 15  }
   0xf   :  { %s17218_s24 = sld [smem:[%s19456_s0 + %s17085_s20]]   ;;  %s17091_s28 = smov 17  }
  0x10   :  { %s17223_s30 = sld [smem:[%s19456_s0 + %s17086_s26]]  }
  0x11   :  { %s17228_s6 = sld [smem:[%s19456_s0 + %s17087_s1]]  }
  0x12   :  { %19500 = sst [smem:[#allocation28_spill]] %s17203_s8 }
  0x13   :  { %19501 = sst [smem:[#allocation29_spill]] %s17208_s14 }
  0x14   :  { %19502 = sst [smem:[#allocation30_spill]] %s17213_s19 }
  0x15   :  { %19503 = sst [smem:[#allocation31_spill]] %s17218_s24 }
  0x16   :  { %19504 = sst [smem:[#allocation32_spill]] %s17223_s30 }
  0x17   :  { %19505 = sst [smem:[#allocation33_spill]] %s17228_s6 }
  0x18   :  { %s17233_s12 = sld [smem:[%s19456_s0 + %s17088_s7]]   ;;  %s17092_s7 = smov 18  }
  0x19   :  { %s17238_s20 = sld [smem:[%s19456_s0 + %s17089_s15]]   ;;  %s17093_s15 = smov 19  }
  0x1a   :  { %s17243_s27 = sld [smem:[%s19456_s0 + %s17090_s22]]   ;;  %s17094_s22 = smov 20  }
  0x1b   :  { %s17248_s4 = sld [smem:[%s19456_s0 + %s17091_s28]]   ;;  %s17095_s28 = smov 21  }
  0x1c   :  { %s17253_s13 = sld [smem:[%s19456_s0 + %s17092_s7]]   ;;  %s17096_s7 = smov 22  }
  0x1d   :  { %s17268_s6 = sld [smem:[%s19456_s0 + %s17095_s28]]   ;;  %s17099_s28 = smov 25  }
  0x1e   :  { %19506 = sst [smem:[#allocation34_spill]] %s17233_s12 }
  0x1f   :  { %19507 = sst [smem:[#allocation35_spill]] %s17238_s20 }
  0x20   :  { %19508 = sst [smem:[#allocation36_spill]] %s17243_s27 }
  0x21   :  { %19509 = sst [smem:[#allocation37_spill]] %s17248_s4 }
  0x22   :  { %19510 = sst [smem:[#allocation38_spill]] %s17253_s13 }
  0x23   :  { %s17258_s12 = sld [smem:[%s19456_s0 + %s17093_s15]]   ;;  %s17097_s15 = smov 23  }
  0x24   :  { %s17263_s27 = sld [smem:[%s19456_s0 + %s17094_s22]]   ;;  %s17098_s22 = smov 24  }
  0x25   :  { %19513 = sst [smem:[#allocation41_spill]] %s17268_s6 }
  0x26   :  { %s17273_s13 = sld [smem:[%s19456_s0 + %s17096_s7]]   ;;  %s17100_s7 = smov 26  }
  0x27   :  { %s17288_s6 = sld [smem:[%s19456_s0 + %s17099_s28]]   ;;  %s17103_s28 = smov 29  }
  0x29   :  { %19511 = sst [smem:[#allocation39_spill]] %s17258_s12 }
  0x2a   :  { %19512 = sst [smem:[#allocation40_spill]] %s17263_s27 }
  0x2b   :  { %s17278_s12 = sld [smem:[%s19456_s0 + %s17097_s15]]   ;;  %s17101_s15 = smov 27  }
  0x2c   :  { %19514 = sst [smem:[#allocation42_spill]] %s17273_s13 }
  0x2d   :  { %s17283_s27 = sld [smem:[%s19456_s0 + %s17098_s22]]   ;;  %s17102_s22 = smov 28  }
  0x2e   :  { %19517 = sst [smem:[#allocation45_spill]] %s17288_s6 }
  0x2f   :  { %s17293_s13 = sld [smem:[%s19456_s0 + %s17100_s7]]   ;;  %s17104_s7 = smov 30  }
  0x30   :  { %s17308_s6 = sld [smem:[%s19456_s0 + %s17103_s28]]   ;;  %s17107_s28 = smov 33  }
  0x31   :  { %19515 = sst [smem:[#allocation43_spill]] %s17278_s12 }
  0x32   :  { %s17298_s12 = sld [smem:[%s19456_s0 + %s17101_s15]]   ;;  %s17105_s15 = smov 31  }
  0x33   :  { %19516 = sst [smem:[#allocation44_spill]] %s17283_s27 }
  0x34   :  { %s17303_s27 = sld [smem:[%s19456_s0 + %s17102_s22]]   ;;  %s17106_s22 = smov 32  }
  0x35   :  { %19518 = sst [smem:[#allocation46_spill]] %s17293_s13 }
  0x36   :  { %19521 = sst [smem:[#allocation49_spill]] %s17308_s6 }
  0x37   :  { %s17313_s13 = sld [smem:[%s19456_s0 + %s17104_s7]]   ;;  %s17108_s7 = smov 34  }
  0x38   :  { %19519 = sst [smem:[#allocation47_spill]] %s17298_s12 }
  0x39   :  { %s17318_s12 = sld [smem:[%s19456_s0 + %s17105_s15]]   ;;  %s17109_s15 = smov 35  }
  0x3a   :  { %19520 = sst [smem:[#allocation48_spill]] %s17303_s27 }
  0x3b   :  { %s17323_s27 = sld [smem:[%s19456_s0 + %s17106_s22]]   ;;  %s17110_s22 = smov 36  }
  0x3c   :  { %s17328_s6 = sld [smem:[%s19456_s0 + %s17107_s28]]   ;;  %s17111_s28 = smov 37  }
  0x3d   :  { %19522 = sst [smem:[#allocation50_spill]] %s17313_s13 }
  0x3e   :  { %s17333_s13 = sld [smem:[%s19456_s0 + %s17108_s7]]   ;;  %s17112_s7 = smov 38  }
  0x3f   :  { %19523 = sst [smem:[#allocation51_spill]] %s17318_s12 }
  0x40   :  { %s17338_s12 = sld [smem:[%s19456_s0 + %s17109_s15]]   ;;  %s17113_s15 = smov 39  }
  0x41   :  { %19524 = sst [smem:[#allocation52_spill]] %s17323_s27 }
  0x42   :  { %19525 = sst [smem:[#allocation53_spill]] %s17328_s6 }
  0x43   :  { %s17343_s27 = sld [smem:[%s19456_s0 + %s17110_s22]]   ;;  %s17114_s22 = smov 40  }
  0x44   :  { %19526 = sst [smem:[#allocation54_spill]] %s17333_s13 }
  0x45   :  { %s17348_s6 = sld [smem:[%s19456_s0 + %s17111_s28]]   ;;  %s17115_s28 = smov 41  }
  0x46   :  { %19527 = sst [smem:[#allocation55_spill]] %s17338_s12 }
  0x47   :  { %s17353_s13 = sld [smem:[%s19456_s0 + %s17112_s7]]   ;;  %s17116_s7 = smov 42  }
  0x48   :  { %s17358_s12 = sld [smem:[%s19456_s0 + %s17113_s15]]   ;;  %s17117_s15 = smov 43  }
  0x49   :  { %19528 = sst [smem:[#allocation56_spill]] %s17343_s27 }
  0x4a   :  { %s17363_s27 = sld [smem:[%s19456_s0 + %s17114_s22]]   ;;  %s17118_s22 = smov 44  }
  0x4b   :  { %19529 = sst [smem:[#allocation57_spill]] %s17348_s6 }
  0x4c   :  { %s17368_s6 = sld [smem:[%s19456_s0 + %s17115_s28]]   ;;  %s17119_s28 = smov 45  }
  0x4d   :  { %s17373_s4 = sld [smem:[%s19456_s0 + %s17116_s7]]   ;;  %s17120_s7 = smov 46  }
  0x4e   :  { %19530 = sst [smem:[#allocation58_spill]] %s17358_s12 }
  0x4f   :  { %s17378_s12 = sld [smem:[%s19456_s0 + %s17117_s15]]   ;;  %s17121_s15 = smov 47  }
  0x50   :  { %s17383_s20 = sld [smem:[%s19456_s0 + %s17118_s22]]   ;;  %s17122_s22 = smov 48  }
  0x51   :  { %s17393_s30 = sld [smem:[%s19456_s0 + %s17120_s7]]   ;;  %s17124_s7 = smov 50  }
  0x52   :  { %19531 = sst [smem:[#allocation59_spill]] %s17368_s6 }
  0x53   :  { %s17388_s6 = sld [smem:[%s19456_s0 + %s17119_s28]]   ;;  %s17123_s28 = smov 49  }
  0x54   :  { %s17398_s24 = sld [smem:[%s19456_s0 + %s17121_s15]]   ;;  %s17125_s15 = smov 51  }
  0x55   :  { %s17403_s19 = sld [smem:[%s19456_s0 + %s17122_s22]]   ;;  %s17126_s22 = smov 52  }
  0x56   :  { %s17408_s8 = sld [smem:[%s19456_s0 + %s17123_s28]]   ;;  %s17127_s28 = smov 53  }
  0x57   :  { %s17413_s9 = sld [smem:[%s19456_s0 + %s17124_s7]]   ;;  %s17128_s7 = smov 54  }
  0x58   :  { %s17423_s14 = sld [smem:[%s19456_s0 + %s17126_s22]]  }
  0x59   :  { %s17433_s21 = sld [smem:[%s19456_s0 + %s17128_s7]]  }
  0x5a   :  { %19532 = sst [smem:[#allocation60_spill]] %s17398_s24 }
  0x5b   :  { %s17418_s24 = sld [smem:[%s19456_s0 + %s17125_s15]]  }
  0x5c   :  { %19533 = sst [smem:[#allocation61_spill]] %s17408_s8 }
  0x5d   :  { %s17428_s8 = sld [smem:[%s19456_s0 + %s17127_s28]]  }
  0x5e   :  { %115 = vsyncpa [#allocation3], 0 }
  0x5f   :  { %116 = vsyncpa [#allocation5], 0 }
  0x60   :  { %117 = vsyncpa [#allocation8], 0 }
  0x61   :  { %118 = vsyncpa [#allocation11], 0 }
  0x62   :  { %119 = vsyncpa [#allocation14], 0 }
  0x63   :  { %120 = vsyncpa [#allocation17], 0  ;;  %s17129_s15 = smov [#allocation4]   ;;  %s16821_s18 = scalar_lea.hbm %s17353_s13, 32 }
  0x64   :  { %s210_s16 = sshll.u32 %s17129_s15, 4  ;;  %p16822_p0 = scmp.ne.s32.totalorder %s17353_s13, %s16821_s18  ;;  %s211_s16 = int_to_ptr.vmem [resolvable:$true] %s210_s16 }
  0x65   :  { %p16825_p1 = scmp.lt.u32.totalorder %s16821_s18, %s17353_s13 }
  0x67   :  { %p16827_p2 = pnand %p16825_p1, %p16822_p0 }
  0x69   :  { %16830 = shalt.err (!%p16827_p2)
}
  0x6a   :  { %s16831_s22 = scalar_lea.vmem %s211_s16, 32  ;;  %p16836_p4 = scmp.lt.s32.totalorder %s211_s16, %s211_s16 }
  0x6b   :  { %p16832_p3 = scmp.ne.s32.totalorder %s211_s16, %s16831_s22  ;;  %p16837_p5 = scmp.lt.s32.totalorder %s16831_s22, %s16831_s22 }
  0x6d   :  { %p16838_p6 = por %p16837_p5, %p16836_p4 }
  0x6f   :  { %p16839_p7 = pnand %p16838_p6, %p16832_p3 }
  0x71   :  { %16842 = shalt.err (!%p16839_p7)
}
  0x72   :  { %s19495_s0 = smov 16   ;;  %s17131_s23 = smov 1  }
  0x73   :  { %216 = dma.hbm_to_vmem [thread:$0]  %s17353_s13, 32, %s211_s16, [#allocation5], %s19495_s0, %s19495_s0, %s17131_s23  }
  0x74   :  { %s17132_s26 = smov [#allocation7]   ;;  %s17133_s1 = smov [#allocation10]  }
  0x75   :  { %s238_s28 = sshll.u32 %s17132_s26, 4  ;;  %s262_s2 = sshll.u32 %s17133_s1, 4  ;;  %s239_s28 = int_to_ptr.vmem [resolvable:$true] %s238_s28  ;;  %s263_s2 = int_to_ptr.vmem [resolvable:$true] %s262_s2 }
  0x76   :  { %s16843_s7 = scalar_lea.hbm %s17373_s4, 32 }
  0x77   :  { %p16844_p8 = scmp.ne.s32.totalorder %s17373_s4, %s16843_s7  ;;  %p16847_p9 = scmp.lt.u32.totalorder %s16843_s7, %s17373_s4 }
  0x79   :  { %p16849_p10 = pnand %p16847_p9, %p16844_p8 }
  0x7b   :  { %16852 = shalt.err (!%p16849_p10)
}
  0x7c   :  { %s16853_s10 = scalar_lea.vmem %s239_s28, 32  ;;  %p16858_p12 = scmp.lt.s32.totalorder %s239_s28, %s239_s28 }
  0x7d   :  { %p16854_p11 = scmp.ne.s32.totalorder %s239_s28, %s16853_s10  ;;  %p16859_p13 = scmp.lt.s32.totalorder %s16853_s10, %s16853_s10 }
  0x7f   :  { %p16860_p0 = por %p16859_p13, %p16858_p12 }
  0x81   :  { %p16861_p1 = pnand %p16860_p0, %p16854_p11 }
  0x83   :  { %16864 = shalt.err (!%p16861_p1)
}
  0x84   :  { %244 = dma.hbm_to_vmem [thread:$0]  %s17373_s4, 32, %s239_s28, [#allocation8], %s19495_s0, %s19495_s0, %s17131_s23  }
  0x85   :  { %s16865_s13 = scalar_lea.hbm %s17383_s20, 32 }
  0x86   :  { %p16866_p2 = scmp.ne.s32.totalorder %s17383_s20, %s16865_s13  ;;  %p16869_p3 = scmp.lt.u32.totalorder %s16865_s13, %s17383_s20 }
  0x88   :  { %p16871_p4 = pnand %p16869_p3, %p16866_p2 }
  0x8a   :  { %16874 = shalt.err (!%p16871_p4)
}
  0x8b   :  { %s16875_s11 = scalar_lea.vmem %s263_s2, 32  ;;  %p16880_p6 = scmp.lt.s32.totalorder %s263_s2, %s263_s2 }
  0x8c   :  { %p16876_p5 = scmp.ne.s32.totalorder %s263_s2, %s16875_s11  ;;  %p16881_p7 = scmp.lt.s32.totalorder %s16875_s11, %s16875_s11 }
  0x8e   :  { %p16882_p8 = por %p16881_p7, %p16880_p6 }
  0x90   :  { %p16883_p9 = pnand %p16882_p8, %p16876_p5 }
  0x92   :  { %16886 = shalt.err (!%p16883_p9)
}
  0x93   :  { %268 = dma.hbm_to_vmem [thread:$0]  %s17383_s20, 32, %s263_s2, [#allocation11], %s19495_s0, %s19495_s0, %s17131_s23  }
  0x94   :  { %s17134_s4 = smov [#allocation13]   ;;  %s17135_s16 = smov [#allocation16]  }
  0x95   :  { %s285_s15 = sshll.u32 %s17134_s4, 4  ;;  %s309_s18 = sshll.u32 %s17135_s16, 4  ;;  %s286_s15 = int_to_ptr.vmem [resolvable:$true] %s285_s15  ;;  %s310_s18 = int_to_ptr.vmem [resolvable:$true] %s309_s18 }
  0x96   :  { %s16887_s22 = scalar_lea.hbm %s17393_s30, 16 }
  0x97   :  { %p16888_p10 = scmp.ne.s32.totalorder %s17393_s30, %s16887_s22  ;;  %p16891_p11 = scmp.lt.u32.totalorder %s16887_s22, %s17393_s30 }
  0x99   :  { %p16893_p12 = pnand %p16891_p11, %p16888_p10 }
  0x9b   :  { %16896 = shalt.err (!%p16893_p12)
}
  0x9c   :  { %s16897_s26 = scalar_lea.vmem %s286_s15, 16  ;;  %s16901_s28 = scalar_lea.vmem %s286_s15, 32 }
  0x9d   :  { %p16898_p13 = scmp.ne.s32.totalorder %s286_s15, %s16897_s26  ;;  %p16902_p0 = scmp.lt.s32.totalorder %s286_s15, %s286_s15 }
  0x9e   :  { %p16903_p1 = scmp.lt.s32.totalorder %s16901_s28, %s16897_s26 }
  0xa0   :  { %p16904_p2 = por %p16903_p1, %p16902_p0 }
  0xa2   :  { %p16905_p3 = pnand %p16904_p2, %p16898_p13 }
  0xa4   :  { %16908 = shalt.err (!%p16905_p3)
}
  0xa5   :  { %288 = dma.hbm_to_vmem [thread:$0]  %s17393_s30, 16, %s286_s15, [#allocation14]  }
  0xa6   :  { %s16909_s20 = scalar_lea.hbm %s17413_s9, 16 }
  0xa7   :  { %p16910_p4 = scmp.ne.s32.totalorder %s17413_s9, %s16909_s20  ;;  %p16913_p5 = scmp.lt.u32.totalorder %s16909_s20, %s17413_s9 }
  0xa9   :  { %p16915_p6 = pnand %p16913_p5, %p16910_p4 }
  0xab   :  { %16918 = shalt.err (!%p16915_p6)
}
  0xac   :  { %s16919_s1 = scalar_lea.vmem %s310_s18, 16  ;;  %s16923_s2 = scalar_lea.vmem %s310_s18, 32 }
  0xad   :  { %p16920_p7 = scmp.ne.s32.totalorder %s310_s18, %s16919_s1  ;;  %p16924_p8 = scmp.lt.s32.totalorder %s310_s18, %s310_s18 }
  0xae   :  { %p16925_p9 = scmp.lt.s32.totalorder %s16923_s2, %s16919_s1 }
  0xb0   :  { %p16926_p10 = por %p16925_p9, %p16924_p8 }
  0xb2   :  { %p16927_p11 = pnand %p16926_p10, %p16920_p7 }
  0xb4   :  { %16930 = shalt.err (!%p16927_p11)
}
  0xb5   :  { %312 = dma.hbm_to_vmem [thread:$0]  %s17413_s9, 16, %s310_s18, [#allocation17]  }
  0xb6   :  { %s17136_s30 = smov [#allocation2]   ;;  %s17137_s10 = smov [#allocation6]  }
  0xb7   :  { %s139_s7 = sshll.u32 %s17136_s30, 4  ;;  %s224_s13 = sshll.u32 %s17137_s10, 4  ;;  %s140_s7 = int_to_ptr.vmem [resolvable:$true] %s139_s7  ;;  %s225_s13 = int_to_ptr.vmem [resolvable:$true] %s224_s13 }
  0xb8   :  { %s16931_s11 = scalar_lea.hbm %s17193_s29, 16 }
  0xb9   :  { %p16932_p12 = scmp.ne.s32.totalorder %s17193_s29, %s16931_s11  ;;  %p16935_p13 = scmp.lt.u32.totalorder %s16931_s11, %s17193_s29 }
  0xbb   :  { %p16937_p0 = pnand %p16935_p13, %p16932_p12 }
  0xbd   :  { %16940 = shalt.err (!%p16937_p0)
}
  0xbe   :  { %s16941_s4 = scalar_lea.vmem %s140_s7, 16  ;;  %s16945_s15 = scalar_lea.vmem %s140_s7, 32 }
  0xbf   :  { %p16942_p1 = scmp.ne.s32.totalorder %s140_s7, %s16941_s4  ;;  %p16946_p2 = scmp.lt.s32.totalorder %s140_s7, %s140_s7 }
  0xc0   :  { %p16947_p3 = scmp.lt.s32.totalorder %s16945_s15, %s16941_s4 }
  0xc2   :  { %p16948_p4 = por %p16947_p3, %p16946_p2 }
  0xc4   :  { %p16949_p5 = pnand %p16948_p4, %p16942_p1 }
  0xc6   :  { %16952 = shalt.err (!%p16949_p5)
}
  0xc7   :  { %142 = dma.hbm_to_vmem [thread:$0]  %s17193_s29, 16, %s140_s7, [#allocation3]  }
  0xc8   :  { %s16953_s9 = scalar_lea.hbm %s17363_s27, 32 }
  0xc9   :  { %p16954_p6 = scmp.ne.s32.totalorder %s17363_s27, %s16953_s9  ;;  %p16957_p7 = scmp.lt.u32.totalorder %s16953_s9, %s17363_s27 }
  0xcb   :  { %p16959_p8 = pnand %p16957_p7, %p16954_p6 }
  0xcd   :  { %16962 = shalt.err (!%p16959_p8)
}
  0xce   :  { %s16963_s16 = scalar_lea.vmem %s225_s13, 32  ;;  %p16968_p10 = scmp.lt.s32.totalorder %s225_s13, %s225_s13 }
  0xcf   :  { %p16964_p9 = scmp.ne.s32.totalorder %s225_s13, %s16963_s16  ;;  %p16969_p11 = scmp.lt.s32.totalorder %s16963_s16, %s16963_s16 }
  0xd1   :  { %p16970_p12 = por %p16969_p11, %p16968_p10 }
  0xd3   :  { %p16971_p13 = pnand %p16970_p12, %p16964_p9 }
  0xd5   :  { %16974 = shalt.err (!%p16971_p13)
}
  0xd6   :  { %230 = dma.hbm_to_vmem [thread:$0]  %s17363_s27, 32, %s225_s13, [#allocation5], %s19495_s0, %s19495_s0, %s17131_s23  }
  0xd7   :  { %s17138_s29 = smov [#allocation9]   ;;  %s17139_s22 = smov [#allocation12]  }
  0xd8   :  { %s250_s18 = sshll.u32 %s17138_s29, 4  ;;  %s275_s26 = sshll.u32 %s17139_s22, 4  ;;  %s251_s18 = int_to_ptr.vmem [resolvable:$true] %s250_s18  ;;  %s276_s26 = int_to_ptr.vmem [resolvable:$true] %s275_s26 }
  0xd9   :  { %s16975_s28 = scalar_lea.hbm %s17378_s12, 32 }
  0xda   :  { %p16976_p0 = scmp.ne.s32.totalorder %s17378_s12, %s16975_s28  ;;  %p16979_p1 = scmp.lt.u32.totalorder %s16975_s28, %s17378_s12 }
  0xdc   :  { %p16981_p2 = pnand %p16979_p1, %p16976_p0 }
  0xde   :  { %16984 = shalt.err (!%p16981_p2)
}
  0xdf   :  { %s16985_s20 = scalar_lea.vmem %s251_s18, 32  ;;  %p16990_p4 = scmp.lt.s32.totalorder %s251_s18, %s251_s18 }
  0xe0   :  { %p16986_p3 = scmp.ne.s32.totalorder %s251_s18, %s16985_s20  ;;  %p16991_p5 = scmp.lt.s32.totalorder %s16985_s20, %s16985_s20 }
  0xe2   :  { %p16992_p6 = por %p16991_p5, %p16990_p4 }
  0xe4   :  { %p16993_p7 = pnand %p16992_p6, %p16986_p3 }
  0xe6   :  { %16996 = shalt.err (!%p16993_p7)
}
  0xe7   :  { %256 = dma.hbm_to_vmem [thread:$0]  %s17378_s12, 32, %s251_s18, [#allocation8], %s19495_s0, %s19495_s0, %s17131_s23  }
  0xe8   :  { %s16997_s27 = scalar_lea.hbm %s17388_s6, 16 }
  0xe9   :  { %p16998_p8 = scmp.ne.s32.totalorder %s17388_s6, %s16997_s27  ;;  %p17001_p9 = scmp.lt.u32.totalorder %s16997_s27, %s17388_s6 }
  0xeb   :  { %p17003_p10 = pnand %p17001_p9, %p16998_p8 }
  0xed   :  { %17006 = shalt.err (!%p17003_p10)
}
  0xee   :  { %s17007_s1 = scalar_lea.vmem %s276_s26, 16  ;;  %s17011_s2 = scalar_lea.vmem %s276_s26, 32 }
  0xef   :  { %p17008_p11 = scmp.ne.s32.totalorder %s276_s26, %s17007_s1  ;;  %p17012_p12 = scmp.lt.s32.totalorder %s276_s26, %s276_s26 }
  0xf0   :  { %p17013_p13 = scmp.lt.s32.totalorder %s17011_s2, %s17007_s1 }
  0xf2   :  { %p17014_p0 = por %p17013_p13, %p17012_p12 }
  0xf4   :  { %p17015_p1 = pnand %p17014_p0, %p17008_p11 }
  0xf6   :  { %17018 = shalt.err (!%p17015_p1)
}
  0xf7   :  { %278 = dma.hbm_to_vmem [thread:$0]  %s17388_s6, 16, %s276_s26, [#allocation11]  }
  0xf8   :  { %s17140_s12 = smov [#allocation15]   ;;  %s17141_s30 = smov [#allocation18]  }
  0xf9   :  { %s297_s23 = sshll.u32 %s17140_s12, 4  ;;  %s321_s7 = sshll.u32 %s17141_s30, 4  ;;  %s298_s23 = int_to_ptr.vmem [resolvable:$true] %s297_s23  ;;  %s322_s7 = int_to_ptr.vmem [resolvable:$true] %s321_s7 }
  0xfa   :  { %s17019_s10 = scalar_lea.hbm %s17403_s19, 16 }
  0xfb   :  { %p17020_p2 = scmp.ne.s32.totalorder %s17403_s19, %s17019_s10  ;;  %p17023_p3 = scmp.lt.u32.totalorder %s17019_s10, %s17403_s19 }
  0xfd   :  { %p17025_p4 = pnand %p17023_p3, %p17020_p2 }
  0xff   :  { %17028 = shalt.err (!%p17025_p4)
}
 0x100   :  { %s17029_s13 = scalar_lea.vmem %s298_s23, 16  ;;  %s17033_s11 = scalar_lea.vmem %s298_s23, 32 }
 0x101   :  { %p17030_p5 = scmp.ne.s32.totalorder %s298_s23, %s17029_s13  ;;  %p17034_p6 = scmp.lt.s32.totalorder %s298_s23, %s298_s23 }
 0x102   :  { %p17035_p7 = scmp.lt.s32.totalorder %s17033_s11, %s17029_s13 }
 0x104   :  { %p17036_p8 = por %p17035_p7, %p17034_p6 }
 0x106   :  { %p17037_p9 = pnand %p17036_p8, %p17030_p5 }
 0x108   :  { %17040 = shalt.err (!%p17037_p9)
}
 0x109   :  { %300 = dma.hbm_to_vmem [thread:$0]  %s17403_s19, 16, %s298_s23, [#allocation14]  }
 0x10a   :  { %s17041_s6 = scalar_lea.hbm %s17423_s14, 16 }
 0x10b   :  { %p17042_p10 = scmp.ne.s32.totalorder %s17423_s14, %s17041_s6  ;;  %p17045_p11 = scmp.lt.u32.totalorder %s17041_s6, %s17423_s14 }
 0x10d   :  { %p17047_p12 = pnand %p17045_p11, %p17042_p10 }
 0x10f   :  { %17050 = shalt.err (!%p17047_p12)
}
 0x110   :  { %s17051_s4 = scalar_lea.vmem %s322_s7, 16  ;;  %s17055_s15 = scalar_lea.vmem %s322_s7, 32 }
 0x111   :  { %p17052_p13 = scmp.ne.s32.totalorder %s322_s7, %s17051_s4  ;;  %p17056_p0 = scmp.lt.s32.totalorder %s322_s7, %s322_s7 }
 0x112   :  { %p17057_p1 = scmp.lt.s32.totalorder %s17055_s15, %s17051_s4 }
 0x114   :  { %p17058_p2 = por %p17057_p1, %p17056_p0 }
 0x116   :  { %p17059_p3 = pnand %p17058_p2, %p17052_p13 }
 0x118   :  { %17062 = shalt.err (!%p17059_p3)
}
 0x119   :  { %324 = dma.hbm_to_vmem [thread:$0]  %s17423_s14, 16, %s322_s7, [#allocation17]  }
 0x11a   :  { %17063 = dma.done.wait [#allocation3], 16  }
 0x11b   :  { %17064 = vsyncadd [#allocation3], 4294967280 }
 0x11c   :  { %17065 = dma.done.wait [#allocation5], 64  }
 0x11d   :  { %17066 = vsyncadd [#allocation5], 4294967232 }
 0x11e   :  { %17067 = dma.done.wait [#allocation8], 64  }
 0x11f   :  { %17068 = vsyncadd [#allocation8], 4294967232 }
 0x120   :  { %17069 = dma.done.wait [#allocation11], 48  }
 0x121   :  { %17070 = vsyncadd [#allocation11], 4294967248 }
 0x122   :  { %17071 = dma.done.wait [#allocation14], 32  }
 0x123   :  { %17072 = vsyncadd [#allocation14], 4294967264 }
 0x124   :  { %17073 = dma.done.wait [#allocation17], 32  }
 0x125   :  { %17074 = vsyncadd [#allocation17], 4294967264  ;;  %v17142_v0 = vmov 0.0|0.0   ;;  %v366_v1 = vld [vmem:[%s17178_s17] sm:$0xff]  ;;  %v367_v2 = vld [vmem:[%s17178_s17 + $0x8] sm:$0xff]  ;;  %vm397_vm0 = vcmask 523264  }
 0x126   :  { %15515 = vmatprep.subr.bf16.mxu0 %v17142_v0  ;;  %v368_v3 = vld [vmem:[%s17178_s17 + $0x10] sm:$0xff]  ;;  %v15516_v4 = vpack.c.bf16 %v367_v2, %v366_v1  ;;  %v369_v5 = vld [vmem:[%s17178_s17 + $0x18] sm:$0xff]  ;;  %v370_v7 = vld [vmem:[%s17178_s17 + $0x20] sm:$0xff]  ;;  %vm642_vm1 = vcmask 261120   ;;  %s19537_s14 = sld [smem:[#allocation28_spill]]  ;;  %s19538_s19 = sld [smem:[#allocation30_spill]] }
 0x127   :  { %v15519_v6 = vpack.c.bf16 %v369_v5, %v368_v3  ;;  %v371_v8 = vld [vmem:[%s17178_s17 + $0x28] sm:$0xff]  ;;  %v372_v10 = vld [vmem:[%s17178_s17 + $0x30] sm:$0xff]  ;;  %v373_v11 = vld [vmem:[%s17178_s17 + $0x38] sm:$0xff]  ;;  %vm849_vm2 = vcmask 64512   ;;  %s17143_s9 = smov 96   ;;  %vm1026_vm4 = vcmask 130048  }
 0x128   :  { %15517 = vmatpush1.bf16.msra.mxu0 %v15516_v4  ;;  %v15522_v9 = vpack.c.bf16 %v371_v8, %v370_v7  ;;  %v359_v12 = vld [vmem:[%s17163_s5 + $0x8] sm:$0xff]  ;;  %v499_v13 = vld [vmem:[%s17188_s25] sm:$0xff]  ;;  %v15525_v14 = vpack.c.bf16 %v373_v11, %v372_v10  ;;  %v501_v16 = vld [vmem:[%s17188_s25 + $0x10] sm:$0xff]  ;;  %s17144_s16 = smov 88   ;;  %s17145_s29 = smov 120   ;;  %vm2505_vm5 = vcmask 195584  }
 0x129   :  { %15518 = vmatprep.subr.bf16.mxu0 %v17142_v0  ;;  %13448 = vmatprep.mubr.msk.f32.mxu0 %vm397_vm0, %v359_v12  ;;  %v500_v15 = vld [vmem:[%s17188_s25 + $0x8] sm:$0xff]  ;;  %v502_v17 = vld [vmem:[%s17188_s25 + $0x18] sm:$0xff]  ;;  %v374_v18 = vld [vmem:[%s17178_s17 + $0x40] sm:$0xff]  ;;  %s17146_s18 = smov 80   ;;  %s17147_s22 = smov 112   ;;  %vm17153_vm6 = vmmov 0  }
 0x12a   :  { %v375_v19 = vld [vmem:[%s17178_s17 + $0x48] sm:$0xff]  ;;  %v15551_v20 = vpack.c.bf16 %v500_v15, %v499_v13  ;;  %v15555_v21 = vpack.c.bf16 %v502_v17, %v501_v16  ;;  %v376_v23 = vld [vmem:[%s17178_s17 + $0x50] sm:$0xff]  ;;  %v377_v24 = vld [vmem:[%s17178_s17 + $0x58] sm:$0xff]  ;;  %s17148_s26 = smov 72   ;;  %s17149_s28 = smov 104   ;;  %vm13329_vm7 = vcmask 48128  }
 0x12b   :  { %v15528_v22 = vpack.c.bf16 %v375_v19, %v374_v18  ;;  %v15531_v25 = vpack.c.bf16 %v377_v24, %v376_v23  ;;  %v378_v26 = vld [vmem:[%s17178_s17 + $0x60] sm:$0xff]  ;;  %v379_v27 = vld [vmem:[%s17178_s17 + $0x68] sm:$0xff]  ;;  %v380_v29 = vld [vmem:[%s17178_s17 + $0x70] sm:$0xff]  ;;  %s19541_s20 = sld [smem:[#allocation31_spill]]  ;;  %s17150_s27 = smov 8   ;;  %vm13374_vm8 = vcmask 31744  }
 0x12c   :  { %15520 = vmatpush1.bf16.msra.mxu0 %v15519_v6  ;;  %15552 = vmatprep.subr.bf16.mxu1 %v15551_v20  ;;  %v15534_v28 = vpack.c.bf16 %v379_v27, %v378_v26  ;;  %v381_v30 = vld [vmem:[%s17178_s17 + $0x78] sm:$0xff]  ;;  %v382_v32 = vld [vmem:[%s17178_s17 + $0x80] sm:$0xff]  ;;  %v383_v33 = vld [vmem:[%s17178_s17 + $0x88] sm:$0xff]  ;;  %s19493_s1 = smov 24   ;;  %s19542_s2 = sld [smem:[#allocation32_spill]] }
 0x12d   :  { %15521 = vmatprep.subr.bf16.mxu0 %v17142_v0  ;;  %15554 = vmatpush3.bf16.msra.mxu1 %v15551_v20  ;;  %v15537_v31 = vpack.c.bf16 %v381_v30, %v380_v29  ;;  %v15540_v34 = vpack.c.bf16 %v383_v33, %v382_v32  ;;  %v384_v35 = vld [vmem:[%s17178_s17 + $0x90] sm:$0xff]  ;;  %v385_v36 = vld [vmem:[%s17178_s17 + $0x98] sm:$0xff]  ;;  %v386_v38 = vld [vmem:[%s17178_s17 + $0xa0] sm:$0xff]  ;;  %s19543_s12 = sld [smem:[#allocation35_spill]]  ;;  %s19544_s23 = sld [smem:[#allocation37_spill]] }
 0x12e   :  { %15556 = vmatprep.subr.bf16.mxu1 %v15555_v21  ;;  %v15543_v37 = vpack.c.bf16 %v385_v36, %v384_v35  ;;  %v387_v39 = vld [vmem:[%s17178_s17 + $0xa8] sm:$0xff]  ;;  %v388_v41 = vld [vmem:[%s17178_s17 + $0xb0] sm:$0xff]  ;;  %v389_v42 = vld [vmem:[%s17178_s17 + $0xb8] sm:$0xff]  ;;  %s19534_s17 = sld [smem:[#allocation27_spill]]  ;;  %s19545_s30 = sld [smem:[#allocation33_spill]] }
 0x12f   :  { %v15546_v40 = vpack.c.bf16 %v387_v39, %v386_v38  ;;  %v15549_v43 = vpack.c.bf16 %v389_v42, %v388_v41  ;;  %v358_v44 = vld [vmem:[%s17163_s5] sm:$0xff]  ;;  %v361_v45 = vld [vmem:[%s17163_s5 + $0x18] sm:$0xff]  ;;  %v360_v46 = vld [vmem:[%s17163_s5 + $0x10] sm:$0xff]  ;;  %s19546_s7 = sld [smem:[#allocation34_spill]]  ;;  %s19547_s10 = sld [smem:[#allocation36_spill]] }
 0x130   :  { %15523 = vmatpush1.bf16.msra.mxu0 %v15522_v9  ;;  %v363_v47 = vld [vmem:[%s17163_s5 + $0x28] sm:$0xff]  ;;  %v362_v48 = vld [vmem:[%s17163_s5 + $0x20] sm:$0xff]  ;;  %v365_v49 = vld [vmem:[%s17163_s5 + $0x38] sm:$0xff]  ;;  %s19548_s13 = sld [smem:[#allocation38_spill]]  ;;  %s19549_s11 = sld [smem:[#allocation39_spill]] }
 0x131   :  { %15524 = vmatprep.subr.bf16.mxu0 %v17142_v0  ;;  %15558 = vmatpush3.bf16.msra.mxu1 %v15555_v21  ;;  %v364_v50 = vld [vmem:[%s17163_s5 + $0x30] sm:$0xff]  ;;  %v503_v51 = vld [vmem:[%s17188_s25 + $0x20] sm:$0xff]  ;;  %v504_v52 = vld [vmem:[%s17188_s25 + $0x28] sm:$0xff]  ;;  %s19535_s5 = sld [smem:[#allocation29_spill]]  ;;  %s19550_s6 = sld [smem:[#allocation40_spill]] }
 0x132   :  { %v15559_v53 = vpack.c.bf16 %v504_v52, %v503_v51  ;;  %v505_v54 = vld [vmem:[%s17188_s25 + $0x30] sm:$0xff]  ;;  %v506_v55 = vld [vmem:[%s17188_s25 + $0x38] sm:$0xff]  ;;  %v617_v57 = vld [vmem:[%s17198_s3] sm:$0xff]  ;;  %s19536_s25 = sld [smem:[#allocation25_spill]]  ;;  %s19552_s4 = sld [smem:[#allocation26_spill]] }
 0x133   :  { %v15563_v56 = vpack.c.bf16 %v506_v55, %v505_v54  ;;  %v618_v58 = vld [vmem:[%s17198_s3 + $0x8] sm:$0xff]  ;;  %v620_v15 = vld [vmem:[%s17198_s3 + $0x18] sm:$0xff]  ;;  %v13452_v20 = vld [vmem:[#allocation2] ss:$0 sm:$0xff]  ;;  %s19553_s15 = sld [smem:[#allocation43_spill]] }
 0x134   :  { %15526 = vmatpush1.bf16.msra.mxu0 %v15525_v14  ;;  %15560 = vmatprep.subr.bf16.mxu1 %v15559_v53  ;;  %v15567_v59 = vpack.c.bf16 %v618_v58, %v617_v57  ;;  %v13447_v60 = vld [vmem:[%s19534_s17] ss:$0 sm:$0xff]  ;;  %v619_v14 = vld [vmem:[%s17198_s3 + $0x10] sm:$0xff]  ;;  %vm17623_vm3 = vmpackc.low %vm849_vm2, %vm849_vm2  ;;  %s19554_s17 = sld [smem:[#allocation42_spill]] }
 0x135   :  { %15527 = vmatprep.subr.bf16.mxu0 %v17142_v0  ;;  %15562 = vmatpush3.bf16.msra.mxu1 %v15559_v53  ;;  %v15571_v16 = vpack.c.bf16 %v620_v15, %v619_v14 }
 0x136   :  { %15564 = vmatprep.subr.bf16.mxu1 %v15563_v56 }
 0x137   :  { %v622_v17 = vld [vmem:[%s19535_s5] sm:$0xff]  ;;  %v623_v18 = vld [vmem:[%s19535_s5 + $0x8] sm:$0xff]  ;;  %v624_v27 = vld [vmem:[%s19535_s5 + $0x10] sm:$0xff] }
 0x138   :  { %15529 = vmatpush1.bf16.msra.mxu0 %v15528_v22  ;;  %v15575_v19 = vpack.c.bf16 %v623_v18, %v622_v17  ;;  %v611_v24 = vld [vmem:[%s19536_s25] sm:$0xff]  ;;  %v613_v35 = vld [vmem:[%s19536_s25 + $0x10] sm:$0xff]  ;;  %v614_v36 = vld [vmem:[%s19536_s25 + $0x18] sm:$0xff] }
 0x139   :  { %15530 = vmatprep.subr.bf16.mxu0 %v17142_v0  ;;  %15566 = vmatpush3.bf16.msra.mxu1 %v15563_v56 }
 0x13a   :  { %15568 = vmatprep.subr.bf16.mxu1 %v15567_v59 }
 0x13c   :  { %15532 = vmatpush1.bf16.msra.mxu0 %v15531_v25  ;;  %v612_v25 = vld [vmem:[%s19536_s25 + $0x8] sm:$0xff] }
 0x13d   :  { %15533 = vmatprep.subr.bf16.mxu0 %v17142_v0 }
 0x140   :  { %15535 = vmatpush1.bf16.msra.mxu0 %v15534_v28  ;;  %v625_v28 = vld [vmem:[%s19535_s5 + $0x18] sm:$0xff] }
 0x141   :  { %15536 = vmatprep.subr.bf16.mxu0 %v17142_v0 }
 0x144   :  { %15538 = vmatpush1.bf16.msra.mxu0 %v15537_v31  ;;  %v15579_v31 = vpack.c.bf16 %v625_v28, %v624_v27 }
 0x145   :  { %15539 = vmatprep.subr.bf16.mxu0 %v17142_v0 }
 0x148   :  { %15541 = vmatpush1.bf16.msra.mxu0 %v15540_v34 }
 0x149   :  { %15542 = vmatprep.subr.bf16.mxu0 %v17142_v0 }
 0x14c   :  { %15544 = vmatpush1.bf16.msra.mxu0 %v15543_v37 }
 0x14d   :  { %15545 = vmatprep.subr.bf16.mxu0 %v17142_v0 }
 0x150   :  { %15547 = vmatpush1.bf16.msra.mxu0 %v15546_v40  ;;  %v13457_v40 = vld [vmem:[%s19537_s14] ss:$0 sm:$0xff] }
 0x151   :  { %15548 = vmatprep.subr.bf16.mxu0 %v17142_v0 }
 0x154   :  { %15550 = vmatpush1.bf16.msra.mxu0 %v15549_v43 }
 0x157   :  { %475 = vmatmul.mubr.f32.vlgmr.msra.gmra.mrb[0].mxu0 %v358_v44 }
 0x158   :  { %13449 = vmatprep.mubr.msk.f32.mxu0 %vm397_vm0, %v361_v45 }
 0x15b   :  { %480 = vmatmul.mubr.f32.gmra.mrb[2].mxu0 %v360_v46 }
 0x15c   :  { %13450 = vmatprep.mubr.msk.f32.mxu0 %vm397_vm0, %v363_v47 }
 0x15f   :  { %485 = vmatmul.mubr.f32.gmra.mrb[4].mxu0 %v362_v48 }
 0x160   :  { %13451 = vmatprep.mubr.msk.f32.mxu0 %vm397_vm0, %v365_v49 }
 0x163   :  { %490 = vmatmul.mubr.f32.gmra.mrb[6].mxu0 %v364_v50  ;;  %v13462_v50 = vld [vmem:[%s19538_s19] ss:$0 sm:$0xff] }
 0x22a   :  { %v476_v61 = vpop.f32.mrb[0].mxu0 }
 0x22b   :  { %v477_v62 = vadd.f32 %v13447_v60, %v476_v61  ;;  %v478_v63 = vpop.f32.mrb[1].mxu0 }
 0x22d   :  { %v495_v1 = vmax.f32 %v477_v62, 0.0 }
 0x22e   :  { %v481_v2 = vpop.f32.mrb[2].mxu0 }
 0x22f   :  { %v482_v3 = vadd.f32 %v13447_v60, %v481_v2  ;;  %v483_v4 = vpop.f32.mrb[3].mxu0  ;;  %14461 = vmatprep.mubr.msk.f32.mxu1 %vm397_vm0, %v495_v1 }
 0x231   :  { %v496_v5 = vmax.f32 %v482_v3, 0.0 }
 0x232   :  { %v486_v6 = vpop.f32.mrb[4].mxu0 }
 0x233   :  { %v487_v7 = vadd.f32 %v13447_v60, %v486_v6  ;;  %v488_v8 = vpop.f32.mrb[5].mxu0  ;;  %14462 = vmatmul.mubr.msk.f32.vlgmr.msra.gmra.mrb[0].mxu1 %vm397_vm0, %v496_v5 }
 0x234   :  { %15570 = vmatpush3.bf16.msra.mxu1 %v15567_v59 }
 0x235   :  { %v497_v9 = vmax.f32 %v487_v7, 0.0  ;;  %15572 = vmatprep.subr.bf16.mxu1 %v15571_v16 }
 0x236   :  { %v491_v10 = vpop.f32.mrb[6].mxu0 }
 0x237   :  { %v492_v11 = vadd.f32 %v13447_v60, %v491_v10  ;;  %v493_v12 = vpop.f32.mrb[7].mxu0  ;;  %14464 = vmatprep.mubr.msk.f32.mxu1 %vm397_vm0, %v497_v9 }
 0x238   :  { %15574 = vmatpush3.bf16.msra.mxu1 %v15571_v16 }
 0x239   :  { %v498_v13 = vmax.f32 %v492_v11, 0.0  ;;  %15576 = vmatprep.subr.bf16.mxu1 %v15575_v19 }
 0x23b   :  { %14465 = vmatmul.mubr.msk.f32.gmra.mrb[2].mxu1 %vm397_vm0, %v498_v13 }
 0x306   :  { %v14463_v21 = vpop.f32.mrb[0].mxu1 }
 0x307   :  { %v17561_v22 = vadd.f32 %v14463_v21, %v13452_v20  ;;  %v592_v23 = vpop.f32.mrb[1].mxu1 }
 0x308   :  { %v17565_v26 = vadd.f32 %v13452_v20, %v592_v23 }
 0x309   :  { %v633_v30 = vadd.f32 %v612_v25, %v17561_v22 }
 0x30a   :  { %v632_v29 = vadd.f32 %v611_v24, %v17565_v26 }
 0x30c   :  { %14475 = vmatprep.mubr.msk.f32.mxu1 %vm642_vm1, %v632_v29 }
 0x30d   :  { %14476 = vmatmul.mubr.msk.f32.vlgmr.msra.gmra.mrb[4].mxu1 %vm642_vm1, %v633_v30 }
 0x30e   :  { %v14466_v32 = vpop.f32.mrb[2].mxu1  ;;  %15578 = vmatpush3.bf16.msra.mxu1 %v15575_v19 }
 0x30f   :  { %v17573_v33 = vadd.f32 %v14466_v32, %v13452_v20  ;;  %v602_v34 = vpop.f32.mrb[3].mxu1  ;;  %15580 = vmatprep.subr.bf16.mxu1 %v15579_v31 }
 0x310   :  { %v17577_v37 = vadd.f32 %v13452_v20, %v602_v34 }
 0x311   :  { %v635_v39 = vadd.f32 %v614_v36, %v17573_v33 }
 0x312   :  { %v634_v38 = vadd.f32 %v613_v35, %v17577_v37  ;;  %15582 = vmatpush3.bf16.msra.mxu1 %v15579_v31 }
 0x314   :  { %14478 = vmatprep.mubr.msk.f32.mxu1 %vm642_vm1, %v634_v38 }
 0x315   :  { %14479 = vmatmul.mubr.msk.f32.gmra.mrb[6].mxu1 %vm642_vm1, %v635_v39 }
 0x316   :  { %14489 = vmatprep.mubr.msk.f32.mxu1 %vm642_vm1, %v17565_v26 }
 0x319   :  { %14490 = vmatmul.mubr.msk.f32.vlgmr.msra.gmra.mrb[8].mxu1 %vm642_vm1, %v17561_v22 }
 0x31a   :  { %14492 = vmatprep.mubr.msk.f32.mxu1 %vm642_vm1, %v17577_v37 }
 0x31d   :  { %14493 = vmatmul.mubr.msk.f32.gmra.mrb[10].mxu1 %vm642_vm1, %v17573_v33 }
 0x3e0   :  { %v14477_v41 = vpop.f32.mrb[4].mxu1 }
 0x3e1   :  { %v17592_v42 = vadd.f32 %v14477_v41, %v13457_v40  ;;  %v721_v43 = vpop.f32.mrb[5].mxu1 }
 0x3e2   :  { %v17594_v44 = vadd.f32 %v13457_v40, %v721_v43 }
 0x3e4   :  { %14499 = vmatprep.mubr.msk.f32.mxu1 %vm849_vm2, %v17594_v44  ;;  %v17600_v45 = vpack.i.bf16 %v17592_v42, %v17594_v44 }
 0x3e6   :  { %16216 = vrot.lane.b32.xlu0 %v17600_v45, %s17143_s9 }
 0x3e8   :  { %v14480_v46 = vpop.f32.mrb[6].mxu1 }
 0x3e9   :  { %v17604_v47 = vadd.f32 %v14480_v46, %v13457_v40  ;;  %v731_v48 = vpop.f32.mrb[7].mxu1 }
 0x3ea   :  { %v17606_v49 = vadd.f32 %v13457_v40, %v731_v48 }
 0x3ec   :  { %v14491_v51 = vpop.f32.mrb[8].mxu1  ;;  %v17611_v52 = vpack.i.bf16 %v17604_v47, %v17606_v49 }
 0x3ed   :  { %v830_v53 = vadd.f32 %v14491_v51, %v13462_v50  ;;  %v824_v54 = vpop.f32.mrb[9].mxu1 }
 0x3ee   :  { %v825_v55 = vadd.f32 %v13462_v50, %v824_v54  ;;  %16221 = vrot.lane.b32.xlu0 %v17611_v52, %s17143_s9 }
 0x3f0   :  { %v14494_v56 = vpop.f32.mrb[10].mxu1  ;;  %v15595_v57 = vpack.c.bf16 %v830_v53, %v825_v55  ;;  %v17615_v58 = vpack.i.bf16 %v830_v53, %v825_v55 }
 0x3f1   :  { %v840_v59 = vadd.f32 %v14494_v56, %v13462_v50  ;;  %v834_v60 = vpop.f32.mrb[11].mxu1 }
 0x3f2   :  { %v835_v61 = vadd.f32 %v13462_v50, %v834_v60 }
 0x3f4   :  { %v17617_v62 = vpack.c.bf16 %v840_v59, %v835_v61  ;;  %v17619_v63 = vpack.i.bf16 %v840_v59, %v835_v61 }
 0x458   :  { %v16217_v1 = vpop.permute.xlu0 %16216 }
 0x459   :  { %v16219_v2 = vunpack.i.h.bf16 %v16217_v1  ;;  %v16218_v3 = vunpack.i.l.bf16 %v16217_v1 }
 0x45b   :  { %v15583_v5 = vpack.c.bf16 %v16219_v2, %v16218_v3 }
 0x45d   :  { %15585 = vmatprep.subr.msk.bf16.mxu1 %vm17623_vm3, %v15583_v5 }
 0x45e   :  { %15588 = vmatpush3.bf16.xpose.msk.msra.mxu1 %vm17623_vm3, %v15583_v5 }
 0x460   :  { %v16222_v6 = vpop.permute.xlu0 %16221 }
 0x461   :  { %v16224_v7 = vunpack.i.h.bf16 %v16222_v6  ;;  %v16223_v8 = vunpack.i.l.bf16 %v16222_v6 }
 0x463   :  { %v15589_v9 = vpack.c.bf16 %v16224_v7, %v16223_v8 }
 0x465   :  { %14500 = vmatmul.mubr.msk.f32.vlgmr.msra.gmra.mrb[12].mxu1 %vm849_vm2, %v17592_v42  ;;  %15591 = vmatprep.subr.msk.bf16.mxu1 %vm17623_vm3, %v15589_v9 }
 0x466   :  { %15594 = vmatpush3.bf16.xpose.msk.msra.mxu1 %vm17623_vm3, %v15589_v9  ;;  %14506 = vmatprep.mubr.msk.f32.mxu1 %vm849_vm2, %v17606_v49 }
 0x467   :  { %15596 = vmatprep.subr.bf16.mxu1 %v15595_v57 }
 0x46d   :  { %14507 = vmatmul.mubr.msk.f32.vlgmr.msra.gmra.mrb[14].mxu1 %vm849_vm2, %v17604_v47 }
 0x46e   :  { %15598 = vmatpush3.bf16.msra.mxu1 %v15595_v57 }
 0x46f   :  { %15600 = vmatprep.subr.bf16.mxu1 %v17617_v62 }
 0x538   :  { %v14501_v10 = vpop.f32.mrb[12].mxu1 }
 0x539   :  { %v1023_v11 = vmul.f32 0.35355338, %v14501_v10  ;;  %v924_v12 = vpop.f32.mrb[13].mxu1 }
 0x53a   :  { %v1022_v13 = vmul.f32 0.35355338, %v924_v12 }
 0x53b   :  { %v1030_v14 = vsel %vm1026_vm4, %v1023_v11, -inf }
 0x53c   :  { %1031 = vmax.xlane.f32.xlu1 %v1030_v14  ;;  %v1027_v15 = vsel %vm1026_vm4, %v1022_v13, -inf }
 0x540   :  { %1028 = vmax.xlane.f32.xlu1 %v1027_v15  ;;  %v14508_v16 = vpop.f32.mrb[14].mxu1 }
 0x541   :  { %v1025_v17 = vmul.f32 0.35355338, %v14508_v16  ;;  %v1013_v18 = vpop.f32.mrb[15].mxu1 }
 0x542   :  { %v1024_v19 = vmul.f32 0.35355338, %v1013_v18 }
 0x543   :  { %v1036_v20 = vsel %vm1026_vm4, %v1025_v17, -inf }
 0x544   :  { %1037 = vmax.xlane.f32.xlu1 %v1036_v20  ;;  %v1033_v21 = vsel %vm1026_vm4, %v1024_v19, -inf }
 0x545   :  { %1034 = vmax.xlane.f32.xlu0 %v1033_v21 }
 0x555   :  { %16226 = vrot.lane.b32.xlu1 %v17600_v45, %s17144_s16 }
 0x559   :  { %16231 = vrot.lane.b32.xlu1 %v17611_v52, %s17144_s16 }
 0x55b   :  { %1324 = vrot.lane.b32.xlu0 %v17606_v49, %s17145_s29 }
 0x55d   :  { %1233 = vrot.lane.b32.xlu1 %v17594_v44, %s17145_s29 }
 0x561   :  { %1235 = vrot.lane.b32.xlu1 %v17592_v42, %s17145_s29 }
 0x565   :  { %1326 = vrot.lane.b32.xlu1 %v17604_v47, %s17145_s29 }
 0x5c9   :  { %v1032_v23 = vpop.xlane.xlu1 %1031 }
 0x5ca   :  { %v1040_v24 = vsub.f32 %v1023_v11, %v1032_v23 }
 0x5cc   :  { %v1045_v28 = vmul.f32 1.442695, %v1040_v24 }
 0x5cd   :  { %v1029_v25 = vpop.xlane.xlu1 %1028 }
 0x5ce   :  { %v1039_v27 = vsub.f32 %v1022_v13, %v1029_v25 }
 0x5d0   :  { %v1043_v29 = vmul.f32 1.442695, %v1039_v27 }
 0x5d1   :  { %v1038_v30 = vpop.xlane.xlu1 %1037 }
 0x5d2   :  { %16475 = vpow2.f32 %v1043_v29  ;;  %v1042_v31 = vsub.f32 %v1025_v17, %v1038_v30  ;;  %v1035_v32 = vpop.xlane.xlu0 %1034 }
 0x5d3   :  { %16477 = vpow2.f32 %v1045_v28  ;;  %v1041_v34 = vsub.f32 %v1024_v19, %v1035_v32 }
 0x5d4   :  { %v1049_v35 = vmul.f32 1.442695, %v1042_v31 }
 0x5d5   :  { %v1047_v36 = vmul.f32 1.442695, %v1041_v34  ;;  %v16227_v38 = vpop.permute.xlu1 %16226 }
 0x5d6   :  { %v16229_v39 = vunpack.i.h.bf16 %v16227_v38  ;;  %v16228_v40 = vunpack.i.l.bf16 %v16227_v38  ;;  %v1325_v59 = vpop.permute.xlu0 %1324 }
 0x5d7   :  { %16479 = vpow2.f32 %v1047_v36 }
 0x5d8   :  { %16481 = vpow2.f32 %v1049_v35  ;;  %v15603_v41 = vpack.c.bf16 %v16229_v39, %v16228_v40 }
 0x5d9   :  { %v16232_v43 = vpop.permute.xlu1 %16231 }
 0x5da   :  { %v16234_v46 = vunpack.i.h.bf16 %v16232_v43  ;;  %v16233_v48 = vunpack.i.l.bf16 %v16232_v43  ;;  %15605 = vmatprep.subr.msk.bf16.mxu0 %vm17623_vm3, %v15603_v41 }
 0x5db   :  { %15608 = vmatpush3.bf16.xpose.msk.msra.mxu0 %vm17623_vm3, %v15603_v41 }
 0x5dc   :  { %v17662_v50 = vpop.eup %16475  ;;  %v15609_v51 = vpack.c.bf16 %v16234_v46, %v16233_v48 }
 0x5dd   :  { %v17664_v53 = vpop.eup %16477  ;;  %14513 = vmatprep.mubr.msk.f32.mxu1 %vm1026_vm4, %v17662_v50  ;;  %v1234_v54 = vpop.permute.xlu1 %1233 }
 0x5de   :  { %14514 = vmatmul.mubr.msk.f32.vlgmr.msra.gmra.mrb[16].mxu1 %vm1026_vm4, %v17664_v53  ;;  %14527 = vmatprep.mubr.msk.f32.mxu0 %vm849_vm2, %v1234_v54 }
 0x5df   :  { %15602 = vmatpush3.bf16.msra.mxu1 %v17617_v62 }
 0x5e0   :  { %15611 = vmatprep.subr.msk.bf16.mxu1 %vm17623_vm3, %v15609_v51 }
 0x5e1   :  { %v17674_v55 = vpop.eup %16479  ;;  %v1236_v56 = vpop.permute.xlu1 %1235 }
 0x5e2   :  { %v17676_v57 = vpop.eup %16481  ;;  %14520 = vmatprep.mubr.msk.f32.mxu1 %vm1026_vm4, %v17674_v55  ;;  %14528 = vmatmul.mubr.msk.f32.vlgmr.msra.gmra.mrb[8].mxu0 %vm849_vm2, %v1236_v56 }
 0x5e3   :  { %14521 = vmatmul.mubr.msk.f32.vlgmr.msra.gmra.mrb[18].mxu1 %vm1026_vm4, %v17676_v57 }
 0x5e4   :  { %14534 = vmatprep.mubr.msk.f32.mxu1 %vm849_vm2, %v1325_v59 }
 0x5e5   :  { %v1327_v60 = vpop.permute.xlu1 %1326 }
 0x5e8   :  { %15614 = vmatpush3.bf16.xpose.msk.msra.mxu1 %vm17623_vm3, %v15609_v51 }
 0x5ef   :  { %14535 = vmatmul.mubr.msk.f32.vlgmr.msra.gmra.mrb[20].mxu1 %vm849_vm2, %v1327_v60 }
 0x6b1   :  { %v17687_v61 = vpop.f32.mrb[16].mxu1 }
 0x6b2   :  { %v17689_v62 = vpop.f32.mrb[17].mxu1 }
 0x6b5   :  { %v14529_v1 = vpop.f32.mrb[8].mxu0 }
 0x6b6   :  { %v1416_v2 = vmul.f32 0.35355338, %v14529_v1  ;;  %v17691_v3 = vpop.f32.mrb[18].mxu1  ;;  %v1315_v5 = vpop.f32.mrb[9].mxu0 }
 0x6b7   :  { %v1415_v6 = vmul.f32 0.35355338, %v1315_v5  ;;  %v17693_v7 = vpop.f32.mrb[19].mxu1 }
 0x6b8   :  { %v1422_v8 = vsel %vm1026_vm4, %v1416_v2, -inf }
 0x6b9   :  { %1423 = vmax.xlane.f32.xlu0 %v1422_v8  ;;  %v1419_v9 = vsel %vm1026_vm4, %v1415_v6, -inf }
 0x6ba   :  { %1420 = vmax.xlane.f32.xlu1 %v1419_v9 }
 0x6c2   :  { %v14536_v10 = vpop.f32.mrb[20].mxu1 }
 0x6c3   :  { %v1406_v11 = vpop.f32.mrb[21].mxu1  ;;  %v1418_v12 = vmul.f32 0.35355338, %v14536_v10 }
 0x6c4   :  { %v1417_v13 = vmul.f32 0.35355338, %v1406_v11 }
 0x6c5   :  { %v1428_v14 = vsel %vm1026_vm4, %v1418_v12, -inf }
 0x6c6   :  { %v1425_v15 = vsel %vm1026_vm4, %v1417_v13, -inf }
 0x6cb   :  { %16236 = vrot.lane.b32.xlu1 %v17615_v58, %s17145_s29 }
 0x6cf   :  { %16246 = vrot.lane.b32.xlu1 %v17600_v45, %s17146_s18  ;;  %16241 = vrot.lane.b32.xlu0 %v17619_v63, %s17145_s29 }
 0x6d3   :  { %16251 = vrot.lane.b32.xlu1 %v17611_v52, %s17146_s18  ;;  %1641 = vrot.lane.b32.xlu0 %v17594_v44, %s17147_s22 }
 0x6d7   :  { %1732 = vrot.lane.b32.xlu0 %v17606_v49, %s17147_s22 }
 0x6f7   :  { %1429 = vmax.xlane.f32.xlu1 %v1428_v14 }
 0x6fb   :  { %1426 = vmax.xlane.f32.xlu1 %v1425_v15 }
 0x70c   :  { %1643 = vrot.lane.b32.xlu1 %v17592_v42, %s17147_s22 }
 0x710   :  { %1734 = vrot.lane.b32.xlu1 %v17604_v47, %s17147_s22 }
 0x746   :  { %v1424_v16 = vpop.xlane.xlu0 %1423 }
 0x747   :  { %v1432_v17 = vsub.f32 %v1416_v2, %v1424_v16  ;;  %v1421_v18 = vpop.xlane.xlu1 %1420 }
 0x748   :  { %v1431_v19 = vsub.f32 %v1415_v6, %v1421_v18 }
 0x749   :  { %v1437_v20 = vmul.f32 1.442695, %v1432_v17 }
 0x74a   :  { %v1435_v21 = vmul.f32 1.442695, %v1431_v19  ;;  %v16242_v23 = vpop.permute.xlu0 %16241 }
 0x74b   :  { %v16244_v24 = vunpack.i.h.bf16 %v16242_v23  ;;  %v16243_v25 = vunpack.i.l.bf16 %v16242_v23  ;;  %v16237_v27 = vpop.permute.xlu1 %16236 }
 0x74c   :  { %16483 = vpow2.f32 %v1435_v21  ;;  %v16239_v28 = vunpack.i.h.bf16 %v16237_v27  ;;  %v16238_v29 = vunpack.i.l.bf16 %v16237_v27 }
 0x74d   :  { %16485 = vpow2.f32 %v1437_v20  ;;  %v15619_v30 = vpack.c.bf16 %v16244_v24, %v16243_v25 }
 0x74e   :  { %v15615_v31 = vpack.c.bf16 %v16239_v28, %v16238_v29  ;;  %v1642_v48 = vpop.permute.xlu0 %1641 }
 0x74f   :  { %v16247_v32 = vpop.permute.xlu1 %16246  ;;  %15620 = vmatprep.subr.bf16.mxu1 %v15619_v30 }
 0x750   :  { %v16249_v34 = vunpack.i.h.bf16 %v16247_v32  ;;  %v16248_v35 = vunpack.i.l.bf16 %v16247_v32  ;;  %15616 = vmatprep.subr.bf16.mxu0 %v15615_v31  ;;  %15622 = vmatpush3.bf16.msra.mxu1 %v15619_v30 }
 0x751   :  { %15618 = vmatpush3.bf16.msra.mxu0 %v15615_v31 }
 0x752   :  { %v15623_v36 = vpack.c.bf16 %v16249_v34, %v16248_v35  ;;  %v1733_v8 = vpop.permute.xlu0 %1732 }
 0x753   :  { %v16252_v38 = vpop.permute.xlu1 %16251 }
 0x754   :  { %v16254_v39 = vunpack.i.h.bf16 %v16252_v38  ;;  %v16253_v40 = vunpack.i.l.bf16 %v16252_v38  ;;  %15625 = vmatprep.subr.msk.bf16.mxu0 %vm17623_vm3, %v15623_v36 }
 0x756   :  { %v17717_v41 = vpop.eup %16483  ;;  %v15629_v43 = vpack.c.bf16 %v16254_v39, %v16253_v40 }
 0x757   :  { %v17719_v46 = vpop.eup %16485  ;;  %14541 = vmatprep.mubr.msk.f32.mxu0 %vm1026_vm4, %v17717_v41 }
 0x758   :  { %14542 = vmatmul.mubr.msk.f32.vlgmr.msra.gmra.mrb[10].mxu0 %vm1026_vm4, %v17719_v46  ;;  %15631 = vmatprep.subr.msk.bf16.mxu1 %vm17623_vm3, %v15629_v43 }
 0x759   :  { %14555 = vmatprep.mubr.msk.f32.mxu0 %vm849_vm2, %v1642_v48 }
 0x75a   :  { %15628 = vmatpush3.bf16.xpose.msk.msra.mxu0 %vm17623_vm3, %v15623_v36 }
 0x784   :  { %v1430_v51 = vpop.xlane.xlu1 %1429 }
 0x785   :  { %v1434_v54 = vsub.f32 %v1418_v12, %v1430_v51 }
 0x787   :  { %v1441_v60 = vmul.f32 1.442695, %v1434_v54 }
 0x788   :  { %v1427_v56 = vpop.xlane.xlu1 %1426 }
 0x789   :  { %v1433_v59 = vsub.f32 %v1417_v13, %v1427_v56 }
 0x78b   :  { %v1439_v1 = vmul.f32 1.442695, %v1433_v59 }
 0x78c   :  { %v1644_v2 = vpop.permute.xlu1 %1643 }
 0x78d   :  { %16487 = vpow2.f32 %v1439_v1  ;;  %14556 = vmatmul.mubr.msk.f32.vlgmr.msra.gmra.mrb[12].mxu0 %vm849_vm2, %v1644_v2 }
 0x78e   :  { %16489 = vpow2.f32 %v1441_v60 }
 0x790   :  { %v1735_v9 = vpop.permute.xlu1 %1734 }
 0x797   :  { %v17731_v5 = vpop.eup %16487 }
 0x798   :  { %v17733_v6 = vpop.eup %16489  ;;  %14548 = vmatprep.mubr.msk.f32.mxu1 %vm1026_vm4, %v17731_v5 }
 0x799   :  { %14549 = vmatmul.mubr.msk.f32.vlgmr.msra.gmra.mrb[22].mxu1 %vm1026_vm4, %v17733_v6 }
 0x79a   :  { %15634 = vmatpush3.bf16.xpose.msk.msra.mxu1 %vm17623_vm3, %v15629_v43  ;;  %14562 = vmatprep.mubr.msk.f32.mxu1 %vm849_vm2, %v1733_v8 }
 0x7a1   :  { %14563 = vmatmul.mubr.msk.f32.vlgmr.msra.gmra.mrb[24].mxu1 %vm849_vm2, %v1735_v9 }
 0x82b   :  { %v17743_v10 = vpop.f32.mrb[10].mxu0 }
 0x82c   :  { %v17745_v11 = vpop.f32.mrb[11].mxu0 }
 0x860   :  { %v14557_v12 = vpop.f32.mrb[12].mxu0 }
 0x861   :  { %v1824_v13 = vmul.f32 0.35355338, %v14557_v12  ;;  %v1723_v14 = vpop.f32.mrb[13].mxu0 }
 0x862   :  { %v1823_v15 = vmul.f32 0.35355338, %v1723_v14 }
 0x863   :  { %v1830_v16 = vsel %vm1026_vm4, %v1824_v13, -inf }
 0x864   :  { %1831 = vmax.xlane.f32.xlu1 %v1830_v16  ;;  %v1827_v17 = vsel %vm1026_vm4, %v1823_v15, -inf }
 0x865   :  { %1828 = vmax.xlane.f32.xlu0 %v1827_v17 }
 0x86c   :  { %v17749_v18 = vpop.f32.mrb[22].mxu1 }
 0x86d   :  { %v17751_v19 = vpop.f32.mrb[23].mxu1 }
 0x874   :  { %v14564_v20 = vpop.f32.mrb[24].mxu1 }
 0x875   :  { %v1826_v21 = vmul.f32 0.35355338, %v14564_v20  ;;  %v1814_v23 = vpop.f32.mrb[25].mxu1  ;;  %16256 = vrot.lane.b32.xlu1 %v17615_v58, %s17147_s22 }
 0x876   :  { %v1825_v24 = vmul.f32 0.35355338, %v1814_v23 }
 0x877   :  { %v1836_v25 = vsel %vm1026_vm4, %v1826_v21, -inf }
 0x878   :  { %1837 = vmax.xlane.f32.xlu0 %v1836_v25  ;;  %v1833_v27 = vsel %vm1026_vm4, %v1825_v24, -inf }
 0x879   :  { %16266 = vrot.lane.b32.xlu1 %v17600_v45, %s17148_s26 }
 0x87c   :  { %1834 = vmax.xlane.f32.xlu0 %v1833_v27 }
 0x87d   :  { %16271 = vrot.lane.b32.xlu1 %v17611_v52, %s17148_s26 }
 0x881   :  { %2047 = vrot.lane.b32.xlu1 %v17592_v42, %s17149_s28 }
 0x885   :  { %2138 = vrot.lane.b32.xlu1 %v17604_v47, %s17149_s28 }
 0x892   :  { %16261 = vrot.lane.b32.xlu0 %v17619_v63, %s17147_s22 }
 0x896   :  { %2045 = vrot.lane.b32.xlu0 %v17594_v44, %s17149_s28 }
 0x89a   :  { %2136 = vrot.lane.b32.xlu0 %v17606_v49, %s17149_s28 }
 0x8f1   :  { %v1832_v45 = vpop.xlane.xlu1 %1831 }
 0x8f2   :  { %v1840_v28 = vsub.f32 %v1824_v13, %v1832_v45  ;;  %v1829_v29 = vpop.xlane.xlu0 %1828 }
 0x8f3   :  { %v1839_v52 = vsub.f32 %v1823_v15, %v1829_v29 }
 0x8f4   :  { %v1845_v30 = vmul.f32 1.442695, %v1840_v28 }
 0x8f5   :  { %v1843_v31 = vmul.f32 1.442695, %v1839_v52  ;;  %v16257_v32 = vpop.permute.xlu1 %16256 }
 0x8f6   :  { %v16259_v42 = vunpack.i.h.bf16 %v16257_v32  ;;  %v16258_v34 = vunpack.i.l.bf16 %v16257_v32 }
 0x8f7   :  { %16491 = vpow2.f32 %v1843_v31 }
 0x8f8   :  { %16493 = vpow2.f32 %v1845_v30  ;;  %v15635_v47 = vpack.c.bf16 %v16259_v42, %v16258_v34 }
 0x8f9   :  { %v16267_v35 = vpop.permute.xlu1 %16266 }
 0x8fa   :  { %v16269_v36 = vunpack.i.h.bf16 %v16267_v35  ;;  %v16268_v38 = vunpack.i.l.bf16 %v16267_v35  ;;  %15636 = vmatprep.subr.bf16.mxu0 %v15635_v47 }
 0x8fb   :  { %15638 = vmatpush3.bf16.msra.mxu0 %v15635_v47 }
 0x8fc   :  { %v15643_v44 = vpack.c.bf16 %v16269_v36, %v16268_v38  ;;  %v1443_v38 = vsel %vm1026_vm4, %v17717_v41, 0.0 }
 0x8fd   :  { %v16272_v51 = vpop.permute.xlu1 %16271 }
 0x8fe   :  { %15645 = vmatprep.subr.msk.bf16.mxu0 %vm17623_vm3, %v15643_v44  ;;  %v16274_v60 = vunpack.i.h.bf16 %v16272_v51  ;;  %v16273_v2 = vunpack.i.l.bf16 %v16272_v51 }
 0x900   :  { %v15649_v14 = vpack.c.bf16 %v16274_v60, %v16273_v2 }
 0x901   :  { %v16492_v49 = vpop.eup %16491  ;;  %v2048_v15 = vpop.permute.xlu1 %2047 }
 0x902   :  { %v17773_v39 = vpop.eup %16493  ;;  %14569 = vmatprep.mubr.msk.f32.mxu0 %vm1026_vm4, %v16492_v49 }
 0x903   :  { %14570 = vmatmul.mubr.msk.f32.vlgmr.msra.gmra.mrb[14].mxu0 %vm1026_vm4, %v17773_v39 }
 0x904   :  { %15648 = vmatpush3.bf16.xpose.msk.msra.mxu0 %vm17623_vm3, %v15643_v44  ;;  %v1851_v44 = vsel %vm1026_vm4, %v16492_v49, 0.0 }
 0x905   :  { %v1838_v40 = vpop.xlane.xlu0 %1837 }
 0x906   :  { %v1842_v43 = vsub.f32 %v1826_v21, %v1838_v40  ;;  %v2139_v21 = vpop.permute.xlu1 %2138  ;;  %v1446_v40 = vsel %vm1026_vm4, %v17719_v46, 0.0 }
 0x908   :  { %v1849_v56 = vmul.f32 1.442695, %v1842_v43 }
 0x909   :  { %v1835_v48 = vpop.xlane.xlu0 %1834 }
 0x90a   :  { %v1841_v54 = vsub.f32 %v1825_v24, %v1835_v48 }
 0x90c   :  { %v1847_v59 = vmul.f32 1.442695, %v1841_v54 }
 0x90d   :  { %v16262_v1 = vpop.permute.xlu0 %16261 }
 0x90e   :  { %16495 = vpow2.f32 %v1847_v59  ;;  %v16264_v8 = vunpack.i.h.bf16 %v16262_v1  ;;  %v16263_v9 = vunpack.i.l.bf16 %v16262_v1 }
 0x90f   :  { %16497 = vpow2.f32 %v1849_v56 }
 0x910   :  { %v15639_v12 = vpack.c.bf16 %v16264_v8, %v16263_v9 }
 0x911   :  { %v2046_v13 = vpop.permute.xlu0 %2045 }
 0x912   :  { %15640 = vmatprep.subr.bf16.mxu1 %v15639_v12  ;;  %14583 = vmatprep.mubr.msk.f32.mxu0 %vm849_vm2, %v2046_v13 }
 0x913   :  { %15642 = vmatpush3.bf16.msra.mxu1 %v15639_v12  ;;  %14584 = vmatmul.mubr.msk.f32.vlgmr.msra.gmra.mrb[16].mxu0 %vm849_vm2, %v2048_v15 }
 0x914   :  { %15651 = vmatprep.subr.msk.bf16.mxu1 %vm17623_vm3, %v15649_v14 }
 0x915   :  { %v2137_v20 = vpop.permute.xlu0 %2136 }
 0x918   :  { %v17784_v16 = vpop.eup %16495 }
 0x919   :  { %v17786_v17 = vpop.eup %16497  ;;  %14576 = vmatprep.mubr.msk.f32.mxu1 %vm1026_vm4, %v17784_v16 }
 0x91a   :  { %14577 = vmatmul.mubr.msk.f32.vlgmr.msra.gmra.mrb[26].mxu1 %vm1026_vm4, %v17786_v17 }
 0x91b   :  { %14590 = vmatprep.mubr.msk.f32.mxu1 %vm849_vm2, %v2137_v20  ;;  %v1449_v20 = vsel %vm1026_vm4, %v17731_v5, 0.0 }
 0x91c   :  { %15654 = vmatpush3.bf16.xpose.msk.msra.mxu1 %vm17623_vm3, %v15649_v14  ;;  %v1452_v14 = vsel %vm1026_vm4, %v17733_v6, 0.0 }
 0x923   :  { %14591 = vmatmul.mubr.msk.f32.vlgmr.msra.gmra.mrb[28].mxu1 %vm849_vm2, %v2139_v21 }
 0x9d6   :  { %v17796_v23 = vpop.f32.mrb[14].mxu0 }
 0x9d7   :  { %v17798_v24 = vpop.f32.mrb[15].mxu0 }
 0x9e6   :  { %v14585_v25 = vpop.f32.mrb[16].mxu0 }
 0x9e7   :  { %v2228_v27 = vmul.f32 0.35355338, %v14585_v25  ;;  %v2127_v45 = vpop.f32.mrb[17].mxu0 }
 0x9e8   :  { %v2227_v28 = vmul.f32 0.35355338, %v2127_v45 }
 0x9e9   :  { %v2234_v29 = vsel %vm1026_vm4, %v2228_v27, -inf }
 0x9ea   :  { %2235 = vmax.xlane.f32.xlu1 %v2234_v29  ;;  %v2231_v52 = vsel %vm1026_vm4, %v2227_v28, -inf  ;;  %v1857_v29 = vsel %vm1026_vm4, %v17784_v16, 0.0  ;;  %v1060_v16 = vsel %vm1026_vm4, %v17676_v57, 0.0 }
 0x9eb   :  { %2232 = vmax.xlane.f32.xlu0 %v2231_v52 }
 0x9ed   :  { %v17802_v30 = vpop.f32.mrb[26].mxu1 }
 0x9ee   :  { %v17804_v31 = vpop.f32.mrb[27].mxu1 }
 0x9f6   :  { %v14592_v32 = vpop.f32.mrb[28].mxu1 }
 0x9f7   :  { %v2230_v42 = vmul.f32 0.35355338, %v14592_v32  ;;  %v2218_v34 = vpop.f32.mrb[29].mxu1 }
 0x9f8   :  { %v2229_v47 = vmul.f32 0.35355338, %v2218_v34  ;;  %v1051_v34 = vsel %vm1026_vm4, %v17662_v50, 0.0 }
 0x9f9   :  { %v2240_v35 = vsel %vm1026_vm4, %v2230_v42, -inf }
 0x9fa   :  { %2241 = vmax.xlane.f32.xlu0 %v2240_v35  ;;  %v2237_v36 = vsel %vm1026_vm4, %v2229_v47, -inf }
 0x9fb   :  { %16276 = vrot.lane.b32.xlu1 %v17615_v58, %s17149_s28  ;;  %v1854_v58 = vsel %vm1026_vm4, %v17773_v39, 0.0 }
 0x9fe   :  { %2238 = vmax.xlane.f32.xlu0 %v2237_v36 }
 0xa14   :  { %16281 = vrot.lane.b32.xlu0 %v17619_v63, %s17149_s28 }
 0xa1f   :  { %1444 = vadd.xlane.f32.xlu1 %v1443_v38 }
 0xa23   :  { %1852 = vadd.xlane.f32.xlu1 %v1851_v44 }
 0xa33   :  { %1447 = vadd.xlane.f32.xlu0 %v1446_v40 }
 0xa37   :  { %1855 = vadd.xlane.f32.xlu0 %v1854_v58 }
 0xa77   :  { %v2236_v43 = vpop.xlane.xlu1 %2235 }
 0xa78   :  { %v2244_v48 = vsub.f32 %v2228_v27, %v2236_v43  ;;  %v2233_v51 = vpop.xlane.xlu0 %2232  ;;  %v1860_v27 = vsel %vm1026_vm4, %v17786_v17, 0.0  ;;  %v1054_v17 = vsel %vm1026_vm4, %v17664_v53, 0.0 }
 0xa79   :  { %v2243_v54 = vsub.f32 %v2227_v28, %v2233_v51  ;;  %v628_v51 = vld [vmem:[%s19541_s20 + $0x8] sm:$0xff] }
 0xa7a   :  { %v2249_v63 = vmul.f32 1.442695, %v2244_v48  ;;  %v627_v48 = vld [vmem:[%s19541_s20] sm:$0xff] }
 0xa7b   :  { %v2247_v56 = vmul.f32 1.442695, %v2243_v54  ;;  %v16277_v59 = vpop.permute.xlu1 %16276  ;;  %v15663_v54 = vpack.c.bf16 %v628_v51, %v627_v48 }
 0xa7c   :  { %16499 = vpow2.f32 %v2249_v63  ;;  %v16279_v41 = vunpack.i.h.bf16 %v16277_v59  ;;  %v16278_v60 = vunpack.i.l.bf16 %v16277_v59  ;;  %v630_v63 = vld [vmem:[%s19541_s20 + $0x18] sm:$0xff] }
 0xa7d   :  { %16501 = vpow2.f32 %v2247_v56 }
 0xa7e   :  { %v15655_v49 = vpack.c.bf16 %v16279_v41, %v16278_v60 }
 0xa80   :  { %15656 = vmatprep.subr.bf16.mxu0 %v15655_v49 }
 0xa81   :  { %15658 = vmatpush3.bf16.msra.mxu0 %v15655_v49 }
 0xa82   :  { %15664 = vmatprep.subr.bf16.mxu0 %v15663_v54 }
 0xa86   :  { %v16500_v46 = vpop.eup %16499 }
 0xa87   :  { %v16502_v1 = vpop.eup %16501  ;;  %v2242_v2 = vpop.xlane.xlu0 %2241  ;;  %v2258_v39 = vsel %vm1026_vm4, %v16500_v46, 0.0 }
 0xa88   :  { %v2246_v8 = vsub.f32 %v2230_v42, %v2242_v2  ;;  %14597 = vmatprep.mubr.msk.f32.mxu0 %vm1026_vm4, %v16502_v1  ;;  %2259 = vadd.xlane.f32.xlu0 %v2258_v39  ;;  %v2255_v9 = vsel %vm1026_vm4, %v16502_v1, 0.0 }
 0xa89   :  { %14598 = vmatmul.mubr.msk.f32.vlgmr.msra.gmra.mrb[18].mxu0 %vm1026_vm4, %v16500_v46  ;;  %2256 = vadd.xlane.f32.xlu1 %v2255_v9 }
 0xa8a   :  { %v2253_v12 = vmul.f32 1.442695, %v2246_v8  ;;  %15666 = vmatpush3.bf16.msra.mxu0 %v15663_v54 }
 0xa8b   :  { %v2239_v13 = vpop.xlane.xlu0 %2238 }
 0xa8c   :  { %16503 = vpow2.f32 %v2253_v12  ;;  %v2245_v15 = vsub.f32 %v2229_v47, %v2239_v13  ;;  %1453 = vadd.xlane.f32.xlu0 %v1452_v14  ;;  %v1057_v47 = vsel %vm1026_vm4, %v17674_v55, 0.0 }
 0xa8d   :  { %1450 = vadd.xlane.f32.xlu1 %v1449_v20 }
 0xa8e   :  { %v2251_v21 = vmul.f32 1.442695, %v2245_v15 }
 0xa8f   :  { %v16282_v25 = vpop.permute.xlu0 %16281 }
 0xa90   :  { %16505 = vpow2.f32 %v2251_v21  ;;  %v16284_v45 = vunpack.i.h.bf16 %v16282_v25  ;;  %v16283_v28 = vunpack.i.l.bf16 %v16282_v25  ;;  %1861 = vadd.xlane.f32.xlu0 %v1860_v27 }
 0xa91   :  { %1858 = vadd.xlane.f32.xlu1 %v1857_v29 }
 0xa92   :  { %v15659_v6 = vpack.c.bf16 %v16284_v45, %v16283_v28 }
 0xa94   :  { %15660 = vmatprep.subr.bf16.mxu1 %v15659_v6 }
 0xa95   :  { %15662 = vmatpush3.bf16.msra.mxu1 %v15659_v6 }
 0xa96   :  { %v16504_v52 = vpop.eup %16503 }
 0xa97   :  { %v2264_v5 = vsel %vm1026_vm4, %v16504_v52, 0.0 }
 0xa98   :  { %2265 = vadd.xlane.f32.xlu0 %v2264_v5 }
 0xa9a   :  { %v16506_v32 = vpop.eup %16505 }
 0xa9b   :  { %14604 = vmatprep.mubr.msk.f32.mxu1 %vm1026_vm4, %v16506_v32  ;;  %v2261_v42 = vsel %vm1026_vm4, %v16506_v32, 0.0 }
 0xa9c   :  { %1055 = vadd.xlane.f32.xlu0 %v1054_v17  ;;  %2262 = vadd.xlane.f32.xlu1 %v2261_v42 }
 0xa9d   :  { %14605 = vmatmul.mubr.msk.f32.vlgmr.msra.gmra.mrb[30].mxu1 %vm1026_vm4, %v16504_v52 }
 0xaa0   :  { %1061 = vadd.xlane.f32.xlu0 %v1060_v16  ;;  %1052 = vadd.xlane.f32.xlu1 %v1051_v34 }
 0xaa4   :  { %1058 = vadd.xlane.f32.xlu1 %v1057_v47 }
 0xaac   :  { %v1445_v35 = vpop.xlane.xlu1 %1444 }
 0xaad   :  { %16507 = vrcp.f32 %v1445_v35 }
 0xab0   :  { %v1853_v53 = vpop.xlane.xlu1 %1852 }
 0xab1   :  { %16509 = vrcp.f32 %v1853_v53 }
 0xab7   :  { %v16508_v36 = vpop.eup %16507 }
 0xab8   :  { %v1637_v38 = vmul.f32 %v16508_v36, %v17745_v11 }
 0xaba   :  { %2453 = vrot.lane.b32.xlu1 %v1637_v38, %s17150_s27 }
 0xabb   :  { %v16510_v50 = vpop.eup %16509 }
 0xabc   :  { %v2041_v57 = vmul.f32 %v16510_v50, %v17798_v24  ;;  %v629_v24 = vld [vmem:[%s19541_s20 + $0x10] sm:$0xff] }
 0xabd   :  { %v15667_v56 = vpack.c.bf16 %v630_v63, %v629_v24 }
 0xabe   :  { %2469 = vrot.lane.b32.xlu1 %v2041_v57, %s19495_s0 }
 0xabf   :  { %15668 = vmatprep.subr.bf16.mxu0 %v15667_v56 }
 0xac0   :  { %v1448_v55 = vpop.xlane.xlu0 %1447  ;;  %15670 = vmatpush3.bf16.msra.mxu0 %v15667_v56 }
 0xac1   :  { %16511 = vrcp.f32 %v1448_v55 }
 0xac4   :  { %v1856_v44 = vpop.xlane.xlu0 %1855 }
 0xac5   :  { %16513 = vrcp.f32 %v1856_v44 }
 0xacb   :  { %v16512_v40 = vpop.eup %16511 }
 0xacc   :  { %v1638_v58 = vmul.f32 %v16512_v40, %v17743_v10 }
 0xace   :  { %2455 = vrot.lane.b32.xlu0 %v1638_v58, %s17150_s27 }
 0xacf   :  { %v16514_v11 = vpop.eup %16513 }
 0xad0   :  { %v2042_v43 = vmul.f32 %v16514_v11, %v17796_v23 }
 0xad2   :  { %2471 = vrot.lane.b32.xlu1 %v2042_v43, %s19495_s0 }
 0xb15   :  { %v2260_v59 = vpop.xlane.xlu0 %2259 }
 0xb16   :  { %v2257_v41 = vpop.xlane.xlu1 %2256  ;;  %16515 = vrcp.f32 %v2260_v59 }
 0xb17   :  { %16517 = vrcp.f32 %v2257_v41 }
 0xb19   :  { %v1454_v10 = vpop.xlane.xlu0 %1453 }
 0xb1a   :  { %v1451_v60 = vpop.xlane.xlu1 %1450  ;;  %16519 = vrcp.f32 %v1454_v10 }
 0xb1b   :  { %16521 = vrcp.f32 %v1451_v60 }
 0xb1d   :  { %v1862_v23 = vpop.xlane.xlu0 %1861 }
 0xb1e   :  { %v1859_v49 = vpop.xlane.xlu1 %1858  ;;  %16523 = vrcp.f32 %v1862_v23 }
 0xb1f   :  { %16525 = vrcp.f32 %v1859_v49 }
 0xb20   :  { %v16516_v46 = vpop.eup %16515 }
 0xb21   :  { %v16518_v2 = vpop.eup %16517 }
 0xb24   :  { %v16520_v9 = vpop.eup %16519 }
 0xb25   :  { %v16522_v13 = vpop.eup %16521  ;;  %v1640_v14 = vmul.f32 %v16520_v9, %v17749_v18  ;;  %v2266_v25 = vpop.xlane.xlu0 %2265 }
 0xb26   :  { %v1639_v20 = vmul.f32 %v16522_v13, %v17751_v19  ;;  %16527 = vrcp.f32 %v2266_v25 }
 0xb28   :  { %v16524_v15 = vpop.eup %16523 }
 0xb29   :  { %v16526_v21 = vpop.eup %16525  ;;  %v2263_v27 = vpop.xlane.xlu1 %2262  ;;  %v2044_v45 = vmul.f32 %v16524_v15, %v17802_v30 }
 0xb2a   :  { %v2043_v28 = vmul.f32 %v16526_v21, %v17804_v31  ;;  %16529 = vrcp.f32 %v2263_v27  ;;  %v1056_v17 = vpop.xlane.xlu0 %1055 }
 0xb2d   :  { %v1053_v32 = vpop.xlane.xlu1 %1052 }
 0xb2e   :  { %16531 = vrcp.f32 %v1053_v32  ;;  %v1062_v34 = vpop.xlane.xlu0 %1061 }
 0xb2f   :  { %16533 = vrcp.f32 %v1056_v17 }
 0xb30   :  { %v16528_v18 = vpop.eup %16527 }
 0xb31   :  { %v1059_v30 = vpop.xlane.xlu1 %1058 }
 0xb32   :  { %16535 = vrcp.f32 %v1059_v30 }
 0xb33   :  { %16537 = vrcp.f32 %v1062_v34 }
 0xb34   :  { %v16530_v19 = vpop.eup %16529 }
 0xb35   :  { %v2454_v31 = vpop.permute.xlu1 %2453 }
 0xb38   :  { %v16532_v42 = vpop.eup %16531 }
 0xb39   :  { %v2470_v16 = vpop.permute.xlu1 %2469  ;;  %v1229_v47 = vmul.f32 %v16532_v42, %v17689_v62  ;;  %v16534_v35 = vpop.eup %16533 }
 0xb3a   :  { %v1230_v50 = vmul.f32 %v16534_v35, %v17687_v61 }
 0xb3b   :  { %v2497_v38 = vsel %vm849_vm2, %v1229_v47, %v2454_v31 }
 0xb3c   :  { %v2501_v55 = vsel %vm1026_vm4, %v2497_v38, %v2470_v16  ;;  %v16536_v48 = vpop.eup %16535  ;;  %v2692_v38 = vld [vmem:[%s19543_s12] sm:$0xff] }
 0xb3d   :  { %v16538_v51 = vpop.eup %16537  ;;  %v1231_v63 = vmul.f32 %v16536_v48, %v17693_v7  ;;  %v13515_v7 = vld [vmem:[%s19542_s2] ss:$0 sm:$0xff] }
 0xb3e   :  { %v1232_v56 = vmul.f32 %v16538_v51, %v17691_v3  ;;  %v2808_v51 = vld [vmem:[%s19544_s23 + $0x20] sm:$0xff] }
 0xb40   :  { %v2456_v36 = vpop.permute.xlu0 %2455 }
 0xb41   :  { %v2498_v44 = vsel %vm849_vm2, %v1230_v50, %v2456_v36  ;;  %v2693_v50 = vld [vmem:[%s19543_s12 + $0x8] sm:$0xff] }
 0xb44   :  { %v2472_v53 = vpop.permute.xlu1 %2471 }
 0xb45   :  { %v2502_v58 = vsel %vm1026_vm4, %v2498_v44, %v2472_v53  ;;  %v2695_v44 = vld [vmem:[%s19543_s12 + $0x18] sm:$0xff] }
 0xb5c   :  { %v14599_v1 = vpop.f32.mrb[18].mxu0 }
 0xb5d   :  { %v2446_v39 = vmul.f32 %v16516_v46, %v14599_v1  ;;  %v2345_v8 = vpop.f32.mrb[19].mxu0 }
 0xb5e   :  { %v2445_v12 = vmul.f32 %v16518_v2, %v2345_v8 }
 0xb5f   :  { %2487 = vrot.lane.b32.xlu1 %v2446_v39, %s19493_s1 }
 0xb60   :  { %2485 = vrot.lane.b32.xlu0 %v2445_v12, %s19493_s1 }
 0xb63   :  { %2459 = vrot.lane.b32.xlu1 %v1640_v14, %s17150_s27 }
 0xb64   :  { %2457 = vrot.lane.b32.xlu0 %v1639_v20, %s17150_s27 }
 0xb67   :  { %2475 = vrot.lane.b32.xlu1 %v2044_v45, %s19495_s0 }
 0xb68   :  { %2473 = vrot.lane.b32.xlu0 %v2043_v28, %s19495_s0 }
 0xb70   :  { %v14606_v29 = vpop.f32.mrb[30].mxu1 }
 0xb71   :  { %v2448_v6 = vmul.f32 %v16528_v18, %v14606_v29  ;;  %v2432_v52 = vpop.f32.mrb[31].mxu1 }
 0xb72   :  { %v2447_v5 = vmul.f32 %v16530_v19, %v2432_v52 }
 0xb73   :  { %2491 = vrot.lane.b32.xlu1 %v2448_v6, %s19493_s1 }
 0xb74   :  { %2489 = vrot.lane.b32.xlu0 %v2447_v5, %s19493_s1 }
 0xbd1   :  { %v2488_v57 = vpop.permute.xlu1 %2487 }
 0xbd2   :  { %v2486_v40 = vpop.permute.xlu0 %2485  ;;  %v2507_v62 = vsel %vm2505_vm5, %v2502_v58, %v2488_v57  ;;  %v15671_v57 = vpack.c.bf16 %v2693_v50, %v2692_v38  ;;  %v2804_v58 = vld [vmem:[%s19544_s23] sm:$0xff] }
 0xbd3   :  { %v2506_v11 = vsel %vm2505_vm5, %v2501_v55, %v2486_v40  ;;  %v2694_v55 = vld [vmem:[%s19543_s12 + $0x10] sm:$0xff] }
 0xbd4   :  { %14615 = vmatprep.mubr.msk.f32.mxu0 %vm642_vm1, %v2506_v11  ;;  %15672 = vmatprep.subr.bf16.mxu1 %v15671_v57  ;;  %v15675_v40 = vpack.c.bf16 %v2695_v44, %v2694_v55  ;;  %v2805_v11 = vld [vmem:[%s19544_s23 + $0x8] sm:$0xff] }
 0xbd5   :  { %14616 = vmatmul.mubr.msk.f32.vlgmr.msra.gmra.mrb[20].mxu0 %vm642_vm1, %v2507_v62  ;;  %v2460_v61 = vpop.permute.xlu1 %2459  ;;  %15674 = vmatpush3.bf16.msra.mxu1 %v15671_v57  ;;  %v2806_v62 = vld [vmem:[%s19544_s23 + $0x10] sm:$0xff] }
 0xbd6   :  { %v2458_v43 = vpop.permute.xlu0 %2457  ;;  %v2500_v10 = vsel %vm849_vm2, %v1232_v56, %v2460_v61  ;;  %15676 = vmatprep.subr.bf16.mxu1 %v15675_v40  ;;  %v15679_v61 = vpack.c.bf16 %v2805_v11, %v2804_v58 }
 0xbd7   :  { %v2499_v59 = vsel %vm849_vm2, %v1231_v63, %v2458_v43  ;;  %v2807_v43 = vld [vmem:[%s19544_s23 + $0x18] sm:$0xff] }
 0xbd8   :  { %v15683_v48 = vpack.c.bf16 %v2807_v43, %v2806_v62  ;;  %15680 = vmatprep.subr.bf16.mxu0 %v15679_v61 }
 0xbd9   :  { %v2476_v24 = vpop.permute.xlu1 %2475  ;;  %15678 = vmatpush3.bf16.msra.mxu1 %v15675_v40  ;;  %15682 = vmatpush3.bf16.msra.mxu0 %v15679_v61 }
 0xbda   :  { %v2474_v54 = vpop.permute.xlu0 %2473  ;;  %v2504_v49 = vsel %vm1026_vm4, %v2500_v10, %v2476_v24  ;;  %v2809_v24 = vld [vmem:[%s19544_s23 + $0x28] sm:$0xff]  ;;  %15684 = vmatprep.subr.bf16.mxu0 %v15683_v48 }
 0xbdb   :  { %v2503_v60 = vsel %vm1026_vm4, %v2499_v59, %v2474_v54  ;;  %v15687_v54 = vpack.c.bf16 %v2809_v24, %v2808_v51 }
 0xbdd   :  { %15686 = vmatpush3.bf16.msra.mxu0 %v15683_v48 }
 0xbde   :  { %15688 = vmatprep.subr.bf16.mxu0 %v15687_v54 }
 0xbe1   :  { %15690 = vmatpush3.bf16.msra.mxu0 %v15687_v54 }
 0xbe5   :  { %v2492_v41 = vpop.permute.xlu1 %2491 }
 0xbe6   :  { %v2490_v23 = vpop.permute.xlu0 %2489  ;;  %v2509_v1 = vsel %vm2505_vm5, %v2504_v49, %v2492_v41  ;;  %v13520_v49 = vld [vmem:[%s19545_s30] ss:$0 sm:$0xff] }
 0xbe7   :  { %v2508_v46 = vsel %vm2505_vm5, %v2503_v60, %v2490_v23 }
 0xbe8   :  { %14618 = vmatprep.mubr.msk.f32.mxu0 %vm642_vm1, %v2508_v46 }
 0xbe9   :  { %14619 = vmatmul.mubr.msk.f32.gmra.mrb[22].mxu0 %vm642_vm1, %v2509_v1 }
 0xca8   :  { %v14617_v3 = vpop.f32.mrb[20].mxu0 }
 0xca9   :  { %v2600_v2 = vadd.f32 %v14617_v3, %v13515_v7  ;;  %v2594_v39 = vpop.f32.mrb[21].mxu0  ;;  %v13521_v3 = vld [vmem:[%s19546_s7] ss:$0 sm:$0xff] }
 0xcaa   :  { %v2595_v8 = vadd.f32 %v13515_v7, %v2594_v39 }
 0xcab   :  { %v2614_v9 = vadd.f32 %v2600_v2, %v17561_v22 }
 0xcac   :  { %v2613_v12 = vadd.f32 %v2595_v8, %v17565_v26 }
 0xcad   :  { %v2622_v13 = vsel %vm642_vm1, %v2614_v9, 0.0 }
 0xcae   :  { %2623 = vadd.xlane.f32.xlu1 %v2622_v13  ;;  %v2619_v14 = vsel %vm642_vm1, %v2613_v12, 0.0 }
 0xcaf   :  { %2620 = vadd.xlane.f32.xlu0 %v2619_v14 }
 0xcbc   :  { %v14620_v15 = vpop.f32.mrb[22].mxu0 }
 0xcbd   :  { %v2604_v20 = vpop.f32.mrb[23].mxu0  ;;  %v2610_v21 = vadd.f32 %v14620_v15, %v13515_v7 }
 0xcbe   :  { %v2605_v25 = vadd.f32 %v13515_v7, %v2604_v20 }
 0xcbf   :  { %v2616_v28 = vadd.f32 %v2610_v21, %v17573_v33 }
 0xcc0   :  { %v2615_v27 = vadd.f32 %v2605_v25, %v17577_v37 }
 0xcc1   :  { %v2628_v22 = vsel %vm642_vm1, %v2616_v28, 0.0 }
 0xcc2   :  { %v2625_v45 = vsel %vm642_vm1, %v2615_v27, 0.0 }
 0xcc3   :  { %2626 = vadd.xlane.f32.xlu0 %v2625_v45 }
 0xcc7   :  { %2629 = vadd.xlane.f32.xlu0 %v2628_v22 }
 0xd3b   :  { %v2624_v26 = vpop.xlane.xlu1 %2623 }
 0xd3c   :  { %v2633_v18 = vmul.f32 0.03125, %v2624_v26  ;;  %v2621_v29 = vpop.xlane.xlu0 %2620 }
 0xd3d   :  { %v2632_v19 = vmul.f32 0.03125, %v2621_v29 }
 0xd3e   :  { %v2637_v6 = vsub.f32 %v2614_v9, %v2633_v18 }
 0xd3f   :  { %v2636_v52 = vsub.f32 %v2613_v12, %v2632_v19  ;;  %v2810_v19 = vld [vmem:[%s19544_s23 + $0x30] sm:$0xff] }
 0xd40   :  { %v2641_v5 = vmul.f32 %v2637_v6, %v2637_v6 }
 0xd41   :  { %v2640_v32 = vmul.f32 %v2636_v52, %v2636_v52 }
 0xd42   :  { %v2647_v30 = vsel %vm642_vm1, %v2641_v5, 0.0  ;;  %v13522_v5 = vld [vmem:[%s19547_s10] ss:$0 sm:$0xff] }
 0xd43   :  { %2648 = vadd.xlane.f32.xlu0 %v2647_v30  ;;  %v2644_v37 = vsel %vm642_vm1, %v2640_v32, 0.0 }
 0xd44   :  { %2645 = vadd.xlane.f32.xlu1 %v2644_v37 }
 0xd50   :  { %v2627_v33 = vpop.xlane.xlu0 %2626 }
 0xd51   :  { %v2634_v17 = vmul.f32 0.03125, %v2627_v33 }
 0xd53   :  { %v17898_v31 = vsub.f32 %v2615_v27, %v2634_v17 }
 0xd54   :  { %v2630_v42 = vpop.xlane.xlu0 %2629 }
 0xd55   :  { %v2635_v16 = vmul.f32 0.03125, %v2630_v42  ;;  %v2642_v34 = vmul.f32 %v17898_v31, %v17898_v31 }
 0xd57   :  { %v17902_v47 = vsub.f32 %v2616_v28, %v2635_v16  ;;  %v2650_v35 = vsel %vm642_vm1, %v2642_v34, 0.0 }
 0xd58   :  { %2651 = vadd.xlane.f32.xlu1 %v2650_v35 }
 0xd59   :  { %v2643_v53 = vmul.f32 %v17902_v47, %v17902_v47 }
 0xd5b   :  { %v2653_v36 = vsel %vm642_vm1, %v2643_v53, 0.0 }
 0xd5c   :  { %2654 = vadd.xlane.f32.xlu0 %v2653_v36  ;;  %v13527_v36 = vld [vmem:[%s19548_s13] ss:$0 sm:$0xff] }
 0xdd0   :  { %v2649_v63 = vpop.xlane.xlu0 %2648 }
 0xdd1   :  { %v2657_v56 = vmul.f32 0.03125, %v2649_v63  ;;  %v2646_v59 = vpop.xlane.xlu1 %2645 }
 0xdd2   :  { %v2656_v41 = vmul.f32 0.03125, %v2646_v59 }
 0xdd3   :  { %v2661_v10 = vadd.f32 1e-05, %v2657_v56 }
 0xdd4   :  { %v2660_v60 = vadd.f32 1e-05, %v2656_v41 }
 0xdd5   :  { %16539 = vrsqrt.f32 %v2661_v10 }
 0xdd6   :  { %16541 = vrsqrt.f32 %v2660_v60 }
 0xddf   :  { %v16540_v23 = vpop.eup %16539 }
 0xde0   :  { %v16542_v46 = vpop.eup %16541  ;;  %v2669_v1 = vmul.f32 %v16540_v23, %v2637_v6  ;;  %v2811_v6 = vld [vmem:[%s19544_s23 + $0x38] sm:$0xff] }
 0xde1   :  { %v2668_v7 = vmul.f32 %v16542_v46, %v2636_v52  ;;  %v15691_v52 = vpack.c.bf16 %v2811_v6, %v2810_v19 }
 0xde2   :  { %v2679_v2 = vmul.f32 %v13520_v49, %v2669_v1 }
 0xde3   :  { %v2678_v39 = vmul.f32 %v13520_v49, %v2668_v7  ;;  %15692 = vmatprep.subr.bf16.mxu0 %v15691_v52 }
 0xde4   :  { %v2689_v13 = vadd.f32 %v13521_v3, %v2679_v2  ;;  %15694 = vmatpush3.bf16.msra.mxu0 %v15691_v52 }
 0xde5   :  { %v2652_v8 = vpop.xlane.xlu1 %2651  ;;  %v2688_v9 = vadd.f32 %v13521_v3, %v2678_v39 }
 0xde6   :  { %v2658_v12 = vmul.f32 0.03125, %v2652_v8 }
 0xde7   :  { %14629 = vmatprep.mubr.msk.f32.mxu1 %vm642_vm1, %v2688_v9 }
 0xde8   :  { %v2662_v14 = vadd.f32 1e-05, %v2658_v12  ;;  %14630 = vmatmul.mubr.msk.f32.vlgmr.msra.gmra.mrb[32].mxu1 %vm642_vm1, %v2689_v13 }
 0xde9   :  { %v2655_v15 = vpop.xlane.xlu0 %2654 }
 0xdea   :  { %16543 = vrsqrt.f32 %v2662_v14  ;;  %v2659_v20 = vmul.f32 0.03125, %v2655_v15 }
 0xdec   :  { %v2663_v21 = vadd.f32 1e-05, %v2659_v20 }
 0xdee   :  { %16545 = vrsqrt.f32 %v2663_v21  ;;  %v13534_v21 = vld [vmem:[%s17198_s3 + $0x20] sm:$0xff] }
 0xdf4   :  { %v16544_v25 = vpop.eup %16543 }
 0xdf5   :  { %v2670_v27 = vmul.f32 %v16544_v25, %v17898_v31  ;;  %v13535_v25 = vld [vmem:[%s17198_s3 + $0x28] sm:$0xff] }
 0xdf7   :  { %v2680_v45 = vmul.f32 %v13520_v49, %v2670_v27  ;;  %v15695_v27 = vpack.c.bf16 %v13535_v25, %v13534_v21 }
 0xdf8   :  { %v16546_v28 = vpop.eup %16545 }
 0xdf9   :  { %v2690_v22 = vadd.f32 %v13521_v3, %v2680_v45  ;;  %v2671_v26 = vmul.f32 %v16546_v28, %v17902_v47  ;;  %v13536_v45 = vld [vmem:[%s17198_s3 + $0x30] sm:$0xff]  ;;  %v13537_v28 = vld [vmem:[%s17198_s3 + $0x38] sm:$0xff]  ;;  %15696 = vmatprep.subr.bf16.mxu1 %v15695_v27  ;;  %s19551_s3 = sld [smem:[#allocation41_spill]] }
 0xdfa   :  { %15698 = vmatpush3.bf16.msra.mxu1 %v15695_v27 }
 0xdfb   :  { %14632 = vmatprep.mubr.msk.f32.mxu1 %vm642_vm1, %v2690_v22  ;;  %v2681_v18 = vmul.f32 %v13520_v49, %v2671_v26  ;;  %v13539_v26 = vld [vmem:[%s19535_s5 + $0x20] sm:$0xff] }
 0xdfd   :  { %v2691_v29 = vadd.f32 %v13521_v3, %v2681_v18  ;;  %v13540_v18 = vld [vmem:[%s19535_s5 + $0x28] sm:$0xff] }
 0xdff   :  { %14633 = vmatmul.mubr.msk.f32.gmra.mrb[34].mxu1 %vm642_vm1, %v2691_v29 }
 0xebb   :  { %v14631_v32 = vpop.f32.mrb[32].mxu1 }
 0xebc   :  { %v2787_v30 = vadd.f32 %v14631_v32, %v13522_v5  ;;  %v2781_v37 = vpop.f32.mrb[33].mxu1 }
 0xebd   :  { %v2782_v33 = vadd.f32 %v13522_v5, %v2781_v37 }
 0xebe   :  { %v2801_v31 = vmax.f32 %v2787_v30, 0.0 }
 0xebf   :  { %v2800_v17 = vmax.f32 %v2782_v33, 0.0  ;;  %v13532_v33 = vld [vmem:[%s19549_s11] ss:$0 sm:$0xff] }
 0xec1   :  { %14651 = vmatprep.mubr.msk.f32.mxu0 %vm397_vm0, %v2800_v17 }
 0xec2   :  { %14652 = vmatmul.mubr.msk.f32.vlgmr.msra.gmra.mrb[24].mxu0 %vm397_vm0, %v2801_v31 }
 0xed2   :  { %v14634_v42 = vpop.f32.mrb[34].mxu1 }
 0xed3   :  { %v2797_v16 = vadd.f32 %v14634_v42, %v13522_v5  ;;  %v2791_v34 = vpop.f32.mrb[35].mxu1 }
 0xed4   :  { %v2792_v47 = vadd.f32 %v13522_v5, %v2791_v34 }
 0xed5   :  { %v2803_v53 = vmax.f32 %v2797_v16, 0.0  ;;  %v13533_v16 = vld [vmem:[%s19550_s6] ss:$0 sm:$0xff] }
 0xed6   :  { %v2802_v35 = vmax.f32 %v2792_v47, 0.0 }
 0xed8   :  { %14654 = vmatprep.mubr.msk.f32.mxu0 %vm397_vm0, %v2802_v35 }
 0xed9   :  { %14655 = vmatmul.mubr.msk.f32.gmra.mrb[26].mxu0 %vm397_vm0, %v2803_v53 }
 0xf95   :  { %v14653_v38 = vpop.f32.mrb[24].mxu0 }
 0xf96   :  { %v2903_v50 = vadd.f32 %v14653_v38, %v13527_v36  ;;  %v2897_v57 = vpop.f32.mrb[25].mxu0  ;;  %v13542_v38 = vld [vmem:[%s19535_s5 + $0x38] sm:$0xff] }
 0xf97   :  { %v2898_v55 = vadd.f32 %v13527_v36, %v2897_v57  ;;  %v16811_v57 = vld [vmem:[%s19536_s25] sm:$0xff] }
 0xf98   :  { %v2917_v44 = vadd.f32 %v2903_v50, %v2689_v13 }
 0xf99   :  { %v2916_v40 = vadd.f32 %v2898_v55, %v2688_v9 }
 0xf9a   :  { %v2925_v58 = vsel %vm642_vm1, %v2917_v44, 0.0 }
 0xf9b   :  { %2926 = vadd.xlane.f32.xlu0 %v2925_v58  ;;  %v2922_v11 = vsel %vm642_vm1, %v2916_v40, 0.0  ;;  %v16812_v58 = vld [vmem:[%s19536_s25 + $0x8] sm:$0xff] }
 0xf9c   :  { %2923 = vadd.xlane.f32.xlu1 %v2922_v11 }
 0xfac   :  { %v14656_v62 = vpop.f32.mrb[26].mxu0 }
 0xfad   :  { %v2913_v61 = vadd.f32 %v14656_v62, %v13527_v36  ;;  %v2907_v43 = vpop.f32.mrb[27].mxu0 }
 0xfae   :  { %v2908_v48 = vadd.f32 %v13527_v36, %v2907_v43  ;;  %v13541_v36 = vld [vmem:[%s19535_s5 + $0x30] sm:$0xff]  ;;  %s19555_s5 = sld [smem:[#allocation44_spill]] }
 0xfaf   :  { %v2919_v51 = vadd.f32 %v2913_v61, %v2691_v29  ;;  %v15703_v29 = vpack.c.bf16 %v13540_v18, %v13539_v26  ;;  %v15707_v62 = vpack.c.bf16 %v13542_v38, %v13541_v36 }
 0xfb0   :  { %v2918_v24 = vadd.f32 %v2908_v48, %v2690_v22  ;;  %v15699_v22 = vpack.c.bf16 %v13537_v28, %v13536_v45 }
 0xfb1   :  { %v2931_v54 = vsel %vm642_vm1, %v2919_v51, 0.0 }
 0xfb2   :  { %2932 = vadd.xlane.f32.xlu0 %v2931_v54  ;;  %v2928_v63 = vsel %vm642_vm1, %v2918_v24, 0.0  ;;  %15700 = vmatprep.subr.bf16.mxu1 %v15699_v22 }
 0xfb3   :  { %2929 = vadd.xlane.f32.xlu1 %v2928_v63  ;;  %15702 = vmatpush3.bf16.msra.mxu1 %v15699_v22 }
 0xfb4   :  { %15704 = vmatprep.subr.bf16.mxu1 %v15703_v29 }
0x1028   :  { %v2927_v56 = vpop.xlane.xlu0 %2926 }
0x1029   :  { %v2935_v59 = vmul.f32 0.03125, %v2927_v56  ;;  %v2924_v41 = vpop.xlane.xlu1 %2923 }
0x102a   :  { %v2934_v10 = vmul.f32 0.03125, %v2924_v41 }
0x102b   :  { %v2939_v60 = vsub.f32 %v2917_v44, %v2935_v59 }
0x102c   :  { %v2938_v23 = vsub.f32 %v2916_v40, %v2934_v10 }
0x102d   :  { %v2943_v49 = vmul.f32 %v2939_v60, %v2939_v60 }
0x102e   :  { %v2942_v46 = vmul.f32 %v2938_v23, %v2938_v23 }
0x102f   :  { %v2949_v1 = vsel %vm642_vm1, %v2943_v49, 0.0  ;;  %v16814_v49 = vld [vmem:[%s19536_s25 + $0x18] sm:$0xff] }
0x1030   :  { %2950 = vadd.xlane.f32.xlu0 %v2949_v1  ;;  %v2946_v7 = vsel %vm642_vm1, %v2942_v46, 0.0  ;;  %v13549_v1 = vld [vmem:[%s19537_s14 + $0x1] ss:$0 sm:$0xff]  ;;  %s19556_s14 = sld [smem:[#allocation45_spill]] }
0x1031   :  { %2947 = vadd.xlane.f32.xlu1 %v2946_v7 }
0x103f   :  { %v2933_v3 = vpop.xlane.xlu0 %2932 }
0x1040   :  { %v2937_v2 = vmul.f32 0.03125, %v2933_v3  ;;  %v2930_v39 = vpop.xlane.xlu1 %2929 }
0x1041   :  { %v2936_v8 = vmul.f32 0.03125, %v2930_v39 }
0x1042   :  { %v2941_v9 = vsub.f32 %v2919_v51, %v2937_v2 }
0x1043   :  { %v2940_v12 = vsub.f32 %v2918_v24, %v2936_v8 }
0x1044   :  { %v2945_v13 = vmul.f32 %v2941_v9, %v2941_v9 }
0x1045   :  { %v2944_v14 = vmul.f32 %v2940_v12, %v2940_v12 }
0x1046   :  { %v2955_v15 = vsel %vm642_vm1, %v2945_v13, 0.0 }
0x1047   :  { %2956 = vadd.xlane.f32.xlu0 %v2955_v15  ;;  %v2952_v20 = vsel %vm642_vm1, %v2944_v14, 0.0  ;;  %v13554_v15 = vld [vmem:[%s19538_s19 + $0x1] ss:$0 sm:$0xff]  ;;  %s19557_s19 = sld [smem:[#allocation46_spill]] }
0x1048   :  { %2953 = vadd.xlane.f32.xlu1 %v2952_v20 }
0x10bd   :  { %v2951_v19 = vpop.xlane.xlu0 %2950 }
0x10be   :  { %v2959_v6 = vmul.f32 0.03125, %v2951_v19  ;;  %v2948_v52 = vpop.xlane.xlu1 %2947 }
0x10bf   :  { %v2958_v5 = vmul.f32 0.03125, %v2948_v52 }
0x10c0   :  { %v2963_v32 = vadd.f32 1e-05, %v2959_v6 }
0x10c1   :  { %v2962_v30 = vadd.f32 1e-05, %v2958_v5 }
0x10c2   :  { %16547 = vrsqrt.f32 %v2963_v32 }
0x10c3   :  { %16549 = vrsqrt.f32 %v2962_v30 }
0x10cc   :  { %v16548_v37 = vpop.eup %16547 }
0x10cd   :  { %v16550_v17 = vpop.eup %16549  ;;  %v2971_v31 = vmul.f32 %v16548_v37, %v2939_v60  ;;  %v16813_v60 = vld [vmem:[%s19536_s25 + $0x10] sm:$0xff] }
0x10ce   :  { %v2970_v42 = vmul.f32 %v16550_v17, %v2938_v23 }
0x10cf   :  { %v2981_v34 = vmul.f32 %v13532_v33, %v2971_v31 }
0x10d0   :  { %v2980_v47 = vmul.f32 %v13532_v33, %v2970_v42 }
0x10d1   :  { %v17950_v35 = vadd.f32 %v13533_v16, %v2981_v34 }
0x10d2   :  { %v17952_v53 = vadd.f32 %v13533_v16, %v2980_v47 }
0x10d3   :  { %v3016_v11 = vadd.f32 %v16812_v58, %v17950_v35 }
0x10d4   :  { %v2957_v50 = vpop.xlane.xlu0 %2956  ;;  %v3015_v55 = vadd.f32 %v16811_v57, %v17952_v53 }
0x10d5   :  { %v2961_v44 = vmul.f32 0.03125, %v2957_v50  ;;  %v2954_v40 = vpop.xlane.xlu1 %2953 }
0x10d6   :  { %v2960_v61 = vmul.f32 0.03125, %v2954_v40  ;;  %14665 = vmatprep.mubr.msk.f32.mxu1 %vm642_vm1, %v3015_v55 }
0x10d7   :  { %v2965_v43 = vadd.f32 1e-05, %v2961_v44  ;;  %14666 = vmatmul.mubr.msk.f32.vlgmr.msra.gmra.mrb[36].mxu1 %vm642_vm1, %v3016_v11 }
0x10d8   :  { %v2964_v48 = vadd.f32 1e-05, %v2960_v61  ;;  %15706 = vmatpush3.bf16.msra.mxu1 %v15703_v29 }
0x10d9   :  { %16551 = vrsqrt.f32 %v2965_v43  ;;  %15708 = vmatprep.subr.bf16.mxu1 %v15707_v62 }
0x10da   :  { %16553 = vrsqrt.f32 %v2964_v48 }
0x10dc   :  { %15710 = vmatpush3.bf16.msra.mxu1 %v15707_v62 }
0x10e3   :  { %v16552_v51 = vpop.eup %16551 }
0x10e4   :  { %v16554_v24 = vpop.eup %16553  ;;  %v2973_v54 = vmul.f32 %v16552_v51, %v2941_v9 }
0x10e5   :  { %v2972_v63 = vmul.f32 %v16554_v24, %v2940_v12 }
0x10e6   :  { %v2983_v56 = vmul.f32 %v13532_v33, %v2973_v54 }
0x10e7   :  { %v2982_v59 = vmul.f32 %v13532_v33, %v2972_v63 }
0x10e8   :  { %v17962_v41 = vadd.f32 %v13533_v16, %v2983_v56 }
0x10e9   :  { %v17964_v10 = vadd.f32 %v13533_v16, %v2982_v59 }
0x10ea   :  { %v3018_v46 = vadd.f32 %v16814_v49, %v17962_v41 }
0x10eb   :  { %v3017_v23 = vadd.f32 %v16813_v60, %v17964_v10 }
0x10ed   :  { %14668 = vmatprep.mubr.msk.f32.mxu1 %vm642_vm1, %v3017_v23 }
0x10ee   :  { %14669 = vmatmul.mubr.msk.f32.gmra.mrb[38].mxu1 %vm642_vm1, %v3018_v46 }
0x10ef   :  { %14679 = vmatprep.mubr.msk.f32.mxu1 %vm642_vm1, %v17952_v53 }
0x10f2   :  { %14680 = vmatmul.mubr.msk.f32.vlgmr.msra.gmra.mrb[40].mxu1 %vm642_vm1, %v17950_v35 }
0x10f3   :  { %14682 = vmatprep.mubr.msk.f32.mxu1 %vm642_vm1, %v17964_v10 }
0x10f6   :  { %14683 = vmatmul.mubr.msk.f32.gmra.mrb[42].mxu1 %vm642_vm1, %v17962_v41 }
0x11aa   :  { %v14667_v7 = vpop.f32.mrb[36].mxu1 }
0x11ab   :  { %v17981_v3 = vadd.f32 %v14667_v7, %v13549_v1  ;;  %v3103_v2 = vpop.f32.mrb[37].mxu1 }
0x11ac   :  { %v17983_v39 = vadd.f32 %v13549_v1, %v3103_v2 }
0x11ae   :  { %14689 = vmatprep.mubr.msk.f32.mxu0 %vm849_vm2, %v17983_v39  ;;  %v17989_v8 = vpack.i.bf16 %v17981_v3, %v17983_v39 }
0x11b0   :  { %16286 = vrot.lane.b32.xlu1 %v17989_v8, %s17143_s9 }
0x11c1   :  { %v14670_v9 = vpop.f32.mrb[38].mxu1 }
0x11c2   :  { %v17993_v12 = vadd.f32 %v14670_v9, %v13549_v1  ;;  %v3113_v13 = vpop.f32.mrb[39].mxu1 }
0x11c3   :  { %v17995_v14 = vadd.f32 %v13549_v1, %v3113_v13 }
0x11c5   :  { %v14681_v20 = vpop.f32.mrb[40].mxu1  ;;  %14696 = vmatprep.mubr.msk.f32.mxu1 %vm849_vm2, %v17995_v14  ;;  %v18002_v21 = vpack.i.bf16 %v17993_v12, %v17995_v14 }
0x11c6   :  { %v3212_v25 = vadd.f32 %v14681_v20, %v13554_v15  ;;  %v3206_v27 = vpop.f32.mrb[41].mxu1 }
0x11c7   :  { %v3207_v45 = vadd.f32 %v13554_v15, %v3206_v27  ;;  %16291 = vrot.lane.b32.xlu0 %v18002_v21, %s17143_s9 }
0x11c9   :  { %v14684_v28 = vpop.f32.mrb[42].mxu1  ;;  %v15723_v22 = vpack.c.bf16 %v3212_v25, %v3207_v45  ;;  %v18006_v26 = vpack.i.bf16 %v3212_v25, %v3207_v45 }
0x11ca   :  { %v3222_v18 = vadd.f32 %v14684_v28, %v13554_v15  ;;  %v3216_v29 = vpop.f32.mrb[43].mxu1 }
0x11cb   :  { %v3217_v19 = vadd.f32 %v13554_v15, %v3216_v29 }
0x11cd   :  { %v15727_v6 = vpack.c.bf16 %v3222_v18, %v3217_v19  ;;  %v18008_v52 = vpack.i.bf16 %v3222_v18, %v3217_v19 }
0x1222   :  { %v16287_v5 = vpop.permute.xlu1 %16286 }
0x1223   :  { %v16289_v32 = vunpack.i.h.bf16 %v16287_v5  ;;  %v16288_v30 = vunpack.i.l.bf16 %v16287_v5 }
0x1225   :  { %v15711_v37 = vpack.c.bf16 %v16289_v32, %v16288_v30 }
0x1227   :  { %15713 = vmatprep.subr.msk.bf16.mxu0 %vm17623_vm3, %v15711_v37 }
0x1228   :  { %15716 = vmatpush3.bf16.xpose.msk.msra.mxu0 %vm17623_vm3, %v15711_v37 }
0x1229   :  { %15724 = vmatprep.subr.bf16.mxu0 %v15723_v22 }
0x122f   :  { %14690 = vmatmul.mubr.msk.f32.vlgmr.msra.gmra.mrb[28].mxu0 %vm849_vm2, %v17981_v3 }
0x1230   :  { %15726 = vmatpush3.bf16.msra.mxu0 %v15723_v22 }
0x1239   :  { %v16292_v33 = vpop.permute.xlu0 %16291 }
0x123a   :  { %v16294_v17 = vunpack.i.h.bf16 %v16292_v33  ;;  %v16293_v31 = vunpack.i.l.bf16 %v16292_v33 }
0x123c   :  { %v15717_v42 = vpack.c.bf16 %v16294_v17, %v16293_v31 }
0x123e   :  { %15719 = vmatprep.subr.msk.bf16.mxu1 %vm17623_vm3, %v15717_v42 }
0x123f   :  { %15722 = vmatpush3.bf16.xpose.msk.msra.mxu1 %vm17623_vm3, %v15717_v42 }
0x1240   :  { %15728 = vmatprep.subr.bf16.mxu1 %v15727_v6 }
0x1246   :  { %14697 = vmatmul.mubr.msk.f32.vlgmr.msra.gmra.mrb[44].mxu1 %vm849_vm2, %v17993_v12 }
0x1247   :  { %15730 = vmatpush3.bf16.msra.mxu1 %v15727_v6 }
0x1302   :  { %v14691_v16 = vpop.f32.mrb[28].mxu0 }
0x1303   :  { %v3404_v34 = vmul.f32 0.35355338, %v14691_v16  ;;  %v3305_v47 = vpop.f32.mrb[29].mxu0 }
0x1304   :  { %v3403_v36 = vmul.f32 0.35355338, %v3305_v47 }
0x1305   :  { %v3410_v38 = vsel %vm1026_vm4, %v3404_v34, -inf }
0x1306   :  { %3411 = vmax.xlane.f32.xlu0 %v3410_v38  ;;  %v3407_v50 = vsel %vm1026_vm4, %v3403_v36, -inf }
0x1307   :  { %3408 = vmax.xlane.f32.xlu1 %v3407_v50 }
0x1318   :  { %16296 = vrot.lane.b32.xlu1 %v17989_v8, %s17144_s16 }
0x1319   :  { %v14698_v57 = vpop.f32.mrb[44].mxu1 }
0x131a   :  { %v3406_v55 = vmul.f32 0.35355338, %v14698_v57  ;;  %v3394_v44 = vpop.f32.mrb[45].mxu1 }
0x131b   :  { %v3405_v58 = vmul.f32 0.35355338, %v3394_v44 }
0x131c   :  { %3613 = vrot.lane.b32.xlu1 %v17983_v39, %s17145_s29  ;;  %v3416_v40 = vsel %vm1026_vm4, %v3406_v55, -inf }
0x131d   :  { %3417 = vmax.xlane.f32.xlu0 %v3416_v40  ;;  %v3413_v11 = vsel %vm1026_vm4, %v3405_v58, -inf }
0x1333   :  { %16301 = vrot.lane.b32.xlu0 %v18002_v21, %s17144_s16 }
0x1337   :  { %3704 = vrot.lane.b32.xlu0 %v17995_v14, %s17145_s29 }
0x1340   :  { %3414 = vmax.xlane.f32.xlu1 %v3413_v11 }
0x1351   :  { %3615 = vrot.lane.b32.xlu1 %v17981_v3, %s17145_s29 }
0x1355   :  { %3706 = vrot.lane.b32.xlu1 %v17993_v12, %s17145_s29 }
0x1393   :  { %v3412_v62 = vpop.xlane.xlu0 %3411 }
0x1394   :  { %v3420_v61 = vsub.f32 %v3404_v34, %v3412_v62  ;;  %v3409_v43 = vpop.xlane.xlu1 %3408 }
0x1395   :  { %v3419_v48 = vsub.f32 %v3403_v36, %v3409_v43 }
0x1396   :  { %v3425_v51 = vmul.f32 1.442695, %v3420_v61 }
0x1397   :  { %v3423_v24 = vmul.f32 1.442695, %v3419_v48 }
0x1398   :  { %v16297_v54 = vpop.permute.xlu1 %16296 }
0x1399   :  { %16555 = vpow2.f32 %v3423_v24  ;;  %v16299_v63 = vunpack.i.h.bf16 %v16297_v54  ;;  %v16298_v56 = vunpack.i.l.bf16 %v16297_v54 }
0x139a   :  { %16557 = vpow2.f32 %v3425_v51 }
0x139b   :  { %v15731_v59 = vpack.c.bf16 %v16299_v63, %v16298_v56 }
0x139c   :  { %v3614_v49 = vpop.permute.xlu1 %3613 }
0x139d   :  { %15733 = vmatprep.subr.msk.bf16.mxu0 %vm17623_vm3, %v15731_v59 }
0x13a3   :  { %v18040_v60 = vpop.eup %16555 }
0x13a4   :  { %v18042_v23 = vpop.eup %16557  ;;  %14703 = vmatprep.mubr.msk.f32.mxu0 %vm1026_vm4, %v18040_v60 }
0x13a5   :  { %14704 = vmatmul.mubr.msk.f32.vlgmr.msra.gmra.mrb[30].mxu0 %vm1026_vm4, %v18042_v23 }
0x13a6   :  { %15736 = vmatpush3.bf16.xpose.msk.msra.mxu0 %vm17623_vm3, %v15731_v59  ;;  %14717 = vmatprep.mubr.msk.f32.mxu0 %vm849_vm2, %v3614_v49 }
0x13aa   :  { %v3418_v46 = vpop.xlane.xlu0 %3417 }
0x13ab   :  { %v3422_v13 = vsub.f32 %v3406_v55, %v3418_v46 }
0x13ad   :  { %v3429_v25 = vmul.f32 1.442695, %v3422_v13 }
0x13ae   :  { %v16302_v1 = vpop.permute.xlu0 %16301 }
0x13af   :  { %v16304_v7 = vunpack.i.h.bf16 %v16302_v1  ;;  %v16303_v2 = vunpack.i.l.bf16 %v16302_v1 }
0x13b1   :  { %v15737_v9 = vpack.c.bf16 %v16304_v7, %v16303_v2 }
0x13b2   :  { %v3705_v18 = vpop.permute.xlu0 %3704 }
0x13b3   :  { %15739 = vmatprep.subr.msk.bf16.mxu1 %vm17623_vm3, %v15737_v9 }
0x13cd   :  { %v3415_v15 = vpop.xlane.xlu1 %3414 }
0x13ce   :  { %v3421_v20 = vsub.f32 %v3405_v58, %v3415_v15 }
0x13d0   :  { %v3427_v27 = vmul.f32 1.442695, %v3421_v20 }
0x13d1   :  { %v3616_v45 = vpop.permute.xlu1 %3615 }
0x13d2   :  { %16559 = vpow2.f32 %v3427_v27  ;;  %14718 = vmatmul.mubr.msk.f32.vlgmr.msra.gmra.mrb[32].mxu0 %vm849_vm2, %v3616_v45 }
0x13d3   :  { %16561 = vpow2.f32 %v3429_v25 }
0x13d5   :  { %v3707_v29 = vpop.permute.xlu1 %3706 }
0x13dc   :  { %v18054_v28 = vpop.eup %16559 }
0x13dd   :  { %v18056_v22 = vpop.eup %16561  ;;  %14710 = vmatprep.mubr.msk.f32.mxu1 %vm1026_vm4, %v18054_v28 }
0x13de   :  { %14711 = vmatmul.mubr.msk.f32.vlgmr.msra.gmra.mrb[46].mxu1 %vm1026_vm4, %v18056_v22 }
0x13df   :  { %15742 = vmatpush3.bf16.xpose.msk.msra.mxu1 %vm17623_vm3, %v15737_v9  ;;  %14724 = vmatprep.mubr.msk.f32.mxu1 %vm849_vm2, %v3705_v18 }
0x13e6   :  { %14725 = vmatmul.mubr.msk.f32.vlgmr.msra.gmra.mrb[48].mxu1 %vm849_vm2, %v3707_v29 }
0x1478   :  { %v18066_v19 = vpop.f32.mrb[30].mxu0 }
0x1479   :  { %v18068_v6 = vpop.f32.mrb[31].mxu0 }
0x14a5   :  { %v14719_v5 = vpop.f32.mrb[32].mxu0 }
0x14a6   :  { %v3796_v32 = vmul.f32 0.35355338, %v14719_v5  ;;  %v3695_v30 = vpop.f32.mrb[33].mxu0 }
0x14a7   :  { %v3795_v37 = vmul.f32 0.35355338, %v3695_v30 }
0x14a8   :  { %v3802_v33 = vsel %vm1026_vm4, %v3796_v32, -inf }
0x14a9   :  { %3803 = vmax.xlane.f32.xlu1 %v3802_v33  ;;  %v3799_v17 = vsel %vm1026_vm4, %v3795_v37, -inf }
0x14aa   :  { %3800 = vmax.xlane.f32.xlu0 %v3799_v17 }
0x14b1   :  { %v18072_v31 = vpop.f32.mrb[46].mxu1 }
0x14b2   :  { %v18074_v42 = vpop.f32.mrb[47].mxu1 }
0x14b9   :  { %v14726_v16 = vpop.f32.mrb[48].mxu1 }
0x14ba   :  { %v3798_v34 = vmul.f32 0.35355338, %v14726_v16  ;;  %v3786_v47 = vpop.f32.mrb[49].mxu1  ;;  %16306 = vrot.lane.b32.xlu1 %v18006_v26, %s17145_s29 }
0x14bb   :  { %v3797_v36 = vmul.f32 0.35355338, %v3786_v47 }
0x14bc   :  { %v3808_v38 = vsel %vm1026_vm4, %v3798_v34, -inf }
0x14bd   :  { %3809 = vmax.xlane.f32.xlu0 %v3808_v38  ;;  %v3805_v50 = vsel %vm1026_vm4, %v3797_v36, -inf }
0x14be   :  { %16316 = vrot.lane.b32.xlu1 %v17989_v8, %s17146_s18 }
0x14c1   :  { %3806 = vmax.xlane.f32.xlu0 %v3805_v50 }
0x14c2   :  { %16321 = vrot.lane.b32.xlu1 %v18002_v21, %s17146_s18 }
0x14c6   :  { %4023 = vrot.lane.b32.xlu1 %v17981_v3, %s17147_s22 }
0x14ca   :  { %4114 = vrot.lane.b32.xlu1 %v17993_v12, %s17147_s22 }
0x14d7   :  { %16311 = vrot.lane.b32.xlu0 %v18008_v52, %s17145_s29 }
0x14db   :  { %4021 = vrot.lane.b32.xlu0 %v17983_v39, %s17147_s22 }
0x14df   :  { %4112 = vrot.lane.b32.xlu0 %v17995_v14, %s17147_s22 }
0x1536   :  { %v3804_v57 = vpop.xlane.xlu1 %3803 }
0x1537   :  { %v3812_v55 = vsub.f32 %v3796_v32, %v3804_v57  ;;  %v3801_v44 = vpop.xlane.xlu0 %3800 }
0x1538   :  { %v3811_v40 = vsub.f32 %v3795_v37, %v3801_v44 }
0x1539   :  { %v3817_v58 = vmul.f32 1.442695, %v3812_v55 }
0x153a   :  { %v3815_v11 = vmul.f32 1.442695, %v3811_v40  ;;  %v16307_v62 = vpop.permute.xlu1 %16306 }
0x153b   :  { %v16309_v61 = vunpack.i.h.bf16 %v16307_v62  ;;  %v16308_v43 = vunpack.i.l.bf16 %v16307_v62 }
0x153c   :  { %16563 = vpow2.f32 %v3815_v11 }
0x153d   :  { %16565 = vpow2.f32 %v3817_v58  ;;  %v15743_v48 = vpack.c.bf16 %v16309_v61, %v16308_v43 }
0x153e   :  { %v16317_v51 = vpop.permute.xlu1 %16316 }
0x153f   :  { %v16319_v24 = vunpack.i.h.bf16 %v16317_v51  ;;  %v16318_v54 = vunpack.i.l.bf16 %v16317_v51  ;;  %15744 = vmatprep.subr.bf16.mxu0 %v15743_v48 }
0x1540   :  { %15746 = vmatpush3.bf16.msra.mxu0 %v15743_v48 }
0x1541   :  { %v15751_v63 = vpack.c.bf16 %v16319_v24, %v16318_v54 }
0x1542   :  { %v16322_v7 = vpop.permute.xlu1 %16321 }
0x1543   :  { %15753 = vmatprep.subr.msk.bf16.mxu0 %vm17623_vm3, %v15751_v63  ;;  %v16324_v15 = vunpack.i.h.bf16 %v16322_v7  ;;  %v16323_v25 = vunpack.i.l.bf16 %v16322_v7 }
0x1545   :  { %v15757_v5 = vpack.c.bf16 %v16324_v15, %v16323_v25 }
0x1546   :  { %v18096_v56 = vpop.eup %16563  ;;  %v4024_v32 = vpop.permute.xlu1 %4023 }
0x1547   :  { %v18098_v59 = vpop.eup %16565  ;;  %14731 = vmatprep.mubr.msk.f32.mxu0 %vm1026_vm4, %v18096_v56 }
0x1548   :  { %14732 = vmatmul.mubr.msk.f32.vlgmr.msra.gmra.mrb[34].mxu0 %vm1026_vm4, %v18098_v59 }
0x1549   :  { %15756 = vmatpush3.bf16.xpose.msk.msra.mxu0 %vm17623_vm3, %v15751_v63 }
0x154a   :  { %v3810_v49 = vpop.xlane.xlu0 %3809  ;;  %v4115_v17 = vpop.permute.xlu1 %4114 }
0x154b   :  { %v3814_v46 = vsub.f32 %v3798_v34, %v3810_v49 }
0x154d   :  { %v3821_v9 = vmul.f32 1.442695, %v3814_v46 }
0x154e   :  { %v3807_v1 = vpop.xlane.xlu0 %3806 }
0x154f   :  { %v3813_v2 = vsub.f32 %v3797_v36, %v3807_v1 }
0x1551   :  { %v3819_v13 = vmul.f32 1.442695, %v3813_v2 }
0x1552   :  { %v16312_v20 = vpop.permute.xlu0 %16311 }
0x1553   :  { %16567 = vpow2.f32 %v3819_v13  ;;  %v16314_v27 = vunpack.i.h.bf16 %v16312_v20  ;;  %v16313_v45 = vunpack.i.l.bf16 %v16312_v20 }
0x1554   :  { %16569 = vpow2.f32 %v3821_v9 }
0x1555   :  { %v15747_v18 = vpack.c.bf16 %v16314_v27, %v16313_v45 }
0x1556   :  { %v4022_v29 = vpop.permute.xlu0 %4021 }
0x1557   :  { %15748 = vmatprep.subr.bf16.mxu1 %v15747_v18  ;;  %14745 = vmatprep.mubr.msk.f32.mxu0 %vm849_vm2, %v4022_v29 }
0x1558   :  { %15750 = vmatpush3.bf16.msra.mxu1 %v15747_v18  ;;  %14746 = vmatmul.mubr.msk.f32.vlgmr.msra.gmra.mrb[36].mxu0 %vm849_vm2, %v4024_v32 }
0x1559   :  { %15759 = vmatprep.subr.msk.bf16.mxu1 %vm17623_vm3, %v15757_v5 }
0x155a   :  { %v4113_v33 = vpop.permute.xlu0 %4112 }
0x155d   :  { %v18110_v30 = vpop.eup %16567 }
0x155e   :  { %v18112_v37 = vpop.eup %16569  ;;  %14738 = vmatprep.mubr.msk.f32.mxu1 %vm1026_vm4, %v18110_v30 }
0x155f   :  { %14739 = vmatmul.mubr.msk.f32.vlgmr.msra.gmra.mrb[50].mxu1 %vm1026_vm4, %v18112_v37 }
0x1560   :  { %14752 = vmatprep.mubr.msk.f32.mxu1 %vm849_vm2, %v4113_v33 }
0x1561   :  { %15762 = vmatpush3.bf16.xpose.msk.msra.mxu1 %vm17623_vm3, %v15757_v5 }
0x1568   :  { %14753 = vmatmul.mubr.msk.f32.vlgmr.msra.gmra.mrb[52].mxu1 %vm849_vm2, %v4115_v17 }
0x161b   :  { %v18122_v16 = vpop.f32.mrb[34].mxu0 }
0x161c   :  { %v18124_v34 = vpop.f32.mrb[35].mxu0 }
0x162b   :  { %v14747_v47 = vpop.f32.mrb[36].mxu0 }
0x162c   :  { %v4204_v36 = vmul.f32 0.35355338, %v14747_v47  ;;  %v4103_v38 = vpop.f32.mrb[37].mxu0 }
0x162d   :  { %v4203_v50 = vmul.f32 0.35355338, %v4103_v38 }
0x162e   :  { %v4210_v57 = vsel %vm1026_vm4, %v4204_v36, -inf }
0x162f   :  { %4211 = vmax.xlane.f32.xlu1 %v4210_v57  ;;  %v4207_v55 = vsel %vm1026_vm4, %v4203_v50, -inf }
0x1630   :  { %4208 = vmax.xlane.f32.xlu0 %v4207_v55 }
0x1632   :  { %v18128_v44 = vpop.f32.mrb[50].mxu1 }
0x1633   :  { %v18130_v40 = vpop.f32.mrb[51].mxu1 }
0x163b   :  { %v14754_v58 = vpop.f32.mrb[52].mxu1 }
0x163c   :  { %v4206_v11 = vmul.f32 0.35355338, %v14754_v58  ;;  %v4194_v62 = vpop.f32.mrb[53].mxu1 }
0x163d   :  { %v4205_v61 = vmul.f32 0.35355338, %v4194_v62 }
0x163e   :  { %v4216_v43 = vsel %vm1026_vm4, %v4206_v11, -inf }
0x163f   :  { %4217 = vmax.xlane.f32.xlu0 %v4216_v43  ;;  %v4213_v48 = vsel %vm1026_vm4, %v4205_v61, -inf }
0x1640   :  { %16326 = vrot.lane.b32.xlu1 %v18006_v26, %s17147_s22 }
0x1643   :  { %4214 = vmax.xlane.f32.xlu0 %v4213_v48 }
0x1644   :  { %16336 = vrot.lane.b32.xlu1 %v17989_v8, %s17148_s26 }
0x1648   :  { %16341 = vrot.lane.b32.xlu1 %v18002_v21, %s17148_s26 }
0x164c   :  { %4427 = vrot.lane.b32.xlu1 %v17981_v3, %s17149_s28 }
0x1650   :  { %4518 = vrot.lane.b32.xlu1 %v17993_v12, %s17149_s28 }
0x1659   :  { %16331 = vrot.lane.b32.xlu0 %v18008_v52, %s17147_s22 }
0x165d   :  { %4425 = vrot.lane.b32.xlu0 %v17983_v39, %s17149_s28 }
0x1661   :  { %4516 = vrot.lane.b32.xlu0 %v17995_v14, %s17149_s28 }
0x16bc   :  { %v4212_v51 = vpop.xlane.xlu1 %4211 }
0x16bd   :  { %v4220_v8 = vsub.f32 %v4204_v36, %v4212_v51  ;;  %v4209_v24 = vpop.xlane.xlu0 %4208 }
0x16be   :  { %v4219_v54 = vsub.f32 %v4203_v50, %v4209_v24 }
0x16bf   :  { %v4225_v21 = vmul.f32 1.442695, %v4220_v8 }
0x16c0   :  { %v4223_v63 = vmul.f32 1.442695, %v4219_v54  ;;  %v16327_v49 = vpop.permute.xlu1 %16326 }
0x16c1   :  { %v16329_v3 = vunpack.i.h.bf16 %v16327_v49  ;;  %v16328_v46 = vunpack.i.l.bf16 %v16327_v49 }
0x16c2   :  { %16571 = vpow2.f32 %v4223_v63 }
0x16c3   :  { %16573 = vpow2.f32 %v4225_v21  ;;  %v15763_v12 = vpack.c.bf16 %v16329_v3, %v16328_v46 }
0x16c4   :  { %v16337_v1 = vpop.permute.xlu1 %16336 }
0x16c5   :  { %v16339_v7 = vunpack.i.h.bf16 %v16337_v1  ;;  %v16338_v2 = vunpack.i.l.bf16 %v16337_v1  ;;  %15764 = vmatprep.subr.bf16.mxu0 %v15763_v12 }
0x16c6   :  { %15766 = vmatpush3.bf16.msra.mxu0 %v15763_v12 }
0x16c7   :  { %v15771_v39 = vpack.c.bf16 %v16339_v7, %v16338_v2  ;;  %v3823_v2 = vsel %vm1026_vm4, %v18096_v56, 0.0 }
0x16c8   :  { %v16342_v25 = vpop.permute.xlu1 %16341 }
0x16c9   :  { %15773 = vmatprep.subr.msk.bf16.mxu0 %vm17623_vm3, %v15771_v39  ;;  %v16344_v29 = vunpack.i.h.bf16 %v16342_v25  ;;  %v16343_v32 = vunpack.i.l.bf16 %v16342_v25 }
0x16cb   :  { %v15777_v38 = vpack.c.bf16 %v16344_v29, %v16343_v32 }
0x16cc   :  { %v16572_v14 = vpop.eup %16571  ;;  %v4218_v9 = vpop.xlane.xlu0 %4217 }
0x16cd   :  { %v18152_v13 = vpop.eup %16573  ;;  %14759 = vmatprep.mubr.msk.f32.mxu0 %vm1026_vm4, %v16572_v14  ;;  %v4222_v15 = vsub.f32 %v4206_v11, %v4218_v9  ;;  %v4428_v50 = vpop.permute.xlu1 %4427  ;;  %v3826_v9 = vsel %vm1026_vm4, %v18098_v59, 0.0 }
0x16ce   :  { %14760 = vmatmul.mubr.msk.f32.vlgmr.msra.gmra.mrb[38].mxu0 %vm1026_vm4, %v18152_v13 }
0x16cf   :  { %15776 = vmatpush3.bf16.xpose.msk.msra.mxu0 %vm17623_vm3, %v15771_v39  ;;  %v4229_v45 = vmul.f32 1.442695, %v4222_v15  ;;  %v4231_v39 = vsel %vm1026_vm4, %v16572_v14, 0.0 }
0x16d0   :  { %v4215_v20 = vpop.xlane.xlu0 %4214 }
0x16d1   :  { %v4221_v27 = vsub.f32 %v4205_v61, %v4215_v20  ;;  %v4519_v11 = vpop.permute.xlu1 %4518 }
0x16d3   :  { %v4227_v18 = vmul.f32 1.442695, %v4221_v27 }
0x16d4   :  { %v16332_v5 = vpop.permute.xlu0 %16331 }
0x16d5   :  { %16575 = vpow2.f32 %v4227_v18  ;;  %v16334_v33 = vunpack.i.h.bf16 %v16332_v5  ;;  %v16333_v17 = vunpack.i.l.bf16 %v16332_v5 }
0x16d6   :  { %16577 = vpow2.f32 %v4229_v45 }
0x16d7   :  { %v15767_v47 = vpack.c.bf16 %v16334_v33, %v16333_v17 }
0x16d8   :  { %v4426_v36 = vpop.permute.xlu0 %4425 }
0x16d9   :  { %15768 = vmatprep.subr.bf16.mxu1 %v15767_v47  ;;  %14773 = vmatprep.mubr.msk.f32.mxu0 %vm849_vm2, %v4426_v36 }
0x16da   :  { %15770 = vmatpush3.bf16.msra.mxu1 %v15767_v47  ;;  %14774 = vmatmul.mubr.msk.f32.vlgmr.msra.gmra.mrb[40].mxu0 %vm849_vm2, %v4428_v50 }
0x16db   :  { %15779 = vmatprep.subr.msk.bf16.mxu1 %vm17623_vm3, %v15777_v38 }
0x16dc   :  { %v4517_v58 = vpop.permute.xlu0 %4516 }
0x16df   :  { %v18163_v57 = vpop.eup %16575 }
0x16e0   :  { %v18165_v55 = vpop.eup %16577  ;;  %14766 = vmatprep.mubr.msk.f32.mxu1 %vm1026_vm4, %v18163_v57 }
0x16e1   :  { %14767 = vmatmul.mubr.msk.f32.vlgmr.msra.gmra.mrb[54].mxu1 %vm1026_vm4, %v18165_v55 }
0x16e2   :  { %14780 = vmatprep.mubr.msk.f32.mxu1 %vm849_vm2, %v4517_v58  ;;  %v3829_v58 = vsel %vm1026_vm4, %v18110_v30, 0.0 }
0x16e3   :  { %15782 = vmatpush3.bf16.xpose.msk.msra.mxu1 %vm17623_vm3, %v15777_v38  ;;  %v3832_v38 = vsel %vm1026_vm4, %v18112_v37, 0.0 }
0x16ea   :  { %14781 = vmatmul.mubr.msk.f32.vlgmr.msra.gmra.mrb[56].mxu1 %vm849_vm2, %v4519_v11 }
0x17a1   :  { %v18175_v62 = vpop.f32.mrb[38].mxu0 }
0x17a2   :  { %v18177_v61 = vpop.f32.mrb[39].mxu0 }
0x17ad   :  { %v14775_v43 = vpop.f32.mrb[40].mxu0 }
0x17ae   :  { %v4608_v48 = vmul.f32 0.35355338, %v14775_v43  ;;  %v4507_v51 = vpop.f32.mrb[41].mxu0 }
0x17af   :  { %v4607_v8 = vmul.f32 0.35355338, %v4507_v51 }
0x17b0   :  { %v4614_v24 = vsel %vm1026_vm4, %v4608_v48, -inf }
0x17b1   :  { %4615 = vmax.xlane.f32.xlu1 %v4614_v24  ;;  %v4611_v54 = vsel %vm1026_vm4, %v4607_v8, -inf  ;;  %v4237_v24 = vsel %vm1026_vm4, %v18163_v57, 0.0  ;;  %v3440_v57 = vsel %vm1026_vm4, %v18056_v22, 0.0 }
0x17b2   :  { %4612 = vmax.xlane.f32.xlu0 %v4611_v54 }
0x17b4   :  { %v18181_v21 = vpop.f32.mrb[54].mxu1 }
0x17b5   :  { %v18183_v63 = vpop.f32.mrb[55].mxu1 }
0x17bd   :  { %v14782_v49 = vpop.f32.mrb[56].mxu1 }
0x17be   :  { %v4610_v3 = vmul.f32 0.35355338, %v14782_v49  ;;  %v4598_v46 = vpop.f32.mrb[57].mxu1 }
0x17bf   :  { %v4609_v12 = vmul.f32 0.35355338, %v4598_v46  ;;  %v3431_v46 = vsel %vm1026_vm4, %v18040_v60, 0.0 }
0x17c0   :  { %v4620_v1 = vsel %vm1026_vm4, %v4610_v3, -inf }
0x17c1   :  { %4621 = vmax.xlane.f32.xlu0 %v4620_v1  ;;  %v4617_v7 = vsel %vm1026_vm4, %v4609_v12, -inf }
0x17c2   :  { %16346 = vrot.lane.b32.xlu1 %v18006_v26, %s17149_s28  ;;  %v4234_v26 = vsel %vm1026_vm4, %v18152_v13, 0.0 }
0x17c5   :  { %4618 = vmax.xlane.f32.xlu0 %v4617_v7 }
0x17db   :  { %16351 = vrot.lane.b32.xlu0 %v18008_v52, %s17149_s28 }
0x17e6   :  { %3824 = vadd.xlane.f32.xlu1 %v3823_v2 }
0x17ea   :  { %4232 = vadd.xlane.f32.xlu1 %v4231_v39 }
0x17fa   :  { %3827 = vadd.xlane.f32.xlu0 %v3826_v9 }
0x17fe   :  { %4235 = vadd.xlane.f32.xlu0 %v4234_v26 }
0x183e   :  { %v4616_v15 = vpop.xlane.xlu1 %4615 }
0x183f   :  { %v4624_v20 = vsub.f32 %v4608_v48, %v4616_v15  ;;  %v4613_v25 = vpop.xlane.xlu0 %4612  ;;  %v4240_v48 = vsel %vm1026_vm4, %v18165_v55, 0.0  ;;  %v3434_v55 = vsel %vm1026_vm4, %v18042_v23, 0.0 }
0x1840   :  { %v4623_v27 = vsub.f32 %v4607_v8, %v4613_v25  ;;  %v13545_v25 = vld [vmem:[%s19541_s20 + $0x28] sm:$0xff] }
0x1841   :  { %v4629_v52 = vmul.f32 1.442695, %v4624_v20  ;;  %v13544_v20 = vld [vmem:[%s19541_s20 + $0x20] sm:$0xff] }
0x1842   :  { %v4627_v45 = vmul.f32 1.442695, %v4623_v27  ;;  %v16347_v18 = vpop.permute.xlu1 %16346  ;;  %v15791_v27 = vpack.c.bf16 %v13545_v25, %v13544_v20 }
0x1843   :  { %16579 = vpow2.f32 %v4629_v52  ;;  %v16349_v56 = vunpack.i.h.bf16 %v16347_v18  ;;  %v16348_v29 = vunpack.i.l.bf16 %v16347_v18  ;;  %v13547_v52 = vld [vmem:[%s19541_s20 + $0x38] sm:$0xff] }
0x1844   :  { %16581 = vpow2.f32 %v4627_v45 }
0x1845   :  { %v15783_v14 = vpack.c.bf16 %v16349_v56, %v16348_v29 }
0x1847   :  { %15784 = vmatprep.subr.bf16.mxu0 %v15783_v14 }
0x1848   :  { %15786 = vmatpush3.bf16.msra.mxu0 %v15783_v14 }
0x1849   :  { %15792 = vmatprep.subr.bf16.mxu0 %v15791_v27 }
0x184d   :  { %v16580_v59 = vpop.eup %16579 }
0x184e   :  { %v16582_v5 = vpop.eup %16581  ;;  %v4622_v32 = vpop.xlane.xlu0 %4621  ;;  %v4638_v13 = vsel %vm1026_vm4, %v16580_v59, 0.0 }
0x184f   :  { %v4626_v33 = vsub.f32 %v4610_v3, %v4622_v32  ;;  %14787 = vmatprep.mubr.msk.f32.mxu0 %vm1026_vm4, %v16582_v5  ;;  %4639 = vadd.xlane.f32.xlu0 %v4638_v13  ;;  %v4635_v17 = vsel %vm1026_vm4, %v16582_v5, 0.0 }
0x1850   :  { %14788 = vmatmul.mubr.msk.f32.vlgmr.msra.gmra.mrb[42].mxu0 %vm1026_vm4, %v16580_v59  ;;  %4636 = vadd.xlane.f32.xlu1 %v4635_v17 }
0x1851   :  { %v4633_v47 = vmul.f32 1.442695, %v4626_v33  ;;  %15794 = vmatpush3.bf16.msra.mxu0 %v15791_v27 }
0x1852   :  { %v4619_v36 = vpop.xlane.xlu0 %4618 }
0x1853   :  { %16583 = vpow2.f32 %v4633_v47  ;;  %v4625_v50 = vsub.f32 %v4609_v12, %v4619_v36  ;;  %3833 = vadd.xlane.f32.xlu0 %v3832_v38  ;;  %v3437_v12 = vsel %vm1026_vm4, %v18054_v28, 0.0 }
0x1854   :  { %3830 = vadd.xlane.f32.xlu1 %v3829_v58 }
0x1855   :  { %v4631_v11 = vmul.f32 1.442695, %v4625_v50 }
0x1856   :  { %v16352_v43 = vpop.permute.xlu0 %16351 }
0x1857   :  { %16585 = vpow2.f32 %v4631_v11  ;;  %v16354_v51 = vunpack.i.h.bf16 %v16352_v43  ;;  %v16353_v8 = vunpack.i.l.bf16 %v16352_v43  ;;  %4241 = vadd.xlane.f32.xlu0 %v4240_v48 }
0x1858   :  { %4238 = vadd.xlane.f32.xlu1 %v4237_v24 }
0x1859   :  { %v15787_v37 = vpack.c.bf16 %v16354_v51, %v16353_v8 }
0x185b   :  { %15788 = vmatprep.subr.bf16.mxu1 %v15787_v37 }
0x185c   :  { %15790 = vmatpush3.bf16.msra.mxu1 %v15787_v37 }
0x185d   :  { %v16584_v54 = vpop.eup %16583 }
0x185e   :  { %v4644_v30 = vsel %vm1026_vm4, %v16584_v54, 0.0 }
0x185f   :  { %4645 = vadd.xlane.f32.xlu0 %v4644_v30 }
0x1861   :  { %v16586_v49 = vpop.eup %16585 }
0x1862   :  { %14794 = vmatprep.mubr.msk.f32.mxu1 %vm1026_vm4, %v16586_v49  ;;  %v4641_v3 = vsel %vm1026_vm4, %v16586_v49, 0.0 }
0x1863   :  { %3435 = vadd.xlane.f32.xlu0 %v3434_v55  ;;  %4642 = vadd.xlane.f32.xlu1 %v4641_v3 }
0x1864   :  { %14795 = vmatmul.mubr.msk.f32.vlgmr.msra.gmra.mrb[58].mxu1 %vm1026_vm4, %v16584_v54 }
0x1867   :  { %3441 = vadd.xlane.f32.xlu0 %v3440_v57  ;;  %3432 = vadd.xlane.f32.xlu1 %v3431_v46 }
0x186b   :  { %3438 = vadd.xlane.f32.xlu1 %v3437_v12 }
0x1873   :  { %v3825_v1 = vpop.xlane.xlu1 %3824 }
0x1874   :  { %16587 = vrcp.f32 %v3825_v1 }
0x1877   :  { %v4233_v23 = vpop.xlane.xlu1 %4232 }
0x1878   :  { %16589 = vrcp.f32 %v4233_v23 }
0x187e   :  { %v16588_v7 = vpop.eup %16587 }
0x187f   :  { %v4017_v2 = vmul.f32 %v16588_v7, %v18124_v34 }
0x1881   :  { %4833 = vrot.lane.b32.xlu1 %v4017_v2, %s17150_s27 }
0x1882   :  { %v16590_v22 = vpop.eup %16589 }
0x1883   :  { %v4421_v60 = vmul.f32 %v16590_v22, %v18177_v61  ;;  %v13546_v61 = vld [vmem:[%s19541_s20 + $0x30] sm:$0xff]  ;;  %s19558_s20 = sld [smem:[#allocation51_spill]] }
0x1884   :  { %v15795_v45 = vpack.c.bf16 %v13547_v52, %v13546_v61 }
0x1885   :  { %4849 = vrot.lane.b32.xlu1 %v4421_v60, %s19495_s0 }
0x1886   :  { %15796 = vmatprep.subr.bf16.mxu0 %v15795_v45 }
0x1887   :  { %v3828_v28 = vpop.xlane.xlu0 %3827  ;;  %15798 = vmatpush3.bf16.msra.mxu0 %v15795_v45 }
0x1888   :  { %16591 = vrcp.f32 %v3828_v28 }
0x188b   :  { %v4236_v39 = vpop.xlane.xlu0 %4235 }
0x188c   :  { %16593 = vrcp.f32 %v4236_v39 }
0x1892   :  { %v16592_v9 = vpop.eup %16591 }
0x1893   :  { %v4018_v26 = vmul.f32 %v16592_v9, %v18122_v16 }
0x1895   :  { %4835 = vrot.lane.b32.xlu0 %v4018_v26, %s17150_s27 }
0x1896   :  { %v16594_v34 = vpop.eup %16593 }
0x1897   :  { %v4422_v15 = vmul.f32 %v16594_v34, %v18175_v62 }
0x1899   :  { %4851 = vrot.lane.b32.xlu1 %v4422_v15, %s19495_s0 }
0x18dc   :  { %v4640_v18 = vpop.xlane.xlu0 %4639 }
0x18dd   :  { %v4637_v56 = vpop.xlane.xlu1 %4636  ;;  %16595 = vrcp.f32 %v4640_v18 }
0x18de   :  { %16597 = vrcp.f32 %v4637_v56 }
0x18e0   :  { %v3834_v16 = vpop.xlane.xlu0 %3833 }
0x18e1   :  { %v3831_v29 = vpop.xlane.xlu1 %3830  ;;  %16599 = vrcp.f32 %v3834_v16 }
0x18e2   :  { %16601 = vrcp.f32 %v3831_v29 }
0x18e4   :  { %v4242_v62 = vpop.xlane.xlu0 %4241 }
0x18e5   :  { %v4239_v14 = vpop.xlane.xlu1 %4238  ;;  %16603 = vrcp.f32 %v4242_v62 }
0x18e6   :  { %16605 = vrcp.f32 %v4239_v14 }
0x18e7   :  { %v16596_v59 = vpop.eup %16595 }
0x18e8   :  { %v16598_v32 = vpop.eup %16597 }
0x18eb   :  { %v16600_v17 = vpop.eup %16599 }
0x18ec   :  { %v16602_v36 = vpop.eup %16601  ;;  %v4020_v38 = vmul.f32 %v16600_v17, %v18128_v44  ;;  %v4646_v43 = vpop.xlane.xlu0 %4645 }
0x18ed   :  { %v4019_v58 = vmul.f32 %v16602_v36, %v18130_v40  ;;  %16607 = vrcp.f32 %v4646_v43 }
0x18ef   :  { %v16604_v50 = vpop.eup %16603 }
0x18f0   :  { %v16606_v11 = vpop.eup %16605  ;;  %v4643_v48 = vpop.xlane.xlu1 %4642  ;;  %v4424_v51 = vmul.f32 %v16604_v50, %v18181_v21 }
0x18f1   :  { %v4423_v8 = vmul.f32 %v16606_v11, %v18183_v63  ;;  %16609 = vrcp.f32 %v4643_v48  ;;  %v3436_v55 = vpop.xlane.xlu0 %3435 }
0x18f4   :  { %v3433_v49 = vpop.xlane.xlu1 %3432 }
0x18f5   :  { %16611 = vrcp.f32 %v3433_v49  ;;  %v3442_v46 = vpop.xlane.xlu0 %3441 }
0x18f6   :  { %16613 = vrcp.f32 %v3436_v55 }
0x18f7   :  { %v16608_v44 = vpop.eup %16607 }
0x18f8   :  { %v3439_v21 = vpop.xlane.xlu1 %3438 }
0x18f9   :  { %16615 = vrcp.f32 %v3439_v21 }
0x18fa   :  { %16617 = vrcp.f32 %v3442_v46 }
0x18fb   :  { %v16610_v40 = vpop.eup %16609 }
0x18fc   :  { %v4834_v63 = vpop.permute.xlu1 %4833 }
0x18ff   :  { %v16612_v3 = vpop.eup %16611 }
0x1900   :  { %v4850_v57 = vpop.permute.xlu1 %4849  ;;  %v3609_v12 = vmul.f32 %v16612_v3, %v18068_v6  ;;  %v16614_v1 = vpop.eup %16613 }
0x1901   :  { %v3610_v22 = vmul.f32 %v16614_v1, %v18066_v19 }
0x1902   :  { %v4877_v2 = vsel %vm849_vm2, %v3609_v12, %v4834_v63 }
0x1903   :  { %v4881_v28 = vsel %vm1026_vm4, %v4877_v2, %v4850_v57  ;;  %v16616_v20 = vpop.eup %16615  ;;  %v13616_v2 = vld [vmem:[%s19543_s12 + $0x20] sm:$0xff] }
0x1904   :  { %v16618_v25 = vpop.eup %16617  ;;  %v3611_v52 = vmul.f32 %v16616_v20, %v18074_v42  ;;  %v13607_v42 = vld [vmem:[%s19542_s2 + $0x1] ss:$0 sm:$0xff]  ;;  %v13628_v20 = vld [vmem:[%s19544_s23 + $0x50] sm:$0xff]  ;;  %s19559_s2 = sld [smem:[#allocation49_spill]] }
0x1905   :  { %v3612_v45 = vmul.f32 %v16618_v25, %v18072_v31 }
0x1907   :  { %v4836_v7 = vpop.permute.xlu0 %4835 }
0x1908   :  { %v4878_v39 = vsel %vm849_vm2, %v3610_v22, %v4836_v7  ;;  %v13617_v22 = vld [vmem:[%s19543_s12 + $0x28] sm:$0xff] }
0x190b   :  { %v4852_v23 = vpop.permute.xlu1 %4851 }
0x190c   :  { %v4882_v26 = vsel %vm1026_vm4, %v4878_v39, %v4852_v23  ;;  %v13619_v39 = vld [vmem:[%s19543_s12 + $0x38] sm:$0xff] }
0x1923   :  { %v14789_v5 = vpop.f32.mrb[42].mxu0 }
0x1924   :  { %v4826_v13 = vmul.f32 %v16596_v59, %v14789_v5  ;;  %v4725_v33 = vpop.f32.mrb[43].mxu0 }
0x1925   :  { %v4825_v47 = vmul.f32 %v16598_v32, %v4725_v33 }
0x1926   :  { %4867 = vrot.lane.b32.xlu1 %v4826_v13, %s19493_s1 }
0x1927   :  { %4865 = vrot.lane.b32.xlu0 %v4825_v47, %s19493_s1 }
0x192a   :  { %4839 = vrot.lane.b32.xlu1 %v4020_v38, %s17150_s27 }
0x192b   :  { %4837 = vrot.lane.b32.xlu0 %v4019_v58, %s17150_s27 }
0x192e   :  { %4855 = vrot.lane.b32.xlu1 %v4424_v51, %s19495_s0 }
0x192f   :  { %4853 = vrot.lane.b32.xlu0 %v4423_v8, %s19495_s0 }
0x1937   :  { %v14796_v24 = vpop.f32.mrb[58].mxu1 }
0x1938   :  { %v4828_v37 = vmul.f32 %v16608_v44, %v14796_v24  ;;  %v4812_v54 = vpop.f32.mrb[59].mxu1 }
0x1939   :  { %v4827_v30 = vmul.f32 %v16610_v40, %v4812_v54 }
0x193a   :  { %4871 = vrot.lane.b32.xlu1 %v4828_v37, %s19493_s1 }
0x193b   :  { %4869 = vrot.lane.b32.xlu0 %v4827_v30, %s19493_s1 }
0x1998   :  { %v4868_v60 = vpop.permute.xlu1 %4867 }
0x1999   :  { %v4866_v9 = vpop.permute.xlu0 %4865  ;;  %v4886_v15 = vsel %vm2505_vm5, %v4882_v26, %v4868_v60  ;;  %v15799_v60 = vpack.c.bf16 %v13617_v22, %v13616_v2  ;;  %v5380_v26 = vld [vmem:[%s19551_s3] sm:$0xff] }
0x199a   :  { %v4885_v34 = vsel %vm2505_vm5, %v4881_v28, %v4866_v9  ;;  %v13618_v28 = vld [vmem:[%s19543_s12 + $0x30] sm:$0xff]  ;;  %v13621_v22 = vld [vmem:[%s19547_s10 + $0x1] ss:$0 sm:$0xff]  ;;  %s19560_s12 = sld [smem:[#allocation53_spill]]  ;;  %s19565_s10 = sld [smem:[#allocation54_spill]] }
0x199b   :  { %14805 = vmatprep.mubr.msk.f32.mxu0 %vm642_vm1, %v4885_v34  ;;  %15800 = vmatprep.subr.bf16.mxu1 %v15799_v60  ;;  %v15803_v9 = vpack.c.bf16 %v13619_v39, %v13618_v28  ;;  %v5381_v34 = vld [vmem:[%s19551_s3 + $0x8] sm:$0xff] }
0x199c   :  { %14806 = vmatmul.mubr.msk.f32.vlgmr.msra.gmra.mrb[44].mxu0 %vm642_vm1, %v4886_v15  ;;  %v4840_v6 = vpop.permute.xlu1 %4839  ;;  %15802 = vmatpush3.bf16.msra.mxu1 %v15799_v60  ;;  %v15823_v15 = vpack.c.bf16 %v5381_v34, %v5380_v26 }
0x199d   :  { %v4838_v19 = vpop.permute.xlu0 %4837  ;;  %v4880_v16 = vsel %vm849_vm2, %v3612_v45, %v4840_v6  ;;  %15804 = vmatprep.subr.bf16.mxu1 %v15803_v9  ;;  %v13626_v6 = vld [vmem:[%s19544_s23 + $0x40] sm:$0xff]  ;;  %v13631_v45 = vld [vmem:[%s19544_s23 + $0x68] sm:$0xff] }
0x199e   :  { %v4879_v18 = vsel %vm849_vm2, %v3611_v52, %v4838_v19  ;;  %v13627_v19 = vld [vmem:[%s19544_s23 + $0x48] sm:$0xff]  ;;  %v13630_v52 = vld [vmem:[%s19544_s23 + $0x60] sm:$0xff] }
0x199f   :  { %v15807_v25 = vpack.c.bf16 %v13627_v19, %v13626_v6 }
0x19a0   :  { %v4856_v61 = vpop.permute.xlu1 %4855  ;;  %15806 = vmatpush3.bf16.msra.mxu1 %v15803_v9 }
0x19a1   :  { %v4854_v27 = vpop.permute.xlu0 %4853  ;;  %v4884_v14 = vsel %vm1026_vm4, %v4880_v16, %v4856_v61  ;;  %15824 = vmatprep.subr.bf16.mxu1 %v15823_v15  ;;  %v13629_v61 = vld [vmem:[%s19544_s23 + $0x58] sm:$0xff]  ;;  %15808 = vmatprep.subr.bf16.mxu0 %v15807_v25 }
0x19a2   :  { %v4883_v29 = vsel %vm1026_vm4, %v4879_v18, %v4854_v27  ;;  %v15811_v27 = vpack.c.bf16 %v13629_v61, %v13628_v20  ;;  %15810 = vmatpush3.bf16.msra.mxu0 %v15807_v25  ;;  %v15815_v18 = vpack.c.bf16 %v13631_v45, %v13630_v52  ;;  %v13644_v25 = vld [vmem:[%s19554_s17] ss:$0 sm:$0xff] }
0x19a4   :  { %15812 = vmatprep.subr.bf16.mxu0 %v15811_v27 }
0x19a6   :  { %15814 = vmatpush3.bf16.msra.mxu0 %v15811_v27 }
0x19a7   :  { %15816 = vmatprep.subr.bf16.mxu0 %v15815_v18 }
0x19aa   :  { %15818 = vmatpush3.bf16.msra.mxu0 %v15815_v18 }
0x19ac   :  { %v4872_v56 = vpop.permute.xlu1 %4871 }
0x19ad   :  { %v4870_v62 = vpop.permute.xlu0 %4869  ;;  %v4888_v5 = vsel %vm2505_vm5, %v4884_v14, %v4872_v56 }
0x19ae   :  { %v4887_v59 = vsel %vm2505_vm5, %v4883_v29, %v4870_v62 }
0x19af   :  { %14808 = vmatprep.mubr.msk.f32.mxu0 %vm642_vm1, %v4887_v59 }
0x19b0   :  { %14809 = vmatmul.mubr.msk.f32.gmra.mrb[46].mxu0 %vm642_vm1, %v4888_v5 }
0x1a6f   :  { %v14807_v31 = vpop.f32.mrb[44].mxu0 }
0x1a70   :  { %v4979_v32 = vadd.f32 %v14807_v31, %v13607_v42  ;;  %v4973_v13 = vpop.f32.mrb[45].mxu0 }
0x1a71   :  { %v4974_v33 = vadd.f32 %v13607_v42, %v4973_v13 }
0x1a72   :  { %v4993_v17 = vadd.f32 %v4979_v32, %v17950_v35 }
0x1a73   :  { %v4992_v47 = vadd.f32 %v4974_v33, %v17952_v53  ;;  %v13615_v33 = vld [vmem:[%s19546_s7 + $0x1] ss:$0 sm:$0xff]  ;;  %s19564_s7 = sld [smem:[#allocation50_spill]] }
0x1a74   :  { %v5003_v36 = vsel %vm642_vm1, %v4993_v17, 0.0 }
0x1a75   :  { %5004 = vadd.xlane.f32.xlu1 %v5003_v36  ;;  %v5000_v38 = vsel %vm642_vm1, %v4992_v47, 0.0  ;;  %v5382_v36 = vld [vmem:[%s19551_s3 + $0x10] sm:$0xff] }
0x1a76   :  { %5001 = vadd.xlane.f32.xlu0 %v5000_v38  ;;  %v5383_v38 = vld [vmem:[%s19551_s3 + $0x18] sm:$0xff] }
0x1a83   :  { %v14810_v50 = vpop.f32.mrb[46].mxu0 }
0x1a84   :  { %v4983_v58 = vpop.f32.mrb[47].mxu0  ;;  %v4989_v11 = vadd.f32 %v14810_v50, %v13607_v42 }
0x1a85   :  { %v4984_v43 = vadd.f32 %v13607_v42, %v4983_v58  ;;  %v13614_v42 = vld [vmem:[%s19545_s30 + $0x1] ss:$0 sm:$0xff]  ;;  %s19563_s30 = sld [smem:[#allocation52_spill]] }
0x1a86   :  { %v4995_v51 = vadd.f32 %v4989_v11, %v17962_v41 }
0x1a87   :  { %v4994_v48 = vadd.f32 %v4984_v43, %v17964_v10 }
0x1a88   :  { %v5009_v35 = vsel %vm642_vm1, %v4995_v51, 0.0 }
0x1a89   :  { %v5006_v8 = vsel %vm642_vm1, %v4994_v48, 0.0 }
0x1a8a   :  { %5007 = vadd.xlane.f32.xlu0 %v5006_v8 }
0x1a8e   :  { %5010 = vadd.xlane.f32.xlu0 %v5009_v35 }
0x1b02   :  { %v5005_v53 = vpop.xlane.xlu1 %5004 }
0x1b03   :  { %v5013_v44 = vmul.f32 0.03125, %v5005_v53  ;;  %v5002_v24 = vpop.xlane.xlu0 %5001 }
0x1b04   :  { %v5012_v40 = vmul.f32 0.03125, %v5002_v24 }
0x1b05   :  { %v5017_v37 = vsub.f32 %v4993_v17, %v5013_v44 }
0x1b06   :  { %v5016_v54 = vsub.f32 %v4992_v47, %v5012_v40 }
0x1b07   :  { %v5021_v30 = vmul.f32 %v5017_v37, %v5017_v37 }
0x1b08   :  { %v5020_v49 = vmul.f32 %v5016_v54, %v5016_v54 }
0x1b09   :  { %v5027_v21 = vsel %vm642_vm1, %v5021_v30, 0.0 }
0x1b0a   :  { %5028 = vadd.xlane.f32.xlu0 %v5027_v21  ;;  %v5024_v41 = vsel %vm642_vm1, %v5020_v49, 0.0 }
0x1b0b   :  { %5025 = vadd.xlane.f32.xlu1 %v5024_v41  ;;  %v18320_v41 = vld [vmem:[%s19552_s4] sm:$0xff] }
0x1b17   :  { %v5008_v10 = vpop.xlane.xlu0 %5007 }
0x1b18   :  { %v5014_v55 = vmul.f32 0.03125, %v5008_v10  ;;  %v18327_v10 = vld [vmem:[%s19552_s4 + $0x8] sm:$0xff] }
0x1b1a   :  { %v18277_v63 = vsub.f32 %v4994_v48, %v5014_v55  ;;  %v15827_v48 = vpack.c.bf16 %v5383_v38, %v5382_v36  ;;  %v13632_v55 = vld [vmem:[%s19544_s23 + $0x70] sm:$0xff] }
0x1b1b   :  { %v5011_v3 = vpop.xlane.xlu0 %5010 }
0x1b1c   :  { %v5015_v57 = vmul.f32 0.03125, %v5011_v3  ;;  %v5022_v46 = vmul.f32 %v18277_v63, %v18277_v63 }
0x1b1e   :  { %v18281_v12 = vsub.f32 %v4995_v51, %v5015_v57  ;;  %v5030_v1 = vsel %vm642_vm1, %v5022_v46, 0.0  ;;  %v5385_v57 = vld [vmem:[%s19553_s15] sm:$0xff]  ;;  %v5386_v46 = vld [vmem:[%s19553_s15 + $0x8] sm:$0xff] }
0x1b1f   :  { %5031 = vadd.xlane.f32.xlu1 %v5030_v1  ;;  %v15831_v1 = vpack.c.bf16 %v5386_v46, %v5385_v57 }
0x1b20   :  { %v5023_v23 = vmul.f32 %v18281_v12, %v18281_v12 }
0x1b22   :  { %v5033_v7 = vsel %vm642_vm1, %v5023_v23, 0.0  ;;  %v5388_v23 = vld [vmem:[%s19553_s15 + $0x18] sm:$0xff] }
0x1b23   :  { %5034 = vadd.xlane.f32.xlu0 %v5033_v7  ;;  %v17152_v7 = vmov 0.0  }
0x1b97   :  { %v5029_v56 = vpop.xlane.xlu0 %5028 }
0x1b98   :  { %v5037_v16 = vmul.f32 0.03125, %v5029_v56  ;;  %v5026_v29 = vpop.xlane.xlu1 %5025 }
0x1b99   :  { %v5036_v62 = vmul.f32 0.03125, %v5026_v29 }
0x1b9a   :  { %v5041_v14 = vadd.f32 1e-05, %v5037_v16 }
0x1b9b   :  { %v5040_v59 = vadd.f32 1e-05, %v5036_v62  ;;  %v13647_v62 = vld [vmem:[%s19555_s5] ss:$0 sm:$0xff] }
0x1b9c   :  { %16619 = vrsqrt.f32 %v5041_v14 }
0x1b9d   :  { %16621 = vrsqrt.f32 %v5040_v59 }
0x1ba6   :  { %v16620_v5 = vpop.eup %16619 }
0x1ba7   :  { %v16622_v31 = vpop.eup %16621  ;;  %v5049_v32 = vmul.f32 %v16620_v5, %v5017_v37 }
0x1ba8   :  { %v5048_v13 = vmul.f32 %v16622_v31, %v5016_v54 }
0x1ba9   :  { %v5059_v17 = vmul.f32 %v13614_v42, %v5049_v32 }
0x1baa   :  { %v5058_v47 = vmul.f32 %v13614_v42, %v5048_v13 }
0x1bab   :  { %v18305_v43 = vadd.f32 %v13615_v33, %v5059_v17 }
0x1bac   :  { %v5032_v50 = vpop.xlane.xlu1 %5031  ;;  %v18303_v58 = vadd.f32 %v13615_v33, %v5058_v47 }
0x1bad   :  { %v5038_v11 = vmul.f32 0.03125, %v5032_v50 }
0x1bae   :  { %14819 = vmatprep.mubr.msk.f32.mxu1 %vm642_vm1, %v18303_v58 }
0x1baf   :  { %v5042_v51 = vadd.f32 1e-05, %v5038_v11  ;;  %14820 = vmatmul.mubr.msk.f32.vlgmr.msra.gmra.mrb[60].mxu1 %vm642_vm1, %v18305_v43 }
0x1bb0   :  { %v5035_v8 = vpop.xlane.xlu0 %5034  ;;  %15826 = vmatpush3.bf16.msra.mxu1 %v15823_v15 }
0x1bb1   :  { %16623 = vrsqrt.f32 %v5042_v51  ;;  %v5039_v35 = vmul.f32 0.03125, %v5035_v8  ;;  %15828 = vmatprep.subr.bf16.mxu1 %v15827_v48 }
0x1bb3   :  { %v5043_v53 = vadd.f32 1e-05, %v5039_v35 }
0x1bb4   :  { %15830 = vmatpush3.bf16.msra.mxu1 %v15827_v48 }
0x1bb5   :  { %16625 = vrsqrt.f32 %v5043_v53  ;;  %15832 = vmatprep.subr.bf16.mxu1 %v15831_v1 }
0x1bbb   :  { %v16624_v44 = vpop.eup %16623 }
0x1bbc   :  { %v5050_v24 = vmul.f32 %v16624_v44, %v18277_v63  ;;  %v13633_v63 = vld [vmem:[%s19544_s23 + $0x78] sm:$0xff]  ;;  %s19562_s23 = sld [smem:[#allocation48_spill]] }
0x1bbd   :  { %v15819_v3 = vpack.c.bf16 %v13633_v63, %v13632_v55 }
0x1bbe   :  { %v5060_v40 = vmul.f32 %v13614_v42, %v5050_v24 }
0x1bbf   :  { %v16626_v37 = vpop.eup %16625  ;;  %15820 = vmatprep.subr.bf16.mxu0 %v15819_v3 }
0x1bc0   :  { %v18312_v54 = vadd.f32 %v13615_v33, %v5060_v40  ;;  %v5051_v30 = vmul.f32 %v16626_v37, %v18281_v12  ;;  %15822 = vmatpush3.bf16.msra.mxu0 %v15819_v3  ;;  %v5387_v12 = vld [vmem:[%s19553_s15 + $0x10] sm:$0xff] }
0x1bc1   :  { %14874 = vmatprep.subr.mxu0 %v17152_v7  ;;  %v15835_v2 = vpack.c.bf16 %v5388_v23, %v5387_v12 }
0x1bc2   :  { %14822 = vmatprep.mubr.msk.f32.mxu1 %vm642_vm1, %v18312_v54  ;;  %v5061_v49 = vmul.f32 %v13614_v42, %v5051_v30 }
0x1bc4   :  { %v18317_v21 = vadd.f32 %v13615_v33, %v5061_v49 }
0x1bc6   :  { %14823 = vmatmul.mubr.msk.f32.gmra.mrb[62].mxu1 %vm642_vm1, %v18317_v21 }
0x1bc7   :  { %14855 = vmatprep.mubr.msk.f32.mxu1 %vm642_vm1, %v18320_v41 }
0x1bca   :  { %14856 = vmatmul.mubr.msk.f32.vlgmr.msra.gmra.mrb[64].mxu1 %vm642_vm1, %v18327_v10 }
0x1bcb   :  { %14866 = vmatprep.mubr.f32.mxu1 %v17152_v7  ;;  %15834 = vmatpush3.bf16.msra.mxu1 %v15831_v1 }
0x1bcc   :  { %15836 = vmatprep.subr.bf16.mxu1 %v15835_v2 }
0x1bcf   :  { %15838 = vmatpush3.bf16.msra.mxu1 %v15835_v2 }
0x1bd0   :  { %14869 = vmatprep.subr.mxu1 %v17152_v7 }
0x1bd2   :  { %14867 = vmatmul.mubr.f32.vlgmr.msra.gmra.mrb[66].mxu1 %v17152_v7 }
0x1bd3   :  { %14871 = vmatprep.mubr.msk.f32.mxu1 %vm17153_vm6, %v17152_v7 }
0x1c82   :  { %v14821_v60 = vpop.f32.mrb[60].mxu1 }
0x1c83   :  { %v5169_v28 = vadd.f32 %v14821_v60, %v13621_v22  ;;  %v5163_v39 = vpop.f32.mrb[61].mxu1 }
0x1c84   :  { %v5164_v9 = vadd.f32 %v13621_v22, %v5163_v39 }
0x1c85   :  { %v5183_v34 = vmax.f32 %v5169_v28, 0.0 }
0x1c86   :  { %v5182_v26 = vmax.f32 %v5164_v9, 0.0 }
0x1c88   :  { %14841 = vmatprep.mubr.msk.f32.mxu0 %vm397_vm0, %v5182_v26 }
0x1c89   :  { %14842 = vmatmul.mubr.msk.f32.vlgmr.msra.gmra.mrb[48].mxu0 %vm397_vm0, %v5183_v34 }
0x1c99   :  { %v14824_v15 = vpop.f32.mrb[62].mxu1 }
0x1c9a   :  { %v5179_v6 = vadd.f32 %v14824_v15, %v13621_v22  ;;  %v5173_v19 = vpop.f32.mrb[63].mxu1 }
0x1c9b   :  { %v5174_v20 = vadd.f32 %v13621_v22, %v5173_v19 }
0x1c9c   :  { %v5185_v52 = vmax.f32 %v5179_v6, 0.0 }
0x1c9d   :  { %v5184_v61 = vmax.f32 %v5174_v20, 0.0  ;;  %v14857_v27 = vpop.f32.mrb[64].mxu1 }
0x1c9e   :  { %v18347_v45 = vadd.f32 %v14857_v27, %v13644_v25  ;;  %v5475_v18 = vpop.f32.mrb[65].mxu1 }
0x1c9f   :  { %v18349_v56 = vadd.f32 %v13644_v25, %v5475_v18  ;;  %14844 = vmatprep.mubr.msk.f32.mxu0 %vm397_vm0, %v5184_v61 }
0x1ca0   :  { %5646 = vrot.lane.b32.xlu0 %v18347_v45, %s17143_s9  ;;  %14845 = vmatmul.mubr.msk.f32.gmra.mrb[50].mxu0 %vm397_vm0, %v5185_v52 }
0x1ca1   :  { %5569 = vrot.lane.b32.xlu1 %v18349_v56, %s17143_s9  ;;  %14876 = vmatprep.mubr.msk.f32.mxu0 %vm17153_vm6, %v17152_v7 }
0x1ca5   :  { %5894 = vrot.lane.b32.xlu1 %v18349_v56, %s17144_s16  ;;  %v14868_v16 = vpop.f32.mrb[66].mxu1 }
0x1ca6   :  { %v5559_v29 = vpop.f32.mrb[67].mxu1  ;;  %v18365_v5 = vadd.f32 %v14868_v16, %v13647_v62 }
0x1ca7   :  { %v18368_v42 = vadd.f32 %v13647_v62, %v5559_v29 }
0x1ca9   :  { %5892 = vrot.lane.b32.xlu1 %v18349_v56, %s17145_s29 }
0x1d12   :  { %v5647_v14 = vpop.permute.xlu0 %5646 }
0x1d13   :  { %14875 = vmatpush3.xpose.msk.msra.mxu0 %vm849_vm2, %v5647_v14  ;;  %v5570_v59 = vpop.permute.xlu1 %5569 }
0x1d14   :  { %14870 = vmatpush3.xpose.msk.msra.mxu1 %vm849_vm2, %v5570_v59  ;;  %14884 = vmatprep.subr.mxu0 %v17152_v7 }
0x1d15   :  { %14879 = vmatprep.subr.mxu1 %v17152_v7 }
0x1d16   :  { %14877 = vmatmul.mubr.msk.f32.vlgmr.msra.gmra.mrb[52].mxu0 %vm849_vm2, %v18347_v45 }
0x1d17   :  { %14872 = vmatmul.mubr.msk.f32.vlgmr.msra.gmra.mrb[68].mxu1 %vm849_vm2, %v18349_v56  ;;  %14885 = vmatpush3.msra.mxu0 %v18365_v5  ;;  %v5895_v8 = vpop.permute.xlu1 %5894 }
0x1d18   :  { %14880 = vmatpush3.msra.mxu1 %v18368_v42  ;;  %14886 = vmatprep.mubr.msk.f32.mxu0 %vm17153_vm6, %v17152_v7 }
0x1d19   :  { %14894 = vmatprep.subr.mxu0 %v17152_v7  ;;  %14881 = vmatprep.mubr.msk.f32.mxu1 %vm17153_vm6, %v17152_v7 }
0x1d1a   :  { %14889 = vmatprep.subr.mxu1 %v17152_v7 }
0x1d1b   :  { %v5893_v35 = vpop.permute.xlu1 %5892 }
0x1d5c   :  { %v18384_v31 = vpop.f32.mrb[48].mxu0 }
0x1d5d   :  { %v18386_v32 = vpop.f32.mrb[49].mxu0 }
0x1d73   :  { %v18388_v13 = vpop.f32.mrb[50].mxu0 }
0x1d74   :  { %v18390_v33 = vpop.f32.mrb[51].mxu0 }
0x1de9   :  { %v5718_v17 = vpop.f32.mrb[52].mxu0 }
0x1dea   :  { %v5723_v47 = vmul.f32 0.35355338, %v5718_v17  ;;  %v5641_v36 = vpop.f32.mrb[68].mxu1  ;;  %v14878_v38 = vpop.f32.mrb[53].mxu0 }
0x1deb   :  { %v5722_v50 = vmul.f32 0.35355338, %v5641_v36  ;;  %v14873_v11 = vpop.f32.mrb[69].mxu1 }
0x1dec   :  { %v5727_v48 = vsel %vm849_vm2, %v5723_v47, -inf }
0x1ded   :  { %5728 = vmax.xlane.f32.xlu0 %v5727_v48  ;;  %v5724_v51 = vsel %vm849_vm2, %v5722_v50, -inf }
0x1dee   :  { %5725 = vmax.xlane.f32.xlu1 %v5724_v51 }
0x1dff   :  { %5970 = vrot.lane.b32.xlu1 %v18347_v45, %s17145_s29 }
0x1e03   :  { %6146 = vrot.lane.b32.xlu1 %v18365_v5, %s17145_s29  ;;  %5972 = vrot.lane.b32.xlu0 %v18347_v45, %s17144_s16 }
0x1e07   :  { %6069 = vrot.lane.b32.xlu0 %v18368_v42, %s17145_s29 }
0x1e7a   :  { %v5729_v53 = vpop.xlane.xlu0 %5728 }
0x1e7b   :  { %v5731_v44 = vsub.f32 %v5723_v47, %v5729_v53  ;;  %v5726_v24 = vpop.xlane.xlu1 %5725 }
0x1e7c   :  { %v5730_v40 = vsub.f32 %v5722_v50, %v5726_v24 }
0x1e7d   :  { %v5734_v37 = vmul.f32 1.442695, %v5731_v44 }
0x1e7e   :  { %v5732_v30 = vmul.f32 1.442695, %v5730_v40  ;;  %v5973_v63 = vpop.permute.xlu0 %5972 }
0x1e7f   :  { %16627 = vpow2.f32 %v5734_v37  ;;  %v5971_v49 = vpop.permute.xlu1 %5970 }
0x1e80   :  { %16629 = vpow2.f32 %v5732_v30 }
0x1e82   :  { %v6070_v46 = vpop.permute.xlu0 %6069 }
0x1e83   :  { %v6147_v57 = vpop.permute.xlu1 %6146 }
0x1e89   :  { %v18402_v55 = vpop.eup %16627 }
0x1e8a   :  { %v18404_v3 = vpop.eup %16629  ;;  %14887 = vmatmul.mubr.msk.f32.vlgmr.msra.gmra.mrb[54].mxu0 %vm849_vm2, %v18402_v55 }
0x1e8b   :  { %14895 = vmatpush3.xpose.msk.msra.mxu0 %vm849_vm2, %v5973_v63  ;;  %14882 = vmatmul.mubr.msk.f32.vlgmr.msra.gmra.mrb[70].mxu1 %vm849_vm2, %v18404_v3 }
0x1e8c   :  { %14890 = vmatpush3.xpose.msk.msra.mxu1 %vm849_vm2, %v5895_v8  ;;  %14896 = vmatprep.mubr.msk.f32.mxu0 %vm17153_vm6, %v17152_v7 }
0x1e8d   :  { %14904 = vmatprep.subr.mxu0 %v17152_v7  ;;  %14891 = vmatprep.mubr.msk.f32.mxu1 %vm17153_vm6, %v17152_v7 }
0x1e8e   :  { %14897 = vmatmul.mubr.msk.f32.vlgmr.msra.gmra.mrb[56].mxu0 %vm849_vm2, %v5971_v49  ;;  %14899 = vmatprep.subr.mxu1 %v17152_v7 }
0x1e8f   :  { %14905 = vmatpush3.msra.mxu0 %v6147_v57  ;;  %14892 = vmatmul.mubr.msk.f32.vlgmr.msra.gmra.mrb[72].mxu1 %vm849_vm2, %v5893_v35 }
0x1e90   :  { %14900 = vmatpush3.msra.mxu1 %v6070_v46  ;;  %14906 = vmatprep.mubr.msk.f32.mxu0 %vm17153_vm6, %v17152_v7 }
0x1e91   :  { %14914 = vmatprep.subr.mxu0 %v17152_v7  ;;  %14901 = vmatprep.mubr.msk.f32.mxu1 %vm17153_vm6, %v17152_v7 }
0x1e92   :  { %14909 = vmatprep.subr.mxu1 %v17152_v7 }
0x1f5d   :  { %v18426_v12 = vpop.f32.mrb[54].mxu0 }
0x1f5e   :  { %v18428_v1 = vpop.f32.mrb[70].mxu1  ;;  %v14888_v23 = vpop.f32.mrb[55].mxu0 }
0x1f5f   :  { %v14883_v2 = vpop.f32.mrb[71].mxu1 }
0x1f61   :  { %v6044_v22 = vpop.f32.mrb[56].mxu0 }
0x1f62   :  { %v6049_v60 = vmul.f32 0.35355338, %v6044_v22  ;;  %v5966_v28 = vpop.f32.mrb[72].mxu1  ;;  %v14898_v39 = vpop.f32.mrb[57].mxu0 }
0x1f63   :  { %v6048_v9 = vmul.f32 0.35355338, %v5966_v28  ;;  %v14893_v26 = vpop.f32.mrb[73].mxu1 }
0x1f64   :  { %v6053_v34 = vsel %vm849_vm2, %v6049_v60, -inf }
0x1f65   :  { %6054 = vmax.xlane.f32.xlu1 %v6053_v34  ;;  %v6050_v15 = vsel %vm849_vm2, %v6048_v9, -inf }
0x1f66   :  { %6051 = vmax.xlane.f32.xlu0 %v6050_v15 }
0x1f76   :  { %6306 = vrot.lane.b32.xlu1 %v18347_v45, %s17146_s18 }
0x1f7a   :  { %6304 = vrot.lane.b32.xlu1 %v18347_v45, %s17147_s22 }
0x1f7c   :  { %6228 = vrot.lane.b32.xlu0 %v18349_v56, %s17146_s18 }
0x1f7e   :  { %6478 = vrot.lane.b32.xlu1 %v18365_v5, %s17147_s22 }
0x1f80   :  { %6226 = vrot.lane.b32.xlu0 %v18349_v56, %s17147_s22 }
0x1f84   :  { %6402 = vrot.lane.b32.xlu0 %v18368_v42, %s17147_s22 }
0x1ff2   :  { %v6055_v6 = vpop.xlane.xlu1 %6054 }
0x1ff3   :  { %v6057_v19 = vsub.f32 %v6049_v60, %v6055_v6  ;;  %v6052_v20 = vpop.xlane.xlu0 %6051 }
0x1ff4   :  { %v6056_v25 = vsub.f32 %v6048_v9, %v6052_v20 }
0x1ff5   :  { %v6060_v61 = vmul.f32 1.442695, %v6057_v19 }
0x1ff6   :  { %v6058_v27 = vmul.f32 1.442695, %v6056_v25  ;;  %v6307_v52 = vpop.permute.xlu1 %6306 }
0x1ff7   :  { %16631 = vpow2.f32 %v6060_v61  ;;  %v6229_v18 = vpop.permute.xlu0 %6228 }
0x1ff8   :  { %16633 = vpow2.f32 %v6058_v27 }
0x1ffa   :  { %v6305_v16 = vpop.permute.xlu1 %6304 }
0x1ffb   :  { %v6227_v62 = vpop.permute.xlu0 %6226 }
0x1ffe   :  { %v6479_v59 = vpop.permute.xlu1 %6478 }
0x1fff   :  { %v6403_v17 = vpop.permute.xlu0 %6402 }
0x2001   :  { %v18444_v29 = vpop.eup %16631 }
0x2002   :  { %v18446_v14 = vpop.eup %16633  ;;  %14907 = vmatmul.mubr.msk.f32.vlgmr.msra.gmra.mrb[58].mxu0 %vm849_vm2, %v18444_v29  ;;  %v6065_v27 = vsel %vm849_vm2, %v18444_v29, 0.0 }
0x2003   :  { %14915 = vmatpush3.xpose.msk.msra.mxu0 %vm849_vm2, %v6307_v52  ;;  %14902 = vmatmul.mubr.msk.f32.vlgmr.msra.gmra.mrb[74].mxu1 %vm849_vm2, %v18446_v14  ;;  %v6062_v52 = vsel %vm849_vm2, %v18446_v14, 0.0 }
0x2004   :  { %14910 = vmatpush3.xpose.msk.msra.mxu1 %vm849_vm2, %v6229_v18  ;;  %14916 = vmatprep.mubr.msk.f32.mxu0 %vm17153_vm6, %v17152_v7 }
0x2005   :  { %14924 = vmatprep.subr.mxu0 %v17152_v7  ;;  %14911 = vmatprep.mubr.msk.f32.mxu1 %vm17153_vm6, %v17152_v7 }
0x2006   :  { %14917 = vmatmul.mubr.msk.f32.vlgmr.msra.gmra.mrb[60].mxu0 %vm849_vm2, %v6305_v16  ;;  %14919 = vmatprep.subr.mxu1 %v17152_v7 }
0x2007   :  { %14925 = vmatpush3.msra.mxu0 %v6479_v59  ;;  %14912 = vmatmul.mubr.msk.f32.vlgmr.msra.gmra.mrb[76].mxu1 %vm849_vm2, %v6227_v62 }
0x2008   :  { %14920 = vmatpush3.msra.mxu1 %v6403_v17  ;;  %14926 = vmatprep.mubr.msk.f32.mxu0 %vm17153_vm6, %v17152_v7 }
0x2009   :  { %14934 = vmatprep.subr.mxu0 %v17152_v7  ;;  %14921 = vmatprep.mubr.msk.f32.mxu1 %vm17153_vm6, %v17152_v7 }
0x200a   :  { %14929 = vmatprep.subr.mxu1 %v17152_v7 }
0x20d5   :  { %v18468_v47 = vpop.f32.mrb[58].mxu0 }
0x20d6   :  { %v18470_v36 = vpop.f32.mrb[74].mxu1  ;;  %v14908_v38 = vpop.f32.mrb[59].mxu0 }
0x20d7   :  { %v14903_v50 = vpop.f32.mrb[75].mxu1 }
0x20d9   :  { %v6378_v11 = vpop.f32.mrb[60].mxu0 }
0x20da   :  { %v6383_v48 = vmul.f32 0.35355338, %v6378_v11  ;;  %v6300_v51 = vpop.f32.mrb[76].mxu1  ;;  %v14918_v8 = vpop.f32.mrb[61].mxu0 }
0x20db   :  { %v6382_v35 = vmul.f32 0.35355338, %v6300_v51  ;;  %v14913_v53 = vpop.f32.mrb[77].mxu1  ;;  %v5739_v8 = vsel %vm849_vm2, %v18402_v55, 0.0 }
0x20dc   :  { %v6387_v44 = vsel %vm849_vm2, %v6383_v48, -inf }
0x20dd   :  { %6388 = vmax.xlane.f32.xlu1 %v6387_v44  ;;  %v6384_v24 = vsel %vm849_vm2, %v6382_v35, -inf }
0x20de   :  { %6385 = vmax.xlane.f32.xlu0 %v6384_v24 }
0x20ee   :  { %6638 = vrot.lane.b32.xlu1 %v18347_v45, %s17148_s26 }
0x20f2   :  { %6636 = vrot.lane.b32.xlu1 %v18347_v45, %s17149_s28 }
0x20f4   :  { %6560 = vrot.lane.b32.xlu0 %v18349_v56, %s17148_s26 }
0x20f8   :  { %6558 = vrot.lane.b32.xlu0 %v18349_v56, %s17149_s28 }
0x216a   :  { %v6389_v40 = vpop.xlane.xlu1 %6388 }
0x216b   :  { %v6391_v37 = vsub.f32 %v6383_v48, %v6389_v40  ;;  %v6386_v30 = vpop.xlane.xlu0 %6385 }
0x216c   :  { %v6390_v49 = vsub.f32 %v6382_v35, %v6386_v30  ;;  %v5736_v35 = vsel %vm849_vm2, %v18404_v3, 0.0 }
0x216d   :  { %v6394_v63 = vmul.f32 1.442695, %v6391_v37 }
0x216e   :  { %v6392_v57 = vmul.f32 1.442695, %v6390_v49  ;;  %v6639_v46 = vpop.permute.xlu1 %6638 }
0x216f   :  { %16635 = vpow2.f32 %v6394_v63  ;;  %v6561_v23 = vpop.permute.xlu0 %6560 }
0x2170   :  { %16637 = vpow2.f32 %v6392_v57 }
0x2172   :  { %v6637_v45 = vpop.permute.xlu1 %6636 }
0x2173   :  { %v6559_v56 = vpop.permute.xlu0 %6558 }
0x2179   :  { %v16636_v2 = vpop.eup %16635 }
0x217a   :  { %v16638_v22 = vpop.eup %16637  ;;  %14927 = vmatmul.mubr.msk.f32.vlgmr.msra.gmra.mrb[62].mxu0 %vm849_vm2, %v16636_v2  ;;  %v6399_v16 = vsel %vm849_vm2, %v16636_v2, 0.0  ;;  %v5391_v2 = vld [vmem:[%s19556_s14 + $0x8] sm:$0xff] }
0x217b   :  { %14935 = vmatpush3.xpose.msk.msra.mxu0 %vm849_vm2, %v6639_v46  ;;  %14922 = vmatmul.mubr.msk.f32.vlgmr.msra.gmra.mrb[78].mxu1 %vm849_vm2, %v16638_v22  ;;  %v6396_v18 = vsel %vm849_vm2, %v16638_v22, 0.0  ;;  %v5392_v22 = vld [vmem:[%s19556_s14 + $0x10] sm:$0xff] }
0x217c   :  { %14930 = vmatpush3.xpose.msk.msra.mxu1 %vm849_vm2, %v6561_v23  ;;  %14936 = vmatprep.mubr.msk.f32.mxu0 %vm17153_vm6, %v17152_v7  ;;  %v5390_v23 = vld [vmem:[%s19556_s14] sm:$0xff] }
0x217d   :  { %14931 = vmatprep.mubr.msk.f32.mxu1 %vm17153_vm6, %v17152_v7  ;;  %14944 = vmatprep.subr.mxu0 %v17152_v7 }
0x217e   :  { %14937 = vmatmul.mubr.msk.f32.vlgmr.msra.gmra.mrb[64].mxu0 %vm849_vm2, %v6637_v45  ;;  %14939 = vmatprep.subr.mxu1 %v17152_v7  ;;  %v15839_v45 = vpack.c.bf16 %v5391_v2, %v5390_v23 }
0x217f   :  { %14932 = vmatmul.mubr.msk.f32.vlgmr.msra.gmra.mrb[80].mxu1 %vm849_vm2, %v6559_v56  ;;  %14946 = vmatprep.mubr.msk.f32.mxu0 %vm17153_vm6, %v17152_v7 }
0x2180   :  { %14941 = vmatprep.mubr.msk.f32.mxu1 %vm17153_vm6, %v17152_v7 }
0x224d   :  { %v18498_v60 = vpop.f32.mrb[62].mxu0 }
0x224e   :  { %v6474_v28 = vpop.f32.mrb[78].mxu1  ;;  %v14928_v39 = vpop.f32.mrb[63].mxu0 }
0x224f   :  { %v14923_v9 = vpop.f32.mrb[79].mxu1 }
0x2251   :  { %v6710_v26 = vpop.f32.mrb[64].mxu0 }
0x2252   :  { %v6715_v34 = vmul.f32 0.35355338, %v6710_v26  ;;  %v6632_v15 = vpop.f32.mrb[80].mxu1  ;;  %v14938_v6 = vpop.f32.mrb[65].mxu0 }
0x2253   :  { %v6714_v19 = vmul.f32 0.35355338, %v6632_v15  ;;  %v14933_v20 = vpop.f32.mrb[81].mxu1 }
0x2254   :  { %v6719_v25 = vsel %vm849_vm2, %v6715_v34, -inf  ;;  %v13635_v20 = vld [vmem:[%s19548_s13 + $0x1] ss:$0 sm:$0xff]  ;;  %s19566_s13 = sld [smem:[#allocation55_spill]] }
0x2255   :  { %6720 = vmax.xlane.f32.xlu1 %v6719_v25  ;;  %v6716_v61 = vsel %vm849_vm2, %v6714_v19, -inf  ;;  %v5282_v25 = vadd.f32 %v13635_v20, %v18386_v32 }
0x2256   :  { %6717 = vmax.xlane.f32.xlu0 %v6716_v61  ;;  %v5287_v61 = vadd.f32 %v18384_v31, %v13635_v20 }
0x2266   :  { %6810 = vrot.lane.b32.xlu1 %v18365_v5, %s17149_s28 }
0x226c   :  { %6734 = vrot.lane.b32.xlu0 %v18368_v42, %s17149_s28 }
0x228a   :  { %6066 = vadd.xlane.f32.xlu1 %v6065_v27  ;;  %v5300_v27 = vadd.f32 %v5282_v25, %v18303_v58 }
0x228b   :  { %6063 = vadd.xlane.f32.xlu0 %v6062_v52  ;;  %v5292_v52 = vadd.f32 %v13635_v20, %v18390_v33 }
0x228f   :  { %6397 = vadd.xlane.f32.xlu0 %v6396_v18  ;;  %v5301_v18 = vadd.f32 %v5287_v61, %v18305_v43  ;;  %v7066_v61 = vld [vmem:[%s19558_s20 + $0x10] sm:$0xff] }
0x2293   :  { %6400 = vadd.xlane.f32.xlu0 %v6399_v16  ;;  %v5297_v16 = vadd.f32 %v18388_v13, %v13635_v20  ;;  %v7065_v20 = vld [vmem:[%s19558_s20 + $0x8] sm:$0xff] }
0x22e2   :  { %v6721_v62 = vpop.xlane.xlu1 %6720 }
0x22e3   :  { %v6723_v59 = vsub.f32 %v6715_v34, %v6721_v62  ;;  %v6718_v5 = vpop.xlane.xlu0 %6717  ;;  %v5302_v62 = vadd.f32 %v5292_v52, %v18312_v54 }
0x22e4   :  { %v6722_v17 = vsub.f32 %v6714_v19, %v6718_v5  ;;  %v5303_v5 = vadd.f32 %v5297_v16, %v18317_v21 }
0x22e5   :  { %v6726_v38 = vmul.f32 1.442695, %v6723_v59  ;;  %v5308_v59 = vsel %vm642_vm1, %v5300_v27, 0.0  ;;  %v5314_v32 = vsel %vm642_vm1, %v5302_v62, 0.0 }
0x22e6   :  { %v6724_v42 = vmul.f32 1.442695, %v6722_v17  ;;  %v6811_v50 = vpop.permute.xlu1 %6810  ;;  %v5311_v17 = vsel %vm642_vm1, %v5301_v18, 0.0  ;;  %v5317_v58 = vsel %vm642_vm1, %v5303_v5, 0.0 }
0x22e7   :  { %16639 = vpow2.f32 %v6726_v38  ;;  %v6735_v29 = vpop.permute.xlu0 %6734  ;;  %14945 = vmatpush3.msra.mxu0 %v6811_v50 }
0x22e8   :  { %16641 = vpow2.f32 %v6724_v42  ;;  %14940 = vmatpush3.msra.mxu1 %v6735_v29 }
0x22e9   :  { %15840 = vmatprep.subr.bf16.mxu1 %v15839_v45 }
0x22f1   :  { %v16640_v14 = vpop.eup %16639 }
0x22f2   :  { %v16642_v11 = vpop.eup %16641  ;;  %14947 = vmatmul.mubr.msk.f32.vlgmr.msra.gmra.mrb[66].mxu0 %vm849_vm2, %v16640_v14  ;;  %v6731_v48 = vsel %vm849_vm2, %v16640_v14, 0.0 }
0x22f3   :  { %14942 = vmatmul.mubr.msk.f32.vlgmr.msra.gmra.mrb[82].mxu1 %vm849_vm2, %v16642_v11  ;;  %6732 = vadd.xlane.f32.xlu0 %v6731_v48  ;;  %v6728_v51 = vsel %vm849_vm2, %v16642_v11, 0.0 }
0x22f4   :  { %6729 = vadd.xlane.f32.xlu1 %v6728_v51  ;;  %15842 = vmatpush3.bf16.msra.mxu1 %v15839_v45 }
0x22f7   :  { %5740 = vadd.xlane.f32.xlu0 %v5739_v8 }
0x22f8   :  { %5737 = vadd.xlane.f32.xlu1 %v5736_v35 }
0x2317   :  { %v6067_v53 = vpop.xlane.xlu1 %6066 }
0x2318   :  { %16643 = vrcp.f32 %v6067_v53  ;;  %v6064_v44 = vpop.xlane.xlu0 %6063 }
0x2319   :  { %16645 = vrcp.f32 %v6064_v44 }
0x231c   :  { %v6398_v24 = vpop.xlane.xlu0 %6397 }
0x231d   :  { %16647 = vrcp.f32 %v6398_v24 }
0x2320   :  { %v6401_v40 = vpop.xlane.xlu0 %6400 }
0x2321   :  { %16649 = vrcp.f32 %v6401_v40 }
0x2322   :  { %v16644_v37 = vpop.eup %16643 }
0x2323   :  { %v16646_v30 = vpop.eup %16645  ;;  %v6225_v55 = vmul.f32 %v16644_v37, %v18468_v47  ;;  %v5393_v47 = vld [vmem:[%s19556_s14 + $0x18] sm:$0xff] }
0x2324   :  { %v6224_v49 = vmul.f32 %v16646_v30, %v18470_v36  ;;  %v15843_v56 = vpack.c.bf16 %v5393_v47, %v5392_v22 }
0x2325   :  { %6894 = vrot.lane.b32.xlu0 %v6225_v55, %s17150_s27  ;;  %v13672_v55 = vld [vmem:[%s19557_s19] ss:$0 sm:$0xff] }
0x2326   :  { %6892 = vrot.lane.b32.xlu1 %v6224_v49, %s17150_s27  ;;  %15844 = vmatprep.subr.bf16.mxu1 %v15843_v56 }
0x2327   :  { %v16648_v3 = vpop.eup %16647  ;;  %15846 = vmatpush3.bf16.msra.mxu1 %v15843_v56 }
0x2328   :  { %v6556_v63 = vmul.f32 %v16648_v3, %v6474_v28 }
0x232a   :  { %6900 = vrot.lane.b32.xlu1 %v6556_v63, %s19495_s0 }
0x232b   :  { %v16650_v57 = vpop.eup %16649 }
0x232c   :  { %v6557_v46 = vmul.f32 %v16650_v57, %v18498_v60 }
0x232e   :  { %6902 = vrot.lane.b32.xlu1 %v6557_v46, %s19495_s0 }
0x2380   :  { %v6733_v36 = vpop.xlane.xlu0 %6732 }
0x2381   :  { %v6730_v28 = vpop.xlane.xlu1 %6729  ;;  %16651 = vrcp.f32 %v6733_v36 }
0x2382   :  { %16653 = vrcp.f32 %v6730_v28 }
0x2384   :  { %v5741_v43 = vpop.xlane.xlu0 %5740 }
0x2385   :  { %v5738_v31 = vpop.xlane.xlu1 %5737 }
0x2386   :  { %16655 = vrcp.f32 %v5738_v31 }
0x2387   :  { %16657 = vrcp.f32 %v5741_v43 }
0x238b   :  { %v16652_v39 = vpop.eup %16651 }
0x238c   :  { %v16654_v60 = vpop.eup %16653 }
0x2390   :  { %v16656_v13 = vpop.eup %16655 }
0x2391   :  { %v16658_v38 = vpop.eup %16657  ;;  %v5890_v21 = vmul.f32 %v16656_v13, %v18428_v1 }
0x2392   :  { %v5891_v29 = vmul.f32 %v16658_v38, %v18426_v12 }
0x2397   :  { %v6895_v50 = vpop.permute.xlu0 %6894 }
0x2398   :  { %v6893_v33 = vpop.permute.xlu1 %6892  ;;  %v6915_v48 = vsel %vm849_vm2, %v5891_v29, %v6895_v50 }
0x2399   :  { %v6914_v14 = vsel %vm849_vm2, %v5890_v21, %v6893_v33 }
0x239c   :  { %v6901_v54 = vpop.permute.xlu1 %6900 }
0x239d   :  { %v6916_v51 = vsel %vm1026_vm4, %v6914_v14, %v6901_v54 }
0x23a0   :  { %v6903_v42 = vpop.permute.xlu1 %6902 }
0x23a1   :  { %v6917_v35 = vsel %vm1026_vm4, %v6915_v48, %v6903_v42 }
0x23c5   :  { %v6882_v9 = vpop.f32.mrb[66].mxu0 }
0x23c6   :  { %v6889_v26 = vmul.f32 %v16652_v39, %v6882_v9  ;;  %v6806_v34 = vpop.f32.mrb[82].mxu1  ;;  %v14948_v15 = vpop.f32.mrb[67].mxu0 }
0x23c7   :  { %v6888_v6 = vmul.f32 %v16654_v60, %v6806_v34  ;;  %v14943_v19 = vpop.f32.mrb[83].mxu1 }
0x23c8   :  { %6910 = vrot.lane.b32.xlu1 %v6889_v26, %s19493_s1  ;;  %v7064_v19 = vld [vmem:[%s19558_s20] sm:$0xff] }
0x23c9   :  { %6908 = vrot.lane.b32.xlu0 %v6888_v6, %s19493_s1  ;;  %v15855_v25 = vpack.c.bf16 %v7065_v20, %v7064_v19  ;;  %v7069_v20 = vld [vmem:[%s19560_s12] sm:$0xff] }
0x23cb   :  { %15856 = vmatprep.subr.bf16.mxu1 %v15855_v25 }
0x23e8   :  { %5309 = vadd.xlane.f32.xlu0 %v5308_v59 }
0x23ec   :  { %5312 = vadd.xlane.f32.xlu1 %v5311_v17  ;;  %5315 = vadd.xlane.f32.xlu0 %v5314_v32 }
0x23f0   :  { %5318 = vadd.xlane.f32.xlu0 %v5317_v58 }
0x243a   :  { %v6911_v11 = vpop.permute.xlu1 %6910 }
0x243b   :  { %v6909_v8 = vpop.permute.xlu0 %6908  ;;  %v6919_v44 = vsel %vm2505_vm5, %v6917_v35, %v6911_v11  ;;  %v13642_v35 = vld [vmem:[%s19549_s11 + $0x1] ss:$0 sm:$0xff]  ;;  %s19567_s11 = sld [smem:[#allocation56_spill]] }
0x243c   :  { %v6918_v53 = vsel %vm2505_vm5, %v6916_v51, %v6909_v8 }
0x243d   :  { %14957 = vmatprep.mubr.msk.f32.mxu1 %vm642_vm1, %v6918_v53 }
0x243e   :  { %14958 = vmatmul.mubr.msk.f32.vlgmr.msra.gmra.mrb[84].mxu1 %vm642_vm1, %v6919_v44 }
0x243f   :  { %15858 = vmatpush3.bf16.msra.mxu1 %v15855_v25  ;;  %v7070_v25 = vld [vmem:[%s19560_s12 + $0x8] sm:$0xff] }
0x2475   :  { %v5310_v12 = vpop.xlane.xlu0 %5309 }
0x2476   :  { %v5320_v37 = vmul.f32 0.03125, %v5310_v12 }
0x2478   :  { %v18559_v63 = vsub.f32 %v5300_v27, %v5320_v37  ;;  %v7067_v27 = vld [vmem:[%s19558_s20 + $0x18] sm:$0xff] }
0x2479   :  { %v5316_v1 = vpop.xlane.xlu0 %5315  ;;  %v5313_v24 = vpop.xlane.xlu1 %5312  ;;  %v15859_v52 = vpack.c.bf16 %v7067_v27, %v7066_v61  ;;  %v15863_v61 = vpack.c.bf16 %v7070_v25, %v7069_v20 }
0x247a   :  { %v5321_v40 = vmul.f32 0.03125, %v5313_v24  ;;  %v5322_v57 = vmul.f32 0.03125, %v5316_v1  ;;  %v5328_v39 = vmul.f32 %v18559_v63, %v18559_v63  ;;  %v13643_v1 = vld [vmem:[%s19550_s6 + $0x1] ss:$0 sm:$0xff]  ;;  %s19568_s6 = sld [smem:[#allocation58_spill]] }
0x247b   :  { %15860 = vmatprep.subr.bf16.mxu1 %v15859_v52 }
0x247c   :  { %v18557_v49 = vsub.f32 %v5301_v18, %v5321_v40  ;;  %v18566_v36 = vsub.f32 %v5302_v62, %v5322_v57  ;;  %v5332_v26 = vsel %vm642_vm1, %v5328_v39, 0.0  ;;  %15862 = vmatpush3.bf16.msra.mxu1 %v15859_v52  ;;  %v16818_v39 = vld [vmem:[%s19536_s25 + $0x18] sm:$0xff] }
0x247d   :  { %v5319_v30 = vpop.xlane.xlu0 %5318  ;;  %15871 = vmatprep.subr.bf16.mxu1 %v17142_v0 }
0x247e   :  { %v5323_v3 = vmul.f32 0.03125, %v5319_v30  ;;  %v5329_v56 = vmul.f32 %v18557_v49, %v18557_v49  ;;  %v5330_v34 = vmul.f32 %v18566_v36, %v18566_v36 }
0x2480   :  { %v18561_v45 = vsub.f32 %v5303_v5, %v5323_v3  ;;  %v5335_v9 = vsel %vm642_vm1, %v5329_v56, 0.0  ;;  %v5338_v6 = vsel %vm642_vm1, %v5330_v34, 0.0 }
0x2482   :  { %v5331_v60 = vmul.f32 %v18561_v45, %v18561_v45 }
0x2484   :  { %v5341_v15 = vsel %vm642_vm1, %v5331_v60, 0.0  ;;  %v7059_v60 = vld [vmem:[%s19559_s2] sm:$0xff] }
0x2511   :  { %v14959_v46 = vpop.f32.mrb[84].mxu1 }
0x2512   :  { %v7004_v23 = vadd.f32 %v14959_v46, %v13672_v55  ;;  %v6998_v2 = vpop.f32.mrb[85].mxu1 }
0x2513   :  { %v6999_v22 = vadd.f32 %v13672_v55, %v6998_v2  ;;  %v16815_v2 = vld [vmem:[%s19536_s25] sm:$0xff] }
0x2514   :  { %v7014_v47 = vsel %vm642_vm1, %v7004_v23, 0.0 }
0x2515   :  { %7015 = vadd.xlane.f32.xlu0 %v7014_v47  ;;  %v7011_v28 = vsel %vm642_vm1, %v6999_v22, 0.0 }
0x2516   :  { %7012 = vadd.xlane.f32.xlu1 %v7011_v28 }
0x2519   :  { %5336 = vadd.xlane.f32.xlu0 %v5335_v9 }
0x251a   :  { %5333 = vadd.xlane.f32.xlu1 %v5332_v26  ;;  %v7060_v26 = vld [vmem:[%s19559_s2 + $0x8] sm:$0xff] }
0x251b   :  { %v15847_v34 = vpack.c.bf16 %v7060_v26, %v7059_v60 }
0x251d   :  { %5342 = vadd.xlane.f32.xlu0 %v5341_v15  ;;  %v7061_v15 = vld [vmem:[%s19559_s2 + $0x10] sm:$0xff]  ;;  %15848 = vmatprep.subr.bf16.mxu0 %v15847_v34 }
0x251e   :  { %5339 = vadd.xlane.f32.xlu1 %v5338_v6  ;;  %v7062_v6 = vld [vmem:[%s19559_s2 + $0x18] sm:$0xff]  ;;  %15850 = vmatpush3.bf16.msra.mxu0 %v15847_v34 }
0x251f   :  { %v15851_v19 = vpack.c.bf16 %v7062_v6, %v7061_v15 }
0x2521   :  { %15852 = vmatprep.subr.bf16.mxu0 %v15851_v19 }
0x2522   :  { %15854 = vmatpush3.bf16.msra.mxu0 %v15851_v19 }
0x2523   :  { %15864 = vmatprep.subr.bf16.mxu0 %v15863_v61 }
0x25a2   :  { %v7016_v18 = vpop.xlane.xlu0 %7015 }
0x25a3   :  { %v7018_v16 = vmul.f32 0.03125, %v7016_v18  ;;  %v7013_v62 = vpop.xlane.xlu1 %7012 }
0x25a4   :  { %v7017_v59 = vmul.f32 0.03125, %v7013_v62 }
0x25a5   :  { %v18584_v5 = vsub.f32 %v7004_v23, %v7018_v16 }
0x25a6   :  { %v18586_v17 = vsub.f32 %v6999_v22, %v7017_v59  ;;  %v5337_v32 = vpop.xlane.xlu0 %5336  ;;  %v16816_v22 = vld [vmem:[%s19536_s25 + $0x8] sm:$0xff] }
0x25a7   :  { %v5345_v58 = vmul.f32 0.03125, %v5337_v32  ;;  %v5334_v31 = vpop.xlane.xlu1 %5333  ;;  %v7022_v43 = vmul.f32 %v18584_v5, %v18584_v5 }
0x25a8   :  { %v5344_v33 = vmul.f32 0.03125, %v5334_v31  ;;  %v7021_v54 = vmul.f32 %v18586_v17, %v18586_v17 }
0x25a9   :  { %v5349_v13 = vadd.f32 1e-05, %v5345_v58  ;;  %v7026_v38 = vsel %vm642_vm1, %v7022_v43, 0.0 }
0x25aa   :  { %v5348_v42 = vadd.f32 1e-05, %v5344_v33  ;;  %7027 = vadd.xlane.f32.xlu0 %v7026_v38  ;;  %v5343_v50 = vpop.xlane.xlu0 %5342  ;;  %v7023_v21 = vsel %vm642_vm1, %v7021_v54, 0.0  ;;  %v13676_v33 = vld [vmem:[%s19562_s23] ss:$0 sm:$0xff] }
0x25ab   :  { %16659 = vrsqrt.f32 %v5349_v13  ;;  %v5347_v29 = vmul.f32 0.03125, %v5343_v50  ;;  %7024 = vadd.xlane.f32.xlu1 %v7023_v21  ;;  %v5340_v14 = vpop.xlane.xlu1 %5339  ;;  %v7071_v21 = vld [vmem:[%s19560_s12 + $0x10] sm:$0xff] }
0x25ac   :  { %16661 = vrsqrt.f32 %v5348_v42  ;;  %v5346_v11 = vmul.f32 0.03125, %v5340_v14 }
0x25ad   :  { %v5351_v48 = vadd.f32 1e-05, %v5347_v29  ;;  %v7072_v29 = vld [vmem:[%s19560_s12 + $0x18] sm:$0xff] }
0x25ae   :  { %v5350_v51 = vadd.f32 1e-05, %v5346_v11 }
0x25af   :  { %16663 = vrsqrt.f32 %v5351_v48  ;;  %v15867_v48 = vpack.c.bf16 %v7072_v29, %v7071_v21 }
0x25b0   :  { %16665 = vrsqrt.f32 %v5350_v51 }
0x25b5   :  { %v16660_v8 = vpop.eup %16659 }
0x25b6   :  { %v16662_v53 = vpop.eup %16661  ;;  %v5357_v44 = vmul.f32 %v16660_v8, %v18557_v49 }
0x25b7   :  { %v5356_v12 = vmul.f32 %v16662_v53, %v18559_v63 }
0x25b8   :  { %v5367_v24 = vmul.f32 %v13642_v35, %v5357_v44 }
0x25b9   :  { %v16664_v40 = vpop.eup %16663  ;;  %v5366_v37 = vmul.f32 %v13642_v35, %v5356_v12 }
0x25ba   :  { %v16666_v30 = vpop.eup %16665  ;;  %v5359_v55 = vmul.f32 %v16664_v40, %v18561_v45  ;;  %v18599_v3 = vadd.f32 %v13643_v1, %v5367_v24 }
0x25bb   :  { %v5358_v57 = vmul.f32 %v16666_v30, %v18566_v36  ;;  %v18602_v46 = vadd.f32 %v13643_v1, %v5366_v37  ;;  %v16817_v36 = vld [vmem:[%s19536_s25 + $0x10] sm:$0xff]  ;;  %s19561_s25 = sld [smem:[#allocation47_spill]]  ;;  %v13677_v37 = vld [vmem:[%s19564_s7] ss:$0 sm:$0xff] }
0x25bc   :  { %v5369_v23 = vmul.f32 %v13642_v35, %v5359_v55  ;;  %v18610_v47 = vadd.f32 %v16816_v22, %v18599_v3 }
0x25bd   :  { %v18606_v49 = vadd.f32 %v16815_v2, %v18602_v46  ;;  %v5368_v63 = vmul.f32 %v13642_v35, %v5358_v57  ;;  %v13685_v2 = vld [vmem:[%s19565_s10] ss:$0 sm:$0xff] }
0x25be   :  { %v18612_v45 = vadd.f32 %v13643_v1, %v5369_v23 }
0x25bf   :  { %14979 = vmatprep.mubr.msk.f32.mxu1 %vm642_vm1, %v18606_v49  ;;  %v18616_v56 = vadd.f32 %v13643_v1, %v5368_v63 }
0x25c0   :  { %14980 = vmatmul.mubr.msk.f32.vlgmr.msra.gmra.mrb[86].mxu1 %vm642_vm1, %v18610_v47  ;;  %v18626_v9 = vadd.f32 %v16818_v39, %v18612_v45 }
0x25c1   :  { %v18622_v28 = vadd.f32 %v16817_v36, %v18616_v56  ;;  %v13675_v58 = vld [vmem:[%s19561_s25] ss:$0 sm:$0xff] }
0x25c3   :  { %14982 = vmatprep.mubr.msk.f32.mxu1 %vm642_vm1, %v18622_v28 }
0x25c4   :  { %14983 = vmatmul.mubr.msk.f32.gmra.mrb[88].mxu1 %vm642_vm1, %v18626_v9 }
0x25c5   :  { %15003 = vmatprep.mubr.msk.f32.mxu1 %vm17153_vm6, %v17152_v7 }
0x2637   :  { %v7028_v27 = vpop.xlane.xlu0 %7027 }
0x2638   :  { %v7030_v52 = vmul.f32 0.03125, %v7028_v27  ;;  %v7025_v18 = vpop.xlane.xlu1 %7024 }
0x2639   :  { %v7029_v16 = vmul.f32 0.03125, %v7025_v18 }
0x263a   :  { %v7032_v62 = vadd.f32 1e-05, %v7030_v52 }
0x263b   :  { %v7031_v59 = vadd.f32 1e-05, %v7029_v16 }
0x263c   :  { %16667 = vrsqrt.f32 %v7032_v62 }
0x263d   :  { %16669 = vrsqrt.f32 %v7031_v59 }
0x2646   :  { %v16668_v32 = vpop.eup %16667 }
0x2647   :  { %v16670_v31 = vpop.eup %16669  ;;  %v7036_v43 = vmul.f32 %v16668_v32, %v18584_v5 }
0x2648   :  { %v7035_v54 = vmul.f32 %v16670_v31, %v18586_v17 }
0x2649   :  { %v7044_v13 = vmul.f32 %v13675_v58, %v7036_v43 }
0x264a   :  { %v7043_v38 = vmul.f32 %v13675_v58, %v7035_v54 }
0x264b   :  { %v18644_v42 = vadd.f32 %v13676_v33, %v7044_v13 }
0x264c   :  { %v18646_v50 = vadd.f32 %v13676_v33, %v7043_v38 }
0x264d   :  { %v7054_v11 = vadd.f32 %v18644_v42, %v18327_v10 }
0x264e   :  { %v7053_v14 = vadd.f32 %v18646_v50, %v18320_v41  ;;  %v13680_v41 = vld [vmem:[%s19563_s30] ss:$0 sm:$0xff] }
0x2650   :  { %14968 = vmatprep.mubr.msk.f32.mxu0 %vm642_vm1, %v7053_v14 }
0x2651   :  { %14969 = vmatmul.mubr.msk.f32.vlgmr.msra.gmra.mrb[68].mxu0 %vm642_vm1, %v7054_v11 }
0x2652   :  { %15866 = vmatpush3.bf16.msra.mxu0 %v15863_v61  ;;  %14993 = vmatprep.mubr.msk.f32.mxu0 %vm642_vm1, %v18602_v46 }
0x2653   :  { %15868 = vmatprep.subr.bf16.mxu0 %v15867_v48 }
0x2656   :  { %15870 = vmatpush3.bf16.msra.mxu0 %v15867_v48 }
0x2657   :  { %15875 = vmatprep.subr.bf16.mxu0 %v17142_v0 }
0x2659   :  { %14994 = vmatmul.mubr.msk.f32.vlgmr.msra.gmra.mrb[70].mxu0 %vm642_vm1, %v18599_v3 }
0x265a   :  { %14996 = vmatprep.mubr.msk.f32.mxu0 %vm642_vm1, %v18616_v56 }
0x265d   :  { %14997 = vmatmul.mubr.msk.f32.gmra.mrb[72].mxu0 %vm642_vm1, %v18612_v45 }
0x265e   :  { %15010 = vmatprep.mubr.msk.f32.mxu0 %vm17153_vm6, %v17152_v7 }
0x2693   :  { %v14981_v10 = vpop.f32.mrb[86].mxu1 }
0x2694   :  { %v7256_v5 = vadd.f32 %v14981_v10, %v13680_v41  ;;  %v7250_v17 = vpop.f32.mrb[87].mxu1 }
0x2695   :  { %v7251_v51 = vadd.f32 %v13680_v41, %v7250_v17 }
0x2697   :  { %v15872_v8 = vpack.c.bf16 %v7256_v5, %v7251_v51  ;;  %v14984_v35 = vpop.f32.mrb[88].mxu1  ;;  %v18668_v53 = vpack.i.bf16 %v7256_v5, %v7251_v51 }
0x2698   :  { %v7266_v44 = vadd.f32 %v14984_v35, %v13680_v41  ;;  %v7260_v12 = vpop.f32.mrb[89].mxu1 }
0x2699   :  { %v7261_v1 = vadd.f32 %v13680_v41, %v7260_v12  ;;  %16356 = vrot.lane.b32.xlu1 %v18668_v53, %s17145_s29  ;;  %15874 = vmatpush3.bf16.xpose.msk.msra.mxu1 %vm17623_vm3, %v15872_v8 }
0x269a   :  { %15879 = vmatprep.subr.bf16.mxu1 %v17142_v0 }
0x269b   :  { %v15876_v24 = vpack.c.bf16 %v7266_v44, %v7261_v1  ;;  %v18675_v40 = vpack.i.bf16 %v7266_v44, %v7261_v1 }
0x269d   :  { %15878 = vmatpush3.bf16.xpose.msk.msra.mxu0 %vm17623_vm3, %v15876_v24 }
0x269e   :  { %15882 = vmatprep.subr.bf16.mxu0 %v17142_v0 }
0x270b   :  { %v16357_v58 = vpop.permute.xlu1 %16356 }
0x270c   :  { %v16359_v41 = vunpack.i.h.bf16 %v16357_v58  ;;  %v16358_v10 = vunpack.i.l.bf16 %v16357_v58 }
0x270e   :  { %v15886_v8 = vpack.c.bf16 %v16359_v41, %v16358_v10 }
0x2724   :  { %v14970_v30 = vpop.f32.mrb[68].mxu0 }
0x2725   :  { %v18681_v55 = vadd.f32 %v14970_v30, %v13677_v37  ;;  %v7157_v57 = vpop.f32.mrb[69].mxu0 }
0x2726   :  { %v18683_v23 = vadd.f32 %v13677_v37, %v7157_v57 }
0x2727   :  { %15011 = vmatmul.mubr.msk.f32.vlgmr.msra.gmra.mrb[74].mxu0 %vm849_vm2, %v18681_v55 }
0x2728   :  { %15004 = vmatmul.mubr.msk.f32.vlgmr.msra.gmra.mrb[90].mxu1 %vm849_vm2, %v18683_v23  ;;  %15024 = vmatprep.mubr.msk.f32.mxu0 %vm17153_vm6, %v17152_v7 }
0x2729   :  { %15017 = vmatprep.mubr.msk.f32.mxu1 %vm17153_vm6, %v17152_v7 }
0x272c   :  { %v14995_v63 = vpop.f32.mrb[70].mxu0 }
0x272d   :  { %v7359_v22 = vadd.f32 %v14995_v63, %v13685_v2  ;;  %v7353_v36 = vpop.f32.mrb[71].mxu0 }
0x272e   :  { %v7354_v39 = vadd.f32 %v13685_v2, %v7353_v36 }
0x2730   :  { %v14998_v60 = vpop.f32.mrb[72].mxu0  ;;  %v15880_v26 = vpack.c.bf16 %v7359_v22, %v7354_v39  ;;  %v18694_v34 = vpack.i.bf16 %v7359_v22, %v7354_v39 }
0x2731   :  { %v7369_v15 = vadd.f32 %v14998_v60, %v13685_v2  ;;  %v7363_v6 = vpop.f32.mrb[73].mxu0 }
0x2732   :  { %v7364_v19 = vadd.f32 %v13685_v2, %v7363_v6  ;;  %15881 = vmatpush3.bf16.msra.mxu1 %v15880_v26 }
0x2733   :  { %15885 = vmatprep.subr.bf16.mxu1 %v17142_v0 }
0x2734   :  { %v15883_v20 = vpack.c.bf16 %v7369_v15, %v7364_v19  ;;  %v18697_v25 = vpack.i.bf16 %v7369_v15, %v7364_v19 }
0x2736   :  { %15884 = vmatpush3.bf16.msra.mxu0 %v15883_v20 }
0x2737   :  { %15889 = vmatprep.subr.bf16.mxu0 %v17142_v0 }
0x27fa   :  { %v7526_v61 = vpop.f32.mrb[74].mxu0 }
0x27fb   :  { %v7531_v27 = vmul.f32 0.35355338, %v7526_v61  ;;  %v7447_v52 = vpop.f32.mrb[90].mxu1  ;;  %v15012_v18 = vpop.f32.mrb[75].mxu0 }
0x27fc   :  { %v7530_v16 = vmul.f32 0.35355338, %v7447_v52  ;;  %v15005_v62 = vpop.f32.mrb[91].mxu1 }
0x27fd   :  { %v7535_v59 = vsel %vm1026_vm4, %v7531_v27, -inf }
0x27fe   :  { %7536 = vmax.xlane.f32.xlu0 %v7535_v59  ;;  %v7532_v32 = vsel %vm1026_vm4, %v7530_v16, -inf }
0x27ff   :  { %7533 = vmax.xlane.f32.xlu1 %v7532_v32 }
0x2810   :  { %7700 = vrot.lane.b32.xlu1 %v18683_v23, %s17145_s29 }
0x2814   :  { %16361 = vrot.lane.b32.xlu0 %v18675_v40, %s17145_s29  ;;  %7782 = vrot.lane.b32.xlu1 %v18681_v55, %s17145_s29 }
0x2818   :  { %16366 = vrot.lane.b32.xlu0 %v18694_v34, %s17145_s29  ;;  %16371 = vrot.lane.b32.xlu1 %v18697_v25, %s17145_s29 }
0x288b   :  { %v7537_v31 = vpop.xlane.xlu0 %7536 }
0x288c   :  { %v7539_v43 = vsub.f32 %v7531_v27, %v7537_v31  ;;  %v7534_v33 = vpop.xlane.xlu1 %7533 }
0x288d   :  { %v7538_v54 = vsub.f32 %v7530_v16, %v7534_v33 }
0x288e   :  { %v7542_v13 = vmul.f32 1.442695, %v7539_v43 }
0x288f   :  { %v7540_v38 = vmul.f32 1.442695, %v7538_v54  ;;  %v16362_v29 = vpop.permute.xlu0 %16361 }
0x2890   :  { %16671 = vpow2.f32 %v7542_v13  ;;  %v7701_v21 = vpop.permute.xlu1 %7700  ;;  %v16364_v11 = vunpack.i.h.bf16 %v16362_v29  ;;  %v16363_v48 = vunpack.i.l.bf16 %v16362_v29 }
0x2891   :  { %16673 = vpow2.f32 %v7540_v38 }
0x2892   :  { %v15890_v17 = vpack.c.bf16 %v16364_v11, %v16363_v48 }
0x2893   :  { %v16367_v44 = vpop.permute.xlu0 %16366 }
0x2894   :  { %v7783_v14 = vpop.permute.xlu1 %7782  ;;  %v16369_v24 = vunpack.i.h.bf16 %v16367_v44  ;;  %v16368_v37 = vunpack.i.l.bf16 %v16367_v44 }
0x2896   :  { %v15894_v57 = vpack.c.bf16 %v16369_v24, %v16368_v37 }
0x2898   :  { %v16372_v35 = vpop.permute.xlu1 %16371 }
0x2899   :  { %v16374_v12 = vunpack.i.h.bf16 %v16372_v35  ;;  %v16373_v1 = vunpack.i.l.bf16 %v16372_v35 }
0x289a   :  { %v18712_v5 = vpop.eup %16671 }
0x289b   :  { %v18714_v51 = vpop.eup %16673  ;;  %15025 = vmatmul.mubr.msk.f32.vlgmr.msra.gmra.mrb[76].mxu0 %vm1026_vm4, %v18712_v5  ;;  %v15897_v30 = vpack.c.bf16 %v16374_v12, %v16373_v1 }
0x289c   :  { %15892 = vmatpush3.bf16.xpose.msk.msra.mxu0 %vm17623_vm3, %v15890_v17  ;;  %15018 = vmatmul.mubr.msk.f32.vlgmr.msra.gmra.mrb[92].mxu1 %vm1026_vm4, %v18714_v51 }
0x289d   :  { %15888 = vmatpush3.bf16.xpose.msk.msra.mxu1 %vm17623_vm3, %v15886_v8  ;;  %15038 = vmatprep.mubr.msk.f32.mxu0 %vm17153_vm6, %v17152_v7 }
0x289e   :  { %15031 = vmatprep.mubr.msk.f32.mxu1 %vm17153_vm6, %v17152_v7  ;;  %15896 = vmatprep.subr.bf16.mxu0 %v17142_v0 }
0x289f   :  { %15893 = vmatprep.subr.bf16.mxu1 %v17142_v0 }
0x28a3   :  { %15039 = vmatmul.mubr.msk.f32.vlgmr.msra.gmra.mrb[78].mxu0 %vm849_vm2, %v7783_v14 }
0x28a4   :  { %15032 = vmatmul.mubr.msk.f32.vlgmr.msra.gmra.mrb[94].mxu1 %vm849_vm2, %v7701_v21  ;;  %15898 = vmatpush3.bf16.msra.mxu0 %v15897_v30 }
0x28a5   :  { %15895 = vmatpush3.bf16.msra.mxu1 %v15894_v57  ;;  %15052 = vmatprep.mubr.msk.f32.mxu0 %vm17153_vm6, %v17152_v7 }
0x28a6   :  { %15903 = vmatprep.subr.bf16.mxu0 %v17142_v0  ;;  %15045 = vmatprep.mubr.msk.f32.mxu1 %vm17153_vm6, %v17152_v7 }
0x28a7   :  { %15899 = vmatprep.subr.bf16.mxu1 %v17142_v0 }
0x296e   :  { %v18738_v2 = vpop.f32.mrb[76].mxu0 }
0x296f   :  { %v18740_v63 = vpop.f32.mrb[92].mxu1  ;;  %v15026_v22 = vpop.f32.mrb[77].mxu0 }
0x2970   :  { %v15019_v36 = vpop.f32.mrb[93].mxu1 }
0x2976   :  { %v7860_v39 = vpop.f32.mrb[78].mxu0 }
0x2977   :  { %v7865_v60 = vmul.f32 0.35355338, %v7860_v39  ;;  %v7778_v26 = vpop.f32.mrb[94].mxu1  ;;  %v15040_v15 = vpop.f32.mrb[79].mxu0 }
0x2978   :  { %v7864_v6 = vmul.f32 0.35355338, %v7778_v26  ;;  %v15033_v19 = vpop.f32.mrb[95].mxu1 }
0x2979   :  { %v7869_v20 = vsel %vm1026_vm4, %v7865_v60, -inf }
0x297a   :  { %7870 = vmax.xlane.f32.xlu1 %v7869_v20  ;;  %v7866_v61 = vsel %vm1026_vm4, %v7864_v6, -inf }
0x297b   :  { %7867 = vmax.xlane.f32.xlu0 %v7866_v61 }
0x298b   :  { %16381 = vrot.lane.b32.xlu1 %v18675_v40, %s17147_s22 }
0x298f   :  { %8132 = vrot.lane.b32.xlu1 %v18681_v55, %s17147_s22 }
0x2991   :  { %16376 = vrot.lane.b32.xlu0 %v18668_v53, %s17147_s22 }
0x2993   :  { %16391 = vrot.lane.b32.xlu1 %v18697_v25, %s17147_s22 }
0x2995   :  { %8050 = vrot.lane.b32.xlu0 %v18683_v23, %s17147_s22 }
0x2999   :  { %16386 = vrot.lane.b32.xlu0 %v18694_v34, %s17147_s22 }
0x2a07   :  { %v7871_v27 = vpop.xlane.xlu1 %7870 }
0x2a08   :  { %v7873_v52 = vsub.f32 %v7865_v60, %v7871_v27  ;;  %v7868_v18 = vpop.xlane.xlu0 %7867 }
0x2a09   :  { %v7872_v16 = vsub.f32 %v7864_v6, %v7868_v18 }
0x2a0a   :  { %v7876_v62 = vmul.f32 1.442695, %v7873_v52 }
0x2a0b   :  { %v7874_v59 = vmul.f32 1.442695, %v7872_v16  ;;  %v16382_v32 = vpop.permute.xlu1 %16381 }
0x2a0c   :  { %16675 = vpow2.f32 %v7876_v62  ;;  %v16377_v58 = vpop.permute.xlu0 %16376  ;;  %v16384_v43 = vunpack.i.h.bf16 %v16382_v32  ;;  %v16383_v33 = vunpack.i.l.bf16 %v16382_v32 }
0x2a0d   :  { %16677 = vpow2.f32 %v7874_v59  ;;  %v16379_v13 = vunpack.i.h.bf16 %v16377_v58  ;;  %v16378_v38 = vunpack.i.l.bf16 %v16377_v58 }
0x2a0e   :  { %v15904_v29 = vpack.c.bf16 %v16384_v43, %v16383_v33 }
0x2a0f   :  { %v8133_v31 = vpop.permute.xlu1 %8132  ;;  %v15900_v11 = vpack.c.bf16 %v16379_v13, %v16378_v38 }
0x2a10   :  { %v8051_v54 = vpop.permute.xlu0 %8050 }
0x2a13   :  { %v16392_v48 = vpop.permute.xlu1 %16391 }
0x2a14   :  { %v16387_v41 = vpop.permute.xlu0 %16386  ;;  %v16394_v10 = vunpack.i.h.bf16 %v16392_v48  ;;  %v16393_v17 = vunpack.i.l.bf16 %v16392_v48 }
0x2a15   :  { %v16389_v8 = vunpack.i.h.bf16 %v16387_v41  ;;  %v16388_v35 = vunpack.i.l.bf16 %v16387_v41 }
0x2a16   :  { %v18756_v21 = vpop.eup %16675  ;;  %v15911_v44 = vpack.c.bf16 %v16394_v10, %v16393_v17 }
0x2a17   :  { %v18758_v14 = vpop.eup %16677  ;;  %15053 = vmatmul.mubr.msk.f32.vlgmr.msra.gmra.mrb[80].mxu0 %vm1026_vm4, %v18756_v21  ;;  %v15908_v12 = vpack.c.bf16 %v16389_v8, %v16388_v35 }
0x2a18   :  { %15906 = vmatpush3.bf16.xpose.msk.msra.mxu0 %vm17623_vm3, %v15904_v29  ;;  %15046 = vmatmul.mubr.msk.f32.vlgmr.msra.gmra.mrb[96].mxu1 %vm1026_vm4, %v18758_v14 }
0x2a19   :  { %15902 = vmatpush3.bf16.xpose.msk.msra.mxu1 %vm17623_vm3, %v15900_v11  ;;  %15066 = vmatprep.mubr.msk.f32.mxu0 %vm17153_vm6, %v17152_v7 }
0x2a1a   :  { %15059 = vmatprep.mubr.msk.f32.mxu1 %vm17153_vm6, %v17152_v7  ;;  %15910 = vmatprep.subr.bf16.mxu0 %v17142_v0 }
0x2a1b   :  { %15907 = vmatprep.subr.bf16.mxu1 %v17142_v0 }
0x2a1f   :  { %15067 = vmatmul.mubr.msk.f32.vlgmr.msra.gmra.mrb[82].mxu0 %vm849_vm2, %v8133_v31 }
0x2a20   :  { %15060 = vmatmul.mubr.msk.f32.vlgmr.msra.gmra.mrb[98].mxu1 %vm849_vm2, %v8051_v54  ;;  %15912 = vmatpush3.bf16.msra.mxu0 %v15911_v44 }
0x2a21   :  { %15909 = vmatpush3.bf16.msra.mxu1 %v15908_v12  ;;  %15080 = vmatprep.mubr.msk.f32.mxu0 %vm17153_vm6, %v17152_v7  ;;  %v7881_v12 = vsel %vm1026_vm4, %v18756_v21, 0.0 }
0x2a22   :  { %15917 = vmatprep.subr.bf16.mxu0 %v17142_v0  ;;  %15073 = vmatprep.mubr.msk.f32.mxu1 %vm17153_vm6, %v17152_v7 }
0x2a23   :  { %15913 = vmatprep.subr.bf16.mxu1 %v17142_v0 }
0x2aea   :  { %v18782_v1 = vpop.f32.mrb[80].mxu0 }
0x2aeb   :  { %v18784_v24 = vpop.f32.mrb[96].mxu1  ;;  %v15054_v37 = vpop.f32.mrb[81].mxu0 }
0x2aec   :  { %v15047_v30 = vpop.f32.mrb[97].mxu1  ;;  %v7878_v37 = vsel %vm1026_vm4, %v18758_v14, 0.0 }
0x2af2   :  { %v8210_v57 = vpop.f32.mrb[82].mxu0 }
0x2af3   :  { %v8215_v22 = vmul.f32 0.35355338, %v8210_v57  ;;  %v8128_v36 = vpop.f32.mrb[98].mxu1  ;;  %v15068_v39 = vpop.f32.mrb[83].mxu0 }
0x2af4   :  { %v8214_v60 = vmul.f32 0.35355338, %v8128_v36  ;;  %v15061_v26 = vpop.f32.mrb[99].mxu1 }
0x2af5   :  { %v8219_v15 = vsel %vm1026_vm4, %v8215_v22, -inf }
0x2af6   :  { %8220 = vmax.xlane.f32.xlu1 %v8219_v15  ;;  %v8216_v6 = vsel %vm1026_vm4, %v8214_v60, -inf }
0x2af7   :  { %8217 = vmax.xlane.f32.xlu0 %v8216_v6 }
0x2b07   :  { %16401 = vrot.lane.b32.xlu1 %v18675_v40, %s17149_s28 }
0x2b0b   :  { %8478 = vrot.lane.b32.xlu1 %v18681_v55, %s17149_s28 }
0x2b0d   :  { %16396 = vrot.lane.b32.xlu0 %v18668_v53, %s17149_s28 }
0x2b11   :  { %8396 = vrot.lane.b32.xlu0 %v18683_v23, %s17149_s28 }
0x2b83   :  { %v8221_v19 = vpop.xlane.xlu1 %8220 }
0x2b84   :  { %v8223_v20 = vsub.f32 %v8215_v22, %v8221_v19  ;;  %v8218_v61 = vpop.xlane.xlu0 %8217 }
0x2b85   :  { %v8222_v27 = vsub.f32 %v8214_v60, %v8218_v61 }
0x2b86   :  { %v8226_v52 = vmul.f32 1.442695, %v8223_v20 }
0x2b87   :  { %v8224_v18 = vmul.f32 1.442695, %v8222_v27  ;;  %v16402_v16 = vpop.permute.xlu1 %16401 }
0x2b88   :  { %16679 = vpow2.f32 %v8226_v52  ;;  %v16397_v62 = vpop.permute.xlu0 %16396  ;;  %v16404_v40 = vunpack.i.h.bf16 %v16402_v16  ;;  %v16403_v59 = vunpack.i.l.bf16 %v16402_v16 }
0x2b89   :  { %16681 = vpow2.f32 %v8224_v18  ;;  %v16399_v32 = vunpack.i.h.bf16 %v16397_v62  ;;  %v16398_v55 = vunpack.i.l.bf16 %v16397_v62  ;;  %v7547_v62 = vsel %vm1026_vm4, %v18712_v5, 0.0 }
0x2b8a   :  { %v15918_v31 = vpack.c.bf16 %v16404_v40, %v16403_v59  ;;  %v7544_v40 = vsel %vm1026_vm4, %v18714_v51, 0.0 }
0x2b8b   :  { %v15914_v43 = vpack.c.bf16 %v16399_v32, %v16398_v55  ;;  %v8479_v23 = vpop.permute.xlu1 %8478 }
0x2b8c   :  { %v8397_v33 = vpop.permute.xlu0 %8396 }
0x2b92   :  { %v16680_v58 = vpop.eup %16679 }
0x2b93   :  { %v16682_v53 = vpop.eup %16681  ;;  %15081 = vmatmul.mubr.msk.f32.vlgmr.msra.gmra.mrb[84].mxu0 %vm1026_vm4, %v16680_v58  ;;  %v8231_v57 = vsel %vm1026_vm4, %v16680_v58, 0.0 }
0x2b94   :  { %15920 = vmatpush3.bf16.xpose.msk.msra.mxu0 %vm17623_vm3, %v15918_v31  ;;  %15074 = vmatmul.mubr.msk.f32.vlgmr.msra.gmra.mrb[100].mxu1 %vm1026_vm4, %v16682_v53  ;;  %v8228_v30 = vsel %vm1026_vm4, %v16682_v53, 0.0 }
0x2b95   :  { %15916 = vmatpush3.bf16.xpose.msk.msra.mxu1 %vm17623_vm3, %v15914_v43  ;;  %15094 = vmatprep.mubr.msk.f32.mxu0 %vm17153_vm6, %v17152_v7 }
0x2b96   :  { %15087 = vmatprep.mubr.msk.f32.mxu1 %vm17153_vm6, %v17152_v7  ;;  %15924 = vmatprep.subr.bf16.mxu0 %v17142_v0 }
0x2b97   :  { %15921 = vmatprep.subr.bf16.mxu1 %v17142_v0 }
0x2b9b   :  { %15095 = vmatmul.mubr.msk.f32.vlgmr.msra.gmra.mrb[86].mxu0 %vm849_vm2, %v8479_v23 }
0x2b9c   :  { %15088 = vmatmul.mubr.msk.f32.vlgmr.msra.gmra.mrb[102].mxu1 %vm849_vm2, %v8397_v33  ;;  %15108 = vmatprep.mubr.msk.f32.mxu0 %vm17153_vm6, %v17152_v7 }
0x2b9d   :  { %15101 = vmatprep.mubr.msk.f32.mxu1 %vm17153_vm6, %v17152_v7 }
0x2c66   :  { %v18814_v54 = vpop.f32.mrb[84].mxu0 }
0x2c67   :  { %v18816_v13 = vpop.f32.mrb[100].mxu1  ;;  %v15082_v38 = vpop.f32.mrb[85].mxu0 }
0x2c68   :  { %v15075_v29 = vpop.f32.mrb[101].mxu1 }
0x2c69   :  { %v7074_v29 = vld [vmem:[%s19566_s13] sm:$0xff] }
0x2c6e   :  { %v8556_v11 = vpop.f32.mrb[86].mxu0 }
0x2c6f   :  { %v8561_v48 = vmul.f32 0.35355338, %v8556_v11  ;;  %v8474_v41 = vpop.f32.mrb[102].mxu1  ;;  %v15096_v10 = vpop.f32.mrb[87].mxu0  ;;  %v7075_v11 = vld [vmem:[%s19566_s13 + $0x8] sm:$0xff] }
0x2c70   :  { %v8560_v17 = vmul.f32 0.35355338, %v8474_v41  ;;  %v15089_v8 = vpop.f32.mrb[103].mxu1 }
0x2c71   :  { %v8565_v35 = vsel %vm1026_vm4, %v8561_v48, -inf }
0x2c72   :  { %8566 = vmax.xlane.f32.xlu1 %v8565_v35  ;;  %v8562_v44 = vsel %vm1026_vm4, %v8560_v17, -inf }
0x2c73   :  { %8563 = vmax.xlane.f32.xlu0 %v8562_v44 }
0x2c83   :  { %16411 = vrot.lane.b32.xlu1 %v18697_v25, %s17149_s28 }
0x2c89   :  { %16406 = vrot.lane.b32.xlu0 %v18694_v34, %s17149_s28 }
0x2ca7   :  { %7882 = vadd.xlane.f32.xlu1 %v7881_v12 }
0x2ca8   :  { %7879 = vadd.xlane.f32.xlu0 %v7878_v37 }
0x2cac   :  { %8229 = vadd.xlane.f32.xlu0 %v8228_v30 }
0x2cb0   :  { %8232 = vadd.xlane.f32.xlu0 %v8231_v57 }
0x2cff   :  { %v8567_v22 = vpop.xlane.xlu1 %8566 }
0x2d00   :  { %v8569_v36 = vsub.f32 %v8561_v48, %v8567_v22  ;;  %v8564_v25 = vpop.xlane.xlu0 %8563  ;;  %v7077_v48 = vld [vmem:[%s19566_s13 + $0x18] sm:$0xff] }
0x2d01   :  { %v8568_v39 = vsub.f32 %v8560_v17, %v8564_v25 }
0x2d02   :  { %v8572_v60 = vmul.f32 1.442695, %v8569_v36 }
0x2d03   :  { %v8570_v34 = vmul.f32 1.442695, %v8568_v39  ;;  %v16412_v26 = vpop.permute.xlu1 %16411 }
0x2d04   :  { %16683 = vpow2.f32 %v8572_v60  ;;  %v16414_v21 = vunpack.i.h.bf16 %v16412_v26  ;;  %v16413_v15 = vunpack.i.l.bf16 %v16412_v26  ;;  %v16407_v6 = vpop.permute.xlu0 %16406 }
0x2d05   :  { %16685 = vpow2.f32 %v8570_v34  ;;  %v16409_v14 = vunpack.i.h.bf16 %v16407_v6  ;;  %v16408_v19 = vunpack.i.l.bf16 %v16407_v6 }
0x2d06   :  { %v15925_v20 = vpack.c.bf16 %v16414_v21, %v16413_v15 }
0x2d07   :  { %v15922_v61 = vpack.c.bf16 %v16409_v14, %v16408_v19 }
0x2d08   :  { %15926 = vmatpush3.bf16.msra.mxu0 %v15925_v20 }
0x2d09   :  { %15923 = vmatpush3.bf16.msra.mxu1 %v15922_v61 }
0x2d0e   :  { %v16684_v27 = vpop.eup %16683 }
0x2d0f   :  { %v16686_v52 = vpop.eup %16685  ;;  %15109 = vmatmul.mubr.msk.f32.vlgmr.msra.gmra.mrb[88].mxu0 %vm1026_vm4, %v16684_v27  ;;  %v8577_v18 = vsel %vm1026_vm4, %v16684_v27, 0.0 }
0x2d10   :  { %8578 = vadd.xlane.f32.xlu0 %v8577_v18  ;;  %15102 = vmatmul.mubr.msk.f32.vlgmr.msra.gmra.mrb[104].mxu1 %vm1026_vm4, %v16686_v52  ;;  %v8574_v16 = vsel %vm1026_vm4, %v16686_v52, 0.0 }
0x2d11   :  { %8575 = vadd.xlane.f32.xlu1 %v8574_v16 }
0x2d14   :  { %7548 = vadd.xlane.f32.xlu0 %v7547_v62 }
0x2d15   :  { %7545 = vadd.xlane.f32.xlu1 %v7544_v40 }
0x2d34   :  { %v7883_v59 = vpop.xlane.xlu1 %7882 }
0x2d35   :  { %16687 = vrcp.f32 %v7883_v59  ;;  %v7880_v32 = vpop.xlane.xlu0 %7879 }
0x2d36   :  { %16689 = vrcp.f32 %v7880_v32 }
0x2d39   :  { %v8230_v55 = vpop.xlane.xlu0 %8229 }
0x2d3a   :  { %16691 = vrcp.f32 %v8230_v55 }
0x2d3d   :  { %v8233_v58 = vpop.xlane.xlu0 %8232 }
0x2d3e   :  { %16693 = vrcp.f32 %v8233_v58 }
0x2d3f   :  { %v16688_v31 = vpop.eup %16687 }
0x2d40   :  { %v16690_v53 = vpop.eup %16689  ;;  %v8049_v5 = vmul.f32 %v16688_v31, %v18782_v1  ;;  %v15927_v1 = vpack.c.bf16 %v7075_v11, %v7074_v29  ;;  %v8905_v29 = vld [vmem:[%s19568_s6] sm:$0xff]  ;;  %v8906_v11 = vld [vmem:[%s19568_s6 + $0x8] sm:$0xff] }
0x2d41   :  { %v8048_v43 = vmul.f32 %v16690_v53, %v18784_v24  ;;  %v7076_v24 = vld [vmem:[%s19566_s13 + $0x10] sm:$0xff] }
0x2d42   :  { %8746 = vrot.lane.b32.xlu0 %v8049_v5, %s17150_s27  ;;  %15928 = vmatprep.subr.bf16.mxu1 %v15927_v1  ;;  %v15931_v10 = vpack.c.bf16 %v7077_v48, %v7076_v24  ;;  %v15935_v24 = vpack.c.bf16 %v8906_v11, %v8905_v29  ;;  %v8908_v48 = vld [vmem:[%s19568_s6 + $0x18] sm:$0xff] }
0x2d43   :  { %8744 = vrot.lane.b32.xlu1 %v8048_v43, %s17150_s27  ;;  %15930 = vmatpush3.bf16.msra.mxu1 %v15927_v1  ;;  %v8907_v1 = vld [vmem:[%s19568_s6 + $0x10] sm:$0xff] }
0x2d44   :  { %v16692_v51 = vpop.eup %16691  ;;  %15932 = vmatprep.subr.bf16.mxu1 %v15931_v10  ;;  %15936 = vmatprep.subr.bf16.mxu0 %v15935_v24 }
0x2d45   :  { %v8394_v23 = vmul.f32 %v16692_v51, %v18816_v13  ;;  %15938 = vmatpush3.bf16.msra.mxu0 %v15935_v24 }
0x2d47   :  { %8752 = vrot.lane.b32.xlu1 %v8394_v23, %s19495_s0  ;;  %15934 = vmatpush3.bf16.msra.mxu1 %v15931_v10 }
0x2d48   :  { %v16694_v33 = vpop.eup %16693 }
0x2d49   :  { %v8395_v38 = vmul.f32 %v16694_v33, %v18814_v54 }
0x2d4b   :  { %8754 = vrot.lane.b32.xlu1 %v8395_v38, %s19495_s0  ;;  %s19570_s0 = sld [smem:[#allocation57_spill]] }
0x2d9d   :  { %v8579_v41 = vpop.xlane.xlu0 %8578 }
0x2d9e   :  { %v8576_v17 = vpop.xlane.xlu1 %8575  ;;  %16695 = vrcp.f32 %v8579_v41  ;;  %v15939_v41 = vpack.c.bf16 %v8908_v48, %v8907_v1 }
0x2d9f   :  { %16697 = vrcp.f32 %v8576_v17 }
0x2da0   :  { %15940 = vmatprep.subr.bf16.mxu0 %v15939_v41 }
0x2da1   :  { %v7549_v22 = vpop.xlane.xlu0 %7548  ;;  %15942 = vmatpush3.bf16.msra.mxu0 %v15939_v41 }
0x2da2   :  { %v7546_v57 = vpop.xlane.xlu1 %7545 }
0x2da3   :  { %16699 = vrcp.f32 %v7546_v57 }
0x2da4   :  { %16701 = vrcp.f32 %v7549_v22 }
0x2da8   :  { %v16696_v13 = vpop.eup %16695 }
0x2da9   :  { %v16698_v35 = vpop.eup %16697 }
0x2dad   :  { %v16700_v39 = vpop.eup %16699 }
0x2dae   :  { %v16702_v60 = vpop.eup %16701  ;;  %v7698_v21 = vmul.f32 %v16700_v39, %v18740_v63  ;;  %v13722_v63 = vld [vmem:[%s19567_s11] ss:$0 sm:$0xff] }
0x2daf   :  { %v7699_v15 = vmul.f32 %v16702_v60, %v18738_v2 }
0x2db4   :  { %v8747_v26 = vpop.permute.xlu0 %8746 }
0x2db5   :  { %v8745_v36 = vpop.permute.xlu1 %8744  ;;  %v8767_v19 = vsel %vm849_vm2, %v7699_v15, %v8747_v26 }
0x2db6   :  { %v8766_v6 = vsel %vm849_vm2, %v7698_v21, %v8745_v36  ;;  %v13726_v21 = vld [vmem:[#allocation4] ss:$0 sm:$0xff] }
0x2db9   :  { %v8753_v25 = vpop.permute.xlu1 %8752 }
0x2dba   :  { %v8768_v20 = vsel %vm1026_vm4, %v8766_v6, %v8753_v25 }
0x2dbd   :  { %v8755_v34 = vpop.permute.xlu1 %8754 }
0x2dbe   :  { %v8769_v27 = vsel %vm1026_vm4, %v8767_v19, %v8755_v34  ;;  %v13725_v34 = vld [vmem:[%s19570_s0] ss:$0 sm:$0xff] }
0x2de2   :  { %v8734_v8 = vpop.f32.mrb[88].mxu0 }
0x2de3   :  { %v8741_v54 = vmul.f32 %v16696_v13, %v8734_v8  ;;  %v8655_v44 = vpop.f32.mrb[104].mxu1  ;;  %v15110_v12 = vpop.f32.mrb[89].mxu0 }
0x2de4   :  { %v8740_v37 = vmul.f32 %v16698_v35, %v8655_v44  ;;  %v15103_v30 = vpop.f32.mrb[105].mxu1 }
0x2de5   :  { %8762 = vrot.lane.b32.xlu1 %v8741_v54, %s19493_s1 }
0x2de6   :  { %8760 = vrot.lane.b32.xlu0 %v8740_v37, %s19493_s1  ;;  %s19569_s1 = sld [smem:[#allocation59_spill]] }
0x2dec   :  { %v8999_v10 = vld [vmem:[%s19569_s1] sm:$0xff]  ;;  %v9000_v17 = vld [vmem:[%s19569_s1 + $0x8] sm:$0xff]  ;;  %v9001_v13 = vld [vmem:[%s19569_s1 + $0x10] sm:$0xff] }
0x2ded   :  { %v15943_v8 = vpack.c.bf16 %v9000_v17, %v8999_v10  ;;  %v9002_v35 = vld [vmem:[%s19569_s1 + $0x18] sm:$0xff]  ;;  %v9003_v44 = vld [vmem:[%s19569_s1 + $0x20] sm:$0xff]  ;;  %v9004_v12 = vld [vmem:[%s19569_s1 + $0x28] sm:$0xff] }
0x2dee   :  { %v15947_v54 = vpack.c.bf16 %v9002_v35, %v9001_v13  ;;  %v15951_v37 = vpack.c.bf16 %v9004_v12, %v9003_v44  ;;  %v13737_v17 = vld [vmem:[%s19551_s3 + $0x20] sm:$0xff]  ;;  %v13738_v13 = vld [vmem:[%s19551_s3 + $0x28] sm:$0xff]  ;;  %v13739_v35 = vld [vmem:[%s19551_s3 + $0x30] sm:$0xff] }
0x2def   :  { %15944 = vmatprep.subr.bf16.mxu1 %v15943_v8  ;;  %v13742_v12 = vld [vmem:[%s19553_s15 + $0x20] sm:$0xff] }
0x2e57   :  { %v8763_v14 = vpop.permute.xlu1 %8762 }
0x2e58   :  { %v8761_v61 = vpop.permute.xlu0 %8760  ;;  %v8771_v18 = vsel %vm2505_vm5, %v8769_v27, %v8763_v14  ;;  %v9005_v27 = vld [vmem:[%s19569_s1 + $0x30] sm:$0xff] }
0x2e59   :  { %v8770_v52 = vsel %vm2505_vm5, %v8768_v20, %v8761_v61 }
0x2e5a   :  { %15119 = vmatprep.mubr.msk.f32.mxu1 %vm642_vm1, %v8770_v52  ;;  %v9006_v52 = vld [vmem:[%s19569_s1 + $0x38] sm:$0xff] }
0x2e5b   :  { %15120 = vmatmul.mubr.msk.f32.vlgmr.msra.gmra.mrb[106].mxu1 %vm642_vm1, %v8771_v18  ;;  %v15955_v18 = vpack.c.bf16 %v9006_v52, %v9005_v27  ;;  %v13744_v52 = vld [vmem:[%s19553_s15 + $0x30] sm:$0xff] }
0x2e5c   :  { %15946 = vmatpush3.bf16.msra.mxu1 %v15943_v8  ;;  %v15959_v8 = vpack.c.bf16 %v13738_v13, %v13737_v17 }
0x2e5d   :  { %15948 = vmatprep.subr.bf16.mxu1 %v15947_v54 }
0x2e5e   :  { %15960 = vmatprep.subr.bf16.mxu0 %v15959_v8 }
0x2e60   :  { %15950 = vmatpush3.bf16.msra.mxu1 %v15947_v54  ;;  %v13740_v54 = vld [vmem:[%s19551_s3 + $0x38] sm:$0xff] }
0x2e61   :  { %15952 = vmatprep.subr.bf16.mxu1 %v15951_v37  ;;  %v15963_v44 = vpack.c.bf16 %v13740_v54, %v13739_v35 }
0x2e64   :  { %15954 = vmatpush3.bf16.msra.mxu1 %v15951_v37  ;;  %v13743_v37 = vld [vmem:[%s19553_s15 + $0x28] sm:$0xff] }
0x2e65   :  { %15956 = vmatprep.subr.bf16.mxu1 %v15955_v18 }
0x2e68   :  { %15958 = vmatpush3.bf16.msra.mxu1 %v15955_v18  ;;  %v13745_v18 = vld [vmem:[%s19553_s15 + $0x38] sm:$0xff] }
0x2e69   :  { %15174 = vmatprep.subr.mxu1 %v17152_v7 }
0x2f2e   :  { %v15121_v2 = vpop.f32.mrb[106].mxu1 }
0x2f2f   :  { %v8856_v16 = vadd.f32 %v15121_v2, %v13722_v63  ;;  %v8850_v62 = vpop.f32.mrb[107].mxu1 }
0x2f30   :  { %v8851_v40 = vadd.f32 %v13722_v63, %v8850_v62  ;;  %v13727_v63 = vld [vmem:[#allocation6] ss:$0 sm:$0xff] }
0x2f31   :  { %v8860_v59 = vadd.f32 %v8856_v16, %v18644_v42 }
0x2f32   :  { %v8859_v32 = vadd.f32 %v8851_v40, %v18646_v50 }
0x2f33   :  { %v8866_v55 = vsel %vm642_vm1, %v8860_v59, 0.0 }
0x2f34   :  { %8867 = vadd.xlane.f32.xlu1 %v8866_v55  ;;  %v8863_v58 = vsel %vm642_vm1, %v8859_v32, 0.0  ;;  %v13730_v55 = vld [vmem:[#allocation7] ss:$0 sm:$0xff] }
0x2f35   :  { %8864 = vadd.xlane.f32.xlu0 %v8863_v58 }
0x2fc1   :  { %v8868_v31 = vpop.xlane.xlu1 %8867 }
0x2fc2   :  { %v8870_v53 = vmul.f32 0.03125, %v8868_v31  ;;  %v8865_v5 = vpop.xlane.xlu0 %8864 }
0x2fc3   :  { %v8869_v43 = vmul.f32 0.03125, %v8865_v5 }
0x2fc4   :  { %v8872_v51 = vsub.f32 %v8860_v59, %v8870_v53 }
0x2fc5   :  { %v8871_v23 = vsub.f32 %v8859_v32, %v8869_v43 }
0x2fc6   :  { %v8874_v50 = vmul.f32 %v8872_v51, %v8872_v51 }
0x2fc7   :  { %v8873_v33 = vmul.f32 %v8871_v23, %v8871_v23 }
0x2fc8   :  { %v8878_v38 = vsel %vm642_vm1, %v8874_v50, 0.0 }
0x2fc9   :  { %v8875_v42 = vsel %vm642_vm1, %v8873_v33, 0.0 }
0x2fca   :  { %8876 = vadd.xlane.f32.xlu0 %v8875_v42 }
0x2fce   :  { %8879 = vadd.xlane.f32.xlu0 %v8878_v38 }
0x3057   :  { %v8877_v30 = vpop.xlane.xlu0 %8876 }
0x3058   :  { %v8881_v57 = vmul.f32 0.03125, %v8877_v30  ;;  %v15967_v30 = vpack.c.bf16 %v13743_v37, %v13742_v12 }
0x305a   :  { %v8883_v22 = vadd.f32 1e-05, %v8881_v57 }
0x305b   :  { %v8880_v36 = vpop.xlane.xlu0 %8879 }
0x305c   :  { %16703 = vrsqrt.f32 %v8883_v22  ;;  %v8882_v25 = vmul.f32 0.03125, %v8880_v36 }
0x305e   :  { %v8884_v39 = vadd.f32 1e-05, %v8882_v25 }
0x3060   :  { %16705 = vrsqrt.f32 %v8884_v39 }
0x3066   :  { %v16704_v60 = vpop.eup %16703 }
0x3067   :  { %v8887_v26 = vmul.f32 %v16704_v60, %v8871_v23 }
0x3069   :  { %v8895_v15 = vmul.f32 %v13725_v34, %v8887_v26  ;;  %v13733_v26 = vld [vmem:[#allocation9] ss:$0 sm:$0xff] }
0x306a   :  { %v16706_v6 = vpop.eup %16705 }
0x306b   :  { %v8888_v14 = vmul.f32 %v16706_v6, %v8872_v51  ;;  %v8903_v19 = vadd.f32 %v13726_v21, %v8895_v15  ;;  %v13734_v6 = vld [vmem:[#allocation10] ss:$0 sm:$0xff] }
0x306d   :  { %v8896_v20 = vmul.f32 %v13725_v34, %v8888_v14  ;;  %15130 = vmatprep.mubr.msk.f32.mxu0 %vm642_vm1, %v8903_v19 }
0x306f   :  { %v8904_v61 = vadd.f32 %v13726_v21, %v8896_v20 }
0x3071   :  { %15131 = vmatmul.mubr.msk.f32.vlgmr.msra.gmra.mrb[90].mxu0 %vm642_vm1, %v8904_v61 }
0x3072   :  { %15962 = vmatpush3.bf16.msra.mxu0 %v15959_v8 }
0x3073   :  { %15964 = vmatprep.subr.bf16.mxu0 %v15963_v44 }
0x3076   :  { %15966 = vmatpush3.bf16.msra.mxu0 %v15963_v44 }
0x3077   :  { %15968 = vmatprep.subr.bf16.mxu0 %v15967_v30 }
0x3144   :  { %v15132_v2 = vpop.f32.mrb[90].mxu0 }
0x3145   :  { %v8994_v16 = vadd.f32 %v15132_v2, %v13727_v63  ;;  %v8988_v62 = vpop.f32.mrb[91].mxu0 }
0x3146   :  { %v8989_v40 = vadd.f32 %v13727_v63, %v8988_v62  ;;  %v18906_v63 = vld [vmem:[%s19552_s4] sm:$0xff] }
0x3147   :  { %v8998_v32 = vmax.f32 %v8994_v16, 0.0  ;;  %v18911_v16 = vld [vmem:[%s19552_s4 + $0x8] sm:$0xff] }
0x3148   :  { %v8997_v59 = vmax.f32 %v8989_v40, 0.0  ;;  %v15971_v40 = vpack.c.bf16 %v13745_v18, %v13744_v52 }
0x314a   :  { %15149 = vmatprep.mubr.msk.f32.mxu1 %vm397_vm0, %v8997_v59  ;;  %v13752_v59 = vld [vmem:[%s19554_s17 + $0x1] ss:$0 sm:$0xff] }
0x314b   :  { %15150 = vmatmul.mubr.msk.f32.vlgmr.msra.gmra.mrb[108].mxu1 %vm397_vm0, %v8998_v32 }
0x314c   :  { %15176 = vmatprep.mubr.msk.f32.mxu1 %vm17153_vm6, %v17152_v7 }
0x321e   :  { %v15151_v58 = vpop.f32.mrb[108].mxu1 }
0x321f   :  { %v9092_v31 = vadd.f32 %v15151_v58, %v13730_v55  ;;  %v9086_v53 = vpop.f32.mrb[109].mxu1 }
0x3220   :  { %v9087_v5 = vadd.f32 %v13730_v55, %v9086_v53 }
0x3221   :  { %v9096_v43 = vadd.f32 %v9092_v31, %v8904_v61 }
0x3222   :  { %v9095_v51 = vadd.f32 %v9087_v5, %v8903_v19 }
0x3223   :  { %v9102_v23 = vsel %vm642_vm1, %v9096_v43, 0.0 }
0x3224   :  { %9103 = vadd.xlane.f32.xlu0 %v9102_v23  ;;  %v9099_v33 = vsel %vm642_vm1, %v9095_v51, 0.0 }
0x3225   :  { %9100 = vadd.xlane.f32.xlu1 %v9099_v33 }
0x32b1   :  { %v9104_v42 = vpop.xlane.xlu0 %9103 }
0x32b2   :  { %v9106_v50 = vmul.f32 0.03125, %v9104_v42  ;;  %v9101_v38 = vpop.xlane.xlu1 %9100 }
0x32b3   :  { %v9105_v29 = vmul.f32 0.03125, %v9101_v38 }
0x32b4   :  { %v9108_v11 = vsub.f32 %v9096_v43, %v9106_v50  ;;  %v13755_v43 = vld [vmem:[%s19555_s5 + $0x1] ss:$0 sm:$0xff] }
0x32b5   :  { %v9107_v1 = vsub.f32 %v9095_v51, %v9105_v29 }
0x32b6   :  { %v9110_v24 = vmul.f32 %v9108_v11, %v9108_v11 }
0x32b7   :  { %v9109_v48 = vmul.f32 %v9107_v1, %v9107_v1 }
0x32b8   :  { %v9114_v41 = vsel %vm642_vm1, %v9110_v24, 0.0 }
0x32b9   :  { %9115 = vadd.xlane.f32.xlu0 %v9114_v41  ;;  %v9111_v10 = vsel %vm642_vm1, %v9109_v48, 0.0 }
0x32ba   :  { %9112 = vadd.xlane.f32.xlu1 %v9111_v10 }
0x3346   :  { %v9116_v57 = vpop.xlane.xlu0 %9115 }
0x3347   :  { %v9118_v22 = vmul.f32 0.03125, %v9116_v57  ;;  %v9113_v36 = vpop.xlane.xlu1 %9112 }
0x3348   :  { %v9117_v25 = vmul.f32 0.03125, %v9113_v36 }
0x3349   :  { %v9120_v39 = vadd.f32 1e-05, %v9118_v22 }
0x334a   :  { %v9119_v60 = vadd.f32 1e-05, %v9117_v25 }
0x334b   :  { %16707 = vrsqrt.f32 %v9120_v39 }
0x334c   :  { %16709 = vrsqrt.f32 %v9119_v60 }
0x3355   :  { %v16708_v34 = vpop.eup %16707 }
0x3356   :  { %v16710_v21 = vpop.eup %16709  ;;  %v9124_v15 = vmul.f32 %v16708_v34, %v9108_v11 }
0x3357   :  { %v9123_v14 = vmul.f32 %v16710_v21, %v9107_v1 }
0x3358   :  { %v9132_v19 = vmul.f32 %v13733_v26, %v9124_v15 }
0x3359   :  { %v9131_v20 = vmul.f32 %v13733_v26, %v9123_v14 }
0x335a   :  { %v18899_v61 = vadd.f32 %v13734_v6, %v9132_v19 }
0x335b   :  { %v18901_v27 = vadd.f32 %v13734_v6, %v9131_v20 }
0x335c   :  { %v9207_v62 = vadd.f32 %v18911_v16, %v18899_v61 }
0x335d   :  { %v9206_v2 = vadd.f32 %v18906_v63, %v18901_v27 }
0x335f   :  { %15160 = vmatprep.mubr.msk.f32.mxu0 %vm642_vm1, %v9206_v2 }
0x3360   :  { %15161 = vmatmul.mubr.msk.f32.vlgmr.msra.gmra.mrb[92].mxu0 %vm642_vm1, %v9207_v62 }
0x3361   :  { %15970 = vmatpush3.bf16.msra.mxu0 %v15967_v30  ;;  %15171 = vmatprep.mubr.msk.f32.mxu0 %vm642_vm1, %v18901_v27 }
0x3362   :  { %15972 = vmatprep.subr.bf16.mxu0 %v15971_v40 }
0x3365   :  { %15974 = vmatpush3.bf16.msra.mxu0 %v15971_v40 }
0x3366   :  { %15179 = vmatprep.subr.mxu0 %v17152_v7 }
0x3368   :  { %15172 = vmatmul.mubr.msk.f32.vlgmr.msra.gmra.mrb[94].mxu0 %vm642_vm1, %v18899_v61 }
0x3369   :  { %15181 = vmatprep.mubr.msk.f32.mxu0 %vm17153_vm6, %v17152_v7 }
0x3433   :  { %v15162_v32 = vpop.f32.mrb[92].mxu0 }
0x3434   :  { %v18925_v55 = vadd.f32 %v15162_v32, %v13752_v59  ;;  %v9286_v58 = vpop.f32.mrb[93].mxu0 }
0x3435   :  { %v18927_v31 = vadd.f32 %v13752_v59, %v9286_v58 }
0x3436   :  { %9460 = vrot.lane.b32.xlu0 %v18925_v55, %s17143_s9 }
0x3437   :  { %9383 = vrot.lane.b32.xlu1 %v18927_v31, %s17143_s9  ;;  %s19571_s9 = smov 16  }
0x343b   :  { %v15173_v53 = vpop.f32.mrb[94].mxu0  ;;  %9708 = vrot.lane.b32.xlu1 %v18927_v31, %s17144_s16 }
0x343c   :  { %v9373_v5 = vpop.f32.mrb[95].mxu0  ;;  %v18941_v33 = vadd.f32 %v15173_v53, %v13755_v43 }
0x343d   :  { %v18944_v42 = vadd.f32 %v13755_v43, %v9373_v5 }
0x343f   :  { %9706 = vrot.lane.b32.xlu1 %v18927_v31, %s17145_s29 }
0x34a8   :  { %v9461_v51 = vpop.permute.xlu0 %9460 }
0x34a9   :  { %15180 = vmatpush3.xpose.msk.msra.mxu0 %vm849_vm2, %v9461_v51  ;;  %v9384_v23 = vpop.permute.xlu1 %9383 }
0x34aa   :  { %15175 = vmatpush3.xpose.msk.msra.mxu1 %vm849_vm2, %v9384_v23  ;;  %15189 = vmatprep.subr.mxu0 %v17152_v7 }
0x34ab   :  { %15184 = vmatprep.subr.mxu1 %v17152_v7 }
0x34ac   :  { %15182 = vmatmul.mubr.msk.f32.vlgmr.msra.gmra.mrb[96].mxu0 %vm849_vm2, %v18925_v55 }
0x34ad   :  { %15177 = vmatmul.mubr.msk.f32.vlgmr.msra.gmra.mrb[110].mxu1 %vm849_vm2, %v18927_v31  ;;  %15190 = vmatpush3.msra.mxu0 %v18941_v33  ;;  %v9709_v10 = vpop.permute.xlu1 %9708 }
0x34ae   :  { %15185 = vmatpush3.msra.mxu1 %v18944_v42  ;;  %15191 = vmatprep.mubr.msk.f32.mxu0 %vm17153_vm6, %v17152_v7 }
0x34af   :  { %15199 = vmatprep.subr.mxu0 %v17152_v7  ;;  %15186 = vmatprep.mubr.msk.f32.mxu1 %vm17153_vm6, %v17152_v7 }
0x34b0   :  { %15194 = vmatprep.subr.mxu1 %v17152_v7 }
0x34b1   :  { %v9707_v17 = vpop.permute.xlu1 %9706 }
0x357f   :  { %v9532_v50 = vpop.f32.mrb[96].mxu0 }
0x3580   :  { %v9537_v38 = vmul.f32 0.35355338, %v9532_v50  ;;  %v9455_v29 = vpop.f32.mrb[110].mxu1  ;;  %v15183_v11 = vpop.f32.mrb[97].mxu0 }
0x3581   :  { %v9536_v1 = vmul.f32 0.35355338, %v9455_v29  ;;  %v15178_v24 = vpop.f32.mrb[111].mxu1 }
0x3582   :  { %v9541_v48 = vsel %vm849_vm2, %v9537_v38, -inf }
0x3583   :  { %9542 = vmax.xlane.f32.xlu0 %v9541_v48  ;;  %v9538_v41 = vsel %vm849_vm2, %v9536_v1, -inf }
0x3584   :  { %9539 = vmax.xlane.f32.xlu1 %v9538_v41 }
0x3595   :  { %9784 = vrot.lane.b32.xlu1 %v18925_v55, %s17145_s29 }
0x3599   :  { %9786 = vrot.lane.b32.xlu0 %v18925_v55, %s17144_s16  ;;  %9960 = vrot.lane.b32.xlu1 %v18941_v33, %s17145_s29  ;;  %s19572_s16 = smov 24  }
0x359d   :  { %9883 = vrot.lane.b32.xlu0 %v18944_v42, %s17145_s29 }
0x3610   :  { %v9543_v13 = vpop.xlane.xlu0 %9542 }
0x3611   :  { %v9545_v8 = vsub.f32 %v9537_v38, %v9543_v13  ;;  %v9540_v35 = vpop.xlane.xlu1 %9539 }
0x3612   :  { %v9544_v54 = vsub.f32 %v9536_v1, %v9540_v35 }
0x3613   :  { %v9548_v44 = vmul.f32 1.442695, %v9545_v8 }
0x3614   :  { %v9546_v12 = vmul.f32 1.442695, %v9544_v54  ;;  %v9787_v57 = vpop.permute.xlu0 %9786 }
0x3615   :  { %16711 = vpow2.f32 %v9548_v44  ;;  %v9785_v37 = vpop.permute.xlu1 %9784 }
0x3616   :  { %16713 = vpow2.f32 %v9546_v12 }
0x3618   :  { %v9884_v25 = vpop.permute.xlu0 %9883 }
0x3619   :  { %v9961_v36 = vpop.permute.xlu1 %9960 }
0x361f   :  { %v18968_v30 = vpop.eup %16711 }
0x3620   :  { %v18970_v22 = vpop.eup %16713  ;;  %15192 = vmatmul.mubr.msk.f32.vlgmr.msra.gmra.mrb[98].mxu0 %vm849_vm2, %v18968_v30 }
0x3621   :  { %15200 = vmatpush3.xpose.msk.msra.mxu0 %vm849_vm2, %v9787_v57  ;;  %15187 = vmatmul.mubr.msk.f32.vlgmr.msra.gmra.mrb[112].mxu1 %vm849_vm2, %v18970_v22 }
0x3622   :  { %15195 = vmatpush3.xpose.msk.msra.mxu1 %vm849_vm2, %v9709_v10  ;;  %15201 = vmatprep.mubr.msk.f32.mxu0 %vm17153_vm6, %v17152_v7 }
0x3623   :  { %15209 = vmatprep.subr.mxu0 %v17152_v7  ;;  %15196 = vmatprep.mubr.msk.f32.mxu1 %vm17153_vm6, %v17152_v7 }
0x3624   :  { %15202 = vmatmul.mubr.msk.f32.vlgmr.msra.gmra.mrb[100].mxu0 %vm849_vm2, %v9785_v37  ;;  %15204 = vmatprep.subr.mxu1 %v17152_v7 }
0x3625   :  { %15210 = vmatpush3.msra.mxu0 %v9961_v36  ;;  %15197 = vmatmul.mubr.msk.f32.vlgmr.msra.gmra.mrb[114].mxu1 %vm849_vm2, %v9707_v17 }
0x3626   :  { %15205 = vmatpush3.msra.mxu1 %v9884_v25  ;;  %15211 = vmatprep.mubr.msk.f32.mxu0 %vm17153_vm6, %v17152_v7 }
0x3627   :  { %15219 = vmatprep.subr.mxu0 %v17152_v7  ;;  %15206 = vmatprep.mubr.msk.f32.mxu1 %vm17153_vm6, %v17152_v7 }
0x3628   :  { %15214 = vmatprep.subr.mxu1 %v17152_v7 }
0x36f3   :  { %v18992_v39 = vpop.f32.mrb[98].mxu0 }
0x36f4   :  { %v18994_v60 = vpop.f32.mrb[112].mxu1  ;;  %v15193_v34 = vpop.f32.mrb[99].mxu0 }
0x36f5   :  { %v15188_v26 = vpop.f32.mrb[113].mxu1 }
0x36f7   :  { %v9858_v21 = vpop.f32.mrb[100].mxu0 }
0x36f8   :  { %v9863_v15 = vmul.f32 0.35355338, %v9858_v21  ;;  %v9780_v6 = vpop.f32.mrb[114].mxu1  ;;  %v15203_v14 = vpop.f32.mrb[101].mxu0 }
0x36f9   :  { %v9862_v19 = vmul.f32 0.35355338, %v9780_v6  ;;  %v15198_v20 = vpop.f32.mrb[115].mxu1 }
0x36fa   :  { %v9867_v52 = vsel %vm849_vm2, %v9863_v15, -inf }
0x36fb   :  { %9868 = vmax.xlane.f32.xlu1 %v9867_v52  ;;  %v9864_v18 = vsel %vm849_vm2, %v9862_v19, -inf }
0x36fc   :  { %9865 = vmax.xlane.f32.xlu0 %v9864_v18 }
0x370c   :  { %10120 = vrot.lane.b32.xlu1 %v18925_v55, %s17146_s18 }
0x3710   :  { %10118 = vrot.lane.b32.xlu1 %v18925_v55, %s17147_s22 }
0x3712   :  { %10042 = vrot.lane.b32.xlu0 %v18927_v31, %s17146_s18 }
0x3714   :  { %10292 = vrot.lane.b32.xlu1 %v18941_v33, %s17147_s22 }
0x3716   :  { %10040 = vrot.lane.b32.xlu0 %v18927_v31, %s17147_s22 }
0x371a   :  { %10216 = vrot.lane.b32.xlu0 %v18944_v42, %s17147_s22 }
0x3788   :  { %v9869_v2 = vpop.xlane.xlu1 %9868 }
0x3789   :  { %v9871_v62 = vsub.f32 %v9863_v15, %v9869_v2  ;;  %v9866_v40 = vpop.xlane.xlu0 %9865 }
0x378a   :  { %v9870_v59 = vsub.f32 %v9862_v19, %v9866_v40 }
0x378b   :  { %v9874_v32 = vmul.f32 1.442695, %v9871_v62 }
0x378c   :  { %v9872_v58 = vmul.f32 1.442695, %v9870_v59  ;;  %v10121_v53 = vpop.permute.xlu1 %10120 }
0x378d   :  { %16715 = vpow2.f32 %v9874_v32  ;;  %v10043_v5 = vpop.permute.xlu0 %10042 }
0x378e   :  { %16717 = vpow2.f32 %v9872_v58 }
0x3790   :  { %v10119_v43 = vpop.permute.xlu1 %10118 }
0x3791   :  { %v10041_v23 = vpop.permute.xlu0 %10040 }
0x3794   :  { %v10293_v38 = vpop.permute.xlu1 %10292 }
0x3795   :  { %v10217_v29 = vpop.permute.xlu0 %10216 }
0x3797   :  { %v19010_v51 = vpop.eup %16715 }
0x3798   :  { %v19012_v50 = vpop.eup %16717  ;;  %15212 = vmatmul.mubr.msk.f32.vlgmr.msra.gmra.mrb[102].mxu0 %vm849_vm2, %v19010_v51 }
0x3799   :  { %15220 = vmatpush3.xpose.msk.msra.mxu0 %vm849_vm2, %v10121_v53  ;;  %15207 = vmatmul.mubr.msk.f32.vlgmr.msra.gmra.mrb[116].mxu1 %vm849_vm2, %v19012_v50 }
0x379a   :  { %15215 = vmatpush3.xpose.msk.msra.mxu1 %vm849_vm2, %v10043_v5  ;;  %15221 = vmatprep.mubr.msk.f32.mxu0 %vm17153_vm6, %v17152_v7  ;;  %v9879_v5 = vsel %vm849_vm2, %v19010_v51, 0.0 }
0x379b   :  { %15229 = vmatprep.subr.mxu0 %v17152_v7  ;;  %15216 = vmatprep.mubr.msk.f32.mxu1 %vm17153_vm6, %v17152_v7 }
0x379c   :  { %15222 = vmatmul.mubr.msk.f32.vlgmr.msra.gmra.mrb[104].mxu0 %vm849_vm2, %v10119_v43  ;;  %15224 = vmatprep.subr.mxu1 %v17152_v7  ;;  %v9876_v43 = vsel %vm849_vm2, %v19012_v50, 0.0 }
0x379d   :  { %15230 = vmatpush3.msra.mxu0 %v10293_v38  ;;  %15217 = vmatmul.mubr.msk.f32.vlgmr.msra.gmra.mrb[118].mxu1 %vm849_vm2, %v10041_v23 }
0x379e   :  { %15225 = vmatpush3.msra.mxu1 %v10217_v29  ;;  %15231 = vmatprep.mubr.msk.f32.mxu0 %vm17153_vm6, %v17152_v7 }
0x379f   :  { %15239 = vmatprep.subr.mxu0 %v17152_v7  ;;  %15226 = vmatprep.mubr.msk.f32.mxu1 %vm17153_vm6, %v17152_v7 }
0x37a0   :  { %15234 = vmatprep.subr.mxu1 %v17152_v7 }
0x386b   :  { %v19034_v11 = vpop.f32.mrb[102].mxu0 }
0x386c   :  { %v19036_v1 = vpop.f32.mrb[116].mxu1  ;;  %v15213_v24 = vpop.f32.mrb[103].mxu0 }
0x386d   :  { %v15208_v48 = vpop.f32.mrb[117].mxu1 }
0x386f   :  { %v10192_v41 = vpop.f32.mrb[104].mxu0 }
0x3870   :  { %v10197_v10 = vmul.f32 0.35355338, %v10192_v41  ;;  %v10114_v17 = vpop.f32.mrb[118].mxu1  ;;  %v15223_v13 = vpop.f32.mrb[105].mxu0 }
0x3871   :  { %v10196_v8 = vmul.f32 0.35355338, %v10114_v17  ;;  %v15218_v35 = vpop.f32.mrb[119].mxu1 }
0x3872   :  { %v10201_v54 = vsel %vm849_vm2, %v10197_v10, -inf  ;;  %v9553_v35 = vsel %vm849_vm2, %v18968_v30, 0.0 }
0x3873   :  { %10202 = vmax.xlane.f32.xlu1 %v10201_v54  ;;  %v10198_v44 = vsel %vm849_vm2, %v10196_v8, -inf  ;;  %v9550_v54 = vsel %vm849_vm2, %v18970_v22, 0.0 }
0x3874   :  { %10199 = vmax.xlane.f32.xlu0 %v10198_v44 }
0x3884   :  { %10452 = vrot.lane.b32.xlu1 %v18925_v55, %s17148_s26 }
0x3888   :  { %10450 = vrot.lane.b32.xlu1 %v18925_v55, %s17149_s28 }
0x388a   :  { %10374 = vrot.lane.b32.xlu0 %v18927_v31, %s17148_s26 }
0x388e   :  { %10372 = vrot.lane.b32.xlu0 %v18927_v31, %s17149_s28 }
0x3900   :  { %v10203_v12 = vpop.xlane.xlu1 %10202 }
0x3901   :  { %v10205_v37 = vsub.f32 %v10197_v10, %v10203_v12  ;;  %v10200_v57 = vpop.xlane.xlu0 %10199 }
0x3902   :  { %v10204_v36 = vsub.f32 %v10196_v8, %v10200_v57 }
0x3903   :  { %v10208_v25 = vmul.f32 1.442695, %v10205_v37 }
0x3904   :  { %v10206_v34 = vmul.f32 1.442695, %v10204_v36  ;;  %v10453_v26 = vpop.permute.xlu1 %10452 }
0x3905   :  { %16719 = vpow2.f32 %v10208_v25  ;;  %v10375_v21 = vpop.permute.xlu0 %10374 }
0x3906   :  { %16721 = vpow2.f32 %v10206_v34 }
0x3908   :  { %v10451_v55 = vpop.permute.xlu1 %10450 }
0x3909   :  { %v10373_v31 = vpop.permute.xlu0 %10372 }
0x390f   :  { %v16720_v15 = vpop.eup %16719 }
0x3910   :  { %v16722_v6 = vpop.eup %16721  ;;  %15232 = vmatmul.mubr.msk.f32.vlgmr.msra.gmra.mrb[106].mxu0 %vm849_vm2, %v16720_v15  ;;  %v10213_v38 = vsel %vm849_vm2, %v16720_v15, 0.0 }
0x3911   :  { %15240 = vmatpush3.xpose.msk.msra.mxu0 %vm849_vm2, %v10453_v26  ;;  %15227 = vmatmul.mubr.msk.f32.vlgmr.msra.gmra.mrb[120].mxu1 %vm849_vm2, %v16722_v6  ;;  %v10210_v23 = vsel %vm849_vm2, %v16722_v6, 0.0  ;;  %v13747_v6 = vld [vmem:[%s19556_s14 + $0x20] sm:$0xff] }
0x3912   :  { %15235 = vmatpush3.xpose.msk.msra.mxu1 %vm849_vm2, %v10375_v21  ;;  %15241 = vmatprep.mubr.msk.f32.mxu0 %vm17153_vm6, %v17152_v7 }
0x3913   :  { %15236 = vmatprep.mubr.msk.f32.mxu1 %vm17153_vm6, %v17152_v7  ;;  %15249 = vmatprep.subr.mxu0 %v17152_v7 }
0x3914   :  { %15242 = vmatmul.mubr.msk.f32.vlgmr.msra.gmra.mrb[108].mxu0 %vm849_vm2, %v10451_v55  ;;  %15244 = vmatprep.subr.mxu1 %v17152_v7  ;;  %v13748_v55 = vld [vmem:[%s19556_s14 + $0x28] sm:$0xff] }
0x3915   :  { %15237 = vmatmul.mubr.msk.f32.vlgmr.msra.gmra.mrb[122].mxu1 %vm849_vm2, %v10373_v31  ;;  %15251 = vmatprep.mubr.msk.f32.mxu0 %vm17153_vm6, %v17152_v7  ;;  %v15975_v31 = vpack.c.bf16 %v13748_v55, %v13747_v6 }
0x3916   :  { %15246 = vmatprep.mubr.msk.f32.mxu1 %vm17153_vm6, %v17152_v7 }
0x39e3   :  { %v19064_v14 = vpop.f32.mrb[106].mxu0 }
0x39e4   :  { %v10288_v19 = vpop.f32.mrb[120].mxu1  ;;  %v15233_v20 = vpop.f32.mrb[107].mxu0 }
0x39e5   :  { %v15228_v52 = vpop.f32.mrb[121].mxu1 }
0x39e7   :  { %v10524_v18 = vpop.f32.mrb[108].mxu0 }
0x39e8   :  { %v10529_v2 = vmul.f32 0.35355338, %v10524_v18  ;;  %v10446_v62 = vpop.f32.mrb[122].mxu1  ;;  %v15243_v40 = vpop.f32.mrb[109].mxu0  ;;  %v13794_v18 = vld [vmem:[%s19558_s20 + $0x20] sm:$0xff] }
0x39e9   :  { %v10528_v59 = vmul.f32 0.35355338, %v10446_v62  ;;  %v15238_v32 = vpop.f32.mrb[123].mxu1 }
0x39ea   :  { %v10533_v58 = vsel %vm849_vm2, %v10529_v2, -inf }
0x39eb   :  { %10534 = vmax.xlane.f32.xlu1 %v10533_v58  ;;  %v10530_v53 = vsel %vm849_vm2, %v10528_v59, -inf }
0x39ec   :  { %10531 = vmax.xlane.f32.xlu0 %v10530_v53 }
0x39fc   :  { %10624 = vrot.lane.b32.xlu1 %v18941_v33, %s17149_s28 }
0x3a02   :  { %10548 = vrot.lane.b32.xlu0 %v18944_v42, %s17149_s28 }
0x3a20   :  { %9880 = vadd.xlane.f32.xlu1 %v9879_v5 }
0x3a21   :  { %9877 = vadd.xlane.f32.xlu0 %v9876_v43 }
0x3a25   :  { %10211 = vadd.xlane.f32.xlu0 %v10210_v23 }
0x3a29   :  { %10214 = vadd.xlane.f32.xlu0 %v10213_v38 }
0x3a78   :  { %v10535_v29 = vpop.xlane.xlu1 %10534 }
0x3a79   :  { %v10537_v24 = vsub.f32 %v10529_v2, %v10535_v29  ;;  %v10532_v33 = vpop.xlane.xlu0 %10531  ;;  %v13795_v2 = vld [vmem:[%s19558_s20 + $0x28] sm:$0xff] }
0x3a7a   :  { %v10536_v48 = vsub.f32 %v10528_v59, %v10532_v33 }
0x3a7b   :  { %v10540_v41 = vmul.f32 1.442695, %v10537_v24 }
0x3a7c   :  { %v10538_v42 = vmul.f32 1.442695, %v10536_v48  ;;  %v10625_v10 = vpop.permute.xlu1 %10624 }
0x3a7d   :  { %16723 = vpow2.f32 %v10540_v41  ;;  %v10549_v51 = vpop.permute.xlu0 %10548  ;;  %15250 = vmatpush3.msra.mxu0 %v10625_v10 }
0x3a7e   :  { %16725 = vpow2.f32 %v10538_v42  ;;  %15245 = vmatpush3.msra.mxu1 %v10549_v51 }
0x3a7f   :  { %15976 = vmatprep.subr.bf16.mxu1 %v15975_v31 }
0x3a87   :  { %v16724_v50 = vpop.eup %16723 }
0x3a88   :  { %v16726_v17 = vpop.eup %16725  ;;  %15252 = vmatmul.mubr.msk.f32.vlgmr.msra.gmra.mrb[110].mxu0 %vm849_vm2, %v16724_v50  ;;  %v10545_v13 = vsel %vm849_vm2, %v16724_v50, 0.0  ;;  %v13796_v50 = vld [vmem:[%s19558_s20 + $0x30] sm:$0xff] }
0x3a89   :  { %15247 = vmatmul.mubr.msk.f32.vlgmr.msra.gmra.mrb[124].mxu1 %vm849_vm2, %v16726_v17  ;;  %10546 = vadd.xlane.f32.xlu0 %v10545_v13  ;;  %v10542_v8 = vsel %vm849_vm2, %v16726_v17, 0.0  ;;  %v13797_v17 = vld [vmem:[%s19558_s20 + $0x38] sm:$0xff] }
0x3a8a   :  { %10543 = vadd.xlane.f32.xlu1 %v10542_v8  ;;  %15978 = vmatpush3.bf16.msra.mxu1 %v15975_v31 }
0x3a8d   :  { %9554 = vadd.xlane.f32.xlu0 %v9553_v35 }
0x3a8e   :  { %9551 = vadd.xlane.f32.xlu1 %v9550_v54 }
0x3aad   :  { %v9881_v44 = vpop.xlane.xlu1 %9880 }
0x3aae   :  { %16727 = vrcp.f32 %v9881_v44  ;;  %v9878_v12 = vpop.xlane.xlu0 %9877 }
0x3aaf   :  { %16729 = vrcp.f32 %v9878_v12 }
0x3ab2   :  { %v10212_v37 = vpop.xlane.xlu0 %10211 }
0x3ab3   :  { %16731 = vrcp.f32 %v10212_v37 }
0x3ab6   :  { %v10215_v57 = vpop.xlane.xlu0 %10214 }
0x3ab7   :  { %16733 = vrcp.f32 %v10215_v57  ;;  %v15995_v57 = vpack.c.bf16 %v13797_v17, %v13796_v50 }
0x3ab8   :  { %v16728_v36 = vpop.eup %16727 }
0x3ab9   :  { %v16730_v25 = vpop.eup %16729  ;;  %v10039_v30 = vmul.f32 %v16728_v36, %v19034_v11  ;;  %v13749_v11 = vld [vmem:[%s19556_s14 + $0x30] sm:$0xff] }
0x3aba   :  { %v10038_v34 = vmul.f32 %v16730_v25, %v19036_v1  ;;  %v13750_v1 = vld [vmem:[%s19556_s14 + $0x38] sm:$0xff] }
0x3abb   :  { %10708 = vrot.lane.b32.xlu0 %v10039_v30, %s17150_s27  ;;  %v15979_v20 = vpack.c.bf16 %v13750_v1, %v13749_v11 }
0x3abc   :  { %10706 = vrot.lane.b32.xlu1 %v10038_v34, %s17150_s27 }
0x3abd   :  { %v16732_v22 = vpop.eup %16731  ;;  %15980 = vmatprep.subr.bf16.mxu1 %v15979_v20 }
0x3abe   :  { %v10370_v26 = vmul.f32 %v16732_v22, %v10288_v19  ;;  %15982 = vmatpush3.bf16.msra.mxu1 %v15979_v20 }
0x3ac0   :  { %10714 = vrot.lane.b32.xlu1 %v10370_v26, %s19571_s9  ;;  %v13812_v26 = vld [vmem:[%s19563_s30 + $0x1] ss:$0 sm:$0xff] }
0x3ac1   :  { %v16734_v21 = vpop.eup %16733 }
0x3ac2   :  { %v10371_v15 = vmul.f32 %v16734_v21, %v19064_v14  ;;  %v15991_v14 = vpack.c.bf16 %v13795_v2, %v13794_v18 }
0x3ac4   :  { %10716 = vrot.lane.b32.xlu1 %v10371_v15, %s19571_s9  ;;  %15992 = vmatprep.subr.bf16.mxu1 %v15991_v14 }
0x3b16   :  { %v10547_v19 = vpop.xlane.xlu0 %10546 }
0x3b17   :  { %v10544_v52 = vpop.xlane.xlu1 %10543  ;;  %16735 = vrcp.f32 %v10547_v19 }
0x3b18   :  { %16737 = vrcp.f32 %v10544_v52 }
0x3b1a   :  { %v9555_v38 = vpop.xlane.xlu0 %9554 }
0x3b1b   :  { %v9552_v23 = vpop.xlane.xlu1 %9551 }
0x3b1c   :  { %16739 = vrcp.f32 %v9552_v23  ;;  %v13789_v23 = vld [vmem:[%s19559_s2 + $0x20] sm:$0xff] }
0x3b1d   :  { %16741 = vrcp.f32 %v9555_v38  ;;  %v13790_v38 = vld [vmem:[%s19559_s2 + $0x28] sm:$0xff] }
0x3b21   :  { %v16736_v62 = vpop.eup %16735 }
0x3b22   :  { %v16738_v59 = vpop.eup %16737 }
0x3b26   :  { %v16740_v33 = vpop.eup %16739 }
0x3b27   :  { %v16742_v48 = vpop.eup %16741  ;;  %v9704_v10 = vmul.f32 %v16740_v33, %v18994_v60  ;;  %v13792_v33 = vld [vmem:[%s19559_s2 + $0x38] sm:$0xff] }
0x3b28   :  { %v9705_v51 = vmul.f32 %v16742_v48, %v18992_v39  ;;  %v13782_v39 = vld [vmem:[%s19557_s19 + $0x1] ss:$0 sm:$0xff] }
0x3b2d   :  { %v10709_v42 = vpop.permute.xlu0 %10708 }
0x3b2e   :  { %v10707_v29 = vpop.permute.xlu1 %10706  ;;  %v10729_v35 = vsel %vm849_vm2, %v9705_v51, %v10709_v42  ;;  %v13800_v42 = vld [vmem:[%s19560_s12 + $0x28] sm:$0xff] }
0x3b2f   :  { %v10728_v13 = vsel %vm849_vm2, %v9704_v10, %v10707_v29  ;;  %v15983_v29 = vpack.c.bf16 %v13790_v38, %v13789_v23 }
0x3b31   :  { %15984 = vmatprep.subr.bf16.mxu0 %v15983_v29 }
0x3b32   :  { %v10715_v24 = vpop.permute.xlu1 %10714  ;;  %15986 = vmatpush3.bf16.msra.mxu0 %v15983_v29 }
0x3b33   :  { %v10730_v54 = vsel %vm1026_vm4, %v10728_v13, %v10715_v24  ;;  %v13791_v24 = vld [vmem:[%s19559_s2 + $0x30] sm:$0xff] }
0x3b34   :  { %v15987_v48 = vpack.c.bf16 %v13792_v33, %v13791_v24 }
0x3b36   :  { %v10717_v41 = vpop.permute.xlu1 %10716  ;;  %15988 = vmatprep.subr.bf16.mxu0 %v15987_v48 }
0x3b37   :  { %v10731_v12 = vsel %vm1026_vm4, %v10729_v35, %v10717_v41  ;;  %v13799_v41 = vld [vmem:[%s19560_s12 + $0x20] sm:$0xff]  ;;  %15990 = vmatpush3.bf16.msra.mxu0 %v15987_v48 }
0x3b38   :  { %v15999_v10 = vpack.c.bf16 %v13800_v42, %v13799_v41 }
0x3b3a   :  { %16000 = vmatprep.subr.bf16.mxu0 %v15999_v10 }
0x3b5b   :  { %v10696_v40 = vpop.f32.mrb[110].mxu0 }
0x3b5c   :  { %v10703_v32 = vmul.f32 %v16736_v62, %v10696_v40  ;;  %v10620_v58 = vpop.f32.mrb[124].mxu1  ;;  %v15253_v53 = vpop.f32.mrb[111].mxu0 }
0x3b5d   :  { %v10702_v5 = vmul.f32 %v16738_v59, %v10620_v58  ;;  %v15248_v43 = vpop.f32.mrb[125].mxu1 }
0x3b5e   :  { %10724 = vrot.lane.b32.xlu1 %v10703_v32, %s19572_s16 }
0x3b5f   :  { %10722 = vrot.lane.b32.xlu0 %v10702_v5, %s19572_s16 }
0x3bd0   :  { %v10725_v8 = vpop.permute.xlu1 %10724 }
0x3bd1   :  { %v10723_v44 = vpop.permute.xlu0 %10722  ;;  %v10733_v60 = vsel %vm2505_vm5, %v10731_v12, %v10725_v8 }
0x3bd2   :  { %v10732_v37 = vsel %vm2505_vm5, %v10730_v54, %v10723_v44  ;;  %v13787_v44 = vld [vmem:[%s19561_s25 + $0x1] ss:$0 sm:$0xff] }
0x3bd3   :  { %15262 = vmatprep.mubr.msk.f32.mxu1 %vm642_vm1, %v10732_v37  ;;  %v13788_v37 = vld [vmem:[%s19562_s23 + $0x1] ss:$0 sm:$0xff] }
0x3bd4   :  { %15263 = vmatmul.mubr.msk.f32.vlgmr.msra.gmra.mrb[126].mxu1 %vm642_vm1, %v10733_v60 }
0x3bd5   :  { %15994 = vmatpush3.bf16.msra.mxu1 %v15991_v14  ;;  %15284 = vmatprep.mubr.msk.f32.mxu1 %vm642_vm1, %v18606_v49 }
0x3bd6   :  { %15996 = vmatprep.subr.bf16.mxu1 %v15995_v57 }
0x3bd9   :  { %15998 = vmatpush3.bf16.msra.mxu1 %v15995_v57 }
0x3bda   :  { %16007 = vmatprep.subr.bf16.mxu1 %v17142_v0 }
0x3bdc   :  { %15285 = vmatmul.mubr.msk.f32.vlgmr.msra.gmra.mrb[128].mxu1 %vm642_vm1, %v18610_v47 }
0x3bdd   :  { %15287 = vmatprep.mubr.msk.f32.mxu1 %vm642_vm1, %v18622_v28 }
0x3be0   :  { %15288 = vmatmul.mubr.msk.f32.gmra.mrb[130].mxu1 %vm642_vm1, %v18626_v9 }
0x3be1   :  { %15308 = vmatprep.mubr.msk.f32.mxu1 %vm17153_vm6, %v17152_v7 }
0x3ca7   :  { %v15264_v36 = vpop.f32.mrb[126].mxu1 }
0x3ca8   :  { %v10818_v49 = vadd.f32 %v15264_v36, %v13782_v39  ;;  %v10812_v25 = vpop.f32.mrb[127].mxu1 }
0x3ca9   :  { %v10813_v30 = vadd.f32 %v13782_v39, %v10812_v25 }
0x3caa   :  { %v10822_v34 = vadd.f32 %v10818_v49, %v18899_v61 }
0x3cab   :  { %v10821_v22 = vadd.f32 %v10813_v30, %v18901_v27  ;;  %v13801_v30 = vld [vmem:[%s19560_s12 + $0x30] sm:$0xff] }
0x3cac   :  { %v10830_v47 = vsel %vm642_vm1, %v10822_v34, 0.0 }
0x3cad   :  { %10831 = vadd.xlane.f32.xlu1 %v10830_v47  ;;  %v10827_v28 = vsel %vm642_vm1, %v10821_v22, 0.0 }
0x3cae   :  { %10828 = vadd.xlane.f32.xlu0 %v10827_v28 }
0x3caf   :  { %v15286_v9 = vpop.f32.mrb[128].mxu1 }
0x3cb0   :  { %v11064_v21 = vadd.f32 %v15286_v9, %v13812_v26  ;;  %v11058_v15 = vpop.f32.mrb[129].mxu1 }
0x3cb1   :  { %v11059_v6 = vadd.f32 %v13812_v26, %v11058_v15 }
0x3cb3   :  { %v16008_v55 = vpack.c.bf16 %v11064_v21, %v11059_v6  ;;  %v15289_v11 = vpop.f32.mrb[130].mxu1  ;;  %v19130_v31 = vpack.i.bf16 %v11064_v21, %v11059_v6 }
0x3cb4   :  { %v19132_v1 = vadd.f32 %v15289_v11, %v13812_v26  ;;  %v11068_v20 = vpop.f32.mrb[131].mxu1 }
0x3cb5   :  { %v19134_v19 = vadd.f32 %v13812_v26, %v11068_v20  ;;  %16010 = vmatpush3.bf16.xpose.msk.msra.mxu1 %vm17623_vm3, %v16008_v55 }
0x3cb6   :  { %16015 = vmatprep.subr.bf16.mxu1 %v17142_v0 }
0x3cb7   :  { %v16012_v52 = vpack.c.bf16 %v19132_v1, %v19134_v19  ;;  %v19143_v18 = vpack.i.bf16 %v19132_v1, %v19134_v19 }
0x3cbe   :  { %16416 = vrot.lane.b32.xlu1 %v19130_v31, %s17145_s29 }
0x3d3a   :  { %v10832_v2 = vpop.xlane.xlu1 %10831 }
0x3d3b   :  { %v10834_v14 = vmul.f32 0.03125, %v10832_v2  ;;  %v10829_v62 = vpop.xlane.xlu0 %10828 }
0x3d3c   :  { %v10833_v40 = vmul.f32 0.03125, %v10829_v62 }
0x3d3d   :  { %v10836_v59 = vsub.f32 %v10822_v34, %v10834_v14  ;;  %v13802_v34 = vld [vmem:[%s19560_s12 + $0x38] sm:$0xff] }
0x3d3e   :  { %v10835_v32 = vsub.f32 %v10821_v22, %v10833_v40  ;;  %v16003_v26 = vpack.c.bf16 %v13802_v34, %v13801_v30 }
0x3d3f   :  { %v10838_v5 = vmul.f32 %v10836_v59, %v10836_v59 }
0x3d40   :  { %v10837_v58 = vmul.f32 %v10835_v32, %v10835_v32 }
0x3d41   :  { %v10842_v43 = vsel %vm642_vm1, %v10838_v5, 0.0 }
0x3d42   :  { %v10839_v53 = vsel %vm642_vm1, %v10837_v58, 0.0 }
0x3d43   :  { %10840 = vadd.xlane.f32.xlu0 %v10839_v53 }
0x3d47   :  { %10843 = vadd.xlane.f32.xlu0 %v10842_v43  ;;  %v16417_v43 = vpop.permute.xlu1 %16416 }
0x3dd0   :  { %v10841_v51 = vpop.xlane.xlu0 %10840 }
0x3dd1   :  { %v10845_v50 = vmul.f32 0.03125, %v10841_v51 }
0x3dd3   :  { %v10847_v17 = vadd.f32 1e-05, %v10845_v50 }
0x3dd4   :  { %v10844_v13 = vpop.xlane.xlu0 %10843 }
0x3dd5   :  { %16743 = vrsqrt.f32 %v10847_v17  ;;  %v10846_v8 = vmul.f32 0.03125, %v10844_v13  ;;  %v16419_v17 = vunpack.i.h.bf16 %v16417_v43  ;;  %v16418_v13 = vunpack.i.l.bf16 %v16417_v43 }
0x3dd7   :  { %v10848_v35 = vadd.f32 1e-05, %v10846_v8 }
0x3dd9   :  { %16745 = vrsqrt.f32 %v10848_v35 }
0x3ddf   :  { %v16744_v54 = vpop.eup %16743 }
0x3de0   :  { %v10851_v12 = vmul.f32 %v16744_v54, %v10835_v32 }
0x3de2   :  { %v10859_v57 = vmul.f32 %v13787_v44, %v10851_v12 }
0x3de3   :  { %v16746_v60 = vpop.eup %16745 }
0x3de4   :  { %v10852_v39 = vmul.f32 %v16746_v60, %v10836_v59  ;;  %v19157_v36 = vadd.f32 %v13788_v37, %v10859_v57 }
0x3de6   :  { %v10860_v49 = vmul.f32 %v13787_v44, %v10852_v39  ;;  %v10869_v25 = vadd.f32 %v18906_v63, %v19157_v36  ;;  %v16022_v44 = vpack.c.bf16 %v16419_v17, %v16418_v13 }
0x3de8   :  { %v19163_v22 = vadd.f32 %v13788_v37, %v10860_v49  ;;  %15273 = vmatprep.mubr.msk.f32.mxu0 %vm642_vm1, %v10869_v25 }
0x3dea   :  { %v10870_v47 = vadd.f32 %v18911_v16, %v19163_v22 }
0x3dec   :  { %15274 = vmatmul.mubr.msk.f32.vlgmr.msra.gmra.mrb[112].mxu0 %vm642_vm1, %v10870_v47 }
0x3ded   :  { %16002 = vmatpush3.bf16.msra.mxu0 %v15999_v10  ;;  %15298 = vmatprep.mubr.msk.f32.mxu0 %vm642_vm1, %v18602_v46  ;;  %v13809_v46 = vld [vmem:[%s19564_s7 + $0x1] ss:$0 sm:$0xff] }
0x3dee   :  { %16004 = vmatprep.subr.bf16.mxu0 %v16003_v26 }
0x3df1   :  { %16006 = vmatpush3.bf16.msra.mxu0 %v16003_v26 }
0x3df2   :  { %16011 = vmatprep.subr.bf16.mxu0 %v17142_v0 }
0x3df4   :  { %15299 = vmatmul.mubr.msk.f32.vlgmr.msra.gmra.mrb[114].mxu0 %vm642_vm1, %v18599_v3 }
0x3df5   :  { %15301 = vmatprep.mubr.msk.f32.mxu0 %vm642_vm1, %v18616_v56 }
0x3df8   :  { %15302 = vmatmul.mubr.msk.f32.gmra.mrb[116].mxu0 %vm642_vm1, %v18612_v45  ;;  %v13817_v45 = vld [vmem:[%s19565_s10 + $0x1] ss:$0 sm:$0xff] }
0x3df9   :  { %15315 = vmatprep.mubr.msk.f32.mxu0 %vm17153_vm6, %v17152_v7 }
0x3dfa   :  { %16014 = vmatpush3.bf16.xpose.msk.msra.mxu0 %vm17623_vm3, %v16012_v52 }
0x3dfb   :  { %16018 = vmatprep.subr.bf16.mxu0 %v17142_v0 }
0x3ebf   :  { %v15275_v63 = vpop.f32.mrb[112].mxu0 }
0x3ec0   :  { %v19187_v3 = vadd.f32 %v15275_v63, %v13809_v46  ;;  %v10977_v16 = vpop.f32.mrb[113].mxu0 }
0x3ec1   :  { %v19189_v56 = vadd.f32 %v13809_v46, %v10977_v16 }
0x3ec2   :  { %15316 = vmatmul.mubr.msk.f32.vlgmr.msra.gmra.mrb[118].mxu0 %vm849_vm2, %v19187_v3 }
0x3ec3   :  { %15309 = vmatmul.mubr.msk.f32.vlgmr.msra.gmra.mrb[132].mxu1 %vm849_vm2, %v19189_v56  ;;  %15329 = vmatprep.mubr.msk.f32.mxu0 %vm17153_vm6, %v17152_v7 }
0x3ec4   :  { %15322 = vmatprep.mubr.msk.f32.mxu1 %vm17153_vm6, %v17152_v7 }
0x3ec7   :  { %v15300_v28 = vpop.f32.mrb[114].mxu0 }
0x3ec8   :  { %v11155_v9 = vadd.f32 %v15300_v28, %v13817_v45  ;;  %v11149_v21 = vpop.f32.mrb[115].mxu0 }
0x3ec9   :  { %v11150_v15 = vadd.f32 %v13817_v45, %v11149_v21 }
0x3ecb   :  { %v15303_v6 = vpop.f32.mrb[116].mxu0  ;;  %v16016_v55 = vpack.c.bf16 %v11155_v9, %v11150_v15  ;;  %v19200_v11 = vpack.i.bf16 %v11155_v9, %v11150_v15 }
0x3ecc   :  { %v11165_v1 = vadd.f32 %v15303_v6, %v13817_v45  ;;  %v11159_v20 = vpop.f32.mrb[117].mxu0 }
0x3ecd   :  { %v11160_v19 = vadd.f32 %v13817_v45, %v11159_v20  ;;  %16017 = vmatpush3.bf16.msra.mxu1 %v16016_v55 }
0x3ece   :  { %16021 = vmatprep.subr.bf16.mxu1 %v17142_v0 }
0x3ecf   :  { %v16019_v52 = vpack.c.bf16 %v11165_v1, %v11160_v19  ;;  %v19203_v2 = vpack.i.bf16 %v11165_v1, %v11160_v19 }
0x3ed1   :  { %16020 = vmatpush3.bf16.msra.mxu0 %v16019_v52 }
0x3ed2   :  { %16025 = vmatprep.subr.bf16.mxu0 %v17142_v0 }
0x3f95   :  { %v11322_v14 = vpop.f32.mrb[118].mxu0 }
0x3f96   :  { %v11327_v62 = vmul.f32 0.35355338, %v11322_v14  ;;  %v11243_v40 = vpop.f32.mrb[132].mxu1  ;;  %v15317_v59 = vpop.f32.mrb[119].mxu0 }
0x3f97   :  { %v11326_v32 = vmul.f32 0.35355338, %v11243_v40  ;;  %v15310_v58 = vpop.f32.mrb[133].mxu1 }
0x3f98   :  { %v11331_v53 = vsel %vm1026_vm4, %v11327_v62, -inf }
0x3f99   :  { %11332 = vmax.xlane.f32.xlu0 %v11331_v53  ;;  %v11328_v5 = vsel %vm1026_vm4, %v11326_v32, -inf }
0x3f9a   :  { %11329 = vmax.xlane.f32.xlu1 %v11328_v5 }
0x3fab   :  { %11496 = vrot.lane.b32.xlu1 %v19189_v56, %s17145_s29 }
0x3faf   :  { %16421 = vrot.lane.b32.xlu0 %v19143_v18, %s17145_s29  ;;  %11578 = vrot.lane.b32.xlu1 %v19187_v3, %s17145_s29 }
0x3fb3   :  { %16426 = vrot.lane.b32.xlu0 %v19200_v11, %s17145_s29  ;;  %16431 = vrot.lane.b32.xlu1 %v19203_v2, %s17145_s29  ;;  %s19574_s29 = sld [smem:[#allocation61_spill]] }
0x4026   :  { %v11333_v23 = vpop.xlane.xlu0 %11332 }
0x4027   :  { %v11335_v38 = vsub.f32 %v11327_v62, %v11333_v23  ;;  %v11330_v29 = vpop.xlane.xlu1 %11329 }
0x4028   :  { %v11334_v24 = vsub.f32 %v11326_v32, %v11330_v29 }
0x4029   :  { %v11338_v33 = vmul.f32 1.442695, %v11335_v38 }
0x402a   :  { %v11336_v48 = vmul.f32 1.442695, %v11334_v24  ;;  %v16422_v42 = vpop.permute.xlu0 %16421 }
0x402b   :  { %16747 = vpow2.f32 %v11338_v33  ;;  %v11497_v41 = vpop.permute.xlu1 %11496  ;;  %v16424_v51 = vunpack.i.h.bf16 %v16422_v42  ;;  %v16423_v50 = vunpack.i.l.bf16 %v16422_v42 }
0x402c   :  { %16749 = vpow2.f32 %v11336_v48 }
0x402d   :  { %v16026_v35 = vpack.c.bf16 %v16424_v51, %v16423_v50 }
0x402e   :  { %v16427_v37 = vpop.permute.xlu0 %16426 }
0x402f   :  { %v11579_v10 = vpop.permute.xlu1 %11578  ;;  %v16429_v39 = vunpack.i.h.bf16 %v16427_v37  ;;  %v16428_v49 = vunpack.i.l.bf16 %v16427_v37 }
0x4031   :  { %v16030_v30 = vpack.c.bf16 %v16429_v39, %v16428_v49 }
0x4033   :  { %v16432_v12 = vpop.permute.xlu1 %16431 }
0x4034   :  { %v16434_v57 = vunpack.i.h.bf16 %v16432_v12  ;;  %v16433_v60 = vunpack.i.l.bf16 %v16432_v12 }
0x4035   :  { %v19218_v8 = vpop.eup %16747 }
0x4036   :  { %v19220_v54 = vpop.eup %16749  ;;  %15330 = vmatmul.mubr.msk.f32.vlgmr.msra.gmra.mrb[120].mxu0 %vm1026_vm4, %v19218_v8  ;;  %v16033_v25 = vpack.c.bf16 %v16434_v57, %v16433_v60 }
0x4037   :  { %16028 = vmatpush3.bf16.xpose.msk.msra.mxu0 %vm17623_vm3, %v16026_v35  ;;  %15323 = vmatmul.mubr.msk.f32.vlgmr.msra.gmra.mrb[134].mxu1 %vm1026_vm4, %v19220_v54 }
0x4038   :  { %16024 = vmatpush3.bf16.xpose.msk.msra.mxu1 %vm17623_vm3, %v16022_v44  ;;  %15343 = vmatprep.mubr.msk.f32.mxu0 %vm17153_vm6, %v17152_v7 }
0x4039   :  { %15336 = vmatprep.mubr.msk.f32.mxu1 %vm17153_vm6, %v17152_v7  ;;  %16032 = vmatprep.subr.bf16.mxu0 %v17142_v0 }
0x403a   :  { %16029 = vmatprep.subr.bf16.mxu1 %v17142_v0 }
0x403e   :  { %15344 = vmatmul.mubr.msk.f32.vlgmr.msra.gmra.mrb[122].mxu0 %vm849_vm2, %v11579_v10 }
0x403f   :  { %15337 = vmatmul.mubr.msk.f32.vlgmr.msra.gmra.mrb[136].mxu1 %vm849_vm2, %v11497_v41  ;;  %16034 = vmatpush3.bf16.msra.mxu0 %v16033_v25 }
0x4040   :  { %16031 = vmatpush3.bf16.msra.mxu1 %v16030_v30  ;;  %15357 = vmatprep.mubr.msk.f32.mxu0 %vm17153_vm6, %v17152_v7 }
0x4041   :  { %16039 = vmatprep.subr.bf16.mxu0 %v17142_v0  ;;  %15350 = vmatprep.mubr.msk.f32.mxu1 %vm17153_vm6, %v17152_v7 }
0x4042   :  { %16035 = vmatprep.subr.bf16.mxu1 %v17142_v0 }
0x4109   :  { %v19244_v34 = vpop.f32.mrb[120].mxu0 }
0x410a   :  { %v19246_v47 = vpop.f32.mrb[134].mxu1  ;;  %v15331_v26 = vpop.f32.mrb[121].mxu0 }
0x410b   :  { %v15324_v46 = vpop.f32.mrb[135].mxu1 }
0x4111   :  { %v11656_v63 = vpop.f32.mrb[122].mxu0 }
0x4112   :  { %v11661_v16 = vmul.f32 0.35355338, %v11656_v63  ;;  %v11574_v45 = vpop.f32.mrb[136].mxu1  ;;  %v15345_v28 = vpop.f32.mrb[123].mxu0 }
0x4113   :  { %v11660_v9 = vmul.f32 0.35355338, %v11574_v45  ;;  %v15338_v21 = vpop.f32.mrb[137].mxu1 }
0x4114   :  { %v11665_v15 = vsel %vm1026_vm4, %v11661_v16, -inf }
0x4115   :  { %11666 = vmax.xlane.f32.xlu1 %v11665_v15  ;;  %v11662_v6 = vsel %vm1026_vm4, %v11660_v9, -inf }
0x4116   :  { %11663 = vmax.xlane.f32.xlu0 %v11662_v6 }
0x4126   :  { %16441 = vrot.lane.b32.xlu1 %v19143_v18, %s17147_s22 }
0x412a   :  { %11928 = vrot.lane.b32.xlu1 %v19187_v3, %s17147_s22 }
0x412c   :  { %16436 = vrot.lane.b32.xlu0 %v19130_v31, %s17147_s22 }
0x412e   :  { %16451 = vrot.lane.b32.xlu1 %v19203_v2, %s17147_s22 }
0x4130   :  { %11846 = vrot.lane.b32.xlu0 %v19189_v56, %s17147_s22 }
0x4134   :  { %16446 = vrot.lane.b32.xlu0 %v19200_v11, %s17147_s22 }
0x41a2   :  { %v11667_v55 = vpop.xlane.xlu1 %11666 }
0x41a3   :  { %v11669_v1 = vsub.f32 %v11661_v16, %v11667_v55  ;;  %v11664_v20 = vpop.xlane.xlu0 %11663 }
0x41a4   :  { %v11668_v19 = vsub.f32 %v11660_v9, %v11664_v20 }
0x41a5   :  { %v11672_v52 = vmul.f32 1.442695, %v11669_v1 }
0x41a6   :  { %v11670_v14 = vmul.f32 1.442695, %v11668_v19  ;;  %v16442_v62 = vpop.permute.xlu1 %16441 }
0x41a7   :  { %16751 = vpow2.f32 %v11672_v52  ;;  %v16437_v40 = vpop.permute.xlu0 %16436  ;;  %v16444_v32 = vunpack.i.h.bf16 %v16442_v62  ;;  %v16443_v58 = vunpack.i.l.bf16 %v16442_v62 }
0x41a8   :  { %16753 = vpow2.f32 %v11670_v14  ;;  %v16439_v5 = vunpack.i.h.bf16 %v16437_v40  ;;  %v16438_v43 = vunpack.i.l.bf16 %v16437_v40 }
0x41a9   :  { %v16040_v38 = vpack.c.bf16 %v16444_v32, %v16443_v58 }
0x41aa   :  { %v11929_v59 = vpop.permute.xlu1 %11928  ;;  %v16036_v24 = vpack.c.bf16 %v16439_v5, %v16438_v43 }
0x41ab   :  { %v11847_v53 = vpop.permute.xlu0 %11846 }
0x41ae   :  { %v16452_v33 = vpop.permute.xlu1 %16451 }
0x41af   :  { %v16447_v48 = vpop.permute.xlu0 %16446  ;;  %v16454_v41 = vunpack.i.h.bf16 %v16452_v33  ;;  %v16453_v42 = vunpack.i.l.bf16 %v16452_v33 }
0x41b0   :  { %v16449_v10 = vunpack.i.h.bf16 %v16447_v48  ;;  %v16448_v51 = vunpack.i.l.bf16 %v16447_v48 }
0x41b1   :  { %v19262_v23 = vpop.eup %16751  ;;  %v16047_v50 = vpack.c.bf16 %v16454_v41, %v16453_v42 }
0x41b2   :  { %v19264_v29 = vpop.eup %16753  ;;  %15358 = vmatmul.mubr.msk.f32.vlgmr.msra.gmra.mrb[124].mxu0 %vm1026_vm4, %v19262_v23  ;;  %v16044_v17 = vpack.c.bf16 %v16449_v10, %v16448_v51 }
0x41b3   :  { %16042 = vmatpush3.bf16.xpose.msk.msra.mxu0 %vm17623_vm3, %v16040_v38  ;;  %15351 = vmatmul.mubr.msk.f32.vlgmr.msra.gmra.mrb[138].mxu1 %vm1026_vm4, %v19264_v29 }
0x41b4   :  { %16038 = vmatpush3.bf16.xpose.msk.msra.mxu1 %vm17623_vm3, %v16036_v24  ;;  %15371 = vmatprep.mubr.msk.f32.mxu0 %vm17153_vm6, %v17152_v7  ;;  %v11674_v24 = vsel %vm1026_vm4, %v19264_v29, 0.0 }
0x41b5   :  { %15364 = vmatprep.mubr.msk.f32.mxu1 %vm17153_vm6, %v17152_v7  ;;  %16046 = vmatprep.subr.bf16.mxu0 %v17142_v0 }
0x41b6   :  { %16043 = vmatprep.subr.bf16.mxu1 %v17142_v0 }
0x41ba   :  { %15372 = vmatmul.mubr.msk.f32.vlgmr.msra.gmra.mrb[126].mxu0 %vm849_vm2, %v11929_v59 }
0x41bb   :  { %15365 = vmatmul.mubr.msk.f32.vlgmr.msra.gmra.mrb[140].mxu1 %vm849_vm2, %v11847_v53  ;;  %16048 = vmatpush3.bf16.msra.mxu0 %v16047_v50 }
0x41bc   :  { %16045 = vmatpush3.bf16.msra.mxu1 %v16044_v17  ;;  %15385 = vmatprep.mubr.msk.f32.mxu0 %vm17153_vm6, %v17152_v7 }
0x41bd   :  { %16053 = vmatprep.subr.bf16.mxu0 %v17142_v0  ;;  %15378 = vmatprep.mubr.msk.f32.mxu1 %vm17153_vm6, %v17152_v7 }
0x41be   :  { %16049 = vmatprep.subr.bf16.mxu1 %v17142_v0 }
0x4285   :  { %v19288_v13 = vpop.f32.mrb[124].mxu0 }
0x4286   :  { %v19290_v35 = vpop.f32.mrb[138].mxu1  ;;  %v15359_v44 = vpop.f32.mrb[125].mxu0 }
0x4287   :  { %v15352_v12 = vpop.f32.mrb[139].mxu1 }
0x428d   :  { %v12006_v37 = vpop.f32.mrb[126].mxu0 }
0x428e   :  { %v12011_v57 = vmul.f32 0.35355338, %v12006_v37  ;;  %v11924_v60 = vpop.f32.mrb[140].mxu1  ;;  %v15373_v39 = vpop.f32.mrb[127].mxu0 }
0x428f   :  { %v12010_v49 = vmul.f32 0.35355338, %v11924_v60  ;;  %v15366_v25 = vpop.f32.mrb[141].mxu1 }
0x4290   :  { %v12015_v30 = vsel %vm1026_vm4, %v12011_v57, -inf }
0x4291   :  { %12016 = vmax.xlane.f32.xlu1 %v12015_v30  ;;  %v12012_v26 = vsel %vm1026_vm4, %v12010_v49, -inf  ;;  %v11343_v30 = vsel %vm1026_vm4, %v19218_v8, 0.0 }
0x4292   :  { %12013 = vmax.xlane.f32.xlu0 %v12012_v26  ;;  %v11340_v26 = vsel %vm1026_vm4, %v19220_v54, 0.0 }
0x42a2   :  { %16461 = vrot.lane.b32.xlu1 %v19143_v18, %s17149_s28 }
0x42a6   :  { %12274 = vrot.lane.b32.xlu1 %v19187_v3, %s17149_s28 }
0x42a8   :  { %16456 = vrot.lane.b32.xlu0 %v19130_v31, %s17149_s28 }
0x42ac   :  { %12192 = vrot.lane.b32.xlu0 %v19189_v56, %s17149_s28 }
0x431e   :  { %v12017_v46 = vpop.xlane.xlu1 %12016 }
0x431f   :  { %v12019_v63 = vsub.f32 %v12011_v57, %v12017_v46  ;;  %v12014_v16 = vpop.xlane.xlu0 %12013 }
0x4320   :  { %v12018_v45 = vsub.f32 %v12010_v49, %v12014_v16 }
0x4321   :  { %v12022_v28 = vmul.f32 1.442695, %v12019_v63 }
0x4322   :  { %v12020_v9 = vmul.f32 1.442695, %v12018_v45  ;;  %v16462_v21 = vpop.permute.xlu1 %16461 }
0x4323   :  { %16755 = vpow2.f32 %v12022_v28  ;;  %v16457_v15 = vpop.permute.xlu0 %16456  ;;  %v16464_v18 = vunpack.i.h.bf16 %v16462_v21  ;;  %v16463_v6 = vunpack.i.l.bf16 %v16462_v21 }
0x4324   :  { %16757 = vpow2.f32 %v12020_v9  ;;  %v16459_v55 = vunpack.i.h.bf16 %v16457_v15  ;;  %v16458_v3 = vunpack.i.l.bf16 %v16457_v15 }
0x4325   :  { %v16054_v20 = vpack.c.bf16 %v16464_v18, %v16463_v6 }
0x4326   :  { %v16050_v19 = vpack.c.bf16 %v16459_v55, %v16458_v3  ;;  %v12275_v56 = vpop.permute.xlu1 %12274  ;;  %v13804_v55 = vld [vmem:[%s19566_s13 + $0x20] sm:$0xff]  ;;  %v13805_v3 = vld [vmem:[%s19566_s13 + $0x28] sm:$0xff] }
0x4327   :  { %v12193_v52 = vpop.permute.xlu0 %12192 }
0x432d   :  { %v16756_v1 = vpop.eup %16755 }
0x432e   :  { %v16758_v31 = vpop.eup %16757  ;;  %15386 = vmatmul.mubr.msk.f32.vlgmr.msra.gmra.mrb[128].mxu0 %vm1026_vm4, %v16756_v1  ;;  %v12027_v48 = vsel %vm1026_vm4, %v16756_v1, 0.0  ;;  %v13807_v1 = vld [vmem:[%s19566_s13 + $0x38] sm:$0xff] }
0x432f   :  { %16056 = vmatpush3.bf16.xpose.msk.msra.mxu0 %vm17623_vm3, %v16054_v20  ;;  %15379 = vmatmul.mubr.msk.f32.vlgmr.msra.gmra.mrb[142].mxu1 %vm1026_vm4, %v16758_v31  ;;  %v12024_v33 = vsel %vm1026_vm4, %v16758_v31, 0.0 }
0x4330   :  { %16052 = vmatpush3.bf16.xpose.msk.msra.mxu1 %vm17623_vm3, %v16050_v19  ;;  %15399 = vmatprep.mubr.msk.f32.mxu0 %vm17153_vm6, %v17152_v7 }
0x4331   :  { %15392 = vmatprep.mubr.msk.f32.mxu1 %vm17153_vm6, %v17152_v7  ;;  %16060 = vmatprep.subr.bf16.mxu0 %v17142_v0 }
0x4332   :  { %16057 = vmatprep.subr.bf16.mxu1 %v17142_v0 }
0x4336   :  { %15400 = vmatmul.mubr.msk.f32.vlgmr.msra.gmra.mrb[130].mxu0 %vm849_vm2, %v12275_v56 }
0x4337   :  { %15393 = vmatmul.mubr.msk.f32.vlgmr.msra.gmra.mrb[144].mxu1 %vm849_vm2, %v12193_v52  ;;  %15413 = vmatprep.mubr.msk.f32.mxu0 %vm17153_vm6, %v17152_v7 }
0x4338   :  { %15406 = vmatprep.mubr.msk.f32.mxu1 %vm17153_vm6, %v17152_v7  ;;  %v11677_v7 = vsel %vm1026_vm4, %v19262_v23, 0.0 }
0x4401   :  { %v19320_v4 = vpop.f32.mrb[128].mxu0 }
0x4402   :  { %v19322_v14 = vpop.f32.mrb[142].mxu1  ;;  %v15387_v62 = vpop.f32.mrb[129].mxu0 }
0x4403   :  { %v15380_v40 = vpop.f32.mrb[143].mxu1 }
0x4409   :  { %v12352_v59 = vpop.f32.mrb[130].mxu0 }
0x440a   :  { %v12357_v0 = vmul.f32 0.35355338, %v12352_v59  ;;  %v12270_v32 = vpop.f32.mrb[144].mxu1  ;;  %v15401_v58 = vpop.f32.mrb[131].mxu0 }
0x440b   :  { %v12356_v53 = vmul.f32 0.35355338, %v12270_v32  ;;  %v15394_v5 = vpop.f32.mrb[145].mxu1 }
0x440c   :  { %v12361_v43 = vsel %vm1026_vm4, %v12357_v0, -inf }
0x440d   :  { %12362 = vmax.xlane.f32.xlu1 %v12361_v43  ;;  %v12358_v38 = vsel %vm1026_vm4, %v12356_v53, -inf }
0x440e   :  { %12359 = vmax.xlane.f32.xlu0 %v12358_v38 }
0x441e   :  { %16471 = vrot.lane.b32.xlu1 %v19203_v2, %s17149_s28 }
0x4424   :  { %16466 = vrot.lane.b32.xlu0 %v19200_v11, %s17149_s28 }
0x4442   :  { %11678 = vadd.xlane.f32.xlu1 %v11677_v7 }
0x4443   :  { %11675 = vadd.xlane.f32.xlu0 %v11674_v24 }
0x4447   :  { %12025 = vadd.xlane.f32.xlu0 %v12024_v33 }
0x444b   :  { %12028 = vadd.xlane.f32.xlu0 %v12027_v48 }
0x449a   :  { %v12363_v41 = vpop.xlane.xlu1 %12362 }
0x449b   :  { %v12365_v42 = vsub.f32 %v12357_v0, %v12363_v41  ;;  %v12360_v2 = vpop.xlane.xlu0 %12359 }
0x449c   :  { %v12364_v10 = vsub.f32 %v12356_v53, %v12360_v2 }
0x449d   :  { %v12368_v51 = vmul.f32 1.442695, %v12365_v42 }
0x449e   :  { %v12366_v11 = vmul.f32 1.442695, %v12364_v10  ;;  %v16472_v50 = vpop.permute.xlu1 %16471 }
0x449f   :  { %16759 = vpow2.f32 %v12368_v51  ;;  %v16474_v23 = vunpack.i.h.bf16 %v16472_v50  ;;  %v16473_v17 = vunpack.i.l.bf16 %v16472_v50  ;;  %v16467_v44 = vpop.permute.xlu0 %16466 }
0x44a0   :  { %16761 = vpow2.f32 %v12366_v11  ;;  %v16469_v29 = vunpack.i.h.bf16 %v16467_v44  ;;  %v16468_v12 = vunpack.i.l.bf16 %v16467_v44 }
0x44a1   :  { %v16061_v37 = vpack.c.bf16 %v16474_v23, %v16473_v17 }
0x44a2   :  { %v16058_v57 = vpack.c.bf16 %v16469_v29, %v16468_v12 }
0x44a3   :  { %16062 = vmatpush3.bf16.msra.mxu0 %v16061_v37 }
0x44a4   :  { %16059 = vmatpush3.bf16.msra.mxu1 %v16058_v57 }
0x44a9   :  { %v16760_v60 = vpop.eup %16759 }
0x44aa   :  { %v16762_v39 = vpop.eup %16761  ;;  %15414 = vmatmul.mubr.msk.f32.vlgmr.msra.gmra.mrb[132].mxu0 %vm1026_vm4, %v16760_v60  ;;  %v12373_v49 = vsel %vm1026_vm4, %v16760_v60, 0.0 }
0x44ab   :  { %12374 = vadd.xlane.f32.xlu0 %v12373_v49  ;;  %15407 = vmatmul.mubr.msk.f32.vlgmr.msra.gmra.mrb[146].mxu1 %vm1026_vm4, %v16762_v39  ;;  %v12370_v25 = vsel %vm1026_vm4, %v16762_v39, 0.0 }
0x44ac   :  { %12371 = vadd.xlane.f32.xlu1 %v12370_v25 }
0x44af   :  { %11344 = vadd.xlane.f32.xlu0 %v11343_v30 }
0x44b0   :  { %11341 = vadd.xlane.f32.xlu1 %v11340_v26 }
0x44cf   :  { %v11679_v46 = vpop.xlane.xlu1 %11678 }
0x44d0   :  { %16763 = vrcp.f32 %v11679_v46  ;;  %v11676_v63 = vpop.xlane.xlu0 %11675 }
0x44d1   :  { %16765 = vrcp.f32 %v11676_v63 }
0x44d4   :  { %v12026_v16 = vpop.xlane.xlu0 %12025 }
0x44d5   :  { %16767 = vrcp.f32 %v12026_v16 }
0x44d8   :  { %v12029_v45 = vpop.xlane.xlu0 %12028 }
0x44d9   :  { %16769 = vrcp.f32 %v12029_v45  ;;  %v13860_v45 = vld [vmem:[%s19568_s6 + $0x20] sm:$0xff] }
0x44da   :  { %v16764_v28 = vpop.eup %16763 }
0x44db   :  { %v16766_v9 = vpop.eup %16765  ;;  %v11845_v8 = vmul.f32 %v16764_v28, %v19288_v13  ;;  %v16063_v13 = vpack.c.bf16 %v13805_v3, %v13804_v55  ;;  %v13861_v28 = vld [vmem:[%s19568_s6 + $0x28] sm:$0xff]  ;;  %v13870_v3 = vld [vmem:[%s19569_s1 + $0x58] sm:$0xff] }
0x44dc   :  { %v11844_v21 = vmul.f32 %v16766_v9, %v19290_v35  ;;  %v13806_v35 = vld [vmem:[%s19566_s13 + $0x30] sm:$0xff]  ;;  %v16071_v9 = vpack.c.bf16 %v13861_v28, %v13860_v45 }
0x44dd   :  { %12542 = vrot.lane.b32.xlu0 %v11845_v8, %s17150_s27  ;;  %16064 = vmatprep.subr.bf16.mxu1 %v16063_v13  ;;  %v16067_v31 = vpack.c.bf16 %v13807_v1, %v13806_v35  ;;  %v13862_v8 = vld [vmem:[%s19568_s6 + $0x30] sm:$0xff]  ;;  %v13871_v35 = vld [vmem:[%s19569_s1 + $0x60] sm:$0xff]  ;;  %v13872_v1 = vld [vmem:[%s19569_s1 + $0x68] sm:$0xff] }
0x44de   :  { %12540 = vrot.lane.b32.xlu1 %v11844_v21, %s17150_s27  ;;  %16066 = vmatpush3.bf16.msra.mxu1 %v16063_v13  ;;  %v13863_v21 = vld [vmem:[%s19568_s6 + $0x38] sm:$0xff] }
0x44df   :  { %v16768_v54 = vpop.eup %16767  ;;  %16068 = vmatprep.subr.bf16.mxu1 %v16067_v31  ;;  %16072 = vmatprep.subr.bf16.mxu0 %v16071_v9 }
0x44e0   :  { %v12190_v15 = vmul.f32 %v16768_v54, %v19322_v14  ;;  %16074 = vmatpush3.bf16.msra.mxu0 %v16071_v9  ;;  %v16075_v54 = vpack.c.bf16 %v13863_v21, %v13862_v8 }
0x44e2   :  { %12548 = vrot.lane.b32.xlu1 %v12190_v15, %s19571_s9  ;;  %16070 = vmatpush3.bf16.msra.mxu1 %v16067_v31  ;;  %v13867_v15 = vld [vmem:[%s19569_s1 + $0x40] sm:$0xff] }
0x44e3   :  { %v16770_v18 = vpop.eup %16769  ;;  %16076 = vmatprep.subr.bf16.mxu0 %v16075_v54 }
0x44e4   :  { %v12191_v6 = vmul.f32 %v16770_v18, %v19320_v4  ;;  %16078 = vmatpush3.bf16.msra.mxu0 %v16075_v54  ;;  %v13868_v18 = vld [vmem:[%s19569_s1 + $0x48] sm:$0xff] }
0x44e5   :  { %v16079_v55 = vpack.c.bf16 %v13868_v18, %v13867_v15 }
0x44e6   :  { %12550 = vrot.lane.b32.xlu1 %v12191_v6, %s19571_s9  ;;  %v13869_v6 = vld [vmem:[%s19569_s1 + $0x50] sm:$0xff] }
0x44e7   :  { %v16083_v13 = vpack.c.bf16 %v13870_v3, %v13869_v6  ;;  %16080 = vmatprep.subr.bf16.mxu1 %v16079_v55 }
0x4538   :  { %v12375_v20 = vpop.xlane.xlu0 %12374 }
0x4539   :  { %v12372_v19 = vpop.xlane.xlu1 %12371  ;;  %16771 = vrcp.f32 %v12375_v20  ;;  %v16087_v20 = vpack.c.bf16 %v13872_v1, %v13871_v35 }
0x453a   :  { %16773 = vrcp.f32 %v12372_v19 }
0x453c   :  { %v11345_v58 = vpop.xlane.xlu0 %11344 }
0x453d   :  { %v11342_v32 = vpop.xlane.xlu1 %11341 }
0x453e   :  { %16775 = vrcp.f32 %v11342_v32 }
0x453f   :  { %16777 = vrcp.f32 %v11345_v58 }
0x4543   :  { %v16772_v56 = vpop.eup %16771 }
0x4544   :  { %v16774_v14 = vpop.eup %16773 }
0x4548   :  { %v16776_v43 = vpop.eup %16775 }
0x4549   :  { %v16778_v38 = vpop.eup %16777  ;;  %v11494_v33 = vmul.f32 %v16776_v43, %v19246_v47  ;;  %v13854_v47 = vld [vmem:[%s19567_s11 + $0x1] ss:$0 sm:$0xff] }
0x454a   :  { %v11495_v48 = vmul.f32 %v16778_v38, %v19244_v34 }
0x454f   :  { %v12543_v24 = vpop.permute.xlu0 %12542 }
0x4550   :  { %v12541_v53 = vpop.permute.xlu1 %12540  ;;  %v12563_v2 = vsel %vm849_vm2, %v11495_v48, %v12543_v24  ;;  %v13874_v24 = vld [vmem:[%s19569_s1 + $0x78] sm:$0xff]  ;;  %v13864_v48 = vld [vmem:[#allocation6 + $0x1] ss:$0 sm:$0xff] }
0x4551   :  { %v12562_v41 = vsel %vm849_vm2, %v11494_v33, %v12541_v53 }
0x4554   :  { %v12549_v5 = vpop.permute.xlu1 %12548 }
0x4555   :  { %v12564_v10 = vsel %vm1026_vm4, %v12562_v41, %v12549_v5 }
0x4558   :  { %v12551_v7 = vpop.permute.xlu1 %12550 }
0x4559   :  { %v12565_v11 = vsel %vm1026_vm4, %v12563_v2, %v12551_v7  ;;  %v13873_v7 = vld [vmem:[%s19569_s1 + $0x70] sm:$0xff] }
0x455a   :  { %v16091_v33 = vpack.c.bf16 %v13874_v24, %v13873_v7 }
0x457d   :  { %v12530_v52 = vpop.f32.mrb[132].mxu0 }
0x457e   :  { %v12537_v4 = vmul.f32 %v16772_v56, %v12530_v52  ;;  %v12451_v62 = vpop.f32.mrb[146].mxu1  ;;  %v15415_v40 = vpop.f32.mrb[133].mxu0 }
0x457f   :  { %v12536_v59 = vmul.f32 %v16774_v14, %v12451_v62  ;;  %v15408_v0 = vpop.f32.mrb[147].mxu1  ;;  %v13858_v40 = vld [vmem:[%s19570_s0 + $0x1] ss:$0 sm:$0xff]  ;;  %s19573_s0 = sld [smem:[#allocation60_spill]] }
0x4580   :  { %12558 = vrot.lane.b32.xlu1 %v12537_v4, %s19572_s16  ;;  %v13859_v0 = vld [vmem:[#allocation4 + $0x1] ss:$0 sm:$0xff] }
0x4581   :  { %12556 = vrot.lane.b32.xlu0 %v12536_v59, %s19572_s16 }
0x45f2   :  { %v12559_v42 = vpop.permute.xlu1 %12558 }
0x45f3   :  { %v12557_v51 = vpop.permute.xlu0 %12556  ;;  %v12567_v23 = vsel %vm2505_vm5, %v12565_v11, %v12559_v42 }
0x45f4   :  { %v12566_v50 = vsel %vm2505_vm5, %v12564_v10, %v12557_v51 }
0x45f5   :  { %15424 = vmatprep.mubr.msk.f32.mxu1 %vm642_vm1, %v12566_v50  ;;  %v13875_v50 = vld [vmem:[#allocation7 + $0x1] ss:$0 sm:$0xff] }
0x45f6   :  { %15425 = vmatmul.mubr.msk.f32.vlgmr.msra.gmra.mrb[148].mxu1 %vm642_vm1, %v12567_v23 }
0x45f7   :  { %16082 = vmatpush3.bf16.msra.mxu1 %v16079_v55 }
0x45f8   :  { %16084 = vmatprep.subr.bf16.mxu1 %v16083_v13 }
0x45fb   :  { %16086 = vmatpush3.bf16.msra.mxu1 %v16083_v13  ;;  %v13878_v13 = vld [vmem:[#allocation9 + $0x1] ss:$0 sm:$0xff] }
0x45fc   :  { %16088 = vmatprep.subr.bf16.mxu1 %v16087_v20 }
0x45ff   :  { %16090 = vmatpush3.bf16.msra.mxu1 %v16087_v20  ;;  %v13879_v20 = vld [vmem:[#allocation10 + $0x1] ss:$0 sm:$0xff] }
0x4600   :  { %16092 = vmatprep.subr.bf16.mxu1 %v16091_v33 }
0x4603   :  { %16094 = vmatpush3.bf16.msra.mxu1 %v16091_v33 }
0x46c9   :  { %v15426_v34 = vpop.f32.mrb[148].mxu1 }
0x46ca   :  { %v12652_v17 = vadd.f32 %v15426_v34, %v13854_v47  ;;  %v12646_v44 = vpop.f32.mrb[149].mxu1 }
0x46cb   :  { %v12647_v29 = vadd.f32 %v13854_v47, %v12646_v44 }
0x46cc   :  { %v12656_v12 = vadd.f32 %v12652_v17, %v19163_v22 }
0x46cd   :  { %v12655_v37 = vadd.f32 %v12647_v29, %v19157_v36 }
0x46ce   :  { %v12664_v57 = vsel %vm642_vm1, %v12656_v12, 0.0 }
0x46cf   :  { %12665 = vadd.xlane.f32.xlu1 %v12664_v57  ;;  %v12661_v60 = vsel %vm642_vm1, %v12655_v37, 0.0 }
0x46d0   :  { %12662 = vadd.xlane.f32.xlu0 %v12661_v60 }
0x475c   :  { %v12666_v39 = vpop.xlane.xlu1 %12665 }
0x475d   :  { %v12668_v49 = vmul.f32 0.03125, %v12666_v39  ;;  %v12663_v25 = vpop.xlane.xlu0 %12662 }
0x475e   :  { %v12667_v30 = vmul.f32 0.03125, %v12663_v25 }
0x475f   :  { %v12670_v26 = vsub.f32 %v12656_v12, %v12668_v49 }
0x4760   :  { %v12669_v46 = vsub.f32 %v12655_v37, %v12667_v30 }
0x4761   :  { %v12672_v22 = vmul.f32 %v12670_v26, %v12670_v26 }
0x4762   :  { %v12671_v63 = vmul.f32 %v12669_v46, %v12669_v46 }
0x4763   :  { %v12676_v16 = vsel %vm642_vm1, %v12672_v22, 0.0  ;;  %v9146_v22 = vsel %vm642_vm1, %v18899_v61, 0.0 }
0x4764   :  { %v12673_v36 = vsel %vm642_vm1, %v12671_v63, 0.0 }
0x4765   :  { %12674 = vadd.xlane.f32.xlu0 %v12673_v36 }
0x4769   :  { %12677 = vadd.xlane.f32.xlu0 %v12676_v16  ;;  %v9143_v16 = vsel %vm642_vm1, %v18901_v27, 0.0 }
0x47f2   :  { %v12675_v31 = vpop.xlane.xlu0 %12674 }
0x47f3   :  { %v12679_v19 = vmul.f32 0.03125, %v12675_v31 }
0x47f5   :  { %v12681_v56 = vadd.f32 1e-05, %v12679_v19 }
0x47f6   :  { %v12678_v52 = vpop.xlane.xlu0 %12677 }
0x47f7   :  { %16779 = vrsqrt.f32 %v12681_v56  ;;  %v12680_v14 = vmul.f32 0.03125, %v12678_v52 }
0x47f9   :  { %v12682_v4 = vadd.f32 1e-05, %v12680_v14 }
0x47fb   :  { %16781 = vrsqrt.f32 %v12682_v4 }
0x4801   :  { %v16780_v62 = vpop.eup %16779 }
0x4802   :  { %v12685_v59 = vmul.f32 %v16780_v62, %v12669_v46 }
0x4804   :  { %v12693_v32 = vmul.f32 %v13858_v40, %v12685_v59 }
0x4805   :  { %v16782_v58 = vpop.eup %16781 }
0x4806   :  { %v12686_v53 = vmul.f32 %v16782_v58, %v12670_v26  ;;  %v12701_v5 = vadd.f32 %v13859_v0, %v12693_v32 }
0x4808   :  { %v12694_v43 = vmul.f32 %v13858_v40, %v12686_v53  ;;  %15435 = vmatprep.mubr.msk.f32.mxu0 %vm642_vm1, %v12701_v5  ;;  %v12990_v53 = vld [vmem:[%s19573_s0 + $0x8] sm:$0xff] }
0x480a   :  { %v12702_v38 = vadd.f32 %v13859_v0, %v12694_v43  ;;  %v12991_v43 = vld [vmem:[%s19573_s0 + $0x10] sm:$0xff] }
0x480c   :  { %15436 = vmatmul.mubr.msk.f32.vlgmr.msra.gmra.mrb[134].mxu0 %vm642_vm1, %v12702_v38 }
0x48df   :  { %v15437_v41 = vpop.f32.mrb[134].mxu0 }
0x48e0   :  { %v12794_v42 = vadd.f32 %v15437_v41, %v13864_v48  ;;  %v12788_v2 = vpop.f32.mrb[135].mxu0 }
0x48e1   :  { %v12789_v10 = vadd.f32 %v13864_v48, %v12788_v2 }
0x48e2   :  { %v12798_v11 = vmax.f32 %v12794_v42, 0.0 }
0x48e3   :  { %v12797_v51 = vmax.f32 %v12789_v10, 0.0 }
0x48e5   :  { %15454 = vmatprep.mubr.msk.f32.mxu1 %vm397_vm0, %v12797_v51 }
0x48e6   :  { %15455 = vmatmul.mubr.msk.f32.vlgmr.msra.gmra.mrb[150].mxu1 %vm397_vm0, %v12798_v11 }
0x49b9   :  { %v15456_v23 = vpop.f32.mrb[150].mxu1 }
0x49ba   :  { %v12894_v47 = vadd.f32 %v15456_v23, %v13875_v50  ;;  %v12888_v34 = vpop.f32.mrb[151].mxu1 }
0x49bb   :  { %v12889_v17 = vadd.f32 %v13875_v50, %v12888_v34 }
0x49bc   :  { %v12898_v44 = vadd.f32 %v12894_v47, %v12702_v38  ;;  %v12992_v38 = vld [vmem:[%s19573_s0 + $0x18] sm:$0xff] }
0x49bd   :  { %v12897_v29 = vadd.f32 %v12889_v17, %v12701_v5  ;;  %v16099_v7 = vpack.c.bf16 %v12992_v38, %v12991_v43  ;;  %v13219_v43 = vld [vmem:[%s17418_s24 + $0x10] sm:$0xff] }
0x49be   :  { %v12906_v12 = vsel %vm642_vm1, %v12898_v44, 0.0 }
0x49bf   :  { %12907 = vadd.xlane.f32.xlu0 %v12906_v12  ;;  %v12903_v37 = vsel %vm642_vm1, %v12897_v29, 0.0 }
0x49c0   :  { %12904 = vadd.xlane.f32.xlu1 %v12903_v37  ;;  %v13735_v37 = vld [vmem:[#allocation12] ss:$0 sm:$0xff] }
0x4a4c   :  { %v12908_v57 = vpop.xlane.xlu0 %12907 }
0x4a4d   :  { %v12910_v60 = vmul.f32 0.03125, %v12908_v57  ;;  %v12905_v39 = vpop.xlane.xlu1 %12904 }
0x4a4e   :  { %v12909_v49 = vmul.f32 0.03125, %v12905_v39 }
0x4a4f   :  { %v12912_v25 = vsub.f32 %v12898_v44, %v12910_v60 }
0x4a50   :  { %v12911_v30 = vsub.f32 %v12897_v29, %v12909_v49  ;;  %v13736_v49 = vld [vmem:[#allocation13] ss:$0 sm:$0xff] }
0x4a51   :  { %v12914_v26 = vmul.f32 %v12912_v25, %v12912_v25 }
0x4a52   :  { %v12913_v46 = vmul.f32 %v12911_v30, %v12911_v30 }
0x4a53   :  { %v12918_v63 = vsel %vm642_vm1, %v12914_v26, 0.0 }
0x4a54   :  { %12919 = vadd.xlane.f32.xlu0 %v12918_v63  ;;  %v12915_v36 = vsel %vm642_vm1, %v12913_v46, 0.0  ;;  %v13101_v63 = vld [vmem:[%s19574_s29] sm:$0xff] }
0x4a55   :  { %12916 = vadd.xlane.f32.xlu1 %v12915_v36  ;;  %v13102_v36 = vld [vmem:[%s19574_s29 + $0x8] sm:$0xff] }
0x4a58   :  { %9147 = vadd.xlane.f32.xlu0 %v9146_v22  ;;  %v13103_v22 = vld [vmem:[%s19574_s29 + $0x10] sm:$0xff] }
0x4a59   :  { %9144 = vadd.xlane.f32.xlu1 %v9143_v16  ;;  %v16103_v16 = vpack.c.bf16 %v13102_v36, %v13101_v63  ;;  %v13892_v63 = vld [vmem:[#allocation18] ss:$0 sm:$0xff] }
0x4ae1   :  { %v12920_v45 = vpop.xlane.xlu0 %12919 }
0x4ae2   :  { %v12922_v28 = vmul.f32 0.03125, %v12920_v45  ;;  %v12917_v9 = vpop.xlane.xlu1 %12916  ;;  %v13104_v45 = vld [vmem:[%s19574_s29 + $0x18] sm:$0xff] }
0x4ae3   :  { %v12921_v8 = vmul.f32 0.03125, %v12917_v9  ;;  %v13105_v9 = vld [vmem:[%s19574_s29 + $0x20] sm:$0xff] }
0x4ae4   :  { %v12924_v21 = vadd.f32 1e-05, %v12922_v28  ;;  %v16107_v28 = vpack.c.bf16 %v13104_v45, %v13103_v22 }
0x4ae5   :  { %v12923_v54 = vadd.f32 1e-05, %v12921_v8  ;;  %v9148_v15 = vpop.xlane.xlu0 %9147  ;;  %v13106_v8 = vld [vmem:[%s19574_s29 + $0x28] sm:$0xff] }
0x4ae6   :  { %16783 = vrsqrt.f32 %v12924_v21  ;;  %v9145_v18 = vpop.xlane.xlu1 %9144  ;;  %v9150_v6 = vmul.f32 0.03125, %v9148_v15  ;;  %v16111_v21 = vpack.c.bf16 %v13106_v8, %v13105_v9  ;;  %v13108_v15 = vld [vmem:[%s19574_s29 + $0x38] sm:$0xff] }
0x4ae7   :  { %16785 = vrsqrt.f32 %v12923_v54  ;;  %v9149_v3 = vmul.f32 0.03125, %v9145_v18  ;;  %v13107_v54 = vld [vmem:[%s19574_s29 + $0x30] sm:$0xff] }
0x4ae8   :  { %v9152_v19 = vsub.f32 %v18899_v61, %v9150_v6  ;;  %v16115_v18 = vpack.c.bf16 %v13108_v15, %v13107_v54 }
0x4ae9   :  { %v9151_v52 = vsub.f32 %v18901_v27, %v9149_v3  ;;  %v12989_v27 = vld [vmem:[%s19573_s0] sm:$0xff] }
0x4aea   :  { %v9154_v59 = vmul.f32 %v9152_v19, %v9152_v19  ;;  %v16095_v5 = vpack.c.bf16 %v12990_v53, %v12989_v27  ;;  %v13217_v53 = vld [vmem:[%s17418_s24] sm:$0xff] }
0x4aeb   :  { %v9153_v32 = vmul.f32 %v9151_v52, %v9151_v52 }
0x4aec   :  { %v9158_v61 = vsel %vm642_vm1, %v9154_v59, 0.0  ;;  %16096 = vmatprep.subr.bf16.mxu0 %v16095_v5 }
0x4aed   :  { %v9155_v58 = vsel %vm642_vm1, %v9153_v32, 0.0  ;;  %16098 = vmatpush3.bf16.msra.mxu0 %v16095_v5  ;;  %v13218_v5 = vld [vmem:[%s17418_s24 + $0x8] sm:$0xff] }
0x4aee   :  { %16100 = vmatprep.subr.bf16.mxu0 %v16099_v7  ;;  %v16119_v38 = vpack.c.bf16 %v13218_v5, %v13217_v53 }
0x4af0   :  { %v16784_v55 = vpop.eup %16783  ;;  %16120 = vmatprep.subr.bf16.mxu1 %v16119_v38 }
0x4af1   :  { %v16786_v35 = vpop.eup %16785  ;;  %v12928_v1 = vmul.f32 %v16784_v55, %v12912_v25  ;;  %16102 = vmatpush3.bf16.msra.mxu0 %v16099_v7  ;;  %v13220_v7 = vld [vmem:[%s17418_s24 + $0x18] sm:$0xff]  ;;  %16122 = vmatpush3.bf16.msra.mxu1 %v16119_v38 }
0x4af2   :  { %v12927_v31 = vmul.f32 %v16786_v35, %v12911_v30  ;;  %16104 = vmatprep.subr.bf16.mxu0 %v16103_v16 }
0x4af3   :  { %v12936_v56 = vmul.f32 %v13878_v13, %v12928_v1 }
0x4af4   :  { %v12935_v14 = vmul.f32 %v13878_v13, %v12927_v31 }
0x4af5   :  { %v12944_v4 = vadd.f32 %v13879_v20, %v12936_v56 }
0x4af6   :  { %v12943_v62 = vadd.f32 %v13879_v20, %v12935_v14 }
0x4af7   :  { %v12950_v40 = vsel %vm642_vm1, %v12944_v4, 0.0 }
0x4af8   :  { %12951 = vadd.xlane.f32.xlu0 %v12950_v40  ;;  %v12947_v0 = vsel %vm642_vm1, %v12943_v62, 0.0  ;;  %v13882_v40 = vld [vmem:[#allocation15] ss:$0 sm:$0xff] }
0x4af9   :  { %12948 = vadd.xlane.f32.xlu1 %v12947_v0 }
0x4afc   :  { %9159 = vadd.xlane.f32.xlu0 %v9158_v61 }
0x4afd   :  { %9156 = vadd.xlane.f32.xlu1 %v9155_v58 }
0x4b85   :  { %v12952_v24 = vpop.xlane.xlu0 %12951 }
0x4b86   :  { %v12954_v33 = vmul.f32 0.03125, %v12952_v24  ;;  %v12949_v48 = vpop.xlane.xlu1 %12948  ;;  %v16123_v24 = vpack.c.bf16 %v13220_v7, %v13219_v43 }
0x4b87   :  { %v12953_v41 = vmul.f32 0.03125, %v12949_v48  ;;  %v13222_v48 = vld [vmem:[%s17418_s24 + $0x28] sm:$0xff] }
0x4b88   :  { %v12956_v42 = vsub.f32 %v12944_v4, %v12954_v33  ;;  %v13221_v33 = vld [vmem:[%s17418_s24 + $0x20] sm:$0xff]  ;;  %16124 = vmatprep.subr.bf16.mxu1 %v16123_v24 }
0x4b89   :  { %v12955_v2 = vsub.f32 %v12943_v62, %v12953_v41  ;;  %v9160_v10 = vpop.xlane.xlu0 %9159  ;;  %v16127_v41 = vpack.c.bf16 %v13222_v48, %v13221_v33  ;;  %16126 = vmatpush3.bf16.msra.mxu1 %v16123_v24 }
0x4b8a   :  { %v9162_v51 = vmul.f32 0.03125, %v9160_v10  ;;  %v9157_v11 = vpop.xlane.xlu1 %9156  ;;  %v12958_v50 = vmul.f32 %v12956_v42, %v12956_v42 }
0x4b8b   :  { %v9161_v23 = vmul.f32 0.03125, %v9157_v11  ;;  %v12957_v47 = vmul.f32 %v12955_v2, %v12955_v2  ;;  %16128 = vmatprep.subr.bf16.mxu1 %v16127_v41 }
0x4b8c   :  { %v9164_v34 = vadd.f32 1e-05, %v9162_v51  ;;  %v12962_v17 = vsel %vm642_vm1, %v12958_v50, 0.0 }
0x4b8d   :  { %v9163_v44 = vadd.f32 1e-05, %v9161_v23  ;;  %12963 = vadd.xlane.f32.xlu0 %v12962_v17  ;;  %v12959_v29 = vsel %vm642_vm1, %v12957_v47, 0.0  ;;  %16130 = vmatpush3.bf16.msra.mxu1 %v16127_v41  ;;  %v13887_v17 = vld [vmem:[#allocation16] ss:$0 sm:$0xff] }
0x4b8e   :  { %16787 = vrsqrt.f32 %v9164_v34  ;;  %12960 = vadd.xlane.f32.xlu1 %v12959_v29 }
0x4b8f   :  { %16789 = vrsqrt.f32 %v9163_v44 }
0x4b98   :  { %v16788_v12 = vpop.eup %16787 }
0x4b99   :  { %v16790_v57 = vpop.eup %16789  ;;  %v9168_v60 = vmul.f32 %v16788_v12, %v9152_v19 }
0x4b9a   :  { %v9167_v39 = vmul.f32 %v16790_v57, %v9151_v52 }
0x4b9b   :  { %v9176_v25 = vmul.f32 %v13735_v37, %v9168_v60 }
0x4b9c   :  { %v9175_v30 = vmul.f32 %v13735_v37, %v9167_v39 }
0x4b9d   :  { %v9184_v46 = vadd.f32 %v13736_v49, %v9176_v25 }
0x4b9e   :  { %v9183_v26 = vadd.f32 %v13736_v49, %v9175_v30 }
0x4ba0   :  { %15465 = vmatprep.mubr.msk.f32.mxu0 %vm642_vm1, %v9183_v26 }
0x4ba1   :  { %15466 = vmatmul.mubr.msk.f32.vlgmr.msra.gmra.mrb[136].mxu0 %vm642_vm1, %v9184_v46 }
0x4ba2   :  { %16106 = vmatpush3.bf16.msra.mxu0 %v16103_v16 }
0x4ba3   :  { %16108 = vmatprep.subr.bf16.mxu0 %v16107_v28 }
0x4ba6   :  { %16110 = vmatpush3.bf16.msra.mxu0 %v16107_v28 }
0x4ba7   :  { %16112 = vmatprep.subr.bf16.mxu0 %v16111_v21 }
0x4baa   :  { %16114 = vmatpush3.bf16.msra.mxu0 %v16111_v21 }
0x4bab   :  { %16116 = vmatprep.subr.bf16.mxu0 %v16115_v18 }
0x4bae   :  { %16118 = vmatpush3.bf16.msra.mxu0 %v16115_v18 }
0x4c1a   :  { %v12964_v6 = vpop.xlane.xlu0 %12963 }
0x4c1b   :  { %v12966_v55 = vmul.f32 0.03125, %v12964_v6  ;;  %v12961_v3 = vpop.xlane.xlu1 %12960 }
0x4c1c   :  { %v12965_v13 = vmul.f32 0.03125, %v12961_v3 }
0x4c1d   :  { %v12968_v35 = vadd.f32 1e-05, %v12966_v55 }
0x4c1e   :  { %v12967_v1 = vadd.f32 1e-05, %v12965_v13 }
0x4c1f   :  { %16791 = vrsqrt.f32 %v12968_v35 }
0x4c20   :  { %16793 = vrsqrt.f32 %v12967_v1 }
0x4c29   :  { %v16792_v20 = vpop.eup %16791 }
0x4c2a   :  { %v16794_v31 = vpop.eup %16793  ;;  %v12972_v19 = vmul.f32 %v16792_v20, %v12956_v42  ;;  %v13223_v42 = vld [vmem:[%s17418_s24 + $0x30] sm:$0xff] }
0x4c2b   :  { %v12971_v56 = vmul.f32 %v16794_v31, %v12955_v2  ;;  %v13224_v2 = vld [vmem:[%s17418_s24 + $0x38] sm:$0xff]  ;;  %s17154_s24 = smov 122  }
0x4c2c   :  { %v12980_v52 = vmul.f32 %v13735_v37, %v12972_v19  ;;  %v16131_v10 = vpack.c.bf16 %v13224_v2, %v13223_v42 }
0x4c2d   :  { %v12979_v14 = vmul.f32 %v13735_v37, %v12971_v56 }
0x4c2e   :  { %v12988_v62 = vadd.f32 %v13736_v49, %v12980_v52  ;;  %16132 = vmatprep.subr.bf16.mxu1 %v16131_v10 }
0x4c2f   :  { %v12987_v4 = vadd.f32 %v13736_v49, %v12979_v14  ;;  %16134 = vmatpush3.bf16.msra.mxu1 %v16131_v10 }
0x4c31   :  { %15468 = vmatprep.mubr.msk.f32.mxu0 %vm642_vm1, %v12987_v4 }
0x4c32   :  { %15469 = vmatmul.mubr.msk.f32.gmra.mrb[138].mxu0 %vm642_vm1, %v12988_v62 }
0x4c74   :  { %v15467_v59 = vpop.f32.mrb[136].mxu0 }
0x4c75   :  { %v13084_v0 = vadd.f32 %v15467_v59, %v13882_v40  ;;  %v13078_v32 = vpop.f32.mrb[137].mxu0 }
0x4c76   :  { %v13079_v61 = vadd.f32 %v13882_v40, %v13078_v32 }
0x4c77   :  { %v13098_v27 = vmax.f32 %v13084_v0, 0.0 }
0x4c78   :  { %v13097_v58 = vmax.f32 %v13079_v61, 0.0 }
0x4c7a   :  { %15487 = vmatprep.mubr.msk.f32.mxu0 %vm397_vm0, %v13097_v58 }
0x4c7b   :  { %15488 = vmatmul.mubr.msk.f32.vlgmr.msra.gmra.mrb[140].mxu0 %vm397_vm0, %v13098_v27 }
0x4d05   :  { %v15470_v51 = vpop.f32.mrb[138].mxu0 }
0x4d06   :  { %v13094_v11 = vadd.f32 %v15470_v51, %v13882_v40  ;;  %v13088_v50 = vpop.f32.mrb[139].mxu0 }
0x4d07   :  { %v13089_v23 = vadd.f32 %v13882_v40, %v13088_v50 }
0x4d08   :  { %v13100_v34 = vmax.f32 %v13094_v11, 0.0 }
0x4d09   :  { %v13099_v47 = vmax.f32 %v13089_v23, 0.0 }
0x4d0b   :  { %15490 = vmatprep.mubr.msk.f32.mxu0 %vm397_vm0, %v13099_v47 }
0x4d0c   :  { %15491 = vmatmul.mubr.msk.f32.gmra.mrb[142].mxu0 %vm397_vm0, %v13100_v34 }
0x4d4e   :  { %v15489_v44 = vpop.f32.mrb[140].mxu0 }
0x4d4f   :  { %v13200_v29 = vadd.f32 %v15489_v44, %v13887_v17  ;;  %v13194_v12 = vpop.f32.mrb[141].mxu0 }
0x4d50   :  { %v13195_v37 = vadd.f32 %v13887_v17, %v13194_v12 }
0x4d51   :  { %v13214_v60 = vmax.f32 %v13200_v29, 0.0 }
0x4d52   :  { %v13213_v57 = vmax.f32 %v13195_v37, 0.0 }
0x4d54   :  { %15509 = vmatprep.mubr.msk.f32.mxu1 %vm397_vm0, %v13213_v57 }
0x4d55   :  { %15510 = vmatmul.mubr.msk.f32.vlgmr.msra.gmra.mrb[152].mxu1 %vm397_vm0, %v13214_v60 }
0x4ddf   :  { %v15492_v39 = vpop.f32.mrb[142].mxu0 }
0x4de0   :  { %v13210_v49 = vadd.f32 %v15492_v39, %v13887_v17  ;;  %v13204_v25 = vpop.f32.mrb[143].mxu0 }
0x4de1   :  { %v13205_v30 = vadd.f32 %v13887_v17, %v13204_v25 }
0x4de2   :  { %v13216_v46 = vmax.f32 %v13210_v49, 0.0 }
0x4de3   :  { %v13215_v26 = vmax.f32 %v13205_v30, 0.0 }
0x4de5   :  { %15512 = vmatprep.mubr.msk.f32.mxu1 %vm397_vm0, %v13215_v26 }
0x4de6   :  { %15513 = vmatmul.mubr.msk.f32.gmra.mrb[154].mxu1 %vm397_vm0, %v13216_v46 }
0x4e28   :  { %v15511_v36 = vpop.f32.mrb[152].mxu1 }
0x4e29   :  { %v13316_v22 = vadd.f32 %v15511_v36, %v13892_v63  ;;  %v13310_v16 = vpop.f32.mrb[153].mxu1 }
0x4e2a   :  { %v13311_v45 = vadd.f32 %v13892_v63, %v13310_v16 }
0x4e2b   :  { %13331 = vst.msk [vmem:[%s17428_s8 + $0x8] sm:$0xff] %vm13329_vm7, %v13316_v22  ;;  %v13898_v28 = vmul.f32 -1.442695, %v13316_v22 }
0x4e2c   :  { %13330 = vst.msk [vmem:[%s17428_s8] sm:$0xff] %vm13329_vm7, %v13311_v45  ;;  %v13897_v9 = vmul.f32 -1.442695, %v13311_v45 }
0x4e2d   :  { %16795 = vpow2.f32 %v13898_v28 }
0x4e2e   :  { %16797 = vpow2.f32 %v13897_v9 }
0x4e37   :  { %v16796_v8 = vpop.eup %16795 }
0x4e38   :  { %v16798_v21 = vpop.eup %16797  ;;  %v13347_v54 = vadd.f32 1.0, %v16796_v8 }
0x4e39   :  { %v13346_v15 = vadd.f32 1.0, %v16798_v21 }
0x4e3a   :  { %16799 = vrcp.f32 %v13347_v54 }
0x4e3b   :  { %16801 = vrcp.f32 %v13346_v15 }
0x4e44   :  { %v16800_v18 = vpop.eup %16799 }
0x4e45   :  { %v16802_v6 = vpop.eup %16801  ;;  %13364 = vrot.lane.b32.xlu0 %v16800_v18, %s17154_s24 }
0x4e46   :  { %13362 = vrot.lane.b32.xlu1 %v16802_v6, %s17154_s24 }
0x4eb7   :  { %v13365_v55 = vpop.permute.xlu0 %13364 }
0x4eb8   :  { %13376 = vst.msk [vmem:[%s17433_s21 + $0x8] sm:$0xff] %vm13374_vm8, %v13365_v55  ;;  %v13363_v3 = vpop.permute.xlu1 %13362 }
0x4eb9   :  { %13375 = vst.msk [vmem:[%s17433_s21] sm:$0xff] %vm13374_vm8, %v13363_v3  ;;  %v15514_v13 = vpop.f32.mrb[154].mxu1 }
0x4eba   :  { %v13326_v35 = vadd.f32 %v15514_v13, %v13892_v63  ;;  %v13320_v1 = vpop.f32.mrb[155].mxu1 }
0x4ebb   :  { %v13321_v20 = vadd.f32 %v13892_v63, %v13320_v1 }
0x4ebc   :  { %13333 = vst.msk [vmem:[%s17428_s8 + $0x18] sm:$0xff] %vm13329_vm7, %v13326_v35  ;;  %v13900_v31 = vmul.f32 -1.442695, %v13326_v35 }
0x4ebd   :  { %13332 = vst.msk [vmem:[%s17428_s8 + $0x10] sm:$0xff] %vm13329_vm7, %v13321_v20  ;;  %v13899_v19 = vmul.f32 -1.442695, %v13321_v20 }
0x4ebe   :  { %16803 = vpow2.f32 %v13900_v31 }
0x4ebf   :  { %16805 = vpow2.f32 %v13899_v19 }
0x4ec8   :  { %v16804_v56 = vpop.eup %16803 }
0x4ec9   :  { %v16806_v52 = vpop.eup %16805  ;;  %v13349_v4 = vadd.f32 1.0, %v16804_v56 }
0x4eca   :  { %v13348_v14 = vadd.f32 1.0, %v16806_v52 }
0x4ecc   :  { %16807 = vrcp.f32 %v13348_v14 }
0x4ecd   :  { %16809 = vrcp.f32 %v13349_v4 }
0x4ed6   :  { %v16808_v62 = vpop.eup %16807 }
0x4ed7   :  { %13366 = vrot.lane.b32.xlu1 %v16808_v62, %s17154_s24  ;;  %v16810_v40 = vpop.eup %16809 }
0x4edb   :  { %13368 = vrot.lane.b32.xlu1 %v16810_v40, %s17154_s24 }
0x4f49   :  { %v13367_v59 = vpop.permute.xlu1 %13366 }
0x4f4a   :  { %13377 = vst.msk [vmem:[%s17433_s21 + $0x10] sm:$0xff] %vm13374_vm8, %v13367_v59 }
0x4f4d   :  { %v13369_v0 = vpop.permute.xlu1 %13368 }
0x4f4e   :  { %13378 = vst.msk [vmem:[%s17433_s21 + $0x18] sm:$0xff] %vm13374_vm8, %v13369_v0 }
0x4f4f   :  { %13387 = vsyncpa [#allocation3], 1 }
0x4f50   :  { %13388 = vsyncpa [#allocation5], 1 }
0x4f51   :  { %13389 = vsyncpa [#allocation8], 1 }
0x4f52   :  { %13390 = vsyncpa [#allocation11], 1 }
0x4f53   :  { %13391 = vsyncpa [#allocation14], 1 }
0x4f54   :  { %13392 = vsyncpa [#allocation17], 1 }

</bundles_post_ra>
